<compile_context>
chip_gen: v7x
topology: tpu7x:2x2x1
jax: 0.10.0
libtpu: 0.0.40
codegen_flags: <defaults>
</compile_context>

<pallas_src>
import functools

import numpy as np
import jax
import jax.numpy as jnp
from jax import lax
from jax.experimental import pallas as pl
from jax.experimental.pallas import tpu as pltpu

_TB = 8          # samples per grid step (batch tile)
_FC_LANES = 128  # fc1 output padded to a lane-dense width


# ----------------------------------------------------------------------------
# Pallas kernels
# ----------------------------------------------------------------------------
def _conv_relu_pool_kernel(x_ref, w_ref, b_ref, sel_ref, o_ref, *, wp, sin, tb):
    """Fused 3x3 conv (pad=1) + bias + ReLU + 2x2/stride-2 max-pool.

    x_ref:   (cin, tb*sin)   flat zero-padded images; pixel (i, j) of sample s
                             lives at column s*sin + i*wp + j.
    w_ref:   (cout, 9*cin)   weights, column index = (kh*3 + kw)*cin + ci.
    b_ref:   (cout, 1)
    sel_ref: (npool, sout)   0/1 matrix: pooled-window anchor -> column of the
                             next stage's zero-padded flat layout.
    o_ref:   (cout, tb*sout)
    """
    cout = w_ref.shape[0]
    npool, sout = sel_ref.shape

    xv = x_ref[...]                                    # (cin, tb*sin)
    halo = 2 * wp + 2
    L = tb * sin - halo

    # Merge the 9 taps into one contraction -> a single MXU matmul per step.
    taps = []
    for kh in range(3):
        for kw in range(3):
            d = kh * wp + kw
            taps.append(xv[:, d:d + L])
    a_t = jnp.concatenate(taps, axis=0)                # (9*cin, L)

    y = jnp.dot(w_ref[...], a_t, preferred_element_type=jnp.float32)
    y = jnp.maximum(y + b_ref[...], 0.0)               # (cout, L), lane-dense

    # 2x2 max pool: max over flat offsets {0, 1, wp, wp+1} ...
    lm = L - (wp + 1)
    m = jnp.maximum(jnp.maximum(y[:, 0:lm], y[:, 1:lm + 1]),
                    jnp.maximum(y[:, wp:wp + lm], y[:, wp + 1:wp + 1 + lm]))

    # ... then extract the stride-2 anchors and scatter them into the next
    # stage's zero-padded layout with one selection matmul for the whole
    # batch tile (samples stacked along sublanes for MXU row utilization).
    stacked = jnp.concatenate(
        [m[:, s * sin:s * sin + npool] for s in range(tb)], axis=0)
    pooled = jnp.dot(stacked, sel_ref[...],
                     preferred_element_type=jnp.float32)    # (tb*cout, sout)
    o_ref[...] = jnp.concatenate(
        [pooled[s * cout:(s + 1) * cout, :] for s in range(tb)],
        axis=1).astype(o_ref.dtype)


def _fc_kernel(x_ref, w_ref, b_ref, o_ref):
    o_ref[...] = (jnp.dot(x_ref[...], w_ref[...],
                          preferred_element_type=jnp.float32)
                  + b_ref[...]).astype(o_ref.dtype)


# ----------------------------------------------------------------------------
# Pallas wrappers
# ----------------------------------------------------------------------------
def _conv_relu_pool(x, w2d, bias, sel, *, wp, sin, tb):
    cin, total = x.shape
    cout = w2d.shape[0]
    npool, sout = sel.shape
    nb = total // (tb * sin)
    kern = functools.partial(_conv_relu_pool_kernel, wp=wp, sin=sin, tb=tb)
    return pl.pallas_call(
        kern,
        out_shape=jax.ShapeDtypeStruct((cout, nb * tb * sout), jnp.float32),
        grid=(nb,),
        in_specs=[
            pl.BlockSpec((cin, tb * sin), lambda b: (0, b)),
            pl.BlockSpec((cout, w2d.shape[1]), lambda b: (0, 0)),
            pl.BlockSpec((cout, 1), lambda b: (0, 0)),
            pl.BlockSpec((npool, sout), lambda b: (0, 0)),
        ],
        out_specs=pl.BlockSpec((cout, tb * sout), lambda b: (0, b)),
        compiler_params=pltpu.CompilerParams(
            dimension_semantics=("parallel",)),
    )(x, w2d, bias, sel)


def _linear(x, w, b, *, tb):
    n, k = x.shape
    nout = w.shape[1]
    nb = n // tb
    return pl.pallas_call(
        _fc_kernel,
        out_shape=jax.ShapeDtypeStruct((n, nout), jnp.float32),
        grid=(nb,),
        in_specs=[
            pl.BlockSpec((tb, k), lambda i: (i, 0)),
            pl.BlockSpec((k, nout), lambda i: (0, 0)),
            pl.BlockSpec((1, nout), lambda i: (0, 0)),
        ],
        out_specs=pl.BlockSpec((tb, nout), lambda i: (i, 0)),
        compiler_params=pltpu.CompilerParams(
            dimension_semantics=("parallel",)),
    )(x, w, b)


# ----------------------------------------------------------------------------
# Parameters (deterministic synthetic init) + one-time prep (hoisted work)
# ----------------------------------------------------------------------------
def init_params(key, in_channels=1, num_classes=10):
    k1, k2, k3, k4, k5, k6 = jax.random.split(key, 6)
    return {
        "conv1_w": 0.1 * jax.random.normal(k1, (8, in_channels, 3, 3), jnp.float32),
        "conv1_b": 0.1 * jax.random.normal(k2, (8,), jnp.float32),
        "conv2_w": 0.1 * jax.random.normal(k3, (16, 8, 3, 3), jnp.float32),
        "conv2_b": 0.1 * jax.random.normal(k4, (16,), jnp.float32),
        "fc1_w": 0.05 * jax.random.normal(k5, (num_classes, 16 * 7 * 7), jnp.float32),
        "fc1_b": 0.05 * jax.random.normal(k6, (num_classes,), jnp.float32),
    }


def _pool_select_matrix(wp, hout, wout, tgt_stride, tgt_off, sout):
    # anchor a = 2*io*wp + 2*jo  ->  target column (io+off)*stride + (jo+off)
    npool = 2 * (hout - 1) * wp + 2 * (wout - 1) + 1
    sel = np.zeros((npool, sout), np.float32)
    for io in range(hout):
        for jo in range(wout):
            sel[2 * io * wp + 2 * jo,
                (io + tgt_off) * tgt_stride + (jo + tgt_off)] = 1.0
    return jnp.asarray(sel)


def prepare_params(params):
    c1w, c1b = params["conv1_w"], params["conv1_b"]
    c2w, c2b = params["conv2_w"], params["conv2_b"]
    fcw, fcb = params["fc1_w"], params["fc1_b"]
    co1, ci1 = c1w.shape[0], c1w.shape[1]
    co2, ci2 = c2w.shape[0], c2w.shape[1]
    ncls, nfeat = fcw.shape
    return {
        "w1": jnp.transpose(c1w, (0, 2, 3, 1)).reshape(co1, 9 * ci1),
        "b1": c1b.reshape(co1, 1),
        "w2": jnp.transpose(c2w, (0, 2, 3, 1)).reshape(co2, 9 * ci2),
        "b2": c2b.reshape(co2, 1),
        # fc1 pre-transposed + zero-padded to 128 output lanes.
        "wf": jnp.zeros((nfeat, _FC_LANES), jnp.float32).at[:, :ncls].set(fcw.T),
        "bf": jnp.zeros((1, _FC_LANES), jnp.float32).at[0, :ncls].set(fcb),
        # stage 1: 28x28 conv (padded width 30) -> pooled 14x14 written into a
        # zero-padded 16x16 grid for stage 2.
        "sel1": _pool_select_matrix(30, 14, 14, 16, 1, 256),
        # stage 2: 14x14 conv (padded width 16) -> pooled 7x7 into a 64-wide block.
        "sel2": _pool_select_matrix(16, 7, 7, 7, 0, 64),
    }


# ----------------------------------------------------------------------------
# Forward pass
# ----------------------------------------------------------------------------
def cnn_forward(prepped, x, *, num_classes=10):
    n, cin, h, w = x.shape
    assert (h, w) == (28, 28), "fc1 = 16*7*7 implies 28x28 inputs"
    co2 = prepped["w2"].shape[0]
    tb = _TB
    npad = ((n + tb - 1) // tb) * tb

    # NCHW -> channels on sublanes, flat zero-padded pixels on lanes.
    # Per-sample segment: 30x30 padded grid (900 cols) rounded up to 1024.
    xp = jnp.pad(x.astype(jnp.float32),
                 ((0, npad - n), (0, 0), (1, 1), (1, 1)))      # (npad, cin, 30, 30)
    x0 = jnp.transpose(xp, (1, 0, 2, 3)).reshape(cin, npad, 900)
    x0 = jnp.pad(x0, ((0, 0), (0, 0), (0, 1024 - 900))).reshape(cin, npad * 1024)

    # conv1 + ReLU + pool  -> (8, npad*256): zero-padded 16x16 grid per sample.
    x1 = _conv_relu_pool(x0, prepped["w1"], prepped["b1"], prepped["sel1"],
                         wp=30, sin=1024, tb=tb)
    # conv2 + ReLU + pool  -> (16, npad*64): 7x7 per sample (+15 zero columns).
    x2 = _conv_relu_pool(x1, prepped["w2"], prepped["b2"], prepped["sel2"],
                         wp=16, sin=256, tb=tb)

    # Flatten in PyTorch NCHW order (c, i, j) and apply fc1.
    feats = x2.reshape(co2, npad, 64)[:, :, :49]
    feats = jnp.transpose(feats, (1, 0, 2)).reshape(npad, co2 * 49)
    out = _linear(feats, prepped["wf"], prepped["bf"], tb=tb)  # (npad, 128)
    return out[:n, :num_classes]


# ----------------------------------------------------------------------------
# Pure-JAX reference (correctness check only)
# ----------------------------------------------------------------------------
def cnn_reference(params, x):
    dn = lax.conv_dimension_numbers(x.shape, params["conv1_w"].shape,
                                    ("NCHW", "OIHW", "NCHW"))
    y = lax.conv_general_dilated(x, params["conv1_w"], (1, 1), ((1, 1), (1, 1)),
                                 dimension_numbers=dn)
    y = jax.nn.relu(y + params["conv1_b"][None, :, None, None])
    y = lax.reduce_window(y, -jnp.inf, lax.max, (1, 1, 2, 2), (1, 1, 2, 2), "VALID")
    dn2 = lax.conv_dimension_numbers(y.shape, params["conv2_w"].shape,
                                     ("NCHW", "OIHW", "NCHW"))
    y = lax.conv_general_dilated(y, params["conv2_w"], (1, 1), ((1, 1), (1, 1)),
                                 dimension_numbers=dn2)
    y = jax.nn.relu(y + params["conv2_b"][None, :, None, None])
    y = lax.reduce_window(y, -jnp.inf, lax.max, (1, 1, 2, 2), (1, 1, 2, 2), "VALID")
    y = y.reshape(y.shape[0], -1)
    return y @ params["fc1_w"].T + params["fc1_b"]


if __name__ == "__main__":
    key = jax.random.PRNGKey(0)
    kp, kx = jax.random.split(key)
    params = init_params(kp, in_channels=1, num_classes=10)
    # MNIST-style input implied by fc1 (16*7*7): 28x28 spatial, small batch.
    x = jax.random.normal(kx, (2, 1, 28, 28), jnp.float32)

    prepped = prepare_params(params)
    fwd = jax.jit(functools.partial(cnn_forward, num_classes=10))

    out = jax.block_until_ready(fwd(prepped, x))
    assert out.shape == (2, 10), out.shape

    ref = jax.block_until_ready(cnn_reference(params, x))
    assert jnp.allclose(out, ref, atol=2e-3, rtol=2e-3), (
        "mismatch vs reference, max abs err = "
        f"{float(jnp.max(jnp.abs(out - ref)))}")

    print("KERNEL_OK")
</pallas_src>

<mosaic_0001>
module attributes {stable_mosaic.version = 11 : i64} {
  func.func @_conv_relu_pool_kernel(%arg0: i32, %arg1: memref<1x8192xf32, #tpu.memory_space<vmem>>, %arg2: memref<8x9xf32, #tpu.memory_space<vmem>>, %arg3: memref<8x1xf32, #tpu.memory_space<vmem>>, %arg4: memref<807x256xf32, #tpu.memory_space<vmem>>, %arg5: memref<8x2048xf32, #tpu.memory_space<vmem>>) attributes {dimension_semantics = [#tpu.dimension_semantics<parallel>], iteration_bounds = array<i64: 1>, scalar_prefetch = 0 : i64, scratch_operands = 0 : i64, tpu.core_type = #tpu.core_type<tc>, window_params = [{transform_indices = @transform_0, window_bounds = array<i64: 1, 8192>}, {pipeline_mode = #tpu.pipeline_mode<synchronous>, transform_indices = @transform_1, window_bounds = array<i64: 8, 9>}, {pipeline_mode = #tpu.pipeline_mode<synchronous>, transform_indices = @transform_2, window_bounds = array<i64: 8, 1>}, {pipeline_mode = #tpu.pipeline_mode<synchronous>, transform_indices = @transform_3, window_bounds = array<i64: 807, 256>}, {transform_indices = @transform_4, window_bounds = array<i64: 8, 2048>}]} {
    %c0 = arith.constant 0 : index
    %c0_0 = arith.constant 0 : index
    %0 = vector.load %arg1[%c0, %c0_0] : memref<1x8192xf32, #tpu.memory_space<vmem>>, vector<1x8192xf32>
    %1 = vector.extract_strided_slice %0 {offsets = [0, 0], sizes = [1, 8130], strides = [1, 1]} : vector<1x8192xf32> to vector<1x8130xf32>
    %2 = vector.extract_strided_slice %0 {offsets = [0, 1], sizes = [1, 8130], strides = [1, 1]} : vector<1x8192xf32> to vector<1x8130xf32>
    %3 = vector.extract_strided_slice %0 {offsets = [0, 2], sizes = [1, 8130], strides = [1, 1]} : vector<1x8192xf32> to vector<1x8130xf32>
    %4 = vector.extract_strided_slice %0 {offsets = [0, 30], sizes = [1, 8130], strides = [1, 1]} : vector<1x8192xf32> to vector<1x8130xf32>
    %5 = vector.extract_strided_slice %0 {offsets = [0, 31], sizes = [1, 8130], strides = [1, 1]} : vector<1x8192xf32> to vector<1x8130xf32>
    %6 = vector.extract_strided_slice %0 {offsets = [0, 32], sizes = [1, 8130], strides = [1, 1]} : vector<1x8192xf32> to vector<1x8130xf32>
    %7 = vector.extract_strided_slice %0 {offsets = [0, 60], sizes = [1, 8130], strides = [1, 1]} : vector<1x8192xf32> to vector<1x8130xf32>
    %8 = vector.extract_strided_slice %0 {offsets = [0, 61], sizes = [1, 8130], strides = [1, 1]} : vector<1x8192xf32> to vector<1x8130xf32>
    %9 = vector.extract_strided_slice %0 {offsets = [0, 62], sizes = [1, 8130], strides = [1, 1]} : vector<1x8192xf32> to vector<1x8130xf32>
    %10 = tpu.concatenate %1, %2, %3, %4, %5, %6, %7, %8, %9 in 0 : vector<1x8130xf32>, vector<1x8130xf32>, vector<1x8130xf32>, vector<1x8130xf32>, vector<1x8130xf32>, vector<1x8130xf32>, vector<1x8130xf32>, vector<1x8130xf32>, vector<1x8130xf32> -> vector<9x8130xf32>
    %c0_1 = arith.constant 0 : index
    %c0_2 = arith.constant 0 : index
    %11 = vector.load %arg2[%c0_1, %c0_2] : memref<8x9xf32, #tpu.memory_space<vmem>>, vector<8x9xf32>
    %cst = arith.constant dense<0.000000e+00> : vector<8x8130xf32>
    %12 = tpu.matmul %11, %10, %cst {dimension_numbers = #tpu.dot_dimension_numbers<[1], [0], [0], [1], [0, 0, 1, 1], [], []>} : vector<8x9xf32>, vector<9x8130xf32>, vector<8x8130xf32> -> vector<8x8130xf32>
    %c0_3 = arith.constant 0 : index
    %c0_4 = arith.constant 0 : index
    %13 = vector.load %arg3[%c0_3, %c0_4] : memref<8x1xf32, #tpu.memory_space<vmem>>, vector<8x1xf32>
    %14 = vector.broadcast %13 : vector<8x1xf32> to vector<8x8130xf32>
    %15 = arith.addf %12, %14 : vector<8x8130xf32>
    %cst_5 = arith.constant 0.000000e+00 : f32
    %16 = vector.broadcast %cst_5 : f32 to vector<8x8130xf32>
    %17 = arith.maximumf %15, %16 : vector<8x8130xf32>
    %18 = vector.extract_strided_slice %17 {offsets = [0, 0], sizes = [8, 8099], strides = [1, 1]} : vector<8x8130xf32> to vector<8x8099xf32>
    %19 = vector.extract_strided_slice %17 {offsets = [0, 1], sizes = [8, 8099], strides = [1, 1]} : vector<8x8130xf32> to vector<8x8099xf32>
    %20 = arith.maximumf %18, %19 : vector<8x8099xf32>
    %21 = vector.extract_strided_slice %17 {offsets = [0, 30], sizes = [8, 8099], strides = [1, 1]} : vector<8x8130xf32> to vector<8x8099xf32>
    %22 = vector.extract_strided_slice %17 {offsets = [0, 31], sizes = [8, 8099], strides = [1, 1]} : vector<8x8130xf32> to vector<8x8099xf32>
    %23 = arith.maximumf %21, %22 : vector<8x8099xf32>
    %24 = arith.maximumf %20, %23 : vector<8x8099xf32>
    %25 = vector.extract_strided_slice %24 {offsets = [0, 0], sizes = [8, 807], strides = [1, 1]} : vector<8x8099xf32> to vector<8x807xf32>
    %26 = vector.extract_strided_slice %24 {offsets = [0, 1024], sizes = [8, 807], strides = [1, 1]} : vector<8x8099xf32> to vector<8x807xf32>
    %27 = vector.extract_strided_slice %24 {offsets = [0, 2048], sizes = [8, 807], strides = [1, 1]} : vector<8x8099xf32> to vector<8x807xf32>
    %28 = vector.extract_strided_slice %24 {offsets = [0, 3072], sizes = [8, 807], strides = [1, 1]} : vector<8x8099xf32> to vector<8x807xf32>
    %29 = vector.extract_strided_slice %24 {offsets = [0, 4096], sizes = [8, 807], strides = [1, 1]} : vector<8x8099xf32> to vector<8x807xf32>
    %30 = vector.extract_strided_slice %24 {offsets = [0, 5120], sizes = [8, 807], strides = [1, 1]} : vector<8x8099xf32> to vector<8x807xf32>
    %31 = vector.extract_strided_slice %24 {offsets = [0, 6144], sizes = [8, 807], strides = [1, 1]} : vector<8x8099xf32> to vector<8x807xf32>
    %32 = vector.extract_strided_slice %24 {offsets = [0, 7168], sizes = [8, 807], strides = [1, 1]} : vector<8x8099xf32> to vector<8x807xf32>
    %33 = tpu.concatenate %25, %26, %27, %28, %29, %30, %31, %32 in 0 : vector<8x807xf32>, vector<8x807xf32>, vector<8x807xf32>, vector<8x807xf32>, vector<8x807xf32>, vector<8x807xf32>, vector<8x807xf32>, vector<8x807xf32> -> vector<64x807xf32>
    %c0_6 = arith.constant 0 : index
    %c0_7 = arith.constant 0 : index
    %34 = vector.load %arg4[%c0_6, %c0_7] : memref<807x256xf32, #tpu.memory_space<vmem>>, vector<807x256xf32>
    %cst_8 = arith.constant dense<0.000000e+00> : vector<64x256xf32>
    %35 = tpu.matmul %33, %34, %cst_8 {dimension_numbers = #tpu.dot_dimension_numbers<[1], [0], [0], [1], [0, 0, 1, 1], [], []>} : vector<64x807xf32>, vector<807x256xf32>, vector<64x256xf32> -> vector<64x256xf32>
    %36 = vector.extract_strided_slice %35 {offsets = [0, 0], sizes = [8, 256], strides = [1, 1]} : vector<64x256xf32> to vector<8x256xf32>
    %37 = vector.extract_strided_slice %35 {offsets = [8, 0], sizes = [8, 256], strides = [1, 1]} : vector<64x256xf32> to vector<8x256xf32>
    %38 = vector.extract_strided_slice %35 {offsets = [16, 0], sizes = [8, 256], strides = [1, 1]} : vector<64x256xf32> to vector<8x256xf32>
    %39 = vector.extract_strided_slice %35 {offsets = [24, 0], sizes = [8, 256], strides = [1, 1]} : vector<64x256xf32> to vector<8x256xf32>
    %40 = vector.extract_strided_slice %35 {offsets = [32, 0], sizes = [8, 256], strides = [1, 1]} : vector<64x256xf32> to vector<8x256xf32>
    %41 = vector.extract_strided_slice %35 {offsets = [40, 0], sizes = [8, 256], strides = [1, 1]} : vector<64x256xf32> to vector<8x256xf32>
    %42 = vector.extract_strided_slice %35 {offsets = [48, 0], sizes = [8, 256], strides = [1, 1]} : vector<64x256xf32> to vector<8x256xf32>
    %43 = vector.extract_strided_slice %35 {offsets = [56, 0], sizes = [8, 256], strides = [1, 1]} : vector<64x256xf32> to vector<8x256xf32>
    %44 = tpu.concatenate %36, %37, %38, %39, %40, %41, %42, %43 in 1 : vector<8x256xf32>, vector<8x256xf32>, vector<8x256xf32>, vector<8x256xf32>, vector<8x256xf32>, vector<8x256xf32>, vector<8x256xf32>, vector<8x256xf32> -> vector<8x2048xf32>
    %c0_9 = arith.constant 0 : index
    %c0_10 = arith.constant 0 : index
    %45 = vector.load %arg5[%c0_9, %c0_10] : memref<8x2048xf32, #tpu.memory_space<vmem>>, vector<8x2048xf32>
    tpu.vector_store %arg5[%c0_9, %c0_10], %44 {strides = array<i32>} : memref<8x2048xf32, #tpu.memory_space<vmem>>, vector<8x2048xf32>,
    return
  }
  func.func @transform_0(%arg0: i32) -> (i32, i32) {
    %c0_i32 = arith.constant 0 : i32
    %c0_i32_0 = arith.constant 0 : i32
    return %c0_i32, %arg0 : i32, i32
  }
  func.func @transform_1(%arg0: i32) -> (i32, i32) {
    %c0_i32 = arith.constant 0 : i32
    %c0_i32_0 = arith.constant 0 : i32
    %c0_i32_1 = arith.constant 0 : i32
    return %c0_i32, %c0_i32_0 : i32, i32
  }
  func.func @transform_2(%arg0: i32) -> (i32, i32) {
    %c0_i32 = arith.constant 0 : i32
    %c0_i32_0 = arith.constant 0 : i32
    %c0_i32_1 = arith.constant 0 : i32
    return %c0_i32, %c0_i32_0 : i32, i32
  }
  func.func @transform_3(%arg0: i32) -> (i32, i32) {
    %c0_i32 = arith.constant 0 : i32
    %c0_i32_0 = arith.constant 0 : i32
    %c0_i32_1 = arith.constant 0 : i32
    return %c0_i32, %c0_i32_0 : i32, i32
  }
  func.func @transform_4(%arg0: i32) -> (i32, i32) {
    %c0_i32 = arith.constant 0 : i32
    %c0_i32_0 = arith.constant 0 : i32
    return %c0_i32, %arg0 : i32, i32
  }
}

module attributes {stable_mosaic.version = 11 : i64} {
  func.func @_conv_relu_pool_kernel(%arg0: i32, %arg1: memref<8x2048xf32, #tpu.memory_space<vmem>>, %arg2: memref<16x72xf32, #tpu.memory_space<vmem>>, %arg3: memref<16x1xf32, #tpu.memory_space<vmem>>, %arg4: memref<205x64xf32, #tpu.memory_space<vmem>>, %arg5: memref<16x512xf32, #tpu.memory_space<vmem>>) attributes {dimension_semantics = [#tpu.dimension_semantics<parallel>], iteration_bounds = array<i64: 1>, scalar_prefetch = 0 : i64, scratch_operands = 0 : i64, tpu.core_type = #tpu.core_type<tc>, window_params = [{transform_indices = @transform_0, window_bounds = array<i64: 8, 2048>}, {pipeline_mode = #tpu.pipeline_mode<synchronous>, transform_indices = @transform_1, window_bounds = array<i64: 16, 72>}, {pipeline_mode = #tpu.pipeline_mode<synchronous>, transform_indices = @transform_2, window_bounds = array<i64: 16, 1>}, {pipeline_mode = #tpu.pipeline_mode<synchronous>, transform_indices = @transform_3, window_bounds = array<i64: 205, 64>}, {transform_indices = @transform_4, window_bounds = array<i64: 16, 512>}]} {
    %c0 = arith.constant 0 : index
    %c0_0 = arith.constant 0 : index
    %0 = vector.load %arg1[%c0, %c0_0] : memref<8x2048xf32, #tpu.memory_space<vmem>>, vector<8x2048xf32>
    %1 = vector.extract_strided_slice %0 {offsets = [0, 0], sizes = [8, 2014], strides = [1, 1]} : vector<8x2048xf32> to vector<8x2014xf32>
    %2 = vector.extract_strided_slice %0 {offsets = [0, 1], sizes = [8, 2014], strides = [1, 1]} : vector<8x2048xf32> to vector<8x2014xf32>
    %3 = vector.extract_strided_slice %0 {offsets = [0, 2], sizes = [8, 2014], strides = [1, 1]} : vector<8x2048xf32> to vector<8x2014xf32>
    %4 = vector.extract_strided_slice %0 {offsets = [0, 16], sizes = [8, 2014], strides = [1, 1]} : vector<8x2048xf32> to vector<8x2014xf32>
    %5 = vector.extract_strided_slice %0 {offsets = [0, 17], sizes = [8, 2014], strides = [1, 1]} : vector<8x2048xf32> to vector<8x2014xf32>
    %6 = vector.extract_strided_slice %0 {offsets = [0, 18], sizes = [8, 2014], strides = [1, 1]} : vector<8x2048xf32> to vector<8x2014xf32>
    %7 = vector.extract_strided_slice %0 {offsets = [0, 32], sizes = [8, 2014], strides = [1, 1]} : vector<8x2048xf32> to vector<8x2014xf32>
    %8 = vector.extract_strided_slice %0 {offsets = [0, 33], sizes = [8, 2014], strides = [1, 1]} : vector<8x2048xf32> to vector<8x2014xf32>
    %9 = vector.extract_strided_slice %0 {offsets = [0, 34], sizes = [8, 2014], strides = [1, 1]} : vector<8x2048xf32> to vector<8x2014xf32>
    %10 = tpu.concatenate %1, %2, %3, %4, %5, %6, %7, %8, %9 in 0 : vector<8x2014xf32>, vector<8x2014xf32>, vector<8x2014xf32>, vector<8x2014xf32>, vector<8x2014xf32>, vector<8x2014xf32>, vector<8x2014xf32>, vector<8x2014xf32>, vector<8x2014xf32> -> vector<72x2014xf32>
    %c0_1 = arith.constant 0 : index
    %c0_2 = arith.constant 0 : index
    %11 = vector.load %arg2[%c0_1, %c0_2] : memref<16x72xf32, #tpu.memory_space<vmem>>, vector<16x72xf32>
    %cst = arith.constant dense<0.000000e+00> : vector<16x2014xf32>
    %12 = tpu.matmul %11, %10, %cst {dimension_numbers = #tpu.dot_dimension_numbers<[1], [0], [0], [1], [0, 0, 1, 1], [], []>} : vector<16x72xf32>, vector<72x2014xf32>, vector<16x2014xf32> -> vector<16x2014xf32>
    %c0_3 = arith.constant 0 : index
    %c0_4 = arith.constant 0 : index
    %13 = vector.load %arg3[%c0_3, %c0_4] : memref<16x1xf32, #tpu.memory_space<vmem>>, vector<16x1xf32>
    %14 = vector.broadcast %13 : vector<16x1xf32> to vector<16x2014xf32>
    %15 = arith.addf %12, %14 : vector<16x2014xf32>
    %cst_5 = arith.constant 0.000000e+00 : f32
    %16 = vector.broadcast %cst_5 : f32 to vector<16x2014xf32>
    %17 = arith.maximumf %15, %16 : vector<16x2014xf32>
    %18 = vector.extract_strided_slice %17 {offsets = [0, 0], sizes = [16, 1997], strides = [1, 1]} : vector<16x2014xf32> to vector<16x1997xf32>
    %19 = vector.extract_strided_slice %17 {offsets = [0, 1], sizes = [16, 1997], strides = [1, 1]} : vector<16x2014xf32> to vector<16x1997xf32>
    %20 = arith.maximumf %18, %19 : vector<16x1997xf32>
    %21 = vector.extract_strided_slice %17 {offsets = [0, 16], sizes = [16, 1997], strides = [1, 1]} : vector<16x2014xf32> to vector<16x1997xf32>
    %22 = vector.extract_strided_slice %17 {offsets = [0, 17], sizes = [16, 1997], strides = [1, 1]} : vector<16x2014xf32> to vector<16x1997xf32>
    %23 = arith.maximumf %21, %22 : vector<16x1997xf32>
    %24 = arith.maximumf %20, %23 : vector<16x1997xf32>
    %25 = vector.extract_strided_slice %24 {offsets = [0, 0], sizes = [16, 205], strides = [1, 1]} : vector<16x1997xf32> to vector<16x205xf32>
    %26 = vector.extract_strided_slice %24 {offsets = [0, 256], sizes = [16, 205], strides = [1, 1]} : vector<16x1997xf32> to vector<16x205xf32>
    %27 = vector.extract_strided_slice %24 {offsets = [0, 512], sizes = [16, 205], strides = [1, 1]} : vector<16x1997xf32> to vector<16x205xf32>
    %28 = vector.extract_strided_slice %24 {offsets = [0, 768], sizes = [16, 205], strides = [1, 1]} : vector<16x1997xf32> to vector<16x205xf32>
    %29 = vector.extract_strided_slice %24 {offsets = [0, 1024], sizes = [16, 205], strides = [1, 1]} : vector<16x1997xf32> to vector<16x205xf32>
    %30 = vector.extract_strided_slice %24 {offsets = [0, 1280], sizes = [16, 205], strides = [1, 1]} : vector<16x1997xf32> to vector<16x205xf32>
    %31 = vector.extract_strided_slice %24 {offsets = [0, 1536], sizes = [16, 205], strides = [1, 1]} : vector<16x1997xf32> to vector<16x205xf32>
    %32 = vector.extract_strided_slice %24 {offsets = [0, 1792], sizes = [16, 205], strides = [1, 1]} : vector<16x1997xf32> to vector<16x205xf32>
    %33 = tpu.concatenate %25, %26, %27, %28, %29, %30, %31, %32 in 0 : vector<16x205xf32>, vector<16x205xf32>, vector<16x205xf32>, vector<16x205xf32>, vector<16x205xf32>, vector<16x205xf32>, vector<16x205xf32>, vector<16x205xf32> -> vector<128x205xf32>
    %c0_6 = arith.constant 0 : index
    %c0_7 = arith.constant 0 : index
    %34 = vector.load %arg4[%c0_6, %c0_7] : memref<205x64xf32, #tpu.memory_space<vmem>>, vector<205x64xf32>
    %cst_8 = arith.constant dense<0.000000e+00> : vector<128x64xf32>
    %35 = tpu.matmul %33, %34, %cst_8 {dimension_numbers = #tpu.dot_dimension_numbers<[1], [0], [0], [1], [0, 0, 1, 1], [], []>} : vector<128x205xf32>, vector<205x64xf32>, vector<128x64xf32> -> vector<128x64xf32>
    %36 = vector.extract_strided_slice %35 {offsets = [0, 0], sizes = [16, 64], strides = [1, 1]} : vector<128x64xf32> to vector<16x64xf32>
    %37 = vector.extract_strided_slice %35 {offsets = [16, 0], sizes = [16, 64], strides = [1, 1]} : vector<128x64xf32> to vector<16x64xf32>
    %38 = vector.extract_strided_slice %35 {offsets = [32, 0], sizes = [16, 64], strides = [1, 1]} : vector<128x64xf32> to vector<16x64xf32>
    %39 = vector.extract_strided_slice %35 {offsets = [48, 0], sizes = [16, 64], strides = [1, 1]} : vector<128x64xf32> to vector<16x64xf32>
    %40 = vector.extract_strided_slice %35 {offsets = [64, 0], sizes = [16, 64], strides = [1, 1]} : vector<128x64xf32> to vector<16x64xf32>
    %41 = vector.extract_strided_slice %35 {offsets = [80, 0], sizes = [16, 64], strides = [1, 1]} : vector<128x64xf32> to vector<16x64xf32>
    %42 = vector.extract_strided_slice %35 {offsets = [96, 0], sizes = [16, 64], strides = [1, 1]} : vector<128x64xf32> to vector<16x64xf32>
    %43 = vector.extract_strided_slice %35 {offsets = [112, 0], sizes = [16, 64], strides = [1, 1]} : vector<128x64xf32> to vector<16x64xf32>
    %44 = tpu.concatenate %36, %37, %38, %39, %40, %41, %42, %43 in 1 : vector<16x64xf32>, vector<16x64xf32>, vector<16x64xf32>, vector<16x64xf32>, vector<16x64xf32>, vector<16x64xf32>, vector<16x64xf32>, vector<16x64xf32> -> vector<16x512xf32>
    %c0_9 = arith.constant 0 : index
    %c0_10 = arith.constant 0 : index
    %45 = vector.load %arg5[%c0_9, %c0_10] : memref<16x512xf32, #tpu.memory_space<vmem>>, vector<16x512xf32>
    tpu.vector_store %arg5[%c0_9, %c0_10], %44 {strides = array<i32>} : memref<16x512xf32, #tpu.memory_space<vmem>>, vector<16x512xf32>,
    return
  }
  func.func @transform_0(%arg0: i32) -> (i32, i32) {
    %c0_i32 = arith.constant 0 : i32
    %c0_i32_0 = arith.constant 0 : i32
    return %c0_i32, %arg0 : i32, i32
  }
  func.func @transform_1(%arg0: i32) -> (i32, i32) {
    %c0_i32 = arith.constant 0 : i32
    %c0_i32_0 = arith.constant 0 : i32
    %c0_i32_1 = arith.constant 0 : i32
    return %c0_i32, %c0_i32_0 : i32, i32
  }
  func.func @transform_2(%arg0: i32) -> (i32, i32) {
    %c0_i32 = arith.constant 0 : i32
    %c0_i32_0 = arith.constant 0 : i32
    %c0_i32_1 = arith.constant 0 : i32
    return %c0_i32, %c0_i32_0 : i32, i32
  }
  func.func @transform_3(%arg0: i32) -> (i32, i32) {
    %c0_i32 = arith.constant 0 : i32
    %c0_i32_0 = arith.constant 0 : i32
    %c0_i32_1 = arith.constant 0 : i32
    return %c0_i32, %c0_i32_0 : i32, i32
  }
  func.func @transform_4(%arg0: i32) -> (i32, i32) {
    %c0_i32 = arith.constant 0 : i32
    %c0_i32_0 = arith.constant 0 : i32
    return %c0_i32, %arg0 : i32, i32
  }
}

module attributes {stable_mosaic.version = 11 : i64} {
  func.func @_fc_kernel(%arg0: i32, %arg1: memref<8x784xf32, #tpu.memory_space<vmem>>, %arg2: memref<784x128xf32, #tpu.memory_space<vmem>>, %arg3: memref<1x128xf32, #tpu.memory_space<vmem>>, %arg4: memref<8x128xf32, #tpu.memory_space<vmem>>) attributes {dimension_semantics = [#tpu.dimension_semantics<parallel>], iteration_bounds = array<i64: 1>, scalar_prefetch = 0 : i64, scratch_operands = 0 : i64, tpu.core_type = #tpu.core_type<tc>, window_params = [{transform_indices = @transform_0, window_bounds = array<i64: 8, 784>}, {pipeline_mode = #tpu.pipeline_mode<synchronous>, transform_indices = @transform_1, window_bounds = array<i64: 784, 128>}, {pipeline_mode = #tpu.pipeline_mode<synchronous>, transform_indices = @transform_2, window_bounds = array<i64: 1, 128>}, {transform_indices = @transform_3, window_bounds = array<i64: 8, 128>}]} {
    %c0 = arith.constant 0 : index
    %c0_0 = arith.constant 0 : index
    %0 = vector.load %arg1[%c0, %c0_0] : memref<8x784xf32, #tpu.memory_space<vmem>>, vector<8x784xf32>
    %c0_1 = arith.constant 0 : index
    %c0_2 = arith.constant 0 : index
    %1 = vector.load %arg2[%c0_1, %c0_2] : memref<784x128xf32, #tpu.memory_space<vmem>>, vector<784x128xf32>
    %cst = arith.constant dense<0.000000e+00> : vector<8x128xf32>
    %2 = tpu.matmul %0, %1, %cst {dimension_numbers = #tpu.dot_dimension_numbers<[1], [0], [0], [1], [0, 0, 1, 1], [], []>} : vector<8x784xf32>, vector<784x128xf32>, vector<8x128xf32> -> vector<8x128xf32>
    %c0_3 = arith.constant 0 : index
    %c0_4 = arith.constant 0 : index
    %3 = vector.load %arg3[%c0_3, %c0_4] : memref<1x128xf32, #tpu.memory_space<vmem>>, vector<1x128xf32>
    %4 = vector.broadcast %3 : vector<1x128xf32> to vector<8x128xf32>
    %5 = arith.addf %2, %4 : vector<8x128xf32>
    %c0_5 = arith.constant 0 : index
    %c0_6 = arith.constant 0 : index
    %6 = vector.load %arg4[%c0_5, %c0_6] : memref<8x128xf32, #tpu.memory_space<vmem>>, vector<8x128xf32>
    tpu.vector_store %arg4[%c0_5, %c0_6], %5 {strides = array<i32>} : memref<8x128xf32, #tpu.memory_space<vmem>>, vector<8x128xf32>,
    return
  }
  func.func @transform_0(%arg0: i32) -> (i32, i32) {
    %c0_i32 = arith.constant 0 : i32
    %c0_i32_0 = arith.constant 0 : i32
    return %arg0, %c0_i32 : i32, i32
  }
  func.func @transform_1(%arg0: i32) -> (i32, i32) {
    %c0_i32 = arith.constant 0 : i32
    %c0_i32_0 = arith.constant 0 : i32
    %c0_i32_1 = arith.constant 0 : i32
    return %c0_i32, %c0_i32_0 : i32, i32
  }
  func.func @transform_2(%arg0: i32) -> (i32, i32) {
    %c0_i32 = arith.constant 0 : i32
    %c0_i32_0 = arith.constant 0 : i32
    %c0_i32_1 = arith.constant 0 : i32
    return %c0_i32, %c0_i32_0 : i32, i32
  }
  func.func @transform_3(%arg0: i32) -> (i32, i32) {
    %c0_i32 = arith.constant 0 : i32
    %c0_i32_0 = arith.constant 0 : i32
    return %arg0, %c0_i32 : i32, i32
  }
}

</mosaic_0001>

<bundles_post_ra>
// kernel: cnn_forward.4
= control target key start
LH: loop header
LB: loop body
LE: loop exit
PB: predicated region body
PF: predicated region fallthrough
CT: control target
= control target key end

     0   :  { %s2389_s23 = smov 126   ;;  %s2390_s24 = smov 127   ;;  %v2396_v12 = vmov 0.0   ;;  %vm81_vm0 = vcmask 1039360   ;;  %vm145_vm1 = vcmask 1031168   ;;  %vm209_vm2 = vcmask 916480   ;;  %s3809_s0 = inlined_call_operand.vmem [shape: f32[8,2048], index: 0, kind: input, shape index: {}]   ;;  %s3810_s2 = inlined_call_operand.vmem [shape: f32[16,1], index: 2, kind: input, shape index: {}]   ;;  %s3811_s1 = inlined_call_operand.vmem [shape: f32[16,72], index: 1, kind: input, shape index: {}]   ;;  %s3812_s3 = inlined_call_operand.vmem [shape: f32[205,64], index: 3, kind: input, shape index: {}]   ;;  %s3813_s4 = inlined_call_operand.vmem [shape: f32[16,512], index: 4, kind: output, shape index: {}]  }
   0x1   :  { %v2430_v0 = vld [vmem:[%s3809_s0 + $0x8] sm:$0xff]  ;;  %v2435_v1 = vld [vmem:[%s3809_s0 + $0x10] sm:$0xff]  ;;  %v2440_v2 = vld [vmem:[%s3809_s0] sm:$0xff]  ;;  %s2391_s25 = smov 112   ;;  %s2392_s30 = smov 111   ;;  %646 = vmatprep.mubr.f32.mxu0 %v2396_v12  ;;  %723 = vmatprep.mubr.f32.mxu1 %v2396_v12  ;;  %vm273_vm3 = vcmask 908288  }
   0x2   :  { %v2137_v3 = vpack.i.bf16 %v2435_v1, %v2430_v0  ;;  %v2447_v4 = vld [vmem:[%s3809_s0 + $0x18] sm:$0xff]  ;;  %v2458_v6 = vld [vmem:[%s3809_s0 + $0x20] sm:$0xff]  ;;  %v2463_v7 = vld [vmem:[%s3809_s0 + $0x28] sm:$0xff]  ;;  %s2393_s5 = smov 110   ;;  %s2394_s6 = smov 96   ;;  %vm337_vm4 = vcmask 900096  }
   0x3   :  { %v2132_v5 = vpack.i.bf16 %v2447_v4, %v2440_v2  ;;  %v2157_v8 = vpack.i.bf16 %v2463_v7, %v2458_v6  ;;  %s2395_s7 = smov 95   ;;  %v2482_v9 = vld [vmem:[%s3809_s0 + $0x30] sm:$0xff]  ;;  %v2487_v10 = vld [vmem:[%s3809_s0 + $0x38] sm:$0xff]  ;;  %s2397_s12 = smov 94   ;;  %v2507_v13 = vld [vmem:[%s3809_s0 + $0x40] sm:$0xff]  ;;  %vm401_vm5 = vcmask 785408  }
   0x4   :  { %2138 = vrot.lane.b32.xlu1 %v2137_v3, %s2389_s23  ;;  %2128 = vrot.lane.b32.xlu0 %v2137_v3, %s2390_s24  ;;  %v2222_v11 = vpack.i.bf16 %v2487_v10, %v2482_v9  ;;  %v2512_v14 = vld [vmem:[%s3809_s0 + $0x48] sm:$0xff]  ;;  %v2533_v16 = vld [vmem:[%s3809_s0 + $0x50] sm:$0xff]  ;;  %vm465_vm6 = vcmask 777216   ;;  %vm529_vm7 = vcmask 769024   ;;  %vm575_vm8 = vcmask 588800  }
   0x5   :  { %v2247_v15 = vpack.i.bf16 %v2512_v14, %v2507_v13  ;;  %v2538_v17 = vld [vmem:[%s3809_s0 + $0x58] sm:$0xff]  ;;  %v2553_v19 = vld [vmem:[%s3809_s0 + $0x60] sm:$0xff]  ;;  %v2558_v20 = vld [vmem:[%s3809_s0 + $0x68] sm:$0xff]  ;;  %vm1685_vm9 = vcmask 1044480   ;;  %vm2400_vm10 = vmmov 1   ;;  %vm1636_vm12 = vcmask 629760  }
   0x6   :  { %v2292_v18 = vpack.i.bf16 %v2538_v17, %v2533_v16  ;;  %v2317_v21 = vpack.i.bf16 %v2558_v20, %v2553_v19  ;;  %v2579_v22 = vld [vmem:[%s3809_s0 + $0x70] sm:$0xff]  ;;  %v2584_v23 = vld [vmem:[%s3809_s0 + $0x78] sm:$0xff]  ;;  %vm2086_vm11 = vmpackc.low %vm1685_vm9, %vm2400_vm10  ;;  %vm1866_vm13 = vcmask 523264  }
   0x7   :  { %v2362_v24 = vpack.i.bf16 %v2584_v23, %v2579_v22 }
   0x8   :  { %2143 = vrot.lane.b32.xlu1 %v2137_v3, %s2391_s25  ;;  %2133 = vrot.lane.b32.xlu0 %v2132_v5, %s2390_s24 }
   0xc   :  { %2153 = vrot.lane.b32.xlu1 %v2132_v5, %s2391_s25  ;;  %2148 = vrot.lane.b32.xlu0 %v2132_v5, %s2389_s23 }
  0x10   :  { %2163 = vrot.lane.b32.xlu1 %v2137_v3, %s2392_s30  ;;  %2158 = vrot.lane.b32.xlu0 %v2157_v8, %s2390_s24 }
  0x14   :  { %2173 = vrot.lane.b32.xlu1 %v2132_v5, %s2392_s30  ;;  %2168 = vrot.lane.b32.xlu0 %v2137_v3, %s2393_s5 }
  0x18   :  { %2183 = vrot.lane.b32.xlu1 %v2157_v8, %s2389_s23  ;;  %2178 = vrot.lane.b32.xlu0 %v2132_v5, %s2393_s5 }
  0x1c   :  { %2193 = vrot.lane.b32.xlu1 %v2137_v3, %s2394_s6  ;;  %2188 = vrot.lane.b32.xlu0 %v2157_v8, %s2391_s25 }
  0x20   :  { %2203 = vrot.lane.b32.xlu1 %v2132_v5, %s2394_s6  ;;  %2198 = vrot.lane.b32.xlu0 %v2137_v3, %s2395_s7 }
  0x24   :  { %2213 = vrot.lane.b32.xlu1 %v2157_v8, %s2392_s30  ;;  %2208 = vrot.lane.b32.xlu0 %v2132_v5, %s2395_s7 }
  0x28   :  { %2223 = vrot.lane.b32.xlu1 %v2222_v11, %s2390_s24  ;;  %2218 = vrot.lane.b32.xlu0 %v2157_v8, %s2393_s5 }
  0x2c   :  { %501 = vrot.lane.b32.xlu1 %v2435_v1, %s2397_s12  ;;  %499 = vrot.lane.b32.xlu0 %v2430_v0, %s2397_s12 }
  0x30   :  { %2228 = vrot.lane.b32.xlu1 %v2157_v8, %s2394_s6  ;;  %497 = vrot.lane.b32.xlu0 %v2440_v2, %s2397_s12 }
  0x34   :  { %2238 = vrot.lane.b32.xlu1 %v2222_v11, %s2389_s23  ;;  %2233 = vrot.lane.b32.xlu0 %v2157_v8, %s2395_s7 }
  0x38   :  { %2248 = vrot.lane.b32.xlu1 %v2247_v15, %s2390_s24  ;;  %2243 = vrot.lane.b32.xlu0 %v2222_v11, %s2391_s25 }
  0x3c   :  { %2258 = vrot.lane.b32.xlu1 %v2222_v11, %s2393_s5  ;;  %2253 = vrot.lane.b32.xlu0 %v2222_v11, %s2392_s30 }
  0x40   :  { %505 = vrot.lane.b32.xlu1 %v2458_v6, %s2397_s12  ;;  %503 = vrot.lane.b32.xlu0 %v2447_v4, %s2397_s12 }
  0x44   :  { %2268 = vrot.lane.b32.xlu1 %v2247_v15, %s2391_s25  ;;  %2263 = vrot.lane.b32.xlu0 %v2247_v15, %s2389_s23 }
  0x48   :  { %2278 = vrot.lane.b32.xlu1 %v2222_v11, %s2395_s7  ;;  %2273 = vrot.lane.b32.xlu0 %v2222_v11, %s2394_s6 }
  0x4c   :  { %2288 = vrot.lane.b32.xlu1 %v2247_v15, %s2393_s5  ;;  %2283 = vrot.lane.b32.xlu0 %v2247_v15, %s2392_s30 }
  0x50   :  { %507 = vrot.lane.b32.xlu1 %v2463_v7, %s2397_s12  ;;  %2293 = vrot.lane.b32.xlu0 %v2292_v18, %s2390_s24 }
  0x54   :  { %2298 = vrot.lane.b32.xlu1 %v2247_v15, %s2394_s6  ;;  %509 = vrot.lane.b32.xlu0 %v2482_v9, %s2397_s12 }
  0x58   :  { %2308 = vrot.lane.b32.xlu1 %v2292_v18, %s2389_s23  ;;  %2303 = vrot.lane.b32.xlu0 %v2247_v15, %s2395_s7 }
  0x5c   :  { %2318 = vrot.lane.b32.xlu1 %v2317_v21, %s2390_s24  ;;  %2313 = vrot.lane.b32.xlu0 %v2292_v18, %s2391_s25 }
  0x60   :  { %2328 = vrot.lane.b32.xlu1 %v2292_v18, %s2393_s5  ;;  %2323 = vrot.lane.b32.xlu0 %v2292_v18, %s2392_s30 }
  0x64   :  { %513 = vrot.lane.b32.xlu1 %v2507_v13, %s2397_s12  ;;  %511 = vrot.lane.b32.xlu0 %v2487_v10, %s2397_s12 }
  0x68   :  { %2338 = vrot.lane.b32.xlu1 %v2317_v21, %s2391_s25  ;;  %2333 = vrot.lane.b32.xlu0 %v2317_v21, %s2389_s23 }
  0x6c   :  { %2348 = vrot.lane.b32.xlu1 %v2292_v18, %s2395_s7  ;;  %2343 = vrot.lane.b32.xlu0 %v2292_v18, %s2394_s6 }
  0x70   :  { %2358 = vrot.lane.b32.xlu1 %v2317_v21, %s2393_s5  ;;  %2353 = vrot.lane.b32.xlu0 %v2317_v21, %s2392_s30 }
  0x74   :  { %515 = vrot.lane.b32.xlu1 %v2512_v14, %s2397_s12  ;;  %2363 = vrot.lane.b32.xlu0 %v2362_v24, %s2390_s24 }
  0x76   :  { %v2593_v25 = vpop.permute.xlu1 %2138  ;;  %v2129_v26 = vpop.permute.xlu0 %2128 }
  0x77   :  { %v2141_v27 = vunpack.i.h.bf16 %v2593_v25  ;;  %v2140_v28 = vunpack.i.l.bf16 %v2593_v25  ;;  %v2131_v29 = vunpack.i.h.bf16 %v2129_v26  ;;  %v2130_v30 = vunpack.i.l.bf16 %v2129_v26 }
  0x78   :  { %2368 = vrot.lane.b32.xlu1 %v2317_v21, %s2394_s6  ;;  %517 = vrot.lane.b32.xlu0 %v2533_v16, %s2397_s12 }
  0x79   :  { %v83_v31 = vsel %vm81_vm0, %v2130_v30, %v2131_v29  ;;  %v147_v38 = vsel %vm145_vm1, %v2140_v28, %v2141_v27 }
  0x7a   :  { %v2601_v32 = vpop.permute.xlu1 %2143  ;;  %v2134_v33 = vpop.permute.xlu0 %2133  ;;  %v1920_v34 = vpack.c.bf16 %v83_v31, %v2430_v0 }
  0x7b   :  { %v2146_v35 = vunpack.i.h.bf16 %v2601_v32  ;;  %v2145_v36 = vunpack.i.l.bf16 %v2601_v32  ;;  %v2135_v37 = vunpack.i.l.bf16 %v2134_v33  ;;  %v2136_v47 = vunpack.i.h.bf16 %v2134_v33 }
  0x7c   :  { %1921 = vmatprep.subr.bf16.mxu0 %v1920_v34  ;;  %141 = vrot.lane.b32.xlu1 %v2579_v22, %s2389_s23 }
  0x7d   :  { %2373 = vrot.lane.b32.xlu0 %v2317_v21, %s2395_s7  ;;  %v82_v39 = vsel %vm81_vm0, %v2135_v37, %v2130_v30  ;;  %v211_v40 = vsel %vm209_vm2, %v2145_v36, %v2146_v35  ;;  %v84_v56 = vsel %vm81_vm0, %v2131_v29, %v2136_v47 }
  0x7e   :  { %v2616_v41 = vpop.permute.xlu1 %2153  ;;  %v2618_v42 = vpop.permute.xlu0 %2148  ;;  %v1922_v43 = vpack.c.bf16 %v82_v39, %v2440_v2  ;;  %v1924_v44 = vpack.c.bf16 %v211_v40, %v147_v38  ;;  %v1938_v63 = vpack.c.bf16 %v84_v56, %v2435_v1  ;;  %v2398_v2 = vmov 0  }
  0x7f   :  { %v2155_v45 = vunpack.i.l.bf16 %v2616_v41  ;;  %v2150_v46 = vunpack.i.l.bf16 %v2618_v42  ;;  %2377 = vset.pattern.permute.xlu0 %v2398_v2  ;;  %2378 = vset.pattern.permute.xlu1 %v2398_v2  ;;  %v2156_v15 = vunpack.i.h.bf16 %v2616_v41  ;;  %v2151_v18 = vunpack.i.h.bf16 %v2618_v42 }
  0x80   :  { %269 = vrot.lane.b32.xlu1 %v2579_v22, %s2392_s30  ;;  %1923 = vmatpush1.bf16.msra.mxu0 %v1922_v43 }
  0x81   :  { %205 = vrot.lane.b32.xlu0 %v2579_v22, %s2391_s25  ;;  %1925 = vmatprep.subr.bf16.mxu0 %v1924_v44  ;;  %v146_v48 = vsel %vm145_vm1, %v2150_v46, %v2140_v28  ;;  %v210_v49 = vsel %vm209_vm2, %v2155_v45, %v2145_v36  ;;  %v148_v36 = vsel %vm145_vm1, %v2141_v27, %v2151_v18 }
  0x82   :  { %v2629_v50 = vpop.permute.xlu1 %2163  ;;  %v2631_v51 = vpop.permute.xlu0 %2158  ;;  %v1926_v52 = vpack.c.bf16 %v210_v49, %v146_v48  ;;  %v212_v37 = vsel %vm209_vm2, %v2146_v35, %v2156_v15 }
  0x83   :  { %v2166_v53 = vunpack.i.h.bf16 %v2629_v50  ;;  %v2165_v54 = vunpack.i.l.bf16 %v2629_v50  ;;  %v2160_v55 = vunpack.i.l.bf16 %v2631_v51  ;;  %v1942_v41 = vpack.c.bf16 %v212_v37, %v148_v36  ;;  %v2775_v36 = vld [vmem:[%s3811_s1] sm:$0xff] }
  0x84   :  { %519 = vrot.lane.b32.xlu1 %v2538_v17, %s2397_s12  ;;  %1927 = vmatpush1.bf16.msra.mxu0 %v1926_v52 }
  0x85   :  { %333 = vrot.lane.b32.xlu0 %v2579_v22, %s2393_s5  ;;  %v85_v57 = vsel %vm81_vm0, %v2136_v47, %v2160_v55  ;;  %v275_v0 = vsel %vm273_vm3, %v2165_v54, %v2166_v53 }
  0x86   :  { %v2644_v58 = vpop.permute.xlu1 %2173  ;;  %v2646_v59 = vpop.permute.xlu0 %2168  ;;  %v1936_v60 = vpack.c.bf16 %v85_v57, %v2447_v4 }
  0x87   :  { %v2171_v61 = vunpack.i.h.bf16 %v2646_v59  ;;  %v2170_v62 = vunpack.i.l.bf16 %v2646_v59  ;;  %v2175_v3 = vunpack.i.l.bf16 %v2644_v58  ;;  %v2176_v57 = vunpack.i.h.bf16 %v2644_v58 }
  0x88   :  { %397 = vrot.lane.b32.xlu1 %v2579_v22, %s2394_s6  ;;  %1937 = vmatprep.subr.bf16.mxu1 %v1936_v60  ;;  %v2161_v58 = vunpack.i.h.bf16 %v2631_v51 }
  0x89   :  { %521 = vrot.lane.b32.xlu0 %v2553_v19, %s2397_s12  ;;  %1939 = vmatpush1.bf16.msra.mxu1 %v1938_v63  ;;  %v339_v1 = vsel %vm337_vm4, %v2170_v62, %v2171_v61  ;;  %v274_v24 = vsel %vm273_vm3, %v2175_v3, %v2165_v54  ;;  %v276_v59 = vsel %vm273_vm3, %v2166_v53, %v2176_v57 }
  0x8a   :  { %v2663_v4 = vpop.permute.xlu1 %2183  ;;  %v2665_v5 = vpop.permute.xlu0 %2178  ;;  %v1928_v8 = vpack.c.bf16 %v339_v1, %v275_v0  ;;  %v86_v53 = vsel %vm81_vm0, %v2160_v55, %v2161_v58 }
  0x8b   :  { %v2180_v11 = vunpack.i.l.bf16 %v2665_v5  ;;  %v2185_v21 = vunpack.i.l.bf16 %v2663_v4  ;;  %v2181_v49 = vunpack.i.h.bf16 %v2665_v5  ;;  %v1954_v55 = vpack.c.bf16 %v86_v53, %v2458_v6 }
  0x8c   :  { %143 = vrot.lane.b32.xlu1 %v2584_v23, %s2389_s23  ;;  %1929 = vmatprep.subr.bf16.mxu0 %v1928_v8 }
  0x8d   :  { %461 = vrot.lane.b32.xlu0 %v2579_v22, %s2395_s7  ;;  %v338_v26 = vsel %vm337_vm4, %v2180_v11, %v2170_v62  ;;  %v149_v38 = vsel %vm145_vm1, %v2151_v18, %v2185_v21  ;;  %v340_v3 = vsel %vm337_vm4, %v2171_v61, %v2181_v49  ;;  %v563_v61 = vld [vmem:[%s3810_s2] sm:$0xff] }
  0x8e   :  { %v2677_v28 = vpop.permute.xlu1 %2193  ;;  %v2679_v29 = vpop.permute.xlu0 %2188  ;;  %v1930_v30 = vpack.c.bf16 %v338_v26, %v274_v24  ;;  %v1946_v24 = vpack.c.bf16 %v340_v3, %v276_v59  ;;  %v564_v26 = vld [vmem:[%s3810_s2 + $0x8] sm:$0xff] }
  0x8f   :  { %v2196_v31 = vunpack.i.h.bf16 %v2677_v28  ;;  %v2195_v33 = vunpack.i.l.bf16 %v2677_v28  ;;  %v2190_v34 = vunpack.i.l.bf16 %v2679_v29 }
  0x90   :  { %271 = vrot.lane.b32.xlu1 %v2584_v23, %s2392_s30  ;;  %1931 = vmatpush1.bf16.msra.mxu0 %v1930_v30 }
  0x91   :  { %207 = vrot.lane.b32.xlu0 %v2584_v23, %s2391_s25  ;;  %v213_v39 = vsel %vm209_vm2, %v2156_v15, %v2190_v34  ;;  %v403_v42 = vsel %vm401_vm5, %v2195_v33, %v2196_v31 }
  0x92   :  { %v2700_v40 = vpop.permute.xlu1 %2203  ;;  %v2702_v25 = vpop.permute.xlu0 %2198  ;;  %v1940_v27 = vpack.c.bf16 %v213_v39, %v149_v38 }
  0x93   :  { %v2201_v32 = vunpack.i.h.bf16 %v2702_v25  ;;  %v2200_v35 = vunpack.i.l.bf16 %v2702_v25  ;;  %v2205_v43 = vunpack.i.l.bf16 %v2700_v40 }
  0x94   :  { %523 = vrot.lane.b32.xlu1 %v2558_v20, %s2397_s12  ;;  %1941 = vmatprep.subr.bf16.mxu1 %v1940_v27  ;;  %v2206_v27 = vunpack.i.h.bf16 %v2700_v40 }
  0x95   :  { %335 = vrot.lane.b32.xlu0 %v2584_v23, %s2393_s5  ;;  %1943 = vmatpush1.bf16.msra.mxu1 %v1942_v41  ;;  %v467_v44 = vsel %vm465_vm6, %v2200_v35, %v2201_v32  ;;  %v402_v54 = vsel %vm401_vm5, %v2205_v43, %v2195_v33  ;;  %v2191_v43 = vunpack.i.h.bf16 %v2679_v29 }
  0x96   :  { %v2717_v45 = vpop.permute.xlu1 %2213  ;;  %v2719_v46 = vpop.permute.xlu0 %2208  ;;  %v1932_v47 = vpack.c.bf16 %v467_v44, %v403_v42  ;;  %v2186_v42 = vunpack.i.h.bf16 %v2663_v4  ;;  %v404_v25 = vsel %vm401_vm5, %v2196_v31, %v2206_v27 }
  0x97   :  { %v2210_v48 = vunpack.i.l.bf16 %v2719_v46  ;;  %v2215_v52 = vunpack.i.l.bf16 %v2717_v45  ;;  %v2211_v51 = vunpack.i.h.bf16 %v2719_v46  ;;  %v2216_v3 = vunpack.i.h.bf16 %v2717_v45 }
  0x98   :  { %399 = vrot.lane.b32.xlu1 %v2584_v23, %s2394_s6  ;;  %1933 = vmatprep.subr.bf16.mxu0 %v1932_v47 }
  0x99   :  { %525 = vrot.lane.b32.xlu0 %v2579_v22, %s2397_s12  ;;  %v466_v56 = vsel %vm465_vm6, %v2210_v48, %v2200_v35  ;;  %v277_v1 = vsel %vm273_vm3, %v2176_v57, %v2215_v52  ;;  %v468_v40 = vsel %vm465_vm6, %v2201_v32, %v2211_v51  ;;  %v150_v57 = vsel %vm145_vm1, %v2185_v21, %v2186_v42 }
  0x9a   :  { %v2731_v60 = vpop.permute.xlu1 %2223  ;;  %v2733_v62 = vpop.permute.xlu0 %2218  ;;  %v1934_v63 = vpack.c.bf16 %v466_v56, %v402_v54  ;;  %v1950_v56 = vpack.c.bf16 %v468_v40, %v404_v25  ;;  %v278_v59 = vsel %vm273_vm3, %v2215_v52, %v2216_v3 }
  0x9b   :  { %v2220_v0 = vunpack.i.l.bf16 %v2733_v62  ;;  %v2225_v2 = vunpack.i.l.bf16 %v2731_v60  ;;  %v2226_v4 = vunpack.i.h.bf16 %v2731_v60 }
  0x9c   :  { %527 = vrot.lane.b32.xlu1 %v2584_v23, %s2397_s12  ;;  %1935 = vmatpush1.bf16.msra.mxu0 %v1934_v63  ;;  %v214_v63 = vsel %vm209_vm2, %v2190_v34, %v2191_v43 }
  0x9d   :  { %463 = vrot.lane.b32.xlu0 %v2584_v23, %s2395_s7  ;;  %v341_v5 = vsel %vm337_vm4, %v2181_v49, %v2220_v0  ;;  %v87_v50 = vsel %vm81_vm0, %v2161_v58, %v2225_v2  ;;  %v2221_v58 = vunpack.i.h.bf16 %v2733_v62  ;;  %v88_v45 = vsel %vm81_vm0, %v2225_v2, %v2226_v4 }
  0x9e   :  { %v2751_v8 = vpop.permute.xlu1 %501  ;;  %v500_v11 = vpop.permute.xlu0 %499  ;;  %v1944_v15 = vpack.c.bf16 %v341_v5, %v277_v1  ;;  %v1952_v38 = vpack.c.bf16 %v87_v50, %v2463_v7  ;;  %v2793_v7 = vld [vmem:[%s3811_s1 + $0x8] sm:$0xff]  ;;  %v1970_v2 = vpack.c.bf16 %v88_v45, %v2482_v9 }
  0x9f   :  { %v531_v18 = vsel %vm529_vm7, %v500_v11, %v2751_v8 }
  0xa0   :  { %598 = vmatprep.subr.mxu0 %v531_v18  ;;  %1945 = vmatprep.subr.bf16.mxu1 %v1944_v15  ;;  %v1958_v15 = vpack.c.bf16 %v214_v63, %v150_v57 }
  0xa1   :  { %1947 = vmatpush1.bf16.msra.mxu1 %v1946_v24  ;;  %567 = vperm.xlu0 %2377, %v563_v61   ;;  %v342_v61 = vsel %vm337_vm4, %v2220_v0, %v2221_v58 }
  0xa2   :  { %v2770_v30 = vpop.permute.xlu1 %2228  ;;  %v498_v33 = vpop.permute.xlu0 %497  ;;  %572 = vperm.xlu1 %2378, %v564_v26  }
  0xa3   :  { %v530_v37 = vsel %vm529_vm7, %v498_v33, %v500_v11  ;;  %v2230_v39 = vunpack.i.l.bf16 %v2770_v30  ;;  %v1962_v33 = vpack.c.bf16 %v342_v61, %v278_v59 }
  0xa4   :  { %599 = vmatpush1.msra.mxu0 %v530_v37 }
  0xa5   :  { %1953 = vmatprep.subr.bf16.mxu0 %v1952_v38  ;;  %1887 = vmatmul.mubr.msk.f32.vlgmr.msra.gmra.mrb[0].mxu0 %vm575_vm8, %v2775_v36  ;;  %v405_v46 = vsel %vm401_vm5, %v2206_v27, %v2230_v39 }
  0xa6   :  { %v2785_v35 = vpop.permute.xlu1 %2238  ;;  %v2787_v41 = vpop.permute.xlu0 %2233  ;;  %1955 = vmatpush1.bf16.msra.mxu0 %v1954_v55  ;;  %652 = vmatprep.mubr.f32.mxu0 %v2396_v12 }
  0xa7   :  { %v2235_v6 = vunpack.i.l.bf16 %v2787_v41  ;;  %v2240_v44 = vunpack.i.l.bf16 %v2785_v35  ;;  %v2241_v37 = vunpack.i.h.bf16 %v2785_v35  ;;  %v2236_v9 = vunpack.i.h.bf16 %v2787_v41 }
  0xa9   :  { %v469_v47 = vsel %vm465_vm6, %v2211_v51, %v2235_v6  ;;  %1888 = vmatmul.mubr.msk.f32.gmra.mrb[2].mxu0 %vm575_vm8, %v2793_v7  ;;  %v151_v31 = vsel %vm145_vm1, %v2186_v42, %v2240_v44  ;;  %v152_v35 = vsel %vm145_vm1, %v2240_v44, %v2241_v37 }
  0xaa   :  { %v2810_v48 = vpop.permute.xlu1 %2248  ;;  %v2244_v49 = vpop.permute.xlu0 %2243  ;;  %v1948_v54 = vpack.c.bf16 %v469_v47, %v405_v46  ;;  %800 = vmatprep.mubr.f32.mxu0 %v2396_v12 }
  0xab   :  { %v2245_v32 = vunpack.i.l.bf16 %v2244_v49  ;;  %v2250_v28 = vunpack.i.l.bf16 %v2810_v48  ;;  %v2246_v38 = vunpack.i.h.bf16 %v2244_v49 }
  0xac   :  { %1949 = vmatprep.subr.bf16.mxu1 %v1948_v54 }
  0xad   :  { %1951 = vmatpush1.bf16.msra.mxu1 %v1950_v56  ;;  %v215_v1 = vsel %vm209_vm2, %v2191_v43, %v2245_v32  ;;  %v89_v26 = vsel %vm81_vm0, %v2226_v4, %v2250_v28  ;;  %v216_v42 = vsel %vm209_vm2, %v2245_v32, %v2246_v38  ;;  %v470_v56 = vsel %vm465_vm6, %v2235_v6, %v2236_v9 }
  0xae   :  { %v2828_v5 = vpop.permute.xlu1 %2258  ;;  %v2830_v21 = vpop.permute.xlu0 %2253  ;;  %v1956_v29 = vpack.c.bf16 %v215_v1, %v151_v31  ;;  %v1968_v60 = vpack.c.bf16 %v89_v26, %v2487_v10  ;;  %v2231_v10 = vunpack.i.h.bf16 %v2770_v30  ;;  %v1974_v25 = vpack.c.bf16 %v216_v42, %v152_v35 }
  0xaf   :  { %v2260_v34 = vunpack.i.l.bf16 %v2828_v5  ;;  %v2255_v11 = vunpack.i.l.bf16 %v2830_v21  ;;  %v2261_v57 = vunpack.i.h.bf16 %v2828_v5  ;;  %v2256_v63 = vunpack.i.h.bf16 %v2830_v21 }
  0xb0   :  { %1957 = vmatprep.subr.bf16.mxu0 %v1956_v29  ;;  %v406_v32 = vsel %vm401_vm5, %v2230_v39, %v2231_v10 }
  0xb1   :  { %1959 = vmatpush1.bf16.msra.mxu0 %v1958_v15  ;;  %v279_v18 = vsel %vm273_vm3, %v2216_v3, %v2255_v11  ;;  %v343_v24 = vsel %vm337_vm4, %v2221_v58, %v2260_v34  ;;  %v1966_v6 = vpack.c.bf16 %v470_v56, %v406_v32  ;;  %v344_v4 = vsel %vm337_vm4, %v2260_v34, %v2261_v57 }
  0xb2   :  { %v2848_v50 = vpop.permute.xlu1 %505  ;;  %v504_v52 = vpop.permute.xlu0 %503  ;;  %v1960_v62 = vpack.c.bf16 %v343_v24, %v279_v18  ;;  %v280_v5 = vsel %vm273_vm3, %v2255_v11, %v2256_v63  ;;  %v2251_v15 = vunpack.i.h.bf16 %v2810_v48 }
  0xb3   :  { %v533_v0 = vsel %vm529_vm7, %v504_v52, %v2848_v50  ;;  %v532_v53 = vsel %vm529_vm7, %v2751_v8, %v504_v52  ;;  %v1978_v24 = vpack.c.bf16 %v344_v4, %v280_v5 }
  0xb4   :  { %675 = vmatprep.subr.mxu1 %v533_v0  ;;  %1961 = vmatprep.subr.bf16.mxu0 %v1960_v62  ;;  %v90_v26 = vsel %vm81_vm0, %v2250_v28, %v2251_v15 }
  0xb5   :  { %676 = vmatpush1.msra.mxu1 %v532_v53  ;;  %1963 = vmatpush1.bf16.msra.mxu0 %v1962_v33  ;;  %v1986_v48 = vpack.c.bf16 %v90_v26, %v2507_v13 }
  0xb6   :  { %v2857_v51 = vpop.permute.xlu1 %2268  ;;  %v2859_v55 = vpop.permute.xlu0 %2263  ;;  %1889 = vmatmul.mubr.msk.f32.vlgmr.msra.gmra.mrb[0].mxu1 %vm575_vm8, %v2775_v36  ;;  %1969 = vmatprep.subr.bf16.mxu1 %v1968_v60 }
  0xb7   :  { %v2270_v8 = vunpack.i.l.bf16 %v2857_v51  ;;  %v2265_v27 = vunpack.i.l.bf16 %v2859_v55  ;;  %1971 = vmatpush1.bf16.msra.mxu1 %v1970_v2  ;;  %729 = vmatprep.mubr.f32.mxu1 %v2396_v12 }
  0xb9   :  { %v153_v43 = vsel %vm145_vm1, %v2241_v37, %v2265_v27  ;;  %v217_v40 = vsel %vm209_vm2, %v2246_v38, %v2270_v8 }
  0xba   :  { %v2876_v46 = vpop.permute.xlu1 %2278  ;;  %v2274_v47 = vpop.permute.xlu0 %2273  ;;  %v1972_v49 = vpack.c.bf16 %v217_v40, %v153_v43  ;;  %1890 = vmatmul.mubr.msk.f32.gmra.mrb[2].mxu1 %vm575_vm8, %v2793_v7 }
  0xbb   :  { %v2280_v44 = vunpack.i.l.bf16 %v2876_v46  ;;  %v2275_v54 = vunpack.i.l.bf16 %v2274_v47  ;;  %877 = vmatprep.mubr.f32.mxu1 %v2396_v12  ;;  %v2281_v0 = vunpack.i.h.bf16 %v2876_v46  ;;  %v2276_v53 = vunpack.i.h.bf16 %v2274_v47 }
  0xbc   :  { %1973 = vmatprep.subr.bf16.mxu1 %v1972_v49 }
  0xbd   :  { %1975 = vmatpush1.bf16.msra.mxu1 %v1974_v25  ;;  %v407_v3 = vsel %vm401_vm5, %v2231_v10, %v2275_v54  ;;  %v471_v58 = vsel %vm465_vm6, %v2236_v9, %v2280_v44  ;;  %v472_v10 = vsel %vm465_vm6, %v2280_v44, %v2281_v0  ;;  %v408_v13 = vsel %vm401_vm5, %v2275_v54, %v2276_v53 }
  0xbe   :  { %v2892_v31 = vpop.permute.xlu1 %2288  ;;  %v2894_v1 = vpop.permute.xlu0 %2283  ;;  %v1964_v30 = vpack.c.bf16 %v471_v58, %v407_v3  ;;  %v1982_v49 = vpack.c.bf16 %v472_v10, %v408_v13 }
  0xbf   :  { %v2290_v39 = vunpack.i.l.bf16 %v2892_v31  ;;  %v2285_v41 = vunpack.i.l.bf16 %v2894_v1  ;;  %v2291_v25 = vunpack.i.h.bf16 %v2892_v31  ;;  %v2286_v32 = vunpack.i.h.bf16 %v2894_v1 }
  0xc0   :  { %1965 = vmatprep.subr.bf16.mxu0 %v1964_v30 }
  0xc1   :  { %1967 = vmatpush1.bf16.msra.mxu0 %v1966_v6  ;;  %v281_v21 = vsel %vm273_vm3, %v2256_v63, %v2285_v41  ;;  %v345_v29 = vsel %vm337_vm4, %v2261_v57, %v2290_v39  ;;  %v346_v6 = vsel %vm337_vm4, %v2290_v39, %v2291_v25  ;;  %v282_v4 = vsel %vm273_vm3, %v2285_v41, %v2286_v32 }
  0xc2   :  { %v508_v59 = vpop.permute.xlu1 %507  ;;  %v2907_v61 = vpop.permute.xlu0 %2293  ;;  %v1976_v18 = vpack.c.bf16 %v345_v29, %v281_v21 }
  0xc3   :  { %v2295_v34 = vunpack.i.l.bf16 %v2907_v61  ;;  %v534_v33 = vsel %vm529_vm7, %v2848_v50, %v508_v59  ;;  %v2266_v50 = vunpack.i.h.bf16 %v2859_v55 }
  0xc4   :  { %1977 = vmatprep.subr.bf16.mxu1 %v1976_v18 }
  0xc5   :  { %1979 = vmatpush1.bf16.msra.mxu1 %v1978_v24  ;;  %v91_v11 = vsel %vm81_vm0, %v2251_v15, %v2295_v34  ;;  %v154_v54 = vsel %vm145_vm1, %v2265_v27, %v2266_v50 }
  0xc6   :  { %v2914_v45 = vpop.permute.xlu1 %2298  ;;  %v510_v52 = vpop.permute.xlu0 %509  ;;  %v1984_v37 = vpack.c.bf16 %v91_v11, %v2512_v14  ;;  %v2271_v14 = vunpack.i.h.bf16 %v2857_v51  ;;  %v2296_v51 = vunpack.i.h.bf16 %v2907_v61  ;;  %v1994_v61 = vpack.c.bf16 %v346_v6, %v282_v4 }
  0xc7   :  { %v535_v62 = vsel %vm529_vm7, %v508_v59, %v510_v52  ;;  %v2300_v38 = vunpack.i.l.bf16 %v2914_v45 }
  0xc8   :  { %752 = vmatprep.subr.mxu0 %v535_v62  ;;  %v218_v44 = vsel %vm209_vm2, %v2270_v8, %v2271_v14  ;;  %v92_v15 = vsel %vm81_vm0, %v2295_v34, %v2296_v51 }
  0xc9   :  { %753 = vmatpush1.msra.mxu0 %v534_v33  ;;  %v409_v9 = vsel %vm401_vm5, %v2276_v53, %v2300_v38  ;;  %v1990_v30 = vpack.c.bf16 %v218_v44, %v154_v54  ;;  %v2002_v34 = vpack.c.bf16 %v92_v15, %v2533_v16 }
  0xca   :  { %v2923_v28 = vpop.permute.xlu1 %2308  ;;  %v2925_v60 = vpop.permute.xlu0 %2303  ;;  %1891 = vmatmul.mubr.msk.f32.vlgmr.msra.gmra.mrb[4].mxu0 %vm575_vm8, %v2775_v36  ;;  %1985 = vmatprep.subr.bf16.mxu0 %v1984_v37 }
  0xcb   :  { %v2305_v2 = vunpack.i.l.bf16 %v2925_v60  ;;  %1987 = vmatpush1.bf16.msra.mxu0 %v1986_v48  ;;  %806 = vmatprep.mubr.f32.mxu0 %v2396_v12  ;;  %v2310_v35 = vunpack.i.l.bf16 %v2923_v28  ;;  %v2311_v18 = vunpack.i.h.bf16 %v2923_v28  ;;  %v2306_v16 = vunpack.i.h.bf16 %v2925_v60 }
  0xcd   :  { %v473_v42 = vsel %vm465_vm6, %v2281_v0, %v2305_v2  ;;  %v155_v57 = vsel %vm145_vm1, %v2266_v50, %v2310_v35  ;;  %v156_v53 = vsel %vm145_vm1, %v2310_v35, %v2311_v18 }
  0xce   :  { %v2942_v43 = vpop.permute.xlu1 %2318  ;;  %v2314_v40 = vpop.permute.xlu0 %2313  ;;  %v1980_v46 = vpack.c.bf16 %v473_v42, %v409_v9  ;;  %1892 = vmatmul.mubr.msk.f32.gmra.mrb[6].mxu0 %vm575_vm8, %v2793_v7  ;;  %v474_v42 = vsel %vm465_vm6, %v2305_v2, %v2306_v16 }
  0xcf   :  { %v2315_v47 = vunpack.i.l.bf16 %v2314_v40  ;;  %954 = vmatprep.mubr.f32.mxu0 %v2396_v12  ;;  %v2320_v56 = vunpack.i.l.bf16 %v2942_v43  ;;  %v2316_v24 = vunpack.i.h.bf16 %v2314_v40 }
  0xd0   :  { %1981 = vmatprep.subr.bf16.mxu1 %v1980_v46 }
  0xd1   :  { %1983 = vmatpush1.bf16.msra.mxu1 %v1982_v49  ;;  %v219_v63 = vsel %vm209_vm2, %v2271_v14, %v2315_v47  ;;  %v93_v29 = vsel %vm81_vm0, %v2296_v51, %v2320_v56  ;;  %v220_v33 = vsel %vm209_vm2, %v2315_v47, %v2316_v24  ;;  %v2321_v51 = vunpack.i.h.bf16 %v2942_v43 }
  0xd2   :  { %v2959_v3 = vpop.permute.xlu1 %2328  ;;  %v2961_v8 = vpop.permute.xlu0 %2323  ;;  %v1988_v55 = vpack.c.bf16 %v219_v63, %v155_v57  ;;  %v2000_v11 = vpack.c.bf16 %v93_v29, %v2538_v17  ;;  %v2301_v17 = vunpack.i.h.bf16 %v2914_v45  ;;  %v2006_v35 = vpack.c.bf16 %v220_v33, %v156_v53 }
  0xd3   :  { %v2330_v27 = vunpack.i.l.bf16 %v2959_v3  ;;  %v2325_v58 = vunpack.i.l.bf16 %v2961_v8  ;;  %v2331_v40 = vunpack.i.h.bf16 %v2959_v3  ;;  %v2326_v46 = vunpack.i.h.bf16 %v2961_v8 }
  0xd4   :  { %1989 = vmatprep.subr.bf16.mxu0 %v1988_v55  ;;  %v410_v9 = vsel %vm401_vm5, %v2300_v38, %v2301_v17 }
  0xd5   :  { %1991 = vmatpush1.bf16.msra.mxu0 %v1990_v30  ;;  %v283_v5 = vsel %vm273_vm3, %v2286_v32, %v2325_v58  ;;  %v347_v21 = vsel %vm337_vm4, %v2291_v25, %v2330_v27  ;;  %v1998_v2 = vpack.c.bf16 %v474_v42, %v410_v9  ;;  %v348_v25 = vsel %vm337_vm4, %v2330_v27, %v2331_v40 }
  0xd6   :  { %v2977_v59 = vpop.permute.xlu1 %513  ;;  %v512_v31 = vpop.permute.xlu0 %511  ;;  %v1992_v39 = vpack.c.bf16 %v347_v21, %v283_v5  ;;  %v284_v32 = vsel %vm273_vm3, %v2325_v58, %v2326_v46  ;;  %v94_v58 = vsel %vm81_vm0, %v2320_v56, %v2321_v51 }
  0xd7   :  { %v537_v1 = vsel %vm529_vm7, %v512_v31, %v2977_v59  ;;  %v536_v41 = vsel %vm529_vm7, %v510_v52, %v512_v31  ;;  %v2010_v6 = vpack.c.bf16 %v348_v25, %v284_v32  ;;  %v2018_v43 = vpack.c.bf16 %v94_v58, %v2553_v19 }
  0xd8   :  { %829 = vmatprep.subr.mxu1 %v537_v1  ;;  %1993 = vmatprep.subr.bf16.mxu0 %v1992_v39 }
  0xd9   :  { %830 = vmatpush1.msra.mxu1 %v536_v41  ;;  %1995 = vmatpush1.bf16.msra.mxu0 %v1994_v61 }
  0xda   :  { %v2985_v26 = vpop.permute.xlu1 %2338  ;;  %v2987_v62 = vpop.permute.xlu0 %2333  ;;  %1893 = vmatmul.mubr.msk.f32.vlgmr.msra.gmra.mrb[4].mxu1 %vm575_vm8, %v2775_v36  ;;  %2001 = vmatprep.subr.bf16.mxu1 %v2000_v11 }
  0xdb   :  { %v2340_v52 = vunpack.i.l.bf16 %v2985_v26  ;;  %v2335_v0 = vunpack.i.l.bf16 %v2987_v62  ;;  %2003 = vmatpush1.bf16.msra.mxu1 %v2002_v34  ;;  %883 = vmatprep.mubr.f32.mxu1 %v2396_v12  ;;  %v2341_v56 = vunpack.i.h.bf16 %v2985_v26 }
  0xdd   :  { %v157_v37 = vsel %vm145_vm1, %v2311_v18, %v2335_v0  ;;  %v221_v48 = vsel %vm209_vm2, %v2316_v24, %v2340_v52  ;;  %v222_v24 = vsel %vm209_vm2, %v2340_v52, %v2341_v56 }
  0xde   :  { %v3004_v28 = vpop.permute.xlu1 %2348  ;;  %v3006_v14 = vpop.permute.xlu0 %2343  ;;  %v2004_v50 = vpack.c.bf16 %v221_v48, %v157_v37  ;;  %1894 = vmatmul.mubr.msk.f32.gmra.mrb[6].mxu1 %vm575_vm8, %v2793_v7 }
  0xdf   :  { %v2350_v10 = vunpack.i.l.bf16 %v3004_v28  ;;  %v2345_v13 = vunpack.i.l.bf16 %v3006_v14  ;;  %1031 = vmatprep.mubr.f32.mxu1 %v2396_v12  ;;  %v2351_v31 = vunpack.i.h.bf16 %v3004_v28  ;;  %v2346_v39 = vunpack.i.h.bf16 %v3006_v14 }
  0xe0   :  { %2005 = vmatprep.subr.bf16.mxu1 %v2004_v50 }
  0xe1   :  { %2007 = vmatpush1.bf16.msra.mxu1 %v2006_v35  ;;  %v411_v47 = vsel %vm401_vm5, %v2301_v17, %v2345_v13  ;;  %v475_v49 = vsel %vm465_vm6, %v2306_v16, %v2350_v10  ;;  %v476_v18 = vsel %vm465_vm6, %v2350_v10, %v2351_v31  ;;  %v412_v19 = vsel %vm401_vm5, %v2345_v13, %v2346_v39 }
  0xe2   :  { %v3023_v44 = vpop.permute.xlu1 %2358  ;;  %v3025_v54 = vpop.permute.xlu0 %2353  ;;  %v1996_v45 = vpack.c.bf16 %v475_v49, %v411_v47  ;;  %v2014_v52 = vpack.c.bf16 %v476_v18, %v412_v19 }
  0xe3   :  { %v2360_v38 = vunpack.i.l.bf16 %v3023_v44  ;;  %v2355_v60 = vunpack.i.l.bf16 %v3025_v54  ;;  %v2361_v16 = vunpack.i.h.bf16 %v3023_v44  ;;  %v2356_v33 = vunpack.i.h.bf16 %v3025_v54 }
  0xe4   :  { %1997 = vmatprep.subr.bf16.mxu0 %v1996_v45 }
  0xe5   :  { %1999 = vmatpush1.bf16.msra.mxu0 %v1998_v2  ;;  %v285_v57 = vsel %vm273_vm3, %v2326_v46, %v2355_v60  ;;  %v349_v63 = vsel %vm337_vm4, %v2331_v40, %v2360_v38  ;;  %v286_v10 = vsel %vm273_vm3, %v2355_v60, %v2356_v33 }
  0xe6   :  { %v516_v3 = vpop.permute.xlu1 %515  ;;  %v3034_v8 = vpop.permute.xlu0 %2363  ;;  %v2008_v55 = vpack.c.bf16 %v349_v63, %v285_v57 }
  0xe7   :  { %v2365_v30 = vunpack.i.l.bf16 %v3034_v8  ;;  %v538_v29 = vsel %vm529_vm7, %v2977_v59, %v516_v3  ;;  %v2336_v59 = vunpack.i.h.bf16 %v2987_v62  ;;  %v2366_v13 = vunpack.i.h.bf16 %v3034_v8 }
  0xe8   :  { %2009 = vmatprep.subr.bf16.mxu1 %v2008_v55 }
  0xe9   :  { %2011 = vmatpush1.bf16.msra.mxu1 %v2010_v6  ;;  %v95_v27 = vsel %vm81_vm0, %v2321_v51, %v2365_v30  ;;  %v158_v53 = vsel %vm145_vm1, %v2335_v0, %v2336_v59  ;;  %v350_v0 = vsel %vm337_vm4, %v2360_v38, %v2361_v16  ;;  %v96_v49 = vsel %vm81_vm0, %v2365_v30, %v2366_v13 }
  0xea   :  { %v3041_v4 = vpop.permute.xlu1 %2368  ;;  %v518_v5 = vpop.permute.xlu0 %517  ;;  %v2016_v15 = vpack.c.bf16 %v95_v27, %v2558_v20  ;;  %v2022_v50 = vpack.c.bf16 %v222_v24, %v158_v53  ;;  %v2026_v46 = vpack.c.bf16 %v350_v0, %v286_v10  ;;  %v2032_v60 = vpack.c.bf16 %v2366_v13, %v2584_v23 }
  0xeb   :  { %v539_v21 = vsel %vm529_vm7, %v516_v3, %v518_v5  ;;  %v2370_v1 = vunpack.i.l.bf16 %v3041_v4  ;;  %v2371_v44 = vunpack.i.h.bf16 %v3041_v4  ;;  %v2034_v25 = vpack.c.bf16 %v96_v49, %v2579_v22 }
  0xec   :  { %906 = vmatprep.subr.mxu0 %v539_v21 }
  0xed   :  { %907 = vmatpush1.msra.mxu0 %v538_v29  ;;  %v413_v34 = vsel %vm401_vm5, %v2346_v39, %v2370_v1  ;;  %v414_v57 = vsel %vm401_vm5, %v2370_v1, %v2371_v44 }
  0xee   :  { %v3052_v41 = vpop.permute.xlu1 %141  ;;  %1895 = vmatmul.mubr.msk.f32.vlgmr.msra.gmra.mrb[8].mxu0 %vm575_vm8, %v2775_v36  ;;  %2017 = vmatprep.subr.bf16.mxu0 %v2016_v15 }
  0xef   :  { %v2374_v20 = vpop.permute.xlu0 %2373  ;;  %2019 = vmatpush1.bf16.msra.mxu0 %v2018_v43  ;;  %960 = vmatprep.mubr.f32.mxu0 %v2396_v12  ;;  %v159_v48 = vsel %vm145_vm1, %v2336_v59, %v3052_v41 }
  0xf0   :  { %v2375_v61 = vunpack.i.l.bf16 %v2374_v20  ;;  %v2376_v54 = vunpack.i.h.bf16 %v2374_v20 }
  0xf2   :  { %v3063_v11 = vpop.permute.xlu1 %269  ;;  %1896 = vmatmul.mubr.msk.f32.gmra.mrb[10].mxu0 %vm575_vm8, %v2793_v7  ;;  %v477_v17 = vsel %vm465_vm6, %v2351_v31, %v2375_v61  ;;  %v478_v63 = vsel %vm465_vm6, %v2375_v61, %v2376_v54 }
  0xf3   :  { %v206_v26 = vpop.permute.xlu0 %205  ;;  %v2012_v37 = vpack.c.bf16 %v477_v17, %v413_v34  ;;  %1108 = vmatprep.mubr.f32.mxu0 %v2396_v12  ;;  %v287_v9 = vsel %vm273_vm3, %v2356_v33, %v3063_v11  ;;  %v2030_v22 = vpack.c.bf16 %v478_v63, %v414_v57 }
  0xf4   :  { %v223_v28 = vsel %vm209_vm2, %v2341_v56, %v206_v26 }
  0xf5   :  { %v2020_v14 = vpack.c.bf16 %v223_v28, %v159_v48  ;;  %2013 = vmatprep.subr.bf16.mxu1 %v2012_v37 }
  0xf6   :  { %2015 = vmatpush1.bf16.msra.mxu1 %v2014_v52  ;;  %v520_v62 = vpop.permute.xlu1 %519 }
  0xf7   :  { %v334_v35 = vpop.permute.xlu0 %333  ;;  %2021 = vmatprep.subr.bf16.mxu0 %v2020_v14  ;;  %v540_v2 = vsel %vm529_vm7, %v518_v5, %v520_v62 }
  0xf8   :  { %v351_v42 = vsel %vm337_vm4, %v2361_v16, %v334_v35  ;;  %2023 = vmatpush1.bf16.msra.mxu0 %v2022_v50 }
  0xf9   :  { %v2024_v40 = vpack.c.bf16 %v351_v42, %v287_v9 }
  0xfa   :  { %v398_v47 = vpop.permute.xlu1 %397 }
  0xfb   :  { %v522_v45 = vpop.permute.xlu0 %521  ;;  %2025 = vmatprep.subr.bf16.mxu0 %v2024_v40  ;;  %v415_v3 = vsel %vm401_vm5, %v2371_v44, %v398_v47 }
  0xfc   :  { %2027 = vmatpush1.bf16.msra.mxu0 %v2026_v46  ;;  %v541_v38 = vsel %vm529_vm7, %v520_v62, %v522_v45 }
  0xfd   :  { %983 = vmatprep.subr.mxu1 %v541_v38 }
  0xfe   :  { %984 = vmatpush1.msra.mxu1 %v540_v2  ;;  %v144_v32 = vpop.permute.xlu1 %143 }
  0xff   :  { %v462_v51 = vpop.permute.xlu0 %461  ;;  %1897 = vmatmul.mubr.msk.f32.vlgmr.msra.gmra.mrb[8].mxu1 %vm575_vm8, %v2775_v36  ;;  %2033 = vmatprep.subr.bf16.mxu1 %v2032_v60  ;;  %v160_v6 = vsel %vm145_vm1, %v3052_v41, %v144_v32 }
 0x100   :  { %v479_v23 = vsel %vm465_vm6, %v2376_v54, %v462_v51  ;;  %2035 = vmatpush1.bf16.msra.mxu1 %v2034_v25  ;;  %1037 = vmatprep.mubr.f32.mxu1 %v2396_v12 }
 0x101   :  { %v2028_v8 = vpack.c.bf16 %v479_v23, %v415_v3 }
 0x102   :  { %v272_v55 = vpop.permute.xlu1 %271 }
 0x103   :  { %v208_v30 = vpop.permute.xlu0 %207  ;;  %1898 = vmatmul.mubr.msk.f32.gmra.mrb[10].mxu1 %vm575_vm8, %v2793_v7  ;;  %2029 = vmatprep.subr.bf16.mxu0 %v2028_v8  ;;  %v288_v29 = vsel %vm273_vm3, %v3063_v11, %v272_v55 }
 0x104   :  { %v224_v27 = vsel %vm209_vm2, %v206_v26, %v208_v30  ;;  %v2036_v58 = vpack.c.bf16 %v208_v30, %v144_v32  ;;  %2031 = vmatpush1.bf16.msra.mxu0 %v2030_v22  ;;  %1185 = vmatprep.mubr.f32.mxu1 %v2396_v12 }
 0x105   :  { %v2038_v4 = vpack.c.bf16 %v224_v27, %v160_v6 }
 0x106   :  { %2037 = vmatprep.subr.bf16.mxu1 %v2036_v58  ;;  %v524_v5 = vpop.permute.xlu1 %523 }
 0x107   :  { %v336_v21 = vpop.permute.xlu0 %335  ;;  %2039 = vmatpush1.bf16.msra.mxu1 %v2038_v4  ;;  %v542_v1 = vsel %vm529_vm7, %v522_v45, %v524_v5 }
 0x108   :  { %v352_v15 = vsel %vm337_vm4, %v334_v35, %v336_v21  ;;  %v2040_v31 = vpack.c.bf16 %v336_v21, %v272_v55 }
 0x109   :  { %v2042_v39 = vpack.c.bf16 %v352_v15, %v288_v29 }
 0x10a   :  { %2041 = vmatprep.subr.bf16.mxu1 %v2040_v31  ;;  %v400_v41 = vpop.permute.xlu1 %399 }
 0x10b   :  { %v526_v43 = vpop.permute.xlu0 %525  ;;  %2043 = vmatpush1.bf16.msra.mxu1 %v2042_v39  ;;  %v416_v20 = vsel %vm401_vm5, %v398_v47, %v400_v41 }
 0x10c   :  { %v543_v56 = vsel %vm529_vm7, %v524_v5, %v526_v43 }
 0x10d   :  { %1060 = vmatprep.subr.mxu0 %v543_v56 }
 0x10e   :  { %1061 = vmatpush1.msra.mxu0 %v542_v1  ;;  %v528_v24 = vpop.permute.xlu1 %527 }
 0x10f   :  { %v464_v59 = vpop.permute.xlu0 %463  ;;  %1899 = vmatmul.mubr.msk.f32.vlgmr.msra.gmra.mrb[12].mxu0 %vm575_vm8, %v2775_v36  ;;  %v544_v11 = vsel %vm529_vm7, %v526_v43, %v528_v24 }
 0x110   :  { %v480_v61 = vsel %vm465_vm6, %v462_v51, %v464_v59  ;;  %v2044_v18 = vpack.c.bf16 %v464_v59, %v400_v41  ;;  %1114 = vmatprep.mubr.f32.mxu0 %v2396_v12 }
 0x111   :  { %v2046_v19 = vpack.c.bf16 %v480_v61, %v416_v20  ;;  %v1610_v20 = vld [vmem:[%s3812_s3] sm:$0xff]  ;;  %v1611_v61 = vld [vmem:[%s3812_s3 + $0x8] sm:$0xff] }
 0x112   :  { %2045 = vmatprep.subr.bf16.mxu1 %v2044_v18 }
 0x113   :  { %1900 = vmatmul.mubr.msk.f32.gmra.mrb[14].mxu0 %vm575_vm8, %v2793_v7  ;;  %2047 = vmatpush1.bf16.msra.mxu1 %v2046_v19  ;;  %v2049_v19 = vpack.c.bf16 %v1611_v61, %v1610_v20 }
 0x114   :  { %1137 = vmatprep.subr.mxu1 %v528_v24 }
 0x117   :  { %1138 = vmatpush1.msra.mxu1 %v544_v11  ;;  %v2399_v11 = vmov 0.0|0.0  }
 0x118   :  { %1901 = vmatmul.mubr.msk.f32.vlgmr.msra.gmra.mrb[12].mxu1 %vm575_vm8, %v2775_v36  ;;  %2048 = vmatprep.subr.bf16.mxu0 %v2399_v11 }
 0x119   :  { %1191 = vmatprep.mubr.f32.mxu1 %v2396_v12  ;;  %2088 = vmatprep.subr.bf16.mxu1 %v2399_v11 }
 0x11a   :  { %2050 = vmatpush1.bf16.msra.mxu0 %v2049_v19  ;;  %2101 = vmatpush1.bf16.msra.mxu1 %v2049_v19  ;;  %v1618_v19 = vld [vmem:[%s3812_s3 + $0x40] sm:$0xff] }
 0x11b   :  { %2051 = vmatprep.subr.bf16.mxu0 %v2399_v11  ;;  %2089 = vmatprep.subr.bf16.mxu1 %v2399_v11 }
 0x11c   :  { %1902 = vmatmul.mubr.msk.f32.gmra.mrb[14].mxu1 %vm575_vm8, %v2793_v7 }
 0x120   :  { %v3121_v34 = vpop.permute.xlu0 %567 }
 0x121   :  { %v3130_v36 = vpop.permute.xlu1 %572 }
 0x178   :  { %v648_v17 = vpop.f32.mrb[0].mxu0 }
 0x179   :  { %v650_v53 = vpop.f32.mrb[1].mxu0  ;;  %v3133_v12 = vadd.f32 %v648_v17, %v3121_v34 }
 0x17a   :  { %v3124_v16 = vadd.f32 %v650_v53, %v3121_v34 }
 0x17b   :  { %v1198_v62 = vmax.f32 %v3133_v12, 0.0 }
 0x17c   :  { %v1199_v33 = vmax.f32 %v3124_v16, 0.0  ;;  %v654_v26 = vpop.f32.mrb[2].mxu0  ;;  %v1635_v16 = vld [vmem:[%s3812_s3 + $0xc8] sm:$0x1f] }
 0x17d   :  { %v656_v37 = vpop.f32.mrb[3].mxu0  ;;  %v3136_v7 = vadd.f32 %v654_v26, %v3130_v36 }
 0x17e   :  { %1264 = vrot.lane.b32.xlu1 %v1199_v33, %s2390_s24  ;;  %v3162_v40 = vadd.f32 %v656_v37, %v3130_v36  ;;  %v1612_v37 = vld [vmem:[%s3812_s3 + $0x10] sm:$0xff] }
 0x17f   :  { %v1214_v50 = vmax.f32 %v3136_v7, 0.0 }
 0x180   :  { %v1215_v47 = vmax.f32 %v3162_v40, 0.0 }
 0x181   :  { %v2379_v42 = vpack.i.bf16 %v1214_v50, %v1198_v62 }
 0x189   :  { %v725_v52 = vpop.f32.mrb[0].mxu1 }
 0x18a   :  { %v3139_v48 = vadd.f32 %v725_v52, %v3121_v34  ;;  %v727_v28 = vpop.f32.mrb[1].mxu1  ;;  %v1613_v52 = vld [vmem:[%s3812_s3 + $0x18] sm:$0xff] }
 0x18b   :  { %v3142_v14 = vadd.f32 %v727_v28, %v3121_v34 }
 0x18c   :  { %v1200_v0 = vmax.f32 %v3139_v48, 0.0 }
 0x18d   :  { %v1201_v10 = vmax.f32 %v3142_v14, 0.0  ;;  %v731_v13 = vpop.f32.mrb[2].mxu1 }
 0x18e   :  { %1266 = vrot.lane.b32.xlu0 %v1200_v0, %s2390_s24  ;;  %v3152_v35 = vadd.f32 %v731_v13, %v3130_v36  ;;  %v733_v9 = vpop.f32.mrb[3].mxu1 }
 0x18f   :  { %1268 = vrot.lane.b32.xlu1 %v1201_v10, %s2390_s24  ;;  %v3171_v49 = vadd.f32 %v733_v9, %v3130_v36  ;;  %v2052_v9 = vpack.c.bf16 %v1613_v52, %v1612_v37 }
 0x190   :  { %v1216_v46 = vmax.f32 %v3152_v35, 0.0 }
 0x191   :  { %v1217_v44 = vmax.f32 %v3171_v49, 0.0  ;;  %2053 = vmatpush1.bf16.msra.mxu0 %v2052_v9  ;;  %2102 = vmatpush1.bf16.msra.mxu1 %v2052_v9 }
 0x192   :  { %1298 = vrot.lane.b32.xlu0 %v1216_v46, %s2390_s24  ;;  %2054 = vmatprep.subr.bf16.mxu0 %v2399_v11 }
 0x193   :  { %2380 = vrot.lane.b32.xlu1 %v2379_v42, %s2390_s24  ;;  %2090 = vmatprep.subr.bf16.mxu1 %v2399_v11 }
 0x197   :  { %1296 = vrot.lane.b32.xlu1 %v1215_v47, %s2390_s24 }
 0x19b   :  { %1300 = vrot.lane.b32.xlu1 %v1217_v44, %s2390_s24 }
 0x19d   :  { %v802_v54 = vpop.f32.mrb[4].mxu0 }
 0x19e   :  { %v3181_v45 = vadd.f32 %v802_v54, %v3121_v34  ;;  %v804_v38 = vpop.f32.mrb[5].mxu0 }
 0x19f   :  { %v3184_v60 = vadd.f32 %v804_v38, %v3121_v34 }
 0x1a0   :  { %v1202_v2 = vmax.f32 %v3181_v45, 0.0 }
 0x1a1   :  { %v1203_v25 = vmax.f32 %v3184_v60, 0.0  ;;  %v808_v32 = vpop.f32.mrb[6].mxu0 }
 0x1a2   :  { %1270 = vrot.lane.b32.xlu0 %v1202_v2, %s2390_s24  ;;  %v810_v57 = vpop.f32.mrb[7].mxu0  ;;  %v3198_v23 = vadd.f32 %v808_v32, %v3130_v36 }
 0x1a3   :  { %1272 = vrot.lane.b32.xlu1 %v1203_v25, %s2390_s24  ;;  %v3204_v22 = vadd.f32 %v810_v57, %v3130_v36  ;;  %v1614_v57 = vld [vmem:[%s3812_s3 + $0x20] sm:$0xff] }
 0x1a4   :  { %v1218_v27 = vmax.f32 %v3198_v23, 0.0 }
 0x1a5   :  { %v3815_v4 = vmax.f32 %v3204_v22, 0.0 }
 0x1ad   :  { %v879_v63 = vpop.f32.mrb[4].mxu1 }
 0x1ae   :  { %v3195_v51 = vadd.f32 %v879_v63, %v3121_v34  ;;  %v881_v3 = vpop.f32.mrb[5].mxu1  ;;  %v1615_v63 = vld [vmem:[%s3812_s3 + $0x28] sm:$0xff] }
 0x1af   :  { %v3201_v8 = vadd.f32 %v881_v3, %v3121_v34  ;;  %v2055_v3 = vpack.c.bf16 %v1615_v63, %v1614_v57 }
 0x1b0   :  { %v1204_v55 = vmax.f32 %v3195_v51, 0.0 }
 0x1b1   :  { %v3814_v30 = vmax.f32 %v3201_v8, 0.0  ;;  %v3208_v6 = vpop.f32.mrb[6].mxu1  ;;  %2056 = vmatpush1.bf16.msra.mxu0 %v2055_v3  ;;  %2103 = vmatpush1.bf16.msra.mxu1 %v2055_v3  ;;  %v1620_v3 = vld [vmem:[%s3812_s3 + $0x50] sm:$0xff] }
 0x1b2   :  { %1274 = vrot.lane.b32.xlu0 %v1204_v55, %s2390_s24  ;;  %v3214_v58 = vpop.f32.mrb[7].mxu1  ;;  %2057 = vmatprep.subr.bf16.mxu0 %v2399_v11 }
 0x1b3   :  { %1276 = vrot.lane.b32.xlu1 %v3814_v30, %s2390_s24  ;;  %2091 = vmatprep.subr.bf16.mxu1 %v2399_v11 }
 0x1b6   :  { %1302 = vrot.lane.b32.xlu0 %v1218_v27, %s2390_s24 }
 0x1b7   :  { %1304 = vrot.lane.b32.xlu1 %v3815_v4, %s2390_s24 }
 0x1c1   :  { %v956_v5 = vpop.f32.mrb[8].mxu0 }
 0x1c2   :  { %v3227_v21 = vadd.f32 %v956_v5, %v3121_v34  ;;  %v958_v29 = vpop.f32.mrb[9].mxu0 }
 0x1c3   :  { %v3231_v31 = vadd.f32 %v958_v29, %v3121_v34 }
 0x1c4   :  { %v1206_v15 = vmax.f32 %v3227_v21, 0.0 }
 0x1c5   :  { %v962_v39 = vpop.f32.mrb[10].mxu0  ;;  %v1207_v56 = vmax.f32 %v3231_v31, 0.0 }
 0x1c6   :  { %v964_v43 = vpop.f32.mrb[11].mxu0  ;;  %1278 = vrot.lane.b32.xlu0 %v1206_v15, %s2390_s24  ;;  %v3277_v42 = vadd.f32 %v962_v39, %v3130_v36  ;;  %v1616_v39 = vld [vmem:[%s3812_s3 + $0x30] sm:$0xff] }
 0x1c7   :  { %v3256_v17 = vadd.f32 %v964_v43, %v3130_v36  ;;  %v1617_v43 = vld [vmem:[%s3812_s3 + $0x38] sm:$0xff] }
 0x1c8   :  { %v1222_v5 = vmax.f32 %v3277_v42, 0.0 }
 0x1c9   :  { %v1223_v38 = vmax.f32 %v3256_v17, 0.0 }
 0x1ca   :  { %1280 = vrot.lane.b32.xlu0 %v1207_v56, %s2390_s24 }
 0x1d2   :  { %v1033_v1 = vpop.f32.mrb[8].mxu1 }
 0x1d3   :  { %v3241_v41 = vadd.f32 %v1033_v1, %v3121_v34  ;;  %v1035_v59 = vpop.f32.mrb[9].mxu1  ;;  %v2058_v1 = vpack.c.bf16 %v1617_v43, %v1616_v39  ;;  %v1621_v39 = vld [vmem:[%s3812_s3 + $0x58] sm:$0xff] }
 0x1d4   :  { %v3250_v18 = vadd.f32 %v1035_v59, %v3121_v34  ;;  %v2064_v43 = vpack.c.bf16 %v1621_v39, %v1620_v3 }
 0x1d5   :  { %v1208_v24 = vmax.f32 %v3241_v41, 0.0  ;;  %2059 = vmatpush1.bf16.msra.mxu0 %v2058_v1  ;;  %2104 = vmatpush1.bf16.msra.mxu1 %v2058_v1 }
 0x1d6   :  { %v1209_v53 = vmax.f32 %v3250_v18, 0.0  ;;  %v1039_v26 = vpop.f32.mrb[10].mxu1  ;;  %2060 = vmatprep.subr.bf16.mxu0 %v2399_v11  ;;  %2092 = vmatprep.subr.bf16.mxu1 %v2399_v11 }
 0x1d7   :  { %v3266_v28 = vadd.f32 %v1039_v26, %v3130_v36  ;;  %v1041_v13 = vpop.f32.mrb[11].mxu1  ;;  %1282 = vrot.lane.b32.xlu1 %v1208_v24, %s2390_s24  ;;  %v1619_v26 = vld [vmem:[%s3812_s3 + $0x48] sm:$0xff] }
 0x1d8   :  { %1284 = vrot.lane.b32.xlu0 %v1209_v53, %s2390_s24  ;;  %v3282_v32 = vadd.f32 %v1041_v13, %v3130_v36  ;;  %v2061_v52 = vpack.c.bf16 %v1619_v26, %v1618_v19 }
 0x1d9   :  { %v1224_v54 = vmax.f32 %v3266_v28, 0.0 }
 0x1da   :  { %v3816_v29 = vmax.f32 %v3282_v32, 0.0  ;;  %2062 = vmatpush1.bf16.msra.mxu0 %v2061_v52  ;;  %2105 = vmatpush1.bf16.msra.mxu1 %v2061_v52 }
 0x1db   :  { %1314 = vrot.lane.b32.xlu1 %v1224_v54, %s2390_s24  ;;  %2063 = vmatprep.subr.bf16.mxu0 %v2399_v11 }
 0x1dc   :  { %1312 = vrot.lane.b32.xlu0 %v1223_v38, %s2390_s24  ;;  %2093 = vmatprep.subr.bf16.mxu1 %v2399_v11 }
 0x1de   :  { %2065 = vmatpush1.bf16.msra.mxu0 %v2064_v43  ;;  %2106 = vmatpush1.bf16.msra.mxu1 %v2064_v43 }
 0x1df   :  { %1310 = vrot.lane.b32.xlu1 %v1222_v5, %s2390_s24  ;;  %2066 = vmatprep.subr.bf16.mxu0 %v2399_v11 }
 0x1e0   :  { %1316 = vrot.lane.b32.xlu0 %v3816_v29, %s2390_s24  ;;  %2094 = vmatprep.subr.bf16.mxu1 %v2399_v11 }
 0x1e2   :  { %v1110_v59 = vpop.f32.mrb[12].mxu0 }
 0x1e3   :  { %v3315_v20 = vadd.f32 %v1110_v59, %v3121_v34  ;;  %v1112_v61 = vpop.f32.mrb[13].mxu0  ;;  %v1622_v59 = vld [vmem:[%s3812_s3 + $0x60] sm:$0xff] }
 0x1e4   :  { %v3326_v37 = vadd.f32 %v1112_v61, %v3121_v34  ;;  %v1623_v61 = vld [vmem:[%s3812_s3 + $0x68] sm:$0xff] }
 0x1e5   :  { %v1210_v13 = vmax.f32 %v3315_v20, 0.0  ;;  %v2067_v52 = vpack.c.bf16 %v1623_v61, %v1622_v59  ;;  %v3382_v59 = vadd.f32 %v3208_v6, %v3130_v36  ;;  %v1627_v6 = vld [vmem:[%s3812_s3 + $0x88] sm:$0xff] }
 0x1e6   :  { %v3823_v9 = vmax.f32 %v3326_v37, 0.0  ;;  %v1116_v57 = vpop.f32.mrb[14].mxu0  ;;  %v3825_v18 = vmax.f32 %v3326_v37, 0.0  ;;  %v3827_v37 = vmax.f32 %v3282_v32, 0.0  ;;  %v3829_v32 = vmax.f32 %v3204_v22, 0.0 }
 0x1e7   :  { %v1118_v63 = vpop.f32.mrb[15].mxu0  ;;  %1286 = vrot.lane.b32.xlu0 %v1210_v13, %s2390_s24  ;;  %v3359_v39 = vadd.f32 %v1116_v57, %v3130_v36  ;;  %2068 = vmatpush1.bf16.msra.mxu0 %v2067_v52  ;;  %v1625_v57 = vld [vmem:[%s3812_s3 + $0x78] sm:$0xff] }
 0x1e8   :  { %1288 = vrot.lane.b32.xlu1 %v3823_v9, %s2390_s24  ;;  %2107 = vmatpush1.bf16.msra.mxu1 %v2067_v52  ;;  %v3363_v30 = vadd.f32 %v1118_v63, %v3130_v36 }
 0x1e9   :  { %2069 = vmatprep.subr.bf16.mxu0 %v2399_v11  ;;  %2095 = vmatprep.subr.bf16.mxu1 %v2399_v11  ;;  %v3822_v61 = vmax.f32 %v3359_v39, 0.0 }
 0x1ea   :  { %v3819_v52 = vmax.f32 %v3363_v30, 0.0  ;;  %v3831_v22 = vmax.f32 %v3363_v30, 0.0  ;;  %v3833_v30 = vmax.f32 %v3201_v8, 0.0 }
 0x1eb   :  { %v1187_v1 = vpop.f32.mrb[12].mxu1 }
 0x1ec   :  { %v3353_v19 = vadd.f32 %v1187_v1, %v3121_v34  ;;  %v1189_v26 = vpop.f32.mrb[13].mxu1 }
 0x1ed   :  { %v3356_v3 = vadd.f32 %v1189_v26, %v3121_v34  ;;  %v1624_v34 = vld [vmem:[%s3812_s3 + $0x70] sm:$0xff]  ;;  %v3387_v26 = vadd.f32 %v3214_v58, %v3130_v36 }
 0x1ee   :  { %v3818_v43 = vmax.f32 %v3353_v19, 0.0  ;;  %v2070_v63 = vpack.c.bf16 %v1625_v57, %v1624_v34  ;;  %v1626_v34 = vld [vmem:[%s3812_s3 + $0x80] sm:$0xff]  ;;  %v3821_v57 = vmax.f32 %v3382_v59, 0.0  ;;  %v3826_v20 = vmax.f32 %v3353_v19, 0.0 }
 0x1ef   :  { %v3817_v4 = vmax.f32 %v3356_v3, 0.0  ;;  %v1193_v29 = vpop.f32.mrb[14].mxu1  ;;  %v2073_v58 = vpack.c.bf16 %v1627_v6, %v1626_v34  ;;  %v1628_v34 = vld [vmem:[%s3812_s3 + $0x90] sm:$0xff]  ;;  %v1629_v6 = vld [vmem:[%s3812_s3 + $0x98] sm:$0xff]  ;;  %v3828_v19 = vmax.f32 %v3359_v39, 0.0  ;;  %v3830_v39 = vmax.f32 %v3382_v59, 0.0 }
 0x1f0   :  { %v1195_v1 = vpop.f32.mrb[15].mxu1  ;;  %1290 = vrot.lane.b32.xlu0 %v3818_v43, %s2390_s24  ;;  %2071 = vmatpush1.bf16.msra.mxu0 %v2070_v63 }
 0x1f1   :  { %1292 = vrot.lane.b32.xlu1 %v3817_v4, %s2390_s24  ;;  %2108 = vmatpush1.bf16.msra.mxu1 %v2070_v63  ;;  %v3406_v63 = vadd.f32 %v1193_v29, %v3130_v36  ;;  %v3820_v4 = vmax.f32 %v3387_v26, 0.0  ;;  %v3410_v43 = vadd.f32 %v1195_v1, %v3130_v36  ;;  %v2076_v29 = vpack.c.bf16 %v1629_v6, %v1628_v34  ;;  %v1631_v34 = vld [vmem:[%s3812_s3 + $0xa8] sm:$0xff]  ;;  %v1632_v6 = vld [vmem:[%s3812_s3 + $0xb0] sm:$0xff] }
 0x1f2   :  { %2072 = vmatprep.subr.bf16.mxu0 %v2399_v11  ;;  %2096 = vmatprep.subr.bf16.mxu1 %v2399_v11 }
 0x1f3   :  { %v3824_v36 = vmax.f32 %v3406_v63, 0.0  ;;  %v1229_v1 = vmax.f32 %v3410_v43, 0.0 }
 0x1f4   :  { %1318 = vrot.lane.b32.xlu0 %v3822_v61, %s2390_s24  ;;  %2074 = vmatpush1.bf16.msra.mxu0 %v2073_v58 }
 0x1f5   :  { %1320 = vrot.lane.b32.xlu1 %v3819_v52, %s2390_s24  ;;  %2109 = vmatpush1.bf16.msra.mxu1 %v2073_v58  ;;  %v1265_v58 = vpop.permute.xlu1 %1264  ;;  %v1630_v52 = vld [vmem:[%s3812_s3 + $0xa0] sm:$0xff] }
 0x1f6   :  { %2075 = vmatprep.subr.bf16.mxu0 %v2399_v11  ;;  %2097 = vmatprep.subr.bf16.mxu1 %v2399_v11 }
 0x1f8   :  { %1306 = vrot.lane.b32.xlu0 %v3821_v57, %s2390_s24  ;;  %2077 = vmatpush1.bf16.msra.mxu0 %v2076_v29 }
 0x1f9   :  { %1308 = vrot.lane.b32.xlu1 %v3820_v4, %s2390_s24  ;;  %2110 = vmatpush1.bf16.msra.mxu1 %v2076_v29  ;;  %v2079_v29 = vpack.c.bf16 %v1631_v34, %v1630_v52  ;;  %v1633_v4 = vld [vmem:[%s3812_s3 + $0xb8] sm:$0xff] }
 0x1fa   :  { %2078 = vmatprep.subr.bf16.mxu0 %v2399_v11  ;;  %2098 = vmatprep.subr.bf16.mxu1 %v2399_v11  ;;  %v2082_v57 = vpack.c.bf16 %v1633_v4, %v1632_v6  ;;  %v1634_v6 = vld [vmem:[%s3812_s3 + $0xc0] sm:$0xff]  ;;  %s2401_s3 = smov 64  }
 0x1fc   :  { %1322 = vrot.lane.b32.xlu0 %v3824_v36, %s2390_s24  ;;  %2080 = vmatpush1.bf16.msra.mxu0 %v2079_v29 }
 0x1fd   :  { %1324 = vrot.lane.b32.xlu1 %v1229_v1, %s2390_s24  ;;  %2111 = vmatpush1.bf16.msra.mxu1 %v2079_v29 }
 0x1fe   :  { %2081 = vmatprep.subr.bf16.mxu0 %v2399_v11  ;;  %2099 = vmatprep.subr.bf16.mxu1 %v2399_v11 }
 0x200   :  { %v1267_v61 = vpop.permute.xlu0 %1266  ;;  %2083 = vmatpush1.bf16.msra.mxu0 %v2082_v57 }
 0x201   :  { %v1327_v9 = vsel %vm81_vm0, %v1265_v58, %v1267_v61  ;;  %v1269_v36 = vpop.permute.xlu1 %1268  ;;  %2112 = vmatpush1.bf16.msra.mxu1 %v2082_v57  ;;  %2084 = vmatprep.subr.bf16.mxu0 %v2399_v11 }
 0x202   :  { %v3453_v52 = vmax.f32 %v1199_v33, %v1327_v9  ;;  %v1328_v34 = vsel %vm81_vm0, %v1267_v61, %v1269_v36  ;;  %2100 = vmatprep.subr.bf16.mxu1 %v2399_v11  ;;  %v2085_v33 = vpack.c.bf16 %v1635_v16, %v1634_v6 }
 0x203   :  { %v3458_v4 = vmax.f32 %v1200_v0, %v1328_v34 }
 0x204   :  { %1454 = vrot.lane.b32.xlu0 %v3453_v52, %s2391_s25  ;;  %2087 = vmatpush1.bf16.msk.msra.mxu0 %vm2086_vm11, %v2085_v33  ;;  %v1299_v29 = vpop.permute.xlu0 %1298 }
 0x205   :  { %1456 = vrot.lane.b32.xlu1 %v3458_v4, %s2391_s25  ;;  %v2381_v48 = vpop.permute.xlu1 %2380  ;;  %2113 = vmatpush1.bf16.msk.msra.mxu1 %vm2086_vm11, %v2085_v33 }
 0x206   :  { %v2383_v0 = vunpack.i.h.bf16 %v2381_v48  ;;  %v2382_v9 = vunpack.i.l.bf16 %v2381_v48 }
 0x208   :  { %v1326_v61 = vsel %vm81_vm0, %v2382_v9, %v1265_v58 }
 0x209   :  { %v1297_v57 = vpop.permute.xlu1 %1296  ;;  %v3476_v34 = vmax.f32 %v1198_v62, %v1326_v61 }
 0x20a   :  { %v1341_v11 = vsel %vm81_vm0, %v2383_v0, %v1297_v57  ;;  %v1342_v33 = vsel %vm81_vm0, %v1297_v57, %v1299_v29 }
 0x20b   :  { %v3480_v6 = vmax.f32 %v1214_v50, %v1341_v11  ;;  %v3493_v12 = vmax.f32 %v1215_v47, %v1342_v33 }
 0x20d   :  { %v2384_v16 = vpack.i.bf16 %v3480_v6, %v3476_v34  ;;  %v1301_v48 = vpop.permute.xlu1 %1300 }
 0x20e   :  { %v1343_v58 = vsel %vm81_vm0, %v1299_v29, %v1301_v48 }
 0x20f   :  { %v3488_v0 = vmax.f32 %v1216_v46, %v1343_v58  ;;  %2385 = vrot.lane.b32.xlu0 %v2384_v16, %s2391_s25 }
 0x211   :  { %1488 = vrot.lane.b32.xlu1 %v3488_v0, %s2391_s25 }
 0x213   :  { %1486 = vrot.lane.b32.xlu0 %v3493_v12, %s2391_s25 }
 0x214   :  { %v1271_v7 = vpop.permute.xlu0 %1270 }
 0x215   :  { %v1329_v62 = vsel %vm81_vm0, %v1269_v36, %v1271_v7  ;;  %v1273_v50 = vpop.permute.xlu1 %1272 }
 0x216   :  { %v3502_v35 = vmax.f32 %v1201_v10, %v1329_v62  ;;  %v1330_v46 = vsel %vm81_vm0, %v1271_v7, %v1273_v50 }
 0x217   :  { %v3507_v40 = vmax.f32 %v1202_v2, %v1330_v46 }
 0x218   :  { %1458 = vrot.lane.b32.xlu1 %v3502_v35, %s2391_s25 }
 0x219   :  { %1460 = vrot.lane.b32.xlu0 %v3507_v40, %s2391_s25 }
 0x224   :  { %v1275_v47 = vpop.permute.xlu0 %1274 }
 0x225   :  { %v1331_v36 = vsel %vm81_vm0, %v1273_v50, %v1275_v47  ;;  %v3514_v9 = vpop.permute.xlu1 %1276 }
 0x226   :  { %v3518_v14 = vmax.f32 %v1203_v25, %v1331_v36  ;;  %v1332_v10 = vsel %vm81_vm0, %v1275_v47, %v3514_v9 }
 0x227   :  { %v3524_v45 = vmax.f32 %v1204_v55, %v1332_v10 }
 0x228   :  { %v1303_v2 = vpop.permute.xlu0 %1302  ;;  %1462 = vrot.lane.b32.xlu1 %v3518_v14, %s2391_s25 }
 0x229   :  { %v1344_v61 = vsel %vm81_vm0, %v1301_v48, %v1303_v2  ;;  %v1305_v57 = vpop.permute.xlu1 %1304  ;;  %1464 = vrot.lane.b32.xlu0 %v3524_v45, %s2391_s25 }
 0x22a   :  { %v3533_v60 = vmax.f32 %v1217_v44, %v1344_v61  ;;  %v1345_v25 = vsel %vm81_vm0, %v1303_v2, %v1305_v57 }
 0x22b   :  { %v3538_v51 = vmax.f32 %v1218_v27, %v1345_v25 }
 0x22c   :  { %1490 = vrot.lane.b32.xlu1 %v3533_v60, %s2391_s25 }
 0x22d   :  { %1492 = vrot.lane.b32.xlu0 %v3538_v51, %s2391_s25 }
 0x238   :  { %v3544_v55 = vpop.permute.xlu0 %1278 }
 0x239   :  { %v1333_v59 = vsel %vm81_vm0, %v3514_v9, %v3544_v55 }
 0x23c   :  { %v1281_v11 = vpop.permute.xlu0 %1280 }
 0x23d   :  { %v1334_v48 = vsel %vm81_vm0, %v3544_v55, %v1281_v11 }
 0x249   :  { %v1283_v29 = vpop.permute.xlu1 %1282 }
 0x24a   :  { %v1335_v49 = vsel %vm81_vm0, %v1281_v11, %v1283_v29  ;;  %v1285_v44 = vpop.permute.xlu0 %1284 }
 0x24b   :  { %v3549_v16 = vmax.f32 %v1207_v56, %v1335_v49  ;;  %v1336_v23 = vsel %vm81_vm0, %v1283_v29, %v1285_v44  ;;  %v3565_v56 = vmax.f32 %v1206_v15, %v1334_v48 }
 0x24c   :  { %v3554_v27 = vmax.f32 %v1208_v24, %v1336_v23 }
 0x24d   :  { %v1315_v33 = vpop.permute.xlu1 %1314  ;;  %1470 = vrot.lane.b32.xlu0 %v3549_v16, %s2391_s25 }
 0x24e   :  { %v1313_v58 = vpop.permute.xlu0 %1312  ;;  %1472 = vrot.lane.b32.xlu1 %v3554_v27, %s2391_s25 }
 0x24f   :  { %v1350_v31 = vsel %vm81_vm0, %v1313_v58, %v1315_v33 }
 0x250   :  { %v3569_v41 = vmax.f32 %v1223_v38, %v1350_v31 }
 0x251   :  { %v1311_v24 = vpop.permute.xlu1 %1310 }
 0x252   :  { %v1349_v7 = vsel %vm81_vm0, %v1311_v24, %v1313_v58  ;;  %v1317_v62 = vpop.permute.xlu0 %1316  ;;  %1468 = vrot.lane.b32.xlu1 %v3565_v56, %s2391_s25  ;;  %1502 = vrot.lane.b32.xlu0 %v3569_v41, %s2391_s25 }
 0x253   :  { %v3578_v50 = vmax.f32 %v1222_v5, %v1349_v7  ;;  %v1351_v21 = vsel %vm81_vm0, %v1315_v33, %v1317_v62 }
 0x254   :  { %v3583_v15 = vmax.f32 %v1224_v54, %v1351_v21 }
 0x256   :  { %1504 = vrot.lane.b32.xlu1 %v3583_v15, %s2391_s25  ;;  %1500 = vrot.lane.b32.xlu0 %v3578_v50, %s2391_s25 }
 0x259   :  { %v1287_v17 = vpop.permute.xlu0 %1286 }
 0x25a   :  { %v1337_v38 = vsel %vm81_vm0, %v1285_v44, %v1287_v17  ;;  %v1289_v46 = vpop.permute.xlu1 %1288 }
 0x25b   :  { %v3592_v42 = vmax.f32 %v1209_v53, %v1337_v38  ;;  %v1338_v5 = vsel %vm81_vm0, %v1287_v17, %v1289_v46  ;;  %v3832_v38 = vmax.f32 %v3406_v63, 0.0 }
 0x25c   :  { %v3597_v28 = vmax.f32 %v1210_v13, %v1338_v5  ;;  %v3664_v5 = vmax.f32 %v3833_v30, %v1333_v59 }
 0x25d   :  { %1474 = vrot.lane.b32.xlu1 %v3592_v42, %s2391_s25 }
 0x25e   :  { %1476 = vrot.lane.b32.xlu0 %v3597_v28, %s2391_s25 }
 0x262   :  { %v1291_v54 = vpop.permute.xlu0 %1290 }
 0x263   :  { %v1339_v47 = vsel %vm81_vm0, %v1289_v46, %v1291_v54  ;;  %v1293_v36 = vpop.permute.xlu1 %1292 }
 0x264   :  { %v3606_v53 = vmax.f32 %v3825_v18, %v1339_v47  ;;  %v1340_v10 = vsel %vm81_vm0, %v1291_v54, %v1293_v36  ;;  %v3834_v54 = vmax.f32 %v3356_v3, 0.0  ;;  %v3835_v18 = vmax.f32 %v3387_v26, 0.0 }
 0x265   :  { %v3611_v13 = vmax.f32 %v3826_v20, %v1340_v10 }
 0x266   :  { %v1319_v2 = vpop.permute.xlu0 %1318  ;;  %1478 = vrot.lane.b32.xlu1 %v3606_v53, %s2391_s25  ;;  %v3668_v47 = vmax.f32 %v3834_v54, %v1293_v36 }
 0x267   :  { %v1352_v61 = vsel %vm81_vm0, %v1317_v62, %v1319_v2  ;;  %v1321_v25 = vpop.permute.xlu1 %1320  ;;  %1480 = vrot.lane.b32.xlu0 %v3611_v13, %s2391_s25 }
 0x268   :  { %v3620_v11 = vmax.f32 %v3827_v37, %v1352_v61  ;;  %v1353_v29 = vsel %vm81_vm0, %v1319_v2, %v1321_v25 }
 0x269   :  { %v3625_v49 = vmax.f32 %v3828_v19, %v1353_v29 }
 0x26a   :  { %v1307_v44 = vpop.permute.xlu0 %1306  ;;  %1506 = vrot.lane.b32.xlu1 %v3620_v11, %s2391_s25 }
 0x26b   :  { %v1346_v23 = vsel %vm81_vm0, %v1305_v57, %v1307_v44  ;;  %v1309_v48 = vpop.permute.xlu1 %1308  ;;  %1508 = vrot.lane.b32.xlu0 %v3625_v49, %s2391_s25 }
 0x26c   :  { %v3634_v33 = vmax.f32 %v3829_v32, %v1346_v23  ;;  %v1347_v58 = vsel %vm81_vm0, %v1307_v44, %v1309_v48  ;;  %v1348_v9 = vsel %vm81_vm0, %v1309_v48, %v1311_v24 }
 0x26d   :  { %v3639_v31 = vmax.f32 %v3830_v39, %v1347_v58  ;;  %v3677_v10 = vmax.f32 %v3835_v18, %v1348_v9 }
 0x26e   :  { %v1323_v7 = vpop.permute.xlu0 %1322  ;;  %1494 = vrot.lane.b32.xlu1 %v3634_v33, %s2391_s25 }
 0x26f   :  { %v1354_v57 = vsel %vm81_vm0, %v1321_v25, %v1323_v7  ;;  %v1325_v62 = vpop.permute.xlu1 %1324  ;;  %1496 = vrot.lane.b32.xlu0 %v3639_v31, %s2391_s25 }
 0x270   :  { %v3648_v21 = vmax.f32 %v3831_v22, %v1354_v57  ;;  %v1355_v17 = vsel %vm81_vm0, %v1323_v7, %v1325_v62  ;;  %v3682_v3 = vmax.f32 %v1229_v1, %v1325_v62 }
 0x271   :  { %v3656_v46 = vmax.f32 %v3832_v38, %v1355_v17 }
 0x272   :  { %1510 = vrot.lane.b32.xlu1 %v3648_v21, %s2391_s25 }
 0x273   :  { %1512 = vrot.lane.b32.xlu0 %v3656_v46, %s2391_s25 }
 0x276   :  { %1466 = vrot.lane.b32.xlu1 %v3664_v5, %s2391_s25  ;;  %v1455_v63 = vpop.permute.xlu0 %1454 }
 0x277   :  { %1482 = vrot.lane.b32.xlu0 %v3668_v47, %s2391_s25  ;;  %v1457_v55 = vpop.permute.xlu1 %1456 }
 0x278   :  { %v1517_v8 = vsel %vm209_vm2, %v1455_v63, %v1457_v55 }
 0x279   :  { %v1579_v24 = vmax.f32 %v3453_v52, %v1517_v8 }
 0x27a   :  { %1498 = vrot.lane.b32.xlu1 %v3677_v10, %s2391_s25 }
 0x27b   :  { %1514 = vrot.lane.b32.xlu0 %v3682_v3, %s2391_s25  ;;  %1904 = vmatprep.mubr.msk.f32.mxu0 %vm1636_vm12, %v1579_v24 }
 0x281   :  { %v2386_v26 = vpop.permute.xlu0 %2385 }
 0x282   :  { %v2387_v36 = vunpack.i.l.bf16 %v2386_v26  ;;  %v2388_v20 = vunpack.i.h.bf16 %v2386_v26 }
 0x283   :  { %v1489_v43 = vpop.permute.xlu1 %1488 }
 0x284   :  { %v1516_v2 = vsel %vm209_vm2, %v2387_v36, %v1455_v63 }
 0x285   :  { %v1578_v61 = vmax.f32 %v3476_v34, %v1516_v2  ;;  %v1487_v1 = vpop.permute.xlu0 %1486 }
 0x286   :  { %v1531_v25 = vsel %vm209_vm2, %v2388_v20, %v1487_v1  ;;  %v1532_v52 = vsel %vm209_vm2, %v1487_v1, %v1489_v43 }
 0x287   :  { %v1595_v37 = vmax.f32 %v3493_v12, %v1532_v52  ;;  %1754 = vmatmul.mubr.f32.vlgmr.msra.gmra.mrb[16].mxu0 %v1578_v61  ;;  %v1594_v29 = vmax.f32 %v3480_v6, %v1531_v25 }
 0x289   :  { %1905 = vmatprep.mubr.msk.f32.mxu0 %vm1636_vm12, %v1595_v37 }
 0x28a   :  { %v1459_v19 = vpop.permute.xlu1 %1458 }
 0x28b   :  { %v1518_v44 = vsel %vm209_vm2, %v1457_v55, %v1459_v19  ;;  %v1461_v23 = vpop.permute.xlu0 %1460  ;;  %1759 = vmatmul.mubr.f32.gmra.mrb[18].mxu0 %v1594_v29 }
 0x28c   :  { %v1519_v34 = vsel %vm209_vm2, %v1459_v19, %v1461_v23  ;;  %v1580_v32 = vmax.f32 %v3458_v4, %v1518_v44 }
 0x28d   :  { %v1581_v48 = vmax.f32 %v3502_v35, %v1519_v34 }
 0x28f   :  { %1906 = vmatprep.mubr.msk.f32.mxu0 %vm1636_vm12, %v1581_v48 }
 0x290   :  { %1764 = vmatmul.mubr.f32.gmra.mrb[20].mxu0 %v1580_v32 }
 0x29a   :  { %v1463_v12 = vpop.permute.xlu1 %1462 }
 0x29b   :  { %v3702_v58 = vpop.permute.xlu0 %1464  ;;  %v1520_v4 = vsel %vm209_vm2, %v1461_v23, %v1463_v12 }
 0x29c   :  { %v1521_v57 = vsel %vm209_vm2, %v1463_v12, %v3702_v58  ;;  %v1582_v59 = vmax.f32 %v3507_v40, %v1520_v4 }
 0x29d   :  { %v1583_v17 = vmax.f32 %v3518_v14, %v1521_v57 }
 0x29e   :  { %v1491_v6 = vpop.permute.xlu1 %1490 }
 0x29f   :  { %v1533_v39 = vsel %vm209_vm2, %v1489_v43, %v1491_v6  ;;  %v1493_v7 = vpop.permute.xlu0 %1492 }
 0x2a0   :  { %v1534_v62 = vsel %vm209_vm2, %v1491_v6, %v1493_v7  ;;  %v1596_v35 = vmax.f32 %v3488_v0, %v1533_v39 }
 0x2a1   :  { %v1597_v22 = vmax.f32 %v3533_v60, %v1534_v62 }
 0x2a3   :  { %1907 = vmatprep.mubr.msk.f32.mxu0 %vm1636_vm12, %v1597_v22 }
 0x2a4   :  { %1769 = vmatmul.mubr.f32.gmra.mrb[22].mxu0 %v1596_v35 }
 0x2a5   :  { %1908 = vmatprep.mubr.msk.f32.mxu0 %vm1636_vm12, %v1583_v17 }
 0x2a8   :  { %1774 = vmatmul.mubr.f32.gmra.mrb[24].mxu0 %v1582_v59 }
 0x2bf   :  { %v1471_v38 = vpop.permute.xlu0 %1470 }
 0x2c0   :  { %v1473_v30 = vpop.permute.xlu1 %1472 }
 0x2c1   :  { %v1525_v54 = vsel %vm209_vm2, %v1471_v38, %v1473_v30 }
 0x2c2   :  { %v1587_v60 = vmax.f32 %v3549_v16, %v1525_v54 }
 0x2c4   :  { %v1469_v9 = vpop.permute.xlu1 %1468  ;;  %1912 = vmatprep.mubr.msk.f32.mxu1 %vm1636_vm12, %v1587_v60  ;;  %v1503_v0 = vpop.permute.xlu0 %1502 }
 0x2c5   :  { %v1524_v14 = vsel %vm209_vm2, %v1469_v9, %v1471_v38 }
 0x2c6   :  { %v1586_v63 = vmax.f32 %v3565_v56, %v1524_v14 }
 0x2c8   :  { %v1505_v55 = vpop.permute.xlu1 %1504  ;;  %1794 = vmatmul.mubr.f32.vlgmr.msra.gmra.mrb[16].mxu1 %v1586_v63  ;;  %v1501_v18 = vpop.permute.xlu0 %1500 }
 0x2c9   :  { %v1540_v40 = vsel %vm209_vm2, %v1503_v0, %v1505_v55  ;;  %v1539_v8 = vsel %vm209_vm2, %v1501_v18, %v1503_v0 }
 0x2ca   :  { %v1603_v24 = vmax.f32 %v3569_v41, %v1540_v40  ;;  %v1602_v26 = vmax.f32 %v3578_v50, %v1539_v8 }
 0x2cc   :  { %1913 = vmatprep.mubr.msk.f32.mxu1 %vm1636_vm12, %v1603_v24 }
 0x2cd   :  { %1799 = vmatmul.mubr.f32.gmra.mrb[18].mxu1 %v1602_v26 }
 0x2cf   :  { %v1475_v16 = vpop.permute.xlu1 %1474 }
 0x2d0   :  { %v1526_v36 = vsel %vm209_vm2, %v1473_v30, %v1475_v16  ;;  %v1477_v20 = vpop.permute.xlu0 %1476 }
 0x2d1   :  { %v1527_v56 = vsel %vm209_vm2, %v1475_v16, %v1477_v20  ;;  %v1588_v61 = vmax.f32 %v3554_v27, %v1526_v36 }
 0x2d2   :  { %v1589_v2 = vmax.f32 %v3592_v42, %v1527_v56 }
 0x2d4   :  { %1914 = vmatprep.mubr.msk.f32.mxu1 %vm1636_vm12, %v1589_v2 }
 0x2d5   :  { %1804 = vmatmul.mubr.f32.gmra.mrb[20].mxu1 %v1588_v61 }
 0x2d8   :  { %v1479_v43 = vpop.permute.xlu1 %1478 }
 0x2d9   :  { %v1481_v41 = vpop.permute.xlu0 %1480  ;;  %v1528_v27 = vsel %vm209_vm2, %v1477_v20, %v1479_v43 }
 0x2da   :  { %v1529_v52 = vsel %vm209_vm2, %v1479_v43, %v1481_v41 }
 0x2db   :  { %v1591_v44 = vmax.f32 %v3606_v53, %v1529_v52 }
 0x2dc   :  { %v1507_v1 = vpop.permute.xlu1 %1506 }
 0x2dd   :  { %v1541_v50 = vsel %vm209_vm2, %v1505_v55, %v1507_v1  ;;  %v1509_v25 = vpop.permute.xlu0 %1508 }
 0x2de   :  { %v1542_v37 = vsel %vm209_vm2, %v1507_v1, %v1509_v25  ;;  %v1604_v19 = vmax.f32 %v3583_v15, %v1541_v50 }
 0x2df   :  { %v1605_v29 = vmax.f32 %v3620_v11, %v1542_v37  ;;  %v1590_v11 = vmax.f32 %v3597_v28, %v1528_v27 }
 0x2e0   :  { %v1495_v42 = vpop.permute.xlu1 %1494 }
 0x2e1   :  { %v1535_v23 = vsel %vm209_vm2, %v1493_v7, %v1495_v42  ;;  %1915 = vmatprep.mubr.msk.f32.mxu1 %vm1636_vm12, %v1605_v29  ;;  %v1497_v34 = vpop.permute.xlu0 %1496 }
 0x2e2   :  { %v1536_v48 = vsel %vm209_vm2, %v1495_v42, %v1497_v34  ;;  %1809 = vmatmul.mubr.f32.gmra.mrb[22].mxu1 %v1604_v19  ;;  %v1598_v15 = vmax.f32 %v3538_v51, %v1535_v23 }
 0x2e3   :  { %v1599_v32 = vmax.f32 %v3634_v33, %v1536_v48  ;;  %1916 = vmatprep.mubr.msk.f32.mxu1 %vm1636_vm12, %v1591_v44 }
 0x2e4   :  { %v1511_v12 = vpop.permute.xlu1 %1510 }
 0x2e5   :  { %v1543_v6 = vsel %vm209_vm2, %v1509_v25, %v1511_v12  ;;  %v1513_v53 = vpop.permute.xlu0 %1512  ;;  %1909 = vmatprep.mubr.msk.f32.mxu0 %vm1636_vm12, %v1599_v32 }
 0x2e6   :  { %v1544_v39 = vsel %vm209_vm2, %v1511_v12, %v1513_v53  ;;  %1779 = vmatmul.mubr.f32.gmra.mrb[26].mxu0 %v1598_v15  ;;  %1814 = vmatmul.mubr.f32.gmra.mrb[24].mxu1 %v1590_v11  ;;  %v1606_v33 = vmax.f32 %v3625_v49, %v1543_v6 }
 0x2e7   :  { %v1607_v7 = vmax.f32 %v3648_v21, %v1544_v39 }
 0x2e8   :  { %v1467_v57 = vpop.permute.xlu1 %1466 }
 0x2e9   :  { %v1522_v28 = vsel %vm209_vm2, %v3702_v58, %v1467_v57  ;;  %v1523_v51 = vsel %vm209_vm2, %v1467_v57, %v1469_v9  ;;  %1917 = vmatprep.mubr.msk.f32.mxu1 %vm1636_vm12, %v1607_v7  ;;  %v1483_v62 = vpop.permute.xlu0 %1482 }
 0x2ea   :  { %v1584_v22 = vmax.f32 %v3524_v45, %v1522_v28  ;;  %v1585_v35 = vmax.f32 %v3664_v5, %v1523_v51  ;;  %v1530_v4 = vsel %vm209_vm2, %v1481_v41, %v1483_v62  ;;  %v1593_v17 = vmax.f32 %v3668_v47, %v1483_v62  ;;  %1819 = vmatmul.mubr.f32.gmra.mrb[26].mxu1 %v1606_v33 }
 0x2eb   :  { %v1592_v49 = vmax.f32 %v3611_v13, %v1530_v4 }
 0x2ec   :  { %v1499_v21 = vpop.permute.xlu1 %1498  ;;  %1910 = vmatprep.mubr.msk.f32.mxu0 %vm1636_vm12, %v1585_v35  ;;  %1918 = vmatprep.mubr.msk.f32.mxu1 %vm1636_vm12, %v1593_v17 }
 0x2ed   :  { %v1537_v58 = vsel %vm209_vm2, %v1497_v34, %v1499_v21  ;;  %v1538_v59 = vsel %vm209_vm2, %v1499_v21, %v1501_v18  ;;  %v1515_v38 = vpop.permute.xlu0 %1514  ;;  %1784 = vmatmul.mubr.f32.gmra.mrb[28].mxu0 %v1584_v22 }
 0x2ee   :  { %v1600_v45 = vmax.f32 %v3639_v31, %v1537_v58  ;;  %v1601_v5 = vmax.f32 %v3677_v10, %v1538_v59  ;;  %v1545_v47 = vsel %vm209_vm2, %v1513_v53, %v1515_v38  ;;  %v1609_v30 = vmax.f32 %v3682_v3, %v1515_v38  ;;  %1824 = vmatmul.mubr.f32.gmra.mrb[28].mxu1 %v1592_v49 }
 0x2ef   :  { %v1608_v13 = vmax.f32 %v3656_v46, %v1545_v47 }
 0x2f0   :  { %1911 = vmatprep.mubr.msk.f32.mxu0 %vm1636_vm12, %v1601_v5  ;;  %1919 = vmatprep.mubr.msk.f32.mxu1 %vm1636_vm12, %v1609_v30 }
 0x2f1   :  { %1789 = vmatmul.mubr.f32.gmra.mrb[30].mxu0 %v1600_v45 }
 0x2f2   :  { %1829 = vmatmul.mubr.f32.gmra.mrb[30].mxu1 %v1608_v13 }
 0x35a   :  { %v1755_v54 = vpop.f32.mrb[16].mxu0 }
 0x35b   :  { %v1757_v60 = vpop.f32.mrb[17].mxu0 }
 0x35e   :  { %v1760_v9 = vpop.f32.mrb[18].mxu0 }
 0x35f   :  { %v1762_v0 = vpop.f32.mrb[19].mxu0 }
 0x363   :  { %v1765_v31 = vpop.f32.mrb[20].mxu0 }
 0x364   :  { %1836 = vrot.lane.b32.xlu1 %v1765_v31, %s2401_s3  ;;  %v1767_v10 = vpop.f32.mrb[21].mxu0 }
 0x377   :  { %v1770_v14 = vpop.f32.mrb[22].mxu0 }
 0x378   :  { %1838 = vrot.lane.b32.xlu0 %v1770_v14, %s2401_s3  ;;  %v1772_v3 = vpop.f32.mrb[23].mxu0 }
 0x37b   :  { %v1775_v46 = vpop.f32.mrb[24].mxu0 }
 0x37c   :  { %v1777_v63 = vpop.f32.mrb[25].mxu0 }
 0x39b   :  { %v1795_v55 = vpop.f32.mrb[16].mxu1 }
 0x39c   :  { %v1797_v18 = vpop.f32.mrb[17].mxu1 }
 0x3a0   :  { %v1800_v40 = vpop.f32.mrb[18].mxu1 }
 0x3a1   :  { %v1802_v8 = vpop.f32.mrb[19].mxu1 }
 0x3a8   :  { %v1805_v24 = vpop.f32.mrb[20].mxu1 }
 0x3a9   :  { %v1807_v26 = vpop.f32.mrb[21].mxu1 }
 0x3b5   :  { %v1810_v16 = vpop.f32.mrb[22].mxu1 }
 0x3b6   :  { %v1812_v36 = vpop.f32.mrb[23].mxu1 }
 0x3b9   :  { %v1780_v20 = vpop.f32.mrb[26].mxu0  ;;  %v1815_v56 = vpop.f32.mrb[24].mxu1 }
 0x3ba   :  { %v1782_v2 = vpop.f32.mrb[27].mxu0  ;;  %v1817_v61 = vpop.f32.mrb[25].mxu1 }
 0x3bd   :  { %v1820_v43 = vpop.f32.mrb[26].mxu1 }
 0x3be   :  { %v1822_v41 = vpop.f32.mrb[27].mxu1 }
 0x3c0   :  { %v1785_v1 = vpop.f32.mrb[28].mxu0 }
 0x3c1   :  { %v1825_v50 = vpop.f32.mrb[28].mxu1  ;;  %1844 = vrot.lane.b32.xlu1 %v1785_v1, %s2401_s3  ;;  %v1787_v25 = vpop.f32.mrb[29].mxu0 }
 0x3c2   :  { %v1827_v52 = vpop.f32.mrb[29].mxu1 }
 0x3c4   :  { %v1790_v37 = vpop.f32.mrb[30].mxu0 }
 0x3c5   :  { %v1830_v29 = vpop.f32.mrb[30].mxu1  ;;  %1852 = vrot.lane.b32.xlu1 %v1805_v24, %s2401_s3  ;;  %1846 = vrot.lane.b32.xlu0 %v1790_v37, %s2401_s3  ;;  %v1792_v19 = vpop.f32.mrb[31].mxu0 }
 0x3c6   :  { %v1832_v42 = vpop.f32.mrb[31].mxu1 }
 0x3c9   :  { %1860 = vrot.lane.b32.xlu1 %v1825_v50, %s2401_s3  ;;  %1854 = vrot.lane.b32.xlu0 %v1810_v16, %s2401_s3 }
 0x3cd   :  { %1862 = vrot.lane.b32.xlu0 %v1830_v29, %s2401_s3 }
 0x3d6   :  { %v1837_v27 = vpop.permute.xlu1 %1836 }
 0x3d7   :  { %v1867_v44 = vsel %vm1866_vm13, %v1755_v54, %v1837_v27 }
 0x3d8   :  { %1875 = vst [vmem:[%s3813_s4] sm:$0xff] %v1867_v44 }
 0x3ea   :  { %v1839_v23 = vpop.permute.xlu0 %1838 }
 0x3eb   :  { %v1868_v34 = vsel %vm1866_vm13, %v1760_v9, %v1839_v23 }
 0x3ec   :  { %1879 = vst [vmem:[%s3813_s4 + $0x20] sm:$0xff] %v1868_v34 }
 0x433   :  { %v1845_v48 = vpop.permute.xlu1 %1844 }
 0x434   :  { %v1869_v32 = vsel %vm1866_vm13, %v1775_v46, %v1845_v48 }
 0x435   :  { %1876 = vst [vmem:[%s3813_s4 + $0x8] sm:$0xff] %v1869_v32 }
 0x437   :  { %v1853_v11 = vpop.permute.xlu1 %1852  ;;  %v1847_v15 = vpop.permute.xlu0 %1846 }
 0x438   :  { %v1871_v12 = vsel %vm1866_vm13, %v1795_v55, %v1853_v11  ;;  %v1870_v6 = vsel %vm1866_vm13, %v1780_v20, %v1847_v15 }
 0x439   :  { %1877 = vst [vmem:[%s3813_s4 + $0x10] sm:$0xff] %v1871_v12  ;;  %1880 = vst [vmem:[%s3813_s4 + $0x28] sm:$0xff] %v1870_v6 }
 0x43b   :  { %v1861_v53 = vpop.permute.xlu1 %1860  ;;  %v1855_v39 = vpop.permute.xlu0 %1854 }
 0x43c   :  { %v1873_v7 = vsel %vm1866_vm13, %v1815_v56, %v1861_v53  ;;  %v1872_v33 = vsel %vm1866_vm13, %v1800_v40, %v1855_v39 }
 0x43d   :  { %1878 = vst [vmem:[%s3813_s4 + $0x18] sm:$0xff] %v1873_v7  ;;  %1881 = vst [vmem:[%s3813_s4 + $0x30] sm:$0xff] %v1872_v33 }
 0x43f   :  { %v1863_v57 = vpop.permute.xlu0 %1862 }
 0x440   :  { %v1874_v28 = vsel %vm1866_vm13, %v1820_v43, %v1863_v57 }
 0x441   :  { %1882 = vst [vmem:[%s3813_s4 + $0x38] sm:$0xff] %v1874_v28 }

// kernel: cnn_forward.5
= control target key start
LH: loop header
LB: loop body
LE: loop exit
PB: predicated region body
PF: predicated region fallthrough
CT: control target
= control target key end

     0   :  { %vm635_vm0 = vmmov 0   ;;  %vm126_vm1 = vcmask 130048   ;;  %s978_s1 = inlined_call_operand.vmem [shape: f32[784,128], index: 1, kind: input, shape index: {}]   ;;  %s979_s0 = inlined_call_operand.vmem [shape: f32[8,784], index: 0, kind: input, shape index: {}]   ;;  %s980_s2 = inlined_call_operand.vmem [shape: f32[1,128], index: 2, kind: input, shape index: {}]   ;;  %s981_s3 = inlined_call_operand.vmem [shape: f32[8,128], index: 3, kind: output, shape index: {}]  }
   0x1   :  { %v37_v0 = vld [vmem:[%s978_s1 + $0x80] sm:$0xff]  ;;  %v38_v1 = vld [vmem:[%s978_s1 + $0x88] sm:$0xff]  ;;  %v39_v11 = vld [vmem:[%s978_s1 + $0x90] sm:$0xff] }
   0x2   :  { %v21_v2 = vld [vmem:[%s978_s1] sm:$0xff]  ;;  %v532_v3 = vpack.c.bf16 %v38_v1, %v37_v0  ;;  %v22_v4 = vld [vmem:[%s978_s1 + $0x8] sm:$0xff]  ;;  %v40_v13 = vld [vmem:[%s978_s1 + $0x98] sm:$0xff] }
   0x3   :  { %v69_v5 = vld [vmem:[%s978_s1 + $0x180] sm:$0xff]  ;;  %v70_v6 = vld [vmem:[%s978_s1 + $0x188] sm:$0xff]  ;;  %v534_v7 = vpack.c.bf16 %v22_v4, %v21_v2  ;;  %v23_v14 = vld [vmem:[%s978_s1 + $0x10] sm:$0xff]  ;;  %v536_v16 = vpack.c.bf16 %v40_v13, %v39_v11 }
   0x4   :  { %v564_v8 = vpack.c.bf16 %v70_v6, %v69_v5  ;;  %v53_v9 = vld [vmem:[%s978_s1 + $0x100] sm:$0xff]  ;;  %v54_v10 = vld [vmem:[%s978_s1 + $0x108] sm:$0xff]  ;;  %533 = vmatprep.subr.bf16.mxu0 %v532_v3  ;;  %v24_v15 = vld [vmem:[%s978_s1 + $0x18] sm:$0xff] }
   0x5   :  { %v566_v12 = vpack.c.bf16 %v54_v10, %v53_v9  ;;  %535 = vmatpush3.bf16.msra.mxu0 %v534_v7  ;;  %v538_v17 = vpack.c.bf16 %v24_v15, %v23_v14  ;;  %v71_v18 = vld [vmem:[%s978_s1 + $0x190] sm:$0xff]  ;;  %v72_v19 = vld [vmem:[%s978_s1 + $0x198] sm:$0xff]  ;;  %v41_v23 = vld [vmem:[%s978_s1 + $0xa0] sm:$0xff] }
   0x6   :  { %565 = vmatprep.subr.bf16.mxu1 %v564_v8  ;;  %v55_v20 = vld [vmem:[%s978_s1 + $0x110] sm:$0xff]  ;;  %v568_v21 = vpack.c.bf16 %v72_v19, %v71_v18  ;;  %v56_v22 = vld [vmem:[%s978_s1 + $0x118] sm:$0xff]  ;;  %v42_v24 = vld [vmem:[%s978_s1 + $0xa8] sm:$0xff]  ;;  %537 = vmatprep.subr.bf16.mxu0 %v536_v16 }
   0x7   :  { %567 = vmatpush3.bf16.msra.mxu1 %v566_v12  ;;  %v570_v25 = vpack.c.bf16 %v56_v22, %v55_v20  ;;  %v540_v26 = vpack.c.bf16 %v42_v24, %v41_v23  ;;  %v25_v27 = vld [vmem:[%s978_s1 + $0x20] sm:$0xff]  ;;  %v26_v28 = vld [vmem:[%s978_s1 + $0x28] sm:$0xff]  ;;  %v43_v35 = vld [vmem:[%s978_s1 + $0xb0] sm:$0xff] }
   0x8   :  { %v73_v29 = vld [vmem:[%s978_s1 + $0x1a0] sm:$0xff]  ;;  %569 = vmatprep.subr.bf16.mxu1 %v568_v21  ;;  %v74_v30 = vld [vmem:[%s978_s1 + $0x1a8] sm:$0xff]  ;;  %v542_v33 = vpack.c.bf16 %v26_v28, %v25_v27  ;;  %v44_v36 = vld [vmem:[%s978_s1 + $0xb8] sm:$0xff] }
   0x9   :  { %v57_v31 = vld [vmem:[%s978_s1 + $0x120] sm:$0xff]  ;;  %v58_v32 = vld [vmem:[%s978_s1 + $0x128] sm:$0xff]  ;;  %539 = vmatpush3.bf16.msra.mxu0 %v538_v17  ;;  %v572_v34 = vpack.c.bf16 %v74_v30, %v73_v29  ;;  %v27_v37 = vld [vmem:[%s978_s1 + $0x30] sm:$0xff]  ;;  %v544_v39 = vpack.c.bf16 %v44_v36, %v43_v35 }
   0xa   :  { %541 = vmatprep.subr.bf16.mxu0 %v540_v26  ;;  %v574_v38 = vpack.c.bf16 %v58_v32, %v57_v31  ;;  %v28_v40 = vld [vmem:[%s978_s1 + $0x38] sm:$0xff]  ;;  %v75_v41 = vld [vmem:[%s978_s1 + $0x1b0] sm:$0xff]  ;;  %v45_v46 = vld [vmem:[%s978_s1 + $0xc0] sm:$0xff] }
   0xb   :  { %571 = vmatpush3.bf16.msra.mxu1 %v570_v25  ;;  %v76_v42 = vld [vmem:[%s978_s1 + $0x1b8] sm:$0xff]  ;;  %v59_v44 = vld [vmem:[%s978_s1 + $0x130] sm:$0xff]  ;;  %v46_v47 = vld [vmem:[%s978_s1 + $0xc8] sm:$0xff]  ;;  %v546_v48 = vpack.c.bf16 %v28_v40, %v27_v37 }
   0xc   :  { %573 = vmatprep.subr.bf16.mxu1 %v572_v34  ;;  %v576_v43 = vpack.c.bf16 %v76_v42, %v75_v41  ;;  %v60_v45 = vld [vmem:[%s978_s1 + $0x138] sm:$0xff]  ;;  %v77_v49 = vld [vmem:[%s978_s1 + $0x1c0] sm:$0xff]  ;;  %v78_v50 = vld [vmem:[%s978_s1 + $0x1c8] sm:$0xff]  ;;  %v548_v52 = vpack.c.bf16 %v46_v47, %v45_v46 }
   0xd   :  { %543 = vmatpush3.bf16.msra.mxu0 %v542_v33  ;;  %v578_v51 = vpack.c.bf16 %v60_v45, %v59_v44  ;;  %v29_v53 = vld [vmem:[%s978_s1 + $0x40] sm:$0xff]  ;;  %v30_v54 = vld [vmem:[%s978_s1 + $0x48] sm:$0xff]  ;;  %v580_v56 = vpack.c.bf16 %v78_v50, %v77_v49  ;;  %v47_v58 = vld [vmem:[%s978_s1 + $0xd0] sm:$0xff]  ;;  %v634_v50 = vmov 0.0|0.0  }
   0xe   :  { %545 = vmatprep.subr.bf16.mxu0 %v544_v39  ;;  %v61_v55 = vld [vmem:[%s978_s1 + $0x140] sm:$0xff]  ;;  %v62_v57 = vld [vmem:[%s978_s1 + $0x148] sm:$0xff]  ;;  %v48_v59 = vld [vmem:[%s978_s1 + $0xd8] sm:$0xff]  ;;  %v550_v62 = vpack.c.bf16 %v30_v54, %v29_v53 }
   0xf   :  { %575 = vmatpush3.bf16.msra.mxu1 %v574_v38  ;;  %v79_v60 = vld [vmem:[%s978_s1 + $0x1d0] sm:$0xff]  ;;  %v80_v61 = vld [vmem:[%s978_s1 + $0x1d8] sm:$0xff]  ;;  %v582_v63 = vpack.c.bf16 %v62_v57, %v61_v55  ;;  %v552_v0 = vpack.c.bf16 %v48_v59, %v47_v58  ;;  %v49_v6 = vld [vmem:[%s978_s1 + $0xe0] sm:$0xff] }
  0x10   :  { %577 = vmatprep.subr.bf16.mxu1 %v576_v43  ;;  %v31_v1 = vld [vmem:[%s978_s1 + $0x50] sm:$0xff]  ;;  %v32_v2 = vld [vmem:[%s978_s1 + $0x58] sm:$0xff]  ;;  %v584_v4 = vpack.c.bf16 %v80_v61, %v79_v60  ;;  %v50_v7 = vld [vmem:[%s978_s1 + $0xe8] sm:$0xff]  ;;  %v636_v60 = vmov 0.0  }
  0x11   :  { %547 = vmatpush3.bf16.msra.mxu0 %v546_v48  ;;  %v63_v3 = vld [vmem:[%s978_s1 + $0x150] sm:$0xff]  ;;  %v64_v5 = vld [vmem:[%s978_s1 + $0x158] sm:$0xff]  ;;  %v81_v8 = vld [vmem:[%s978_s1 + $0x1e0] sm:$0xff]  ;;  %v554_v10 = vpack.c.bf16 %v32_v2, %v31_v1  ;;  %v556_v14 = vpack.c.bf16 %v50_v7, %v49_v6 }
  0x12   :  { %549 = vmatprep.subr.bf16.mxu0 %v548_v52  ;;  %v82_v9 = vld [vmem:[%s978_s1 + $0x1e8] sm:$0xff]  ;;  %v33_v11 = vld [vmem:[%s978_s1 + $0x60] sm:$0xff]  ;;  %v586_v13 = vpack.c.bf16 %v64_v5, %v63_v3  ;;  %v51_v19 = vld [vmem:[%s978_s1 + $0xf0] sm:$0xff] }
  0x13   :  { %579 = vmatpush3.bf16.msra.mxu1 %v578_v51  ;;  %v15_v12 = vld [vmem:[%s979_s0 + $0x8] sm:$0xff]  ;;  %v65_v16 = vld [vmem:[%s978_s1 + $0x160] sm:$0xff]  ;;  %v588_v18 = vpack.c.bf16 %v82_v9, %v81_v8  ;;  %v52_v20 = vld [vmem:[%s978_s1 + $0xf8] sm:$0xff] }
  0x14   :  { %581 = vmatprep.subr.bf16.mxu1 %v580_v56  ;;  %v34_v15 = vld [vmem:[%s978_s1 + $0x68] sm:$0xff]  ;;  %194 = vmatprep.mubr.f32.mxu0 %v15_v12  ;;  %v17_v21 = vld [vmem:[%s979_s0 + $0x18] sm:$0xff]  ;;  %v83_v22 = vld [vmem:[%s978_s1 + $0x1f0] sm:$0xff]  ;;  %v560_v26 = vpack.c.bf16 %v52_v20, %v51_v19 }
  0x15   :  { %551 = vmatpush3.bf16.msra.mxu0 %v550_v62  ;;  %v66_v17 = vld [vmem:[%s978_s1 + $0x168] sm:$0xff]  ;;  %v84_v23 = vld [vmem:[%s978_s1 + $0x1f8] sm:$0xff]  ;;  %264 = vmatprep.mubr.f32.mxu1 %v17_v21  ;;  %v558_v24 = vpack.c.bf16 %v34_v15, %v33_v11  ;;  %v35_v27 = vld [vmem:[%s978_s1 + $0x70] sm:$0xff] }
  0x16   :  { %553 = vmatprep.subr.bf16.mxu0 %v552_v0  ;;  %v590_v25 = vpack.c.bf16 %v66_v17, %v65_v16  ;;  %v36_v28 = vld [vmem:[%s978_s1 + $0x78] sm:$0xff]  ;;  %v67_v29 = vld [vmem:[%s978_s1 + $0x170] sm:$0xff]  ;;  %v592_v30 = vpack.c.bf16 %v84_v23, %v83_v22  ;;  %v101_v32 = vld [vmem:[%s978_s1 + $0x280] sm:$0xff] }
  0x17   :  { %583 = vmatpush3.bf16.msra.mxu1 %v582_v63  ;;  %v68_v31 = vld [vmem:[%s978_s1 + $0x178] sm:$0xff]  ;;  %v102_v33 = vld [vmem:[%s978_s1 + $0x288] sm:$0xff]  ;;  %v562_v34 = vpack.c.bf16 %v36_v28, %v35_v27  ;;  %v85_v37 = vld [vmem:[%s978_s1 + $0x200] sm:$0xff] }
  0x18   :  { %585 = vmatprep.subr.bf16.mxu1 %v584_v4  ;;  %v594_v35 = vpack.c.bf16 %v68_v31, %v67_v29  ;;  %v596_v36 = vpack.c.bf16 %v102_v33, %v101_v32  ;;  %v86_v38 = vld [vmem:[%s978_s1 + $0x208] sm:$0xff]  ;;  %v103_v39 = vld [vmem:[%s978_s1 + $0x290] sm:$0xff]  ;;  %v104_v40 = vld [vmem:[%s978_s1 + $0x298] sm:$0xff] }
  0x19   :  { %555 = vmatpush3.bf16.msra.mxu0 %v554_v10  ;;  %v14_v41 = vld [vmem:[%s979_s0] sm:$0xff]  ;;  %v598_v42 = vpack.c.bf16 %v86_v38, %v85_v37  ;;  %v16_v43 = vld [vmem:[%s979_s0 + $0x10] sm:$0xff]  ;;  %v600_v45 = vpack.c.bf16 %v104_v40, %v103_v39  ;;  %v88_v46 = vld [vmem:[%s978_s1 + $0x218] sm:$0xff] }
  0x1a   :  { %557 = vmatprep.subr.bf16.mxu0 %v556_v14  ;;  %v87_v44 = vld [vmem:[%s978_s1 + $0x210] sm:$0xff]  ;;  %v105_v47 = vld [vmem:[%s978_s1 + $0x2a0] sm:$0xff]  ;;  %v106_v48 = vld [vmem:[%s978_s1 + $0x2a8] sm:$0xff] }
  0x1b   :  { %587 = vmatpush3.bf16.msra.mxu1 %v586_v13  ;;  %v19_v49 = vld [vmem:[%s979_s0 + $0x28] sm:$0xff]  ;;  %v117_v51 = vld [vmem:[%s978_s1 + $0x300] sm:$0xff]  ;;  %v602_v54 = vpack.c.bf16 %v88_v46, %v87_v44  ;;  %v604_v55 = vpack.c.bf16 %v106_v48, %v105_v47  ;;  %v107_v58 = vld [vmem:[%s978_s1 + $0x2b0] sm:$0xff] }
  0x1c   :  { %589 = vmatprep.subr.bf16.mxu1 %v588_v18  ;;  %v118_v52 = vld [vmem:[%s978_s1 + $0x308] sm:$0xff]  ;;  %v89_v56 = vld [vmem:[%s978_s1 + $0x220] sm:$0xff]  ;;  %v108_v59 = vld [vmem:[%s978_s1 + $0x2b8] sm:$0xff] }
  0x1d   :  { %559 = vmatpush3.bf16.msra.mxu0 %v558_v24  ;;  %v629_v53 = vpack.c.bf16 %v118_v52, %v117_v51  ;;  %v90_v57 = vld [vmem:[%s978_s1 + $0x228] sm:$0xff]  ;;  %v20_v61 = vld [vmem:[%s979_s0 + $0x30] sm:$0xff]  ;;  %v608_v63 = vpack.c.bf16 %v108_v59, %v107_v58  ;;  %v92_v1 = vld [vmem:[%s978_s1 + $0x238] sm:$0xff] }
  0x1e   :  { %561 = vmatprep.subr.bf16.mxu0 %v560_v26  ;;  %v606_v62 = vpack.c.bf16 %v90_v57, %v89_v56  ;;  %v91_v0 = vld [vmem:[%s978_s1 + $0x230] sm:$0xff]  ;;  %v109_v2 = vld [vmem:[%s978_s1 + $0x2c0] sm:$0xff]  ;;  %v110_v3 = vld [vmem:[%s978_s1 + $0x2c8] sm:$0xff] }
  0x1f   :  { %591 = vmatpush3.bf16.msra.mxu1 %v590_v25  ;;  %v610_v4 = vpack.c.bf16 %v92_v1, %v91_v0  ;;  %v612_v5 = vpack.c.bf16 %v110_v3, %v109_v2  ;;  %v93_v6 = vld [vmem:[%s978_s1 + $0x240] sm:$0xff]  ;;  %v94_v7 = vld [vmem:[%s978_s1 + $0x248] sm:$0xff]  ;;  %v111_v8 = vld [vmem:[%s978_s1 + $0x2d0] sm:$0xff] }
  0x20   :  { %593 = vmatprep.subr.bf16.mxu1 %v592_v30  ;;  %v112_v9 = vld [vmem:[%s978_s1 + $0x2d8] sm:$0xff]  ;;  %v614_v10 = vpack.c.bf16 %v94_v7, %v93_v6  ;;  %v95_v12 = vld [vmem:[%s978_s1 + $0x250] sm:$0xff]  ;;  %v113_v14 = vld [vmem:[%s978_s1 + $0x2e0] sm:$0xff] }
  0x21   :  { %563 = vmatpush3.bf16.msra.mxu0 %v562_v34  ;;  %v616_v11 = vpack.c.bf16 %v112_v9, %v111_v8  ;;  %v96_v13 = vld [vmem:[%s978_s1 + $0x258] sm:$0xff]  ;;  %v114_v15 = vld [vmem:[%s978_s1 + $0x2e8] sm:$0xff]  ;;  %v97_v18 = vld [vmem:[%s978_s1 + $0x260] sm:$0xff] }
  0x22   :  { %597 = vmatprep.subr.bf16.mxu0 %v596_v36  ;;  %v618_v16 = vpack.c.bf16 %v96_v13, %v95_v12  ;;  %v620_v17 = vpack.c.bf16 %v114_v15, %v113_v14  ;;  %v98_v19 = vld [vmem:[%s978_s1 + $0x268] sm:$0xff]  ;;  %v115_v20 = vld [vmem:[%s978_s1 + $0x2f0] sm:$0xff]  ;;  %v116_v21 = vld [vmem:[%s978_s1 + $0x2f8] sm:$0xff] }
  0x23   :  { %595 = vmatpush3.bf16.msra.mxu1 %v594_v35  ;;  %v622_v22 = vpack.c.bf16 %v98_v19, %v97_v18  ;;  %v624_v23 = vpack.c.bf16 %v116_v21, %v115_v20  ;;  %v99_v24 = vld [vmem:[%s978_s1 + $0x270] sm:$0xff]  ;;  %v100_v25 = vld [vmem:[%s978_s1 + $0x278] sm:$0xff]  ;;  %v18_v27 = vld [vmem:[%s979_s0 + $0x20] sm:$0xff] }
  0x24   :  { %628 = vmatprep.subr.bf16.mxu1 %v634_v50  ;;  %195 = vmatmul.mubr.f32.vlgmr.msra.gmra.mrb[0].mxu0 %v14_v41  ;;  %v626_v26 = vpack.c.bf16 %v100_v25, %v99_v24  ;;  %v415_v29 = vld [vmem:[%s980_s2] ss:$0 sm:$0xff] }
  0x25   :  { %599 = vmatpush3.bf16.msra.mxu0 %v598_v42  ;;  %334 = vmatprep.mubr.f32.mxu0 %v19_v49 }
  0x26   :  { %265 = vmatmul.mubr.f32.vlgmr.msra.gmra.mrb[0].mxu1 %v16_v43  ;;  %601 = vmatprep.subr.bf16.mxu0 %v600_v45 }
  0x27   :  { %630 = vmatpush3.bf16.msra.mxu1 %v629_v53  ;;  %529 = vmatprep.mubr.msk.f32.mxu1 %vm635_vm0, %v636_v60 }
  0x29   :  { %603 = vmatpush3.bf16.msra.mxu0 %v602_v54 }
  0x2a   :  { %605 = vmatprep.subr.bf16.mxu0 %v604_v55  ;;  %530 = vmatmul.mubr.msk.f32.vlgmr.msra.gmra.mrb[2].mxu1 %vm126_vm1, %v20_v61 }
  0x2d   :  { %607 = vmatpush3.bf16.msra.mxu0 %v606_v62 }
  0x2e   :  { %609 = vmatprep.subr.bf16.mxu0 %v608_v63 }
  0x31   :  { %611 = vmatpush3.bf16.msra.mxu0 %v610_v4 }
  0x32   :  { %613 = vmatprep.subr.bf16.mxu0 %v612_v5 }
  0x35   :  { %615 = vmatpush3.bf16.msra.mxu0 %v614_v10 }
  0x36   :  { %617 = vmatprep.subr.bf16.mxu0 %v616_v11 }
  0x39   :  { %619 = vmatpush3.bf16.msra.mxu0 %v618_v16 }
  0x3a   :  { %621 = vmatprep.subr.bf16.mxu0 %v620_v17 }
  0x3d   :  { %623 = vmatpush3.bf16.msra.mxu0 %v622_v22 }
  0x3e   :  { %625 = vmatprep.subr.bf16.mxu0 %v624_v23 }
  0x41   :  { %627 = vmatpush3.bf16.msra.mxu0 %v626_v26 }
  0x44   :  { %335 = vmatmul.mubr.f32.vlgmr.msra.gmra.mrb[2].mxu0 %v18_v27 }
  0xf7   :  { %v449_v28 = vpop.f32.mrb[0].mxu0 }
  0xf8   :  { %v450_v30 = vpop.f32.mrb[1].mxu0 }
  0xf9   :  { %v484_v31 = vpop.f32.mrb[0].mxu1  ;;  %v451_v32 = vadd.f32 %v450_v30, %v449_v28 }
  0xfa   :  { %v485_v33 = vpop.f32.mrb[1].mxu1 }
  0xfb   :  { %v486_v34 = vadd.f32 %v485_v33, %v484_v31  ;;  %v197_v35 = vadd.f32 %v451_v32, %v415_v29 }
  0xfd   :  { %v267_v36 = vadd.f32 %v486_v34, %v197_v35  ;;  %v406_v37 = vpop.f32.mrb[2].mxu1 }
  0xfe   :  { %v531_v38 = vpop.f32.mrb[3].mxu1 }
 0x117   :  { %v519_v39 = vpop.f32.mrb[2].mxu0 }
 0x118   :  { %v520_v40 = vpop.f32.mrb[3].mxu0 }
 0x119   :  { %v521_v41 = vadd.f32 %v520_v40, %v519_v39 }
 0x11b   :  { %v337_v42 = vadd.f32 %v521_v41, %v267_v36 }
 0x11d   :  { %v407_v43 = vadd.f32 %v406_v37, %v337_v42 }
 0x11f   :  { %410 = vst [vmem:[%s981_s3] sm:$0xff] %v407_v43 }

// kernel: cnn_forward.3
= control target key start
LH: loop header
LB: loop body
LE: loop exit
PB: predicated region body
PF: predicated region fallthrough
CT: control target
= control target key end

     0   :  { %9 = vsyncpa [#allocation3], 0  ;;  %s8796_s15 = smov [#allocation2]   ;;  %s13907_s0 = inlined_call_operand.vmem [shape: f32[1,8192], index: 0, kind: input, shape index: {}]   ;;  %s13908_s1 = inlined_call_operand.vmem [shape: f32[8,9], index: 1, kind: input, shape index: {}]   ;;  %s13909_s2 = inlined_call_operand.vmem [shape: f32[8,1], index: 2, kind: input, shape index: {}]   ;;  %s13910_s3 = inlined_call_operand.hbm [shape: f32[807,256], index: 3, kind: input, shape index: {}]   ;;  %s13911_s4 = inlined_call_operand.vmem [shape: f32[8,2048], index: 4, kind: output, shape index: {}]  }
   0x1   :  { %s21_s16 = sshll.u32 %s8796_s15, 4  ;;  %s8772_s19 = scalar_lea.hbm %s13910_s3, 25856  ;;  %s22_s16 = int_to_ptr.vmem [resolvable:$true] %s21_s16 }
   0x2   :  { %p8773_p0 = scmp.ne.s32.totalorder %s13910_s3, %s8772_s19  ;;  %p8776_p1 = scmp.lt.u32.totalorder %s8772_s19, %s13910_s3 }
   0x4   :  { %p8778_p2 = pnand %p8776_p1, %p8773_p0 }
   0x6   :  { %8781 = shalt.err (!%p8778_p2)
}
   0x7   :  { %s8782_s24 = scalar_lea.vmem %s22_s16, 25856  ;;  %p8787_p4 = scmp.lt.s32.totalorder %s22_s16, %s22_s16 }
   0x8   :  { %p8783_p3 = scmp.ne.s32.totalorder %s22_s16, %s8782_s24  ;;  %p8788_p5 = scmp.lt.s32.totalorder %s8782_s24, %s8782_s24 }
   0xa   :  { %p8789_p6 = por %p8788_p5, %p8787_p4 }
   0xc   :  { %p8790_p7 = pnand %p8789_p6, %p8783_p3 }
   0xe   :  { %8793 = shalt.err (!%p8790_p7)
}
   0xf   :  { %s8797_s25 = smov 256   ;;  %s8798_s26 = smov 16  }
  0x10   :  { %27 = dma.hbm_to_vmem [thread:$0]  %s13910_s3, 25856, %s22_s16, [#allocation3], %s8797_s25, %s8797_s25, %s8798_s26  }
  0x11   :  { %8794 = dma.done.wait [#allocation3], 25856  }
  0x12   :  { %8795 = vsyncadd [#allocation3], 4294941440  ;;  %v47_v0 = vlaneseq  ;;  %v31_v10 = vld [vmem:[%s13907_s0] sm:$0xff]  ;;  %v32_v15 = vld [vmem:[%s13907_s0 + $0x8] sm:$0xff]  ;;  %s8799_s6 = smov 127   ;;  %s8801_s19 = smov 98  }
  0x13   :  { %v33_v34 = vld [vmem:[%s13907_s0 + $0x10] sm:$0xff]  ;;  %v34_v47 = vld [vmem:[%s13907_s0 + $0x18] sm:$0xff]  ;;  %v35_v60 = vld [vmem:[%s13907_s0 + $0x20] sm:$0xff]  ;;  %vm495_vm0 = vcmask 1039360   ;;  %vm2351_vm1 = vcmask 1040384   ;;  %s8802_s20 = smov 97  }
  0x14   :  { %v48_v1 = vshrl.u32 %v47_v0, 7  ;;  %vm751_vm2 = vcmask 1031168   ;;  %vm2416_vm3 = vcmask 1041408   ;;  %s8803_s21 = smov 96   ;;  %vm1007_vm4 = vcmask 801792   ;;  %s8804_s22 = smov 68  }
  0x15   :  { %vm2481_vm5 = vcmask 1042432   ;;  %s8805_s23 = smov 67   ;;  %s8806_s24 = smov 66   ;;  %vm1263_vm6 = vcmask 793600   ;;  %vm2546_vm7 = vcmask 1043456   ;;  %vm1519_vm8 = vcmask 785408  }
  0x16   :  { %v8847_v2 = vsub.s32 4, %v48_v1  ;;  %v8849_v3 = vsub.s32 5, %v48_v1  ;;  %v8851_v4 = vsub.s32 0, %v48_v1  ;;  %v8853_v5 = vsub.s32 1, %v48_v1 }
  0x17   :  { %v8855_v6 = vsub.s32 6, %v48_v1  ;;  %v8857_v7 = vsub.s32 7, %v48_v1  ;;  %v8859_v8 = vsub.s32 2, %v48_v1  ;;  %v8861_v9 = vsub.s32 3, %v48_v1 }
  0x18   :  { %v8867_v11 = vrot.slane %v31_v10, %v8847_v2  ;;  %v8870_v12 = vrot.slane %v31_v10, %v8849_v3  ;;  %v8873_v13 = vrot.slane %v31_v10, %v8851_v4  ;;  %v8876_v14 = vrot.slane %v31_v10, %v8853_v5 }
  0x19   :  { %v8882_v16 = vrot.slane %v31_v10, %v8855_v6  ;;  %v8885_v17 = vrot.slane %v31_v10, %v8857_v7  ;;  %v8888_v18 = vrot.slane %v31_v10, %v8859_v8  ;;  %v8891_v19 = vrot.slane %v31_v10, %v8861_v9 }
  0x1a   :  { %14207 = vst [vmem:[#allocation5_spill] sm:$0xff] %v8867_v11  ;;  %14208 = vst [vmem:[#allocation6_spill] sm:$0xff] %v8870_v12  ;;  %v8895_v20 = vpack.i.bf16 %v8870_v12, %v8867_v11  ;;  %v8899_v21 = vpack.i.bf16 %v8876_v14, %v8873_v13  ;;  %v8906_v23 = vrot.slane %v32_v15, %v8859_v8  ;;  %vm1775_vm9 = vcmask 556032  }
  0x1b   :  { %14209 = vst [vmem:[#allocation7_spill] sm:$0xff] %v8873_v13  ;;  %14210 = vst [vmem:[#allocation8_spill] sm:$0xff] %v8876_v14  ;;  %v8903_v22 = vpack.i.bf16 %v8885_v17, %v8882_v16  ;;  %v8909_v24 = vrot.slane %v32_v15, %v8861_v9  ;;  %v8917_v25 = vpack.i.bf16 %v8891_v19, %v8888_v18  ;;  %vm2611_vm10 = vcmask 1044480  }
  0x1c   :  { %14211 = vst [vmem:[#allocation9_spill] sm:$0xff] %v8882_v16  ;;  %14212 = vst [vmem:[#allocation10_spill] sm:$0xff] %v8885_v17  ;;  %7301 = vrot.lane.b32.xlu1 %v8895_v20, %s8799_s6  ;;  %7291 = vrot.lane.b32.xlu0 %v8899_v21, %s8799_s6  ;;  %v8920_v26 = vrot.slane %v32_v15, %v8851_v4  ;;  %v8923_v27 = vrot.slane %v32_v15, %v8853_v5  ;;  %vm2031_vm11 = vcmask 547840   ;;  %vm2676_vm12 = vcmask 1045504  }
  0x1d   :  { %14213 = vst [vmem:[#allocation11_spill] sm:$0xff] %v8888_v18  ;;  %14214 = vst [vmem:[#allocation12_spill] sm:$0xff] %v8891_v19  ;;  %v8927_v28 = vpack.i.bf16 %v8909_v24, %v8906_v23  ;;  %v8930_v29 = vrot.slane %v32_v15, %v8855_v6  ;;  %v8933_v30 = vrot.slane %v32_v15, %v8857_v7  ;;  %v37_v19 = vld [vmem:[%s13907_s0 + $0x30] sm:$0xff]  ;;  %vm2287_vm13 = vcmask 539648  }
  0x1e   :  { %14215 = vst [vmem:[#allocation13_spill] sm:$0xff] %v8906_v23  ;;  %14216 = vst [vmem:[#allocation14_spill] sm:$0xff] %v8909_v24  ;;  %v8941_v31 = vpack.i.bf16 %v8923_v27, %v8920_v26  ;;  %v8944_v32 = vrot.slane %v32_v15, %v8847_v2  ;;  %v8947_v33 = vrot.slane %v32_v15, %v8849_v3  ;;  %vm2741_vm14 = vcmask 1046528  }
  0x1f   :  { %14217 = vst [vmem:[#allocation15_spill] sm:$0xff] %v8920_v26  ;;  %14218 = vst [vmem:[#allocation16_spill] sm:$0xff] %v8923_v27  ;;  %v8954_v35 = vpack.i.bf16 %v8933_v30, %v8930_v29  ;;  %v8957_v36 = vrot.slane %v33_v34, %v8859_v8  ;;  %v8960_v37 = vrot.slane %v33_v34, %v8861_v9  ;;  %vm8809_vm15 = vmmov 1  }
  0x20   :  { %14219 = vst [vmem:[#allocation17_spill] sm:$0xff] %v8927_v28  ;;  %14220 = vst [vmem:[#allocation18_spill] sm:$0xff] %v8930_v29  ;;  %7306 = vrot.lane.b32.xlu1 %v8903_v22, %s8799_s6  ;;  %7296 = vrot.lane.b32.xlu0 %v8917_v25, %s8799_s6  ;;  %v8968_v38 = vpack.i.bf16 %v8947_v33, %v8944_v32  ;;  %v8971_v39 = vrot.slane %v33_v34, %v8851_v4 }
  0x21   :  { %14221 = vst [vmem:[#allocation19_spill] sm:$0xff] %v8933_v30  ;;  %14222 = vst [vmem:[#allocation20_spill] sm:$0xff] %v8941_v31  ;;  %v8974_v40 = vrot.slane %v33_v34, %v8853_v5  ;;  %v8977_v41 = vrot.slane %v33_v34, %v8855_v6  ;;  %v8980_v42 = vrot.slane %v33_v34, %v8857_v7 }
  0x22   :  { %14223 = vst [vmem:[#allocation21_spill] sm:$0xff] %v8944_v32  ;;  %14224 = vst [vmem:[#allocation22_spill] sm:$0xff] %v8947_v33  ;;  %v8983_v43 = vrot.slane %v33_v34, %v8847_v2  ;;  %v8991_v44 = vpack.i.bf16 %v8960_v37, %v8957_v36  ;;  %v8998_v46 = vrot.slane %v33_v34, %v8849_v3 }
  0x23   :  { %14225 = vst [vmem:[#allocation23_spill] sm:$0xff] %v8954_v35  ;;  %14226 = vst [vmem:[#allocation24_spill] sm:$0xff] %v8957_v36  ;;  %v8995_v45 = vpack.i.bf16 %v8974_v40, %v8971_v39  ;;  %v9005_v48 = vpack.i.bf16 %v8980_v42, %v8977_v41  ;;  %v9008_v49 = vrot.slane %v34_v47, %v8859_v8 }
  0x24   :  { %14227 = vst [vmem:[#allocation25_spill] sm:$0xff] %v8960_v37  ;;  %7316 = vrot.lane.b32.xlu1 %v8927_v28, %s8799_s6  ;;  %7311 = vrot.lane.b32.xlu0 %v8941_v31, %s8799_s6  ;;  %14228 = vst [vmem:[#allocation26_spill] sm:$0xff] %v8968_v38  ;;  %v9011_v50 = vrot.slane %v34_v47, %v8861_v9  ;;  %v9019_v51 = vpack.i.bf16 %v8998_v46, %v8983_v43 }
  0x25   :  { %14229 = vst [vmem:[#allocation27_spill] sm:$0xff] %v8971_v39  ;;  %14230 = vst [vmem:[#allocation28_spill] sm:$0xff] %v8974_v40  ;;  %v9022_v52 = vrot.slane %v34_v47, %v8851_v4  ;;  %v9025_v53 = vrot.slane %v34_v47, %v8853_v5  ;;  %v9032_v55 = vrot.slane %v34_v47, %v8855_v6  ;;  %v36_v40 = vld [vmem:[%s13907_s0 + $0x28] sm:$0xff] }
  0x26   :  { %14231 = vst [vmem:[#allocation29_spill] sm:$0xff] %v8991_v44  ;;  %14232 = vst [vmem:[#allocation30_spill] sm:$0xff] %v8995_v45  ;;  %v9029_v54 = vpack.i.bf16 %v9011_v50, %v9008_v49  ;;  %v9035_v56 = vrot.slane %v34_v47, %v8857_v7  ;;  %v9046_v58 = vrot.slane %v34_v47, %v8847_v2 }
  0x27   :  { %14233 = vst [vmem:[#allocation31_spill] sm:$0xff] %v9005_v48  ;;  %14234 = vst [vmem:[#allocation32_spill] sm:$0xff] %v9019_v51  ;;  %v9043_v57 = vpack.i.bf16 %v9025_v53, %v9022_v52  ;;  %v9049_v59 = vrot.slane %v34_v47, %v8849_v3  ;;  %v9059_v62 = vrot.slane %v35_v60, %v8859_v8 }
  0x28   :  { %7326 = vrot.lane.b32.xlu1 %v8954_v35, %s8799_s6  ;;  %7321 = vrot.lane.b32.xlu0 %v8968_v38, %s8799_s6  ;;  %14235 = vst [vmem:[#allocation33_spill] sm:$0xff] %v9029_v54  ;;  %v9056_v61 = vpack.i.bf16 %v9035_v56, %v9032_v55  ;;  %v9062_v63 = vrot.slane %v35_v60, %v8861_v9 }
  0x29   :  { %14236 = vst [vmem:[#allocation34_spill] sm:$0xff] %v9043_v57  ;;  %v9070_v0 = vpack.i.bf16 %v9049_v59, %v9046_v58  ;;  %v9073_v1 = vrot.slane %v35_v60, %v8851_v4  ;;  %v9076_v10 = vrot.slane %v35_v60, %v8853_v5  ;;  %v9083_v34 = vrot.slane %v35_v60, %v8855_v6 }
  0x2a   :  { %14237 = vst [vmem:[#allocation35_spill] sm:$0xff] %v9056_v61  ;;  %v9080_v15 = vpack.i.bf16 %v9062_v63, %v9059_v62  ;;  %v9086_v47 = vrot.slane %v35_v60, %v8857_v7  ;;  %v9097_v39 = vrot.slane %v35_v60, %v8847_v2  ;;  %v9100_v30 = vrot.slane %v35_v60, %v8849_v3 }
  0x2b   :  { %14238 = vst [vmem:[#allocation36_spill] sm:$0xff] %v9070_v0  ;;  %v9094_v37 = vpack.i.bf16 %v9076_v10, %v9073_v1  ;;  %v9106_v36 = vrot.slane %v36_v40, %v8859_v8  ;;  %v9109_v32 = vrot.slane %v36_v40, %v8861_v9  ;;  %v9112_v24 = vrot.slane %v36_v40, %v8851_v4 }
  0x2c   :  { %7336 = vrot.lane.b32.xlu1 %v8991_v44, %s8799_s6  ;;  %7331 = vrot.lane.b32.xlu0 %v8995_v45, %s8799_s6  ;;  %14239 = vst [vmem:[#allocation37_spill] sm:$0xff] %v9080_v15  ;;  %14240 = vst [vmem:[#allocation38_spill] sm:$0xff] %v9086_v47  ;;  %v9120_v60 = vpack.i.bf16 %v9086_v47, %v9083_v34  ;;  %v9124_v33 = vpack.i.bf16 %v9100_v30, %v9097_v39 }
  0x2d   :  { %14241 = vst [vmem:[#allocation39_spill] sm:$0xff] %v9094_v37  ;;  %14242 = vst [vmem:[#allocation40_spill] sm:$0xff] %v9109_v32  ;;  %v9127_v29 = vrot.slane %v36_v40, %v8853_v5  ;;  %v9131_v26 = vpack.i.bf16 %v9109_v32, %v9106_v36  ;;  %v9134_v17 = vrot.slane %v36_v40, %v8855_v6 }
  0x2e   :  { %14243 = vst [vmem:[#allocation41_spill] sm:$0xff] %v9112_v24  ;;  %14244 = vst [vmem:[#allocation42_spill] sm:$0xff] %v9120_v60  ;;  %v9137_v27 = vrot.slane %v36_v40, %v8857_v7  ;;  %v9148_v18 = vrot.slane %v36_v40, %v8847_v2  ;;  %v9151_v14 = vrot.slane %v36_v40, %v8849_v3 }
  0x2f   :  { %14245 = vst [vmem:[#allocation43_spill] sm:$0xff] %v9124_v33  ;;  %14246 = vst [vmem:[#allocation44_spill] sm:$0xff] %v9127_v29  ;;  %v9145_v23 = vpack.i.bf16 %v9127_v29, %v9112_v24  ;;  %v9161_v12 = vrot.slane %v37_v19, %v8859_v8  ;;  %v9164_v13 = vrot.slane %v37_v19, %v8861_v9 }
  0x30   :  { %7346 = vrot.lane.b32.xlu1 %v9005_v48, %s8799_s6  ;;  %7341 = vrot.lane.b32.xlu0 %v9019_v51, %s8799_s6  ;;  %14247 = vst [vmem:[#allocation45_spill] sm:$0xff] %v9131_v26  ;;  %14248 = vst [vmem:[#allocation46_spill] sm:$0xff] %v9134_v17  ;;  %v9158_v16 = vpack.i.bf16 %v9137_v27, %v9134_v17  ;;  %v9172_v40 = vpack.i.bf16 %v9151_v14, %v9148_v18 }
  0x31   :  { %14249 = vst [vmem:[#allocation47_spill] sm:$0xff] %v9137_v27  ;;  %14250 = vst [vmem:[#allocation48_spill] sm:$0xff] %v9145_v23  ;;  %v9175_v11 = vrot.slane %v37_v19, %v8851_v4  ;;  %v9178_v27 = vrot.slane %v37_v19, %v8853_v5  ;;  %v9182_v32 = vpack.i.bf16 %v9164_v13, %v9161_v12 }
  0x32   :  { %14251 = vst [vmem:[#allocation49_spill] sm:$0xff] %v9148_v18  ;;  %14252 = vst [vmem:[#allocation50_spill] sm:$0xff] %v9151_v14  ;;  %v9185_v17 = vrot.slane %v37_v19, %v8855_v6  ;;  %v9188_v24 = vrot.slane %v37_v19, %v8857_v7  ;;  %v9199_v14 = vrot.slane %v37_v19, %v8847_v2 }
  0x33   :  { %14253 = vst [vmem:[#allocation51_spill] sm:$0xff] %v9158_v16  ;;  %14254 = vst [vmem:[#allocation52_spill] sm:$0xff] %v9161_v12  ;;  %v9196_v18 = vpack.i.bf16 %v9178_v27, %v9175_v11  ;;  %v38_v12 = vld [vmem:[%s13907_s0 + $0x38] sm:$0xff]  ;;  %s8800_s0 = smov 126  }
  0x34   :  { %7356 = vrot.lane.b32.xlu1 %v9029_v54, %s8799_s6  ;;  %7351 = vrot.lane.b32.xlu0 %v9043_v57, %s8799_s6  ;;  %14255 = vst [vmem:[#allocation53_spill] sm:$0xff] %v9164_v13  ;;  %14256 = vst [vmem:[#allocation54_spill] sm:$0xff] %v9172_v40  ;;  %v9202_v13 = vrot.slane %v37_v19, %v8849_v3  ;;  %v9209_v47 = vpack.i.bf16 %v9188_v24, %v9185_v17 }
  0x35   :  { %14257 = vst [vmem:[#allocation55_spill] sm:$0xff] %v9175_v11  ;;  %14258 = vst [vmem:[#allocation56_spill] sm:$0xff] %v9178_v27  ;;  %v9212_v29 = vrot.slane %v38_v12, %v8859_v8  ;;  %v9215_v11 = vrot.slane %v38_v12, %v8861_v9  ;;  %v9226_v27 = vrot.slane %v38_v12, %v8851_v4 }
  0x36   :  { %14259 = vst [vmem:[#allocation57_spill] sm:$0xff] %v9182_v32  ;;  %14260 = vst [vmem:[#allocation58_spill] sm:$0xff] %v9185_v17  ;;  %v9223_v19 = vpack.i.bf16 %v9202_v13, %v9199_v14  ;;  %v9232_v8 = vrot.slane %v38_v12, %v8855_v6  ;;  %v9235_v9 = vrot.slane %v38_v12, %v8857_v7 }
  0x37   :  { %14261 = vst [vmem:[#allocation59_spill] sm:$0xff] %v9188_v24  ;;  %14262 = vst [vmem:[#allocation60_spill] sm:$0xff] %v9196_v18  ;;  %v9229_v24 = vrot.slane %v38_v12, %v8853_v5  ;;  %v9238_v17 = vrot.slane %v38_v12, %v8847_v2  ;;  %v9246_v4 = vpack.i.bf16 %v9215_v11, %v9212_v29 }
  0x38   :  { %7366 = vrot.lane.b32.xlu1 %v9056_v61, %s8799_s6  ;;  %7361 = vrot.lane.b32.xlu0 %v9070_v0, %s8799_s6  ;;  %14263 = vst [vmem:[#allocation61_spill] sm:$0xff] %v9199_v14  ;;  %14264 = vst [vmem:[#allocation62_spill] sm:$0xff] %v9202_v13  ;;  %v9253_v6 = vrot.slane %v38_v12, %v8849_v3  ;;  %v9261_v2 = vpack.i.bf16 %v9235_v9, %v9232_v8 }
  0x39   :  { %14265 = vst [vmem:[#allocation63_spill] sm:$0xff] %v9209_v47  ;;  %14266 = vst [vmem:[#allocation64_spill] sm:$0xff] %v9212_v29  ;;  %v9250_v5 = vpack.i.bf16 %v9229_v24, %v9226_v27 }
  0x3a   :  { %14267 = vst [vmem:[#allocation65_spill] sm:$0xff] %v9215_v11  ;;  %14268 = vst [vmem:[#allocation66_spill] sm:$0xff] %v9223_v19  ;;  %v9265_v7 = vpack.i.bf16 %v9253_v6, %v9238_v17 }
  0x3b   :  { %14269 = vst [vmem:[#allocation67_spill] sm:$0xff] %v9226_v27  ;;  %14270 = vst [vmem:[#allocation68_spill] sm:$0xff] %v9229_v24 }
  0x3c   :  { %7376 = vrot.lane.b32.xlu1 %v9080_v15, %s8799_s6  ;;  %7371 = vrot.lane.b32.xlu0 %v9094_v37, %s8799_s6  ;;  %14271 = vst [vmem:[#allocation69_spill] sm:$0xff] %v9232_v8  ;;  %14272 = vst [vmem:[#allocation70_spill] sm:$0xff] %v9235_v9 }
  0x3d   :  { %14273 = vst [vmem:[#allocation71_spill] sm:$0xff] %v9238_v17  ;;  %14274 = vst [vmem:[#allocation72_spill] sm:$0xff] %v9246_v4 }
  0x3e   :  { %14275 = vst [vmem:[#allocation73_spill] sm:$0xff] %v9250_v5  ;;  %14276 = vst [vmem:[#allocation74_spill] sm:$0xff] %v9253_v6 }
  0x3f   :  { %14277 = vst [vmem:[#allocation75_spill] sm:$0xff] %v9261_v2  ;;  %14278 = vst [vmem:[#allocation76_spill] sm:$0xff] %v9265_v7 }
  0x40   :  { %7386 = vrot.lane.b32.xlu1 %v9120_v60, %s8799_s6  ;;  %7381 = vrot.lane.b32.xlu0 %v9124_v33, %s8799_s6 }
  0x44   :  { %7396 = vrot.lane.b32.xlu1 %v9131_v26, %s8799_s6  ;;  %7391 = vrot.lane.b32.xlu0 %v9145_v23, %s8799_s6 }
  0x48   :  { %7406 = vrot.lane.b32.xlu1 %v9158_v16, %s8799_s6  ;;  %7401 = vrot.lane.b32.xlu0 %v9172_v40, %s8799_s6 }
  0x4c   :  { %7416 = vrot.lane.b32.xlu1 %v9182_v32, %s8799_s6  ;;  %7411 = vrot.lane.b32.xlu0 %v9196_v18, %s8799_s6 }
  0x50   :  { %7426 = vrot.lane.b32.xlu1 %v9209_v47, %s8799_s6  ;;  %7421 = vrot.lane.b32.xlu0 %v9223_v19, %s8799_s6 }
  0x54   :  { %7436 = vrot.lane.b32.xlu1 %v9246_v4, %s8799_s6  ;;  %7431 = vrot.lane.b32.xlu0 %v9250_v5, %s8799_s6 }
  0x58   :  { %7446 = vrot.lane.b32.xlu1 %v9261_v2, %s8799_s6  ;;  %7441 = vrot.lane.b32.xlu0 %v9265_v7, %s8799_s6 }
  0x5c   :  { %7456 = vrot.lane.b32.xlu1 %v8917_v25, %s8800_s0  ;;  %7451 = vrot.lane.b32.xlu0 %v8899_v21, %s8800_s0 }
  0x60   :  { %7466 = vrot.lane.b32.xlu1 %v8903_v22, %s8800_s0  ;;  %7461 = vrot.lane.b32.xlu0 %v8895_v20, %s8800_s0 }
  0x64   :  { %7476 = vrot.lane.b32.xlu1 %v8927_v28, %s8800_s0  ;;  %7471 = vrot.lane.b32.xlu0 %v8941_v31, %s8800_s0 }
  0x68   :  { %7486 = vrot.lane.b32.xlu1 %v8954_v35, %s8800_s0  ;;  %7481 = vrot.lane.b32.xlu0 %v8968_v38, %s8800_s0 }
  0x6c   :  { %7496 = vrot.lane.b32.xlu1 %v8991_v44, %s8800_s0  ;;  %7491 = vrot.lane.b32.xlu0 %v8995_v45, %s8800_s0 }
  0x70   :  { %7506 = vrot.lane.b32.xlu1 %v9005_v48, %s8800_s0  ;;  %7501 = vrot.lane.b32.xlu0 %v9019_v51, %s8800_s0 }
  0x74   :  { %7516 = vrot.lane.b32.xlu1 %v9029_v54, %s8800_s0  ;;  %7511 = vrot.lane.b32.xlu0 %v9043_v57, %s8800_s0 }
  0x78   :  { %7526 = vrot.lane.b32.xlu1 %v9056_v61, %s8800_s0  ;;  %7521 = vrot.lane.b32.xlu0 %v9070_v0, %s8800_s0 }
  0x7c   :  { %7536 = vrot.lane.b32.xlu1 %v9080_v15, %s8800_s0  ;;  %7531 = vrot.lane.b32.xlu0 %v9094_v37, %s8800_s0 }
  0x80   :  { %7546 = vrot.lane.b32.xlu1 %v9120_v60, %s8800_s0  ;;  %7541 = vrot.lane.b32.xlu0 %v9124_v33, %s8800_s0 }
  0x84   :  { %7556 = vrot.lane.b32.xlu1 %v9131_v26, %s8800_s0  ;;  %7551 = vrot.lane.b32.xlu0 %v9145_v23, %s8800_s0 }
  0x88   :  { %7566 = vrot.lane.b32.xlu1 %v9158_v16, %s8800_s0  ;;  %7561 = vrot.lane.b32.xlu0 %v9172_v40, %s8800_s0 }
  0x8c   :  { %7576 = vrot.lane.b32.xlu1 %v9182_v32, %s8800_s0  ;;  %7571 = vrot.lane.b32.xlu0 %v9196_v18, %s8800_s0 }
  0x8e   :  { %v9323_v3 = vpop.permute.xlu1 %7301  ;;  %v9325_v12 = vpop.permute.xlu0 %7291 }
  0x90   :  { %7586 = vrot.lane.b32.xlu1 %v9209_v47, %s8800_s0  ;;  %7581 = vrot.lane.b32.xlu0 %v9223_v19, %s8800_s0 }
  0x92   :  { %v9331_v9 = vpop.permute.xlu1 %7306  ;;  %v9333_v17 = vpop.permute.xlu0 %7296 }
  0x94   :  { %7596 = vrot.lane.b32.xlu1 %v9246_v4, %s8800_s0  ;;  %7591 = vrot.lane.b32.xlu0 %v9250_v5, %s8800_s0 }
  0x96   :  { %v9339_v11 = vpop.permute.xlu1 %7316  ;;  %v9341_v6 = vpop.permute.xlu0 %7311 }
  0x97   :  { %14279 = vst [vmem:[#allocation77_spill] sm:$0xff] %v9339_v11  ;;  %14280 = vst [vmem:[#allocation78_spill] sm:$0xff] %v9341_v6 }
  0x98   :  { %7606 = vrot.lane.b32.xlu1 %v9261_v2, %s8800_s0  ;;  %7601 = vrot.lane.b32.xlu0 %v9265_v7, %s8800_s0 }
  0x9a   :  { %v9347_v8 = vpop.permute.xlu1 %7326  ;;  %v9349_v27 = vpop.permute.xlu0 %7321 }
  0x9b   :  { %14281 = vst [vmem:[#allocation79_spill] sm:$0xff] %v9347_v8  ;;  %14282 = vst [vmem:[#allocation80_spill] sm:$0xff] %v9349_v27 }
  0x9c   :  { %7616 = vrot.lane.b32.xlu1 %v8917_v25, %s8801_s19  ;;  %7611 = vrot.lane.b32.xlu0 %v8899_v21, %s8801_s19 }
  0x9e   :  { %v9355_v11 = vpop.permute.xlu1 %7336  ;;  %v9357_v6 = vpop.permute.xlu0 %7331 }
  0x9f   :  { %14283 = vst [vmem:[#allocation81_spill] sm:$0xff] %v9355_v11  ;;  %14284 = vst [vmem:[#allocation82_spill] sm:$0xff] %v9357_v6 }
  0xa0   :  { %7626 = vrot.lane.b32.xlu1 %v8903_v22, %s8801_s19  ;;  %7621 = vrot.lane.b32.xlu0 %v8895_v20, %s8801_s19 }
  0xa2   :  { %v9363_v8 = vpop.permute.xlu1 %7346  ;;  %v9365_v27 = vpop.permute.xlu0 %7341 }
  0xa3   :  { %14285 = vst [vmem:[#allocation83_spill] sm:$0xff] %v9365_v27 }
  0xa4   :  { %7636 = vrot.lane.b32.xlu1 %v8927_v28, %s8801_s19  ;;  %7631 = vrot.lane.b32.xlu0 %v8941_v31, %s8801_s19 }
  0xa6   :  { %v9371_v24 = vpop.permute.xlu1 %7356  ;;  %v9373_v11 = vpop.permute.xlu0 %7351 }
  0xa8   :  { %7646 = vrot.lane.b32.xlu1 %v8954_v35, %s8801_s19  ;;  %7641 = vrot.lane.b32.xlu0 %v8968_v38, %s8801_s19 }
  0xaa   :  { %v9379_v6 = vpop.permute.xlu1 %7366  ;;  %v9381_v29 = vpop.permute.xlu0 %7361 }
  0xab   :  { %v7369_v28 = vunpack.i.h.bf16 %v9379_v6 }
  0xac   :  { %7656 = vrot.lane.b32.xlu1 %v8991_v44, %s8801_s19  ;;  %7651 = vrot.lane.b32.xlu0 %v8995_v45, %s8801_s19 }
  0xae   :  { %v9387_v14 = vpop.permute.xlu1 %7376  ;;  %v9389_v13 = vpop.permute.xlu0 %7371 }
  0xb0   :  { %7666 = vrot.lane.b32.xlu1 %v9005_v48, %s8801_s19  ;;  %7661 = vrot.lane.b32.xlu0 %v9019_v51, %s8801_s19 }
  0xb2   :  { %v9395_v38 = vpop.permute.xlu1 %7386  ;;  %v9397_v35 = vpop.permute.xlu0 %7381 }
  0xb4   :  { %7676 = vrot.lane.b32.xlu1 %v9029_v54, %s8801_s19  ;;  %7671 = vrot.lane.b32.xlu0 %v9043_v57, %s8801_s19 }
  0xb6   :  { %v9403_v45 = vpop.permute.xlu1 %7396  ;;  %v9405_v44 = vpop.permute.xlu0 %7391 }
  0xb8   :  { %7686 = vrot.lane.b32.xlu1 %v9056_v61, %s8801_s19  ;;  %7681 = vrot.lane.b32.xlu0 %v9070_v0, %s8801_s19 }
  0xba   :  { %v9411_v51 = vpop.permute.xlu1 %7406  ;;  %v9413_v48 = vpop.permute.xlu0 %7401 }
  0xbc   :  { %7696 = vrot.lane.b32.xlu1 %v9080_v15, %s8801_s19  ;;  %7691 = vrot.lane.b32.xlu0 %v9094_v37, %s8801_s19 }
  0xbe   :  { %v9419_v57 = vpop.permute.xlu1 %7416  ;;  %v9421_v54 = vpop.permute.xlu0 %7411 }
  0xc0   :  { %7706 = vrot.lane.b32.xlu1 %v9120_v60, %s8801_s19  ;;  %7701 = vrot.lane.b32.xlu0 %v9124_v33, %s8801_s19  ;;  %v7349_v33 = vunpack.i.h.bf16 %v9363_v8  ;;  %v7348_v60 = vunpack.i.l.bf16 %v9363_v8  ;;  %v7354_v8 = vunpack.i.h.bf16 %v9373_v11 }
  0xc2   :  { %v9427_v0 = vpop.permute.xlu1 %7426  ;;  %v9429_v61 = vpop.permute.xlu0 %7421 }
  0xc3   :  { %14286 = vst [vmem:[#allocation84_spill] sm:$0xff] %v9427_v0  ;;  %14287 = vst [vmem:[#allocation85_spill] sm:$0xff] %v9429_v61  ;;  %v7359_v0 = vunpack.i.h.bf16 %v9371_v24 }
  0xc4   :  { %7716 = vrot.lane.b32.xlu1 %v9131_v26, %s8801_s19  ;;  %7711 = vrot.lane.b32.xlu0 %v9145_v23, %s8801_s19  ;;  %v7344_v26 = vunpack.i.h.bf16 %v9365_v27  ;;  %v518_v23 = vsel %vm495_vm0, %v7348_v60, %v7349_v33 }
  0xc6   :  { %v9435_v37 = vpop.permute.xlu1 %7436  ;;  %v9437_v15 = vpop.permute.xlu0 %7431 }
  0xc7   :  { %14288 = vst [vmem:[#allocation86_spill] sm:$0xff] %v9435_v37  ;;  %14289 = vst [vmem:[#allocation87_spill] sm:$0xff] %v9437_v15 }
  0xc8   :  { %7726 = vrot.lane.b32.xlu1 %v9158_v16, %s8801_s19  ;;  %7721 = vrot.lane.b32.xlu0 %v9172_v40, %s8801_s19  ;;  %v7293_v16 = vunpack.i.l.bf16 %v9325_v12  ;;  %v7353_v40 = vunpack.i.l.bf16 %v9373_v11 }
  0xca   :  { %v9447_v61 = vpop.permute.xlu1 %7446  ;;  %v9449_v37 = vpop.permute.xlu0 %7441 }
  0xcb   :  { %14290 = vst [vmem:[#allocation88_spill] sm:$0xff] %v9447_v61  ;;  %14291 = vst [vmem:[#allocation89_spill] sm:$0xff] %v9449_v37  ;;  %v517_v61 = vsel %vm495_vm0, %v7344_v26, %v7348_v60  ;;  %v14292_v37 = vunpack.i.l.bf16 %v9365_v27  ;;  %v7368_v60 = vunpack.i.l.bf16 %v9379_v6  ;;  %v7364_v27 = vunpack.i.h.bf16 %v9381_v29 }
  0xcc   :  { %7736 = vrot.lane.b32.xlu1 %v9182_v32, %s8801_s19  ;;  %7731 = vrot.lane.b32.xlu0 %v9196_v18, %s8801_s19  ;;  %v7358_v32 = vunpack.i.l.bf16 %v9371_v24  ;;  %v14295_v24 = vunpack.i.h.bf16 %v9323_v3 }
  0xcd   :  { %v516_v15 = vsel %vm495_vm0, %v14292_v37, %v7344_v26  ;;  %v7363_v26 = vunpack.i.l.bf16 %v9381_v29  ;;  %v14296_v37 = vunpack.i.l.bf16 %v9323_v3  ;;  %v519_v29 = vsel %vm495_vm0, %v7349_v33, %v7353_v40 }
  0xce   :  { %v9466_v31 = vpop.permute.xlu1 %7456  ;;  %v9468_v18 = vpop.permute.xlu0 %7451  ;;  %v7378_v33 = vunpack.i.l.bf16 %v9387_v14 }
  0xcf   :  { %14293 = vst [vmem:[#allocation90_spill] sm:$0xff] %v9466_v31  ;;  %14294 = vst [vmem:[#allocation91_spill] sm:$0xff] %v9468_v18  ;;  %v9485_v11 = vsel %vm495_vm0, %v14296_v37, %v14295_v24  ;;  %v14297_v18 = vunpack.i.h.bf16 %v9325_v12  ;;  %v9495_v31 = vsel %vm2351_vm1, %v8977_v41, %v518_v23  ;;  %v522_v24 = vsel %vm495_vm0, %v7358_v32, %v7359_v0 }
  0xd0   :  { %7746 = vrot.lane.b32.xlu1 %v9209_v47, %s8801_s19  ;;  %7741 = vrot.lane.b32.xlu0 %v9223_v19, %s8801_s19  ;;  %v9499_v19 = vsel %vm2351_vm1, %v8998_v46, %v517_v61  ;;  %v9503_v47 = vsel %vm2351_vm1, %v8983_v43, %v516_v15  ;;  %v520_v23 = vsel %vm495_vm0, %v7353_v40, %v7354_v8  ;;  %v7374_v40 = vunpack.i.h.bf16 %v9389_v13 }
  0xd1   :  { %v9490_v6 = vsel %vm495_vm0, %v7293_v16, %v14297_v18  ;;  %v521_v18 = vsel %vm495_vm0, %v7354_v8, %v7358_v32  ;;  %v526_v41 = vsel %vm495_vm0, %v7368_v60, %v7369_v28  ;;  %v525_v61 = vsel %vm495_vm0, %v7364_v27, %v7368_v60 }
  0xd2   :  { %v9506_v37 = vpop.permute.xlu1 %7466  ;;  %v9508_v16 = vpop.permute.xlu0 %7461  ;;  %v523_v43 = vsel %vm495_vm0, %v7359_v0, %v7363_v26  ;;  %v524_v15 = vsel %vm495_vm0, %v7363_v26, %v7364_v27  ;;  %v7379_v32 = vunpack.i.h.bf16 %v9387_v14  ;;  %v7373_v8 = vunpack.i.l.bf16 %v9389_v13 }
  0xd3   :  { %14298 = vst [vmem:[#allocation92_spill] sm:$0xff] %v9506_v37  ;;  %14299 = vst [vmem:[#allocation93_spill] sm:$0xff] %v9508_v16  ;;  %v7389_v60 = vunpack.i.h.bf16 %v9395_v38  ;;  %v7388_v0 = vunpack.i.l.bf16 %v9395_v38  ;;  %v7384_v27 = vunpack.i.h.bf16 %v9397_v35  ;;  %v7383_v26 = vunpack.i.l.bf16 %v9397_v35  ;;  %v14309_v35 = vld [vmem:[#allocation41_spill] sm:$0xff] }
  0xd4   :  { %7756 = vrot.lane.b32.xlu1 %v9246_v4, %s8801_s19  ;;  %7751 = vrot.lane.b32.xlu0 %v9250_v5, %s8801_s19  ;;  %v9536_v37 = vsel %vm2351_vm1, %v9008_v49, %v522_v24  ;;  %v9540_v14 = vsel %vm2351_vm1, %v9025_v53, %v521_v18  ;;  %v9544_v13 = vsel %vm2351_vm1, %v8980_v42, %v519_v29 }
  0xd5   :  { %v9548_v38 = vsel %vm2351_vm1, %v9022_v52, %v520_v23  ;;  %v9557_v49 = vsel %vm2351_vm1, %v9049_v59, %v525_v61  ;;  %v9561_v53 = vsel %vm2351_vm1, %v9011_v50, %v523_v43  ;;  %v9569_v42 = vsel %vm2351_vm1, %v9046_v58, %v524_v15 }
  0xd6   :  { %v9530_v46 = vpop.permute.xlu1 %7476  ;;  %v9532_v16 = vpop.permute.xlu0 %7471  ;;  %v530_v52 = vsel %vm495_vm0, %v7378_v33, %v7379_v32  ;;  %v527_v59 = vsel %vm495_vm0, %v7369_v28, %v7373_v8  ;;  %v528_v29 = vsel %vm495_vm0, %v7373_v8, %v7374_v40  ;;  %v534_v50 = vsel %vm495_vm0, %v7388_v0, %v7389_v60 }
  0xd7   :  { %14300 = vst [vmem:[#allocation94_spill] sm:$0xff] %v9530_v46  ;;  %14301 = vst [vmem:[#allocation95_spill] sm:$0xff] %v9532_v16  ;;  %v9553_v16 = vsel %vm2351_vm1, %v9032_v55, %v526_v41  ;;  %v529_v55 = vsel %vm495_vm0, %v7374_v40, %v7378_v33  ;;  %v533_v24 = vsel %vm495_vm0, %v7384_v27, %v7388_v0  ;;  %v7399_v58 = vunpack.i.h.bf16 %v9403_v45  ;;  %v14317_v46 = vld [vmem:[#allocation49_spill] sm:$0xff] }
  0xd8   :  { %7766 = vrot.lane.b32.xlu1 %v9261_v2, %s8801_s19  ;;  %7761 = vrot.lane.b32.xlu0 %v9265_v7, %s8801_s19  ;;  %v531_v18 = vsel %vm495_vm0, %v7379_v32, %v7383_v26  ;;  %v7398_v61 = vunpack.i.l.bf16 %v9403_v45  ;;  %v7394_v43 = vunpack.i.h.bf16 %v9405_v44  ;;  %v7393_v28 = vunpack.i.l.bf16 %v9405_v44 }
  0xd9   :  { %v532_v15 = vsel %vm495_vm0, %v7383_v26, %v7384_v27  ;;  %v7409_v33 = vunpack.i.h.bf16 %v9411_v51  ;;  %v7408_v40 = vunpack.i.l.bf16 %v9411_v51  ;;  %v7404_v32 = vunpack.i.h.bf16 %v9413_v48 }
  0xda   :  { %v9578_v23 = vpop.permute.xlu1 %7486  ;;  %v9580_v41 = vpop.permute.xlu0 %7481  ;;  %v9596_v45 = vsel %vm2351_vm1, %v9059_v62, %v530_v52  ;;  %v9600_v44 = vsel %vm2351_vm1, %v9076_v10, %v529_v55  ;;  %v9604_v51 = vsel %vm2351_vm1, %v9035_v56, %v527_v59  ;;  %v9608_v8 = vsel %vm2351_vm1, %v9073_v1, %v528_v29 }
  0xdb   :  { %14302 = vst [vmem:[#allocation96_spill] sm:$0xff] %v9578_v23  ;;  %14303 = vst [vmem:[#allocation97_spill] sm:$0xff] %v9580_v41  ;;  %v9612_v0 = vsel %vm2351_vm1, %v9083_v34, %v534_v50  ;;  %v9616_v62 = vsel %vm2351_vm1, %v9100_v30, %v533_v24  ;;  %v9620_v10 = vsel %vm2351_vm1, %v9062_v63, %v531_v18  ;;  %v7403_v56 = vunpack.i.l.bf16 %v9413_v48  ;;  %v14306_v18 = vld [vmem:[#allocation44_spill] sm:$0xff] }
  0xdc   :  { %7776 = vrot.lane.b32.xlu1 %v8917_v25, %s8802_s20  ;;  %7771 = vrot.lane.b32.xlu0 %v8899_v21, %s8802_s20  ;;  %v9629_v26 = vsel %vm2351_vm1, %v9097_v39, %v532_v15  ;;  %v538_v34 = vsel %vm495_vm0, %v7398_v61, %v7399_v58  ;;  %v537_v30 = vsel %vm495_vm0, %v7394_v43, %v7398_v61  ;;  %v7418_v29 = vunpack.i.l.bf16 %v9419_v57  ;;  %v14310_v39 = vld [vmem:[#allocation46_spill] sm:$0xff] }
  0xdd   :  { %v535_v52 = vsel %vm495_vm0, %v7389_v60, %v7393_v28  ;;  %v536_v55 = vsel %vm495_vm0, %v7393_v28, %v7394_v43  ;;  %v542_v48 = vsel %vm495_vm0, %v7408_v40, %v7409_v33  ;;  %v541_v59 = vsel %vm495_vm0, %v7404_v32, %v7408_v40  ;;  %v14307_v43 = vld [vmem:[#allocation38_spill] sm:$0xff] }
  0xde   :  { %v9623_v27 = vpop.permute.xlu1 %7496  ;;  %v9625_v1 = vpop.permute.xlu0 %7491  ;;  %v7414_v60 = vunpack.i.h.bf16 %v9421_v54  ;;  %v7413_v50 = vunpack.i.l.bf16 %v9421_v54  ;;  %v9648_v24 = vsel %vm2351_vm1, %v9106_v36, %v538_v34  ;;  %v9652_v61 = vsel %vm2351_vm1, %v14306_v18, %v537_v30  ;;  %v14311_v34 = vld [vmem:[#allocation50_spill] sm:$0xff] }
  0xdf   :  { %14304 = vst [vmem:[#allocation98_spill] sm:$0xff] %v9623_v27  ;;  %14305 = vst [vmem:[#allocation99_spill] sm:$0xff] %v9625_v1  ;;  %v9656_v28 = vsel %vm2351_vm1, %v14307_v43, %v535_v52  ;;  %v539_v15 = vsel %vm495_vm0, %v7399_v58, %v7403_v56  ;;  %v9663_v54 = vsel %vm2351_vm1, %v14309_v35, %v536_v55  ;;  %v14312_v27 = vld [vmem:[#allocation17_spill] sm:$0xff]  ;;  %v14313_v35 = vld [vmem:[#allocation20_spill] sm:$0xff] }
  0xe0   :  { %7786 = vrot.lane.b32.xlu1 %v8903_v22, %s8802_s20  ;;  %7781 = vrot.lane.b32.xlu0 %v8895_v20, %s8802_s20  ;;  %v9667_v36 = vsel %vm2351_vm1, %v14310_v39, %v542_v48  ;;  %v9671_v30 = vsel %vm2351_vm1, %v14311_v34, %v541_v59  ;;  %v540_v52 = vsel %vm495_vm0, %v7403_v56, %v7404_v32  ;;  %v14314_v55 = vld [vmem:[#allocation40_spill] sm:$0xff]  ;;  %v14315_v59 = vunpack.i.h.bf16 %v9419_v57 }
  0xe1   :  { %v9682_v48 = vsel %vm2351_vm1, %v14314_v55, %v539_v15  ;;  %v545_v56 = vsel %vm495_vm0, %v7414_v60, %v7418_v29  ;;  %v543_v39 = vsel %vm495_vm0, %v7409_v33, %v7413_v50 }
  0xe2   :  { %v7507_v40 = vpop.permute.xlu1 %7506  ;;  %v9659_v63 = vpop.permute.xlu0 %7501  ;;  %v546_v32 = vsel %vm495_vm0, %v7418_v29, %v14315_v59  ;;  %v14318_v59 = vld [vmem:[#allocation23_spill] sm:$0xff] }
  0xe3   :  { %14308 = vst [vmem:[#allocation44_spill] sm:$0xff] %v9659_v63  ;;  %v7509_v18 = vunpack.i.h.bf16 %v7507_v40  ;;  %v7508_v43 = vunpack.i.l.bf16 %v7507_v40  ;;  %v7504_v58 = vunpack.i.h.bf16 %v9659_v63  ;;  %v544_v40 = vsel %vm495_vm0, %v7413_v50, %v7414_v60 }
  0xe4   :  { %7796 = vrot.lane.b32.xlu1 %v14312_v27, %s8802_s20  ;;  %7791 = vrot.lane.b32.xlu0 %v14313_v35, %s8802_s20  ;;  %v14316_v41 = vunpack.i.l.bf16 %v9659_v63  ;;  %v9697_v35 = vsel %vm2351_vm1, %v14317_v46, %v540_v52  ;;  %v14319_v46 = vld [vmem:[#allocation26_spill] sm:$0xff] }
  0xe5   :  { %v774_v34 = vsel %vm751_vm2, %v7508_v43, %v7509_v18  ;;  %v773_v1 = vsel %vm751_vm2, %v7504_v58, %v7508_v43 }
  0xe6   :  { %v772_v23 = vsel %vm751_vm2, %v14316_v41, %v7504_v58  ;;  %v7517_v15 = vpop.permute.xlu1 %7516  ;;  %v7512_v55 = vpop.permute.xlu0 %7511  ;;  %v9701_v29 = vsel %vm2416_vm3, %v9495_v31, %v774_v34  ;;  %v9709_v60 = vsel %vm2416_vm3, %v9499_v19, %v773_v1  ;;  %v14320_v31 = vld [vmem:[#allocation52_spill] sm:$0xff]  ;;  %v14322_v19 = vld [vmem:[#allocation47_spill] sm:$0xff] }
  0xe7   :  { %v9705_v33 = vsel %vm2416_vm3, %v9503_v47, %v772_v23  ;;  %v7519_v50 = vunpack.i.h.bf16 %v7517_v15  ;;  %v7518_v41 = vunpack.i.l.bf16 %v7517_v15  ;;  %v7514_v43 = vunpack.i.h.bf16 %v7512_v55  ;;  %v14321_v47 = vld [vmem:[#allocation56_spill] sm:$0xff]  ;;  %v14323_v34 = vld [vmem:[#allocation55_spill] sm:$0xff] }
  0xe8   :  { %v7513_v58 = vunpack.i.l.bf16 %v7512_v55  ;;  %7806 = vrot.lane.b32.xlu1 %v14318_v59, %s8802_s20  ;;  %7801 = vrot.lane.b32.xlu0 %v14319_v46, %s8802_s20  ;;  %v9717_v52 = vsel %vm2351_vm1, %v14320_v31, %v546_v32  ;;  %v9721_v23 = vsel %vm2351_vm1, %v14321_v47, %v545_v56  ;;  %v9725_v1 = vsel %vm2351_vm1, %v14322_v19, %v543_v39  ;;  %v14327_v19 = vld [vmem:[#allocation29_spill] sm:$0xff] }
  0xe9   :  { %v9729_v15 = vsel %vm2351_vm1, %v14323_v34, %v544_v40  ;;  %v778_v55 = vsel %vm751_vm2, %v7518_v41, %v7519_v50  ;;  %v777_v63 = vsel %vm751_vm2, %v7514_v43, %v7518_v41 }
  0xea   :  { %v775_v46 = vsel %vm751_vm2, %v7509_v18, %v7513_v58  ;;  %v776_v32 = vsel %vm751_vm2, %v7513_v58, %v7514_v43  ;;  %v7527_v31 = vpop.permute.xlu1 %7526  ;;  %v7522_v59 = vpop.permute.xlu0 %7521  ;;  %v9737_v56 = vsel %vm2416_vm3, %v9536_v37, %v778_v55  ;;  %v9749_v41 = vsel %vm2416_vm3, %v9540_v14, %v777_v63  ;;  %v14328_v37 = vld [vmem:[#allocation30_spill] sm:$0xff] }
  0xeb   :  { %v9741_v39 = vsel %vm2416_vm3, %v9544_v13, %v775_v46  ;;  %v9745_v40 = vsel %vm2416_vm3, %v9548_v38, %v776_v32  ;;  %14326 = vst [vmem:[#allocation46_spill] sm:$0xff] %v9749_v41  ;;  %v7529_v18 = vunpack.i.h.bf16 %v7527_v31  ;;  %v7528_v43 = vunpack.i.l.bf16 %v7527_v31  ;;  %v14329_v13 = vld [vmem:[#allocation84_spill] sm:$0xff]  ;;  %v14330_v38 = vld [vmem:[#allocation85_spill] sm:$0xff] }
  0xec   :  { %14324 = vst [vmem:[#allocation38_spill] sm:$0xff] %v9741_v39  ;;  %14325 = vst [vmem:[#allocation41_spill] sm:$0xff] %v9745_v40  ;;  %v7524_v58 = vunpack.i.h.bf16 %v7522_v59  ;;  %v7523_v47 = vunpack.i.l.bf16 %v7522_v59  ;;  %7816 = vrot.lane.b32.xlu1 %v14327_v19, %s8802_s20  ;;  %7811 = vrot.lane.b32.xlu0 %v14328_v37, %s8802_s20  ;;  %v7428_v34 = vunpack.i.l.bf16 %v14329_v13  ;;  %v7424_v55 = vunpack.i.h.bf16 %v14330_v38  ;;  %v14332_v39 = vld [vmem:[#allocation31_spill] sm:$0xff] }
  0xed   :  { %v7423_v32 = vunpack.i.l.bf16 %v14330_v38  ;;  %v782_v14 = vsel %vm751_vm2, %v7528_v43, %v7529_v18 }
  0xee   :  { %v781_v63 = vsel %vm751_vm2, %v7524_v58, %v7528_v43  ;;  %v779_v59 = vsel %vm751_vm2, %v7519_v50, %v7523_v47  ;;  %v780_v31 = vsel %vm751_vm2, %v7523_v47, %v7524_v58  ;;  %v7537_v19 = vpop.permute.xlu1 %7536  ;;  %v7532_v41 = vpop.permute.xlu0 %7531  ;;  %v9765_v37 = vsel %vm2416_vm3, %v9553_v16, %v782_v14  ;;  %v14333_v16 = vld [vmem:[#allocation32_spill] sm:$0xff] }
  0xef   :  { %v9769_v46 = vsel %vm2416_vm3, %v9561_v53, %v779_v59  ;;  %v9773_v38 = vsel %vm2416_vm3, %v9569_v42, %v780_v31  ;;  %v9777_v43 = vsel %vm2416_vm3, %v9557_v49, %v781_v63  ;;  %v7539_v50 = vunpack.i.h.bf16 %v7537_v19 }
  0xf0   :  { %14331 = vst [vmem:[#allocation50_spill] sm:$0xff] %v9777_v43  ;;  %v7538_v58 = vunpack.i.l.bf16 %v7537_v19  ;;  %v7534_v47 = vunpack.i.h.bf16 %v7532_v41  ;;  %v7533_v40 = vunpack.i.l.bf16 %v7532_v41  ;;  %7826 = vrot.lane.b32.xlu1 %v14332_v39, %s8802_s20  ;;  %7821 = vrot.lane.b32.xlu0 %v14333_v16, %s8802_s20  ;;  %v14334_v53 = vunpack.i.h.bf16 %v14329_v13 }
  0xf1   :  { %v549_v42 = vsel %vm495_vm0, %v7424_v55, %v7428_v34  ;;  %v14335_v59 = vunpack.i.h.bf16 %v9419_v57  ;;  %v548_v19 = vsel %vm495_vm0, %v7423_v32, %v7424_v55 }
  0xf2   :  { %v550_v14 = vsel %vm495_vm0, %v7428_v34, %v14334_v53  ;;  %v786_v41 = vsel %vm751_vm2, %v7538_v58, %v7539_v50  ;;  %v785_v63 = vsel %vm751_vm2, %v7534_v47, %v7538_v58  ;;  %v783_v31 = vsel %vm751_vm2, %v7529_v18, %v7533_v40  ;;  %v7547_v16 = vpop.permute.xlu1 %7546  ;;  %v7542_v43 = vpop.permute.xlu0 %7541 }
  0xf3   :  { %v547_v49 = vsel %vm495_vm0, %v14335_v59, %v7423_v32  ;;  %v784_v39 = vsel %vm751_vm2, %v7533_v40, %v7534_v47  ;;  %v9797_v53 = vsel %vm2416_vm3, %v9596_v45, %v786_v41  ;;  %v9801_v57 = vsel %vm2416_vm3, %v9604_v51, %v783_v31  ;;  %v14336_v47 = vld [vmem:[#allocation33_spill] sm:$0xff]  ;;  %v14337_v45 = vld [vmem:[#allocation34_spill] sm:$0xff] }
  0xf4   :  { %v9805_v34 = vsel %vm2416_vm3, %v9608_v8, %v784_v39  ;;  %v9809_v55 = vsel %vm2416_vm3, %v9600_v44, %v785_v63  ;;  %v7549_v18 = vunpack.i.h.bf16 %v7547_v16  ;;  %v7548_v40 = vunpack.i.l.bf16 %v7547_v16  ;;  %7836 = vrot.lane.b32.xlu1 %v14336_v47, %s8802_s20  ;;  %7831 = vrot.lane.b32.xlu0 %v14337_v45, %s8802_s20  ;;  %v14338_v51 = vld [vmem:[#allocation58_spill] sm:$0xff]  ;;  %v14340_v44 = vld [vmem:[#allocation53_spill] sm:$0xff] }
  0xf5   :  { %v7544_v32 = vunpack.i.h.bf16 %v7542_v43  ;;  %v7543_v58 = vunpack.i.l.bf16 %v7542_v43  ;;  %v9817_v59 = vsel %vm2351_vm1, %v14338_v51, %v550_v14  ;;  %v14339_v8 = vld [vmem:[#allocation62_spill] sm:$0xff]  ;;  %v9825_v41 = vsel %vm2351_vm1, %v14340_v44, %v547_v49  ;;  %v14341_v16 = vld [vmem:[#allocation61_spill] sm:$0xff]  ;;  %v14345_v44 = vld [vmem:[#allocation35_spill] sm:$0xff] }
  0xf6   :  { %v9821_v39 = vsel %vm2351_vm1, %v14339_v8, %v549_v42  ;;  %v9829_v43 = vsel %vm2351_vm1, %v14341_v16, %v548_v19  ;;  %v790_v63 = vsel %vm751_vm2, %v7548_v40, %v7549_v18  ;;  %v7557_v51 = vpop.permute.xlu1 %7556  ;;  %v7552_v45 = vpop.permute.xlu0 %7551 }
  0xf7   :  { %v789_v31 = vsel %vm751_vm2, %v7544_v32, %v7548_v40  ;;  %v787_v47 = vsel %vm751_vm2, %v7539_v50, %v7543_v58  ;;  %v788_v14 = vsel %vm751_vm2, %v7543_v58, %v7544_v32  ;;  %v9837_v42 = vsel %vm2416_vm3, %v9612_v0, %v790_v63  ;;  %v14346_v0 = vld [vmem:[#allocation36_spill] sm:$0xff] }
  0xf8   :  { %v9841_v49 = vsel %vm2416_vm3, %v9620_v10, %v787_v47  ;;  %v9845_v19 = vsel %vm2416_vm3, %v9629_v26, %v788_v14  ;;  %v9849_v40 = vsel %vm2416_vm3, %v9616_v62, %v789_v31  ;;  %v7559_v50 = vunpack.i.h.bf16 %v7557_v51  ;;  %7846 = vrot.lane.b32.xlu1 %v14345_v44, %s8802_s20  ;;  %7841 = vrot.lane.b32.xlu0 %v14346_v0, %s8802_s20  ;;  %v14347_v10 = vld [vmem:[#allocation86_spill] sm:$0xff]  ;;  %v14348_v26 = vld [vmem:[#allocation87_spill] sm:$0xff] }
  0xf9   :  { %14342 = vst [vmem:[#allocation17_spill] sm:$0xff] %v9841_v49  ;;  %14343 = vst [vmem:[#allocation40_spill] sm:$0xff] %v9845_v19  ;;  %v7558_v32 = vunpack.i.l.bf16 %v7557_v51  ;;  %v7554_v58 = vunpack.i.h.bf16 %v7552_v45  ;;  %v7553_v8 = vunpack.i.l.bf16 %v7552_v45  ;;  %v7438_v16 = vunpack.i.l.bf16 %v14347_v10  ;;  %v14350_v49 = vld [vmem:[#allocation37_spill] sm:$0xff] }
  0xfa   :  { %14344 = vst [vmem:[#allocation49_spill] sm:$0xff] %v9849_v40  ;;  %v7434_v63 = vunpack.i.h.bf16 %v14348_v26  ;;  %v7433_v14 = vunpack.i.l.bf16 %v14348_v26  ;;  %v7567_v44 = vpop.permute.xlu1 %7566  ;;  %v7562_v40 = vpop.permute.xlu0 %7561 }
  0xfb   :  { %v794_v62 = vsel %vm751_vm2, %v7558_v32, %v7559_v50  ;;  %v793_v31 = vsel %vm751_vm2, %v7554_v58, %v7558_v32  ;;  %v791_v45 = vsel %vm751_vm2, %v7549_v18, %v7553_v8  ;;  %v792_v51 = vsel %vm751_vm2, %v7553_v8, %v7554_v58 }
  0xfc   :  { %v9865_v0 = vsel %vm2416_vm3, %v9648_v24, %v794_v62  ;;  %v9869_v47 = vsel %vm2416_vm3, %v9656_v28, %v791_v45  ;;  %v9873_v26 = vsel %vm2416_vm3, %v9663_v54, %v792_v51  ;;  %v9877_v32 = vsel %vm2416_vm3, %v9652_v61, %v793_v31  ;;  %7856 = vrot.lane.b32.xlu1 %v14350_v49, %s8802_s20  ;;  %v14351_v24 = vld [vmem:[#allocation39_spill] sm:$0xff] }
  0xfd   :  { %14349 = vst [vmem:[#allocation52_spill] sm:$0xff] %v9877_v32  ;;  %v7569_v18 = vunpack.i.h.bf16 %v7567_v44  ;;  %v7568_v58 = vunpack.i.l.bf16 %v7567_v44  ;;  %v7564_v8 = vunpack.i.h.bf16 %v7562_v40  ;;  %v7563_v19 = vunpack.i.l.bf16 %v7562_v40  ;;  %7851 = vrot.lane.b32.xlu0 %v14351_v24, %s8802_s20 }
  0xfe   :  { %v14352_v28 = vunpack.i.h.bf16 %v14347_v10  ;;  %v553_v54 = vsel %vm495_vm0, %v7434_v63, %v7438_v16  ;;  %v14353_v45 = vunpack.i.h.bf16 %v14329_v13  ;;  %v552_v44 = vsel %vm495_vm0, %v7433_v14, %v7434_v63  ;;  %v7577_v24 = vpop.permute.xlu1 %7576  ;;  %v7572_v32 = vpop.permute.xlu0 %7571 }
  0xff   :  { %v798_v40 = vsel %vm751_vm2, %v7568_v58, %v7569_v18  ;;  %v797_v31 = vsel %vm751_vm2, %v7564_v8, %v7568_v58  ;;  %v795_v51 = vsel %vm751_vm2, %v7559_v50, %v7563_v19  ;;  %v796_v49 = vsel %vm751_vm2, %v7563_v19, %v7564_v8  ;;  %v14356_v8 = vld [vmem:[#allocation42_spill] sm:$0xff] }
 0x100   :  { %v554_v62 = vsel %vm495_vm0, %v7438_v16, %v14352_v28  ;;  %v551_v61 = vsel %vm495_vm0, %v14353_v45, %v7433_v14  ;;  %v9897_v28 = vsel %vm2416_vm3, %v9667_v36, %v798_v40  ;;  %v9901_v13 = vsel %vm2416_vm3, %v9682_v48, %v795_v51  ;;  %7866 = vrot.lane.b32.xlu1 %v14356_v8, %s8802_s20  ;;  %v14357_v36 = vld [vmem:[#allocation43_spill] sm:$0xff]  ;;  %v14358_v48 = vld [vmem:[#allocation64_spill] sm:$0xff] }
 0x101   :  { %v9905_v16 = vsel %vm2416_vm3, %v9697_v35, %v796_v49  ;;  %v9909_v63 = vsel %vm2416_vm3, %v9671_v30, %v797_v31  ;;  %v7579_v50 = vunpack.i.h.bf16 %v7577_v24  ;;  %v7578_v19 = vunpack.i.l.bf16 %v7577_v24  ;;  %7861 = vrot.lane.b32.xlu0 %v14357_v36, %s8802_s20  ;;  %v14359_v40 = vld [vmem:[#allocation68_spill] sm:$0xff]  ;;  %v14360_v49 = vld [vmem:[#allocation59_spill] sm:$0xff] }
 0x102   :  { %14354 = vst [vmem:[#allocation56_spill] sm:$0xff] %v9905_v16  ;;  %14355 = vst [vmem:[#allocation47_spill] sm:$0xff] %v9909_v63  ;;  %v7574_v14 = vunpack.i.h.bf16 %v7572_v32  ;;  %v7573_v58 = vunpack.i.l.bf16 %v7572_v32  ;;  %v2410_v45 = vsel %vm2351_vm1, %v14358_v48, %v554_v62  ;;  %v2409_v35 = vsel %vm2351_vm1, %v14359_v40, %v553_v54  ;;  %v14361_v31 = vld [vmem:[#allocation67_spill] sm:$0xff]  ;;  %v7587_v63 = vpop.permute.xlu1 %7586  ;;  %v7582_v16 = vpop.permute.xlu0 %7581  ;;  %v14363_v48 = vld [vmem:[#allocation45_spill] sm:$0xff] }
 0x103   :  { %v2407_v30 = vsel %vm2351_vm1, %v14360_v49, %v551_v61  ;;  %v2408_v24 = vsel %vm2351_vm1, %v14361_v31, %v552_v44  ;;  %v802_v32 = vsel %vm751_vm2, %v7578_v19, %v7579_v50 }
 0x104   :  { %v801_v51 = vsel %vm751_vm2, %v7574_v14, %v7578_v19  ;;  %v799_v8 = vsel %vm751_vm2, %v7569_v18, %v7573_v58  ;;  %v800_v36 = vsel %vm751_vm2, %v7573_v58, %v7574_v14  ;;  %v9929_v62 = vsel %vm2416_vm3, %v9717_v52, %v802_v32  ;;  %7876 = vrot.lane.b32.xlu1 %v14363_v48, %s8802_s20  ;;  %v14364_v52 = vld [vmem:[#allocation48_spill] sm:$0xff] }
 0x105   :  { %v9933_v54 = vsel %vm2416_vm3, %v9725_v1, %v799_v8  ;;  %v9937_v61 = vsel %vm2416_vm3, %v9729_v15, %v800_v36  ;;  %v9941_v44 = vsel %vm2416_vm3, %v9721_v23, %v801_v51  ;;  %v7589_v18 = vunpack.i.h.bf16 %v7587_v63  ;;  %7871 = vrot.lane.b32.xlu0 %v14364_v52, %s8802_s20  ;;  %v14365_v1 = vld [vmem:[#allocation88_spill] sm:$0xff]  ;;  %v14366_v15 = vld [vmem:[#allocation89_spill] sm:$0xff] }
 0x106   :  { %14362 = vst [vmem:[#allocation55_spill] sm:$0xff] %v9941_v44  ;;  %v7588_v19 = vunpack.i.l.bf16 %v7587_v63  ;;  %v7584_v14 = vunpack.i.h.bf16 %v7582_v16  ;;  %v7583_v58 = vunpack.i.l.bf16 %v7582_v16  ;;  %v7448_v40 = vunpack.i.l.bf16 %v14365_v1  ;;  %v7597_v32 = vpop.permute.xlu1 %7596  ;;  %v7592_v51 = vpop.permute.xlu0 %7591  ;;  %v14368_v44 = vld [vmem:[#allocation51_spill] sm:$0xff] }
 0x107   :  { %v7444_v36 = vunpack.i.h.bf16 %v14366_v15  ;;  %v7443_v49 = vunpack.i.l.bf16 %v14366_v15  ;;  %v7593_v52 = vunpack.i.l.bf16 %v7592_v51 }
 0x108   :  { %v806_v23 = vsel %vm751_vm2, %v7588_v19, %v7589_v18  ;;  %v805_v63 = vsel %vm751_vm2, %v7584_v14, %v7588_v19  ;;  %v803_v16 = vsel %vm751_vm2, %v7579_v50, %v7583_v58  ;;  %v804_v31 = vsel %vm751_vm2, %v7583_v58, %v7584_v14  ;;  %7886 = vrot.lane.b32.xlu1 %v14368_v44, %s8802_s20 }
 0x109   :  { %v9957_v48 = vsel %vm2416_vm3, %v9817_v59, %v806_v23  ;;  %v9961_v8 = vsel %vm2416_vm3, %v9825_v41, %v803_v16  ;;  %v9965_v15 = vsel %vm2416_vm3, %v9829_v43, %v804_v31  ;;  %v9969_v19 = vsel %vm2416_vm3, %v9821_v39, %v805_v63  ;;  %v14369_v59 = vld [vmem:[#allocation54_spill] sm:$0xff] }
 0x10a   :  { %14367 = vst [vmem:[#allocation84_spill] sm:$0xff] %v9969_v19  ;;  %v7599_v50 = vunpack.i.h.bf16 %v7597_v32  ;;  %v7598_v14 = vunpack.i.l.bf16 %v7597_v32  ;;  %v7594_v58 = vunpack.i.h.bf16 %v7592_v51  ;;  %7881 = vrot.lane.b32.xlu0 %v14369_v59, %s8802_s20  ;;  %v14370_v41 = vunpack.i.h.bf16 %v14365_v1  ;;  %v9987_v59 = vpop.permute.xlu1 %7606  ;;  %v7602_v19 = vpop.permute.xlu0 %7601 }
 0x10b   :  { %v557_v43 = vsel %vm495_vm0, %v7444_v36, %v7448_v40  ;;  %v14371_v16 = vunpack.i.h.bf16 %v14347_v10  ;;  %v556_v63 = vsel %vm495_vm0, %v7443_v49, %v7444_v36  ;;  %v807_v51 = vsel %vm751_vm2, %v7589_v18, %v7593_v52  ;;  %14372 = vst [vmem:[#allocation85_spill] sm:$0xff] %v9987_v59 }
 0x10c   :  { %v558_v23 = vsel %vm495_vm0, %v7448_v40, %v14370_v41  ;;  %v810_v31 = vsel %vm751_vm2, %v7598_v14, %v7599_v50  ;;  %v809_v32 = vsel %vm751_vm2, %v7594_v58, %v7598_v14  ;;  %v808_v44 = vsel %vm751_vm2, %v7593_v52, %v7594_v58  ;;  %v14377_v58 = vld [vmem:[#allocation57_spill] sm:$0xff] }
 0x10d   :  { %v555_v39 = vsel %vm495_vm0, %v14371_v16, %v7443_v49  ;;  %v9990_v41 = vsel %vm2416_vm3, %v2410_v45, %v810_v31  ;;  %v9993_v10 = vsel %vm2416_vm3, %v2407_v30, %v807_v51  ;;  %v9996_v40 = vsel %vm2416_vm3, %v2408_v24, %v808_v44  ;;  %7896 = vrot.lane.b32.xlu1 %v14377_v58, %s8802_s20  ;;  %v14378_v45 = vld [vmem:[#allocation60_spill] sm:$0xff]  ;;  %v14379_v30 = vld [vmem:[#allocation69_spill] sm:$0xff]  ;;  %v14380_v24 = vld [vmem:[#allocation74_spill] sm:$0xff] }
 0x10e   :  { %14373 = vst [vmem:[#allocation58_spill] sm:$0xff] %v9990_v41  ;;  %14374 = vst [vmem:[#allocation62_spill] sm:$0xff] %v9993_v10  ;;  %v9999_v36 = vsel %vm2416_vm3, %v2409_v35, %v809_v32  ;;  %v14032_v49 = vunpack.i.h.bf16 %v9987_v59  ;;  %v7608_v18 = vunpack.i.l.bf16 %v9987_v59  ;;  %v7604_v52 = vunpack.i.h.bf16 %v7602_v19  ;;  %7891 = vrot.lane.b32.xlu0 %v14378_v45, %s8802_s20  ;;  %v14381_v35 = vld [vmem:[#allocation65_spill] sm:$0xff]  ;;  %v14382_v32 = vld [vmem:[#allocation71_spill] sm:$0xff] }
 0x10f   :  { %14375 = vst [vmem:[#allocation53_spill] sm:$0xff] %v9996_v40  ;;  %14376 = vst [vmem:[#allocation61_spill] sm:$0xff] %v9999_v36  ;;  %v7603_v14 = vunpack.i.l.bf16 %v7602_v19  ;;  %v2414_v16 = vsel %vm2351_vm1, %v14379_v30, %v558_v23  ;;  %v2413_v44 = vsel %vm2351_vm1, %v14380_v24, %v557_v43  ;;  %v2411_v31 = vsel %vm2351_vm1, %v14381_v35, %v555_v39  ;;  %v10020_v36 = vpop.permute.xlu1 %7616  ;;  %v10022_v23 = vpop.permute.xlu0 %7611  ;;  %v14421_v40 = vld [vmem:[#allocation16_spill] sm:$0xff] }
 0x110   :  { %v2412_v51 = vsel %vm2351_vm1, %v14382_v32, %v556_v63  ;;  %v814_v19 = vsel %vm751_vm2, %v7608_v18, %v14032_v49  ;;  %v813_v58 = vsel %vm751_vm2, %v7604_v52, %v7608_v18  ;;  %14383 = vst [vmem:[#allocation86_spill] sm:$0xff] %v10020_v36  ;;  %14384 = vst [vmem:[#allocation87_spill] sm:$0xff] %v10022_v23  ;;  %v14388_v24 = vunpack.i.l.bf16 %v9331_v9  ;;  %v14412_v36 = vld [vmem:[#allocation80_spill] sm:$0xff] }
 0x111   :  { %v811_v45 = vsel %vm751_vm2, %v7599_v50, %v7603_v14  ;;  %v10025_v43 = vsel %vm2416_vm3, %v2414_v16, %v814_v19  ;;  %v812_v39 = vsel %vm751_vm2, %v7603_v14, %v7604_v52  ;;  %v10032_v63 = vsel %vm2416_vm3, %v2413_v44, %v813_v58  ;;  %v14391_v16 = vld [vmem:[#allocation63_spill] sm:$0xff]  ;;  %v14392_v52 = vld [vmem:[#allocation66_spill] sm:$0xff]  ;;  %v14395_v44 = vld [vmem:[#allocation77_spill] sm:$0xff] }
 0x112   :  { %14385 = vst [vmem:[#allocation64_spill] sm:$0xff] %v10025_v43  ;;  %v10029_v30 = vsel %vm2416_vm3, %v2411_v31, %v811_v45  ;;  %14387 = vst [vmem:[#allocation59_spill] sm:$0xff] %v10032_v63  ;;  %v14389_v18 = vunpack.i.h.bf16 %v9323_v3  ;;  %v10040_v35 = vsel %vm2416_vm3, %v2412_v51, %v812_v39  ;;  %7906 = vrot.lane.b32.xlu1 %v14391_v16, %s8802_s20  ;;  %7901 = vrot.lane.b32.xlu0 %v14392_v52, %s8802_s20  ;;  %v14396_v19 = vld [vmem:[#allocation5_spill] sm:$0xff]  ;;  %v14415_v63 = vld [vmem:[#allocation8_spill] sm:$0xff] }
 0x113   :  { %14386 = vst [vmem:[#allocation68_spill] sm:$0xff] %v10029_v30  ;;  %14390 = vst [vmem:[#allocation67_spill] sm:$0xff] %v10040_v35  ;;  %v14393_v14 = vunpack.i.h.bf16 %v9331_v9  ;;  %v14394_v58 = vmov %v14388_v24  ;;  %v7319_v31 = vunpack.i.h.bf16 %v14395_v44  ;;  %v7318_v32 = vunpack.i.l.bf16 %v14395_v44  ;;  %v10063_v49 = vpop.permute.xlu1 %7626  ;;  %v10065_v16 = vpop.permute.xlu0 %7621  ;;  %v14403_v44 = vld [vmem:[#allocation6_spill] sm:$0xff] }
 0x114   :  { %v501_v50 = vsel %vm495_vm0, %v14389_v18, %v14388_v24  ;;  %v10056_v51 = vsel %vm2351_vm1, %v14396_v19, %v9485_v11  ;;  %v14398_v39 = vunpack.i.l.bf16 %v9323_v3  ;;  %v14399_v24 = vunpack.i.h.bf16 %v9333_v17  ;;  %14400 = vst [vmem:[#allocation89_spill] sm:$0xff] %v10063_v49  ;;  %14401 = vst [vmem:[#allocation69_spill] sm:$0xff] %v10065_v16  ;;  %v14407_v49 = vld [vmem:[#allocation9_spill] sm:$0xff]  ;;  %v14417_v43 = vld [vmem:[#allocation82_spill] sm:$0xff] }
 0x115   :  { %v502_v45 = vsel %vm495_vm0, %v14394_v58, %v14393_v14  ;;  %14397 = vst [vmem:[#allocation88_spill] sm:$0xff] %v10056_v51  ;;  %v14402_v14 = vld [vmem:[#allocation7_spill] sm:$0xff]  ;;  %v10074_v52 = vsel %vm2351_vm1, %v14403_v44, %v501_v50  ;;  %v14404_v11 = vunpack.i.l.bf16 %v9333_v17  ;;  %v14405_v3 = vunpack.i.h.bf16 %v9325_v12 }
 0x116   :  { %v499_v18 = vsel %vm495_vm0, %v14399_v24, %v14398_v39  ;;  %v10070_v58 = vsel %vm2351_vm1, %v14402_v14, %v9490_v6  ;;  %v14406_v39 = vld [vmem:[#allocation78_spill] sm:$0xff]  ;;  %v10084_v16 = vsel %vm2351_vm1, %v14407_v49, %v502_v45  ;;  %7916 = vrot.lane.b32.xlu1 %v9246_v4, %s8802_s20  ;;  %7911 = vrot.lane.b32.xlu0 %v9250_v5, %s8802_s20  ;;  %v14408_v6 = vld [vmem:[#allocation12_spill] sm:$0xff]  ;;  %v14409_v12 = vunpack.i.h.bf16 %v9333_v17  ;;  %v14411_v45 = vld [vmem:[#allocation79_spill] sm:$0xff] }
 0x117   :  { %v497_v19 = vsel %vm495_vm0, %v14405_v3, %v14404_v11  ;;  %v7314_v24 = vunpack.i.h.bf16 %v14406_v39  ;;  %v10092_v50 = vsel %vm2351_vm1, %v14408_v6, %v499_v18  ;;  %v14410_v44 = vmov %v14404_v11  ;;  %v10105_v18 = vpop.permute.xlu1 %7636  ;;  %v10107_v35 = vpop.permute.xlu0 %7631 }
 0x118   :  { %v498_v11 = vsel %vm495_vm0, %v14410_v44, %v14409_v12  ;;  %v506_v3 = vsel %vm495_vm0, %v7318_v32, %v7319_v31  ;;  %v7313_v49 = vunpack.i.l.bf16 %v14406_v39  ;;  %v7329_v23 = vunpack.i.h.bf16 %v14411_v45  ;;  %14413 = vst [vmem:[#allocation74_spill] sm:$0xff] %v10105_v18  ;;  %14414 = vst [vmem:[#allocation65_spill] sm:$0xff] %v10107_v35  ;;  %v14416_v44 = vld [vmem:[#allocation81_spill] sm:$0xff] }
 0x119   :  { %v7328_v4 = vunpack.i.l.bf16 %v14411_v45  ;;  %v7324_v5 = vunpack.i.h.bf16 %v14412_v36  ;;  %v7323_v51 = vunpack.i.l.bf16 %v14412_v36  ;;  %v10111_v17 = vsel %vm2351_vm1, %v14415_v63, %v497_v19  ;;  %v14418_v36 = vld [vmem:[#allocation11_spill] sm:$0xff]  ;;  %v14419_v35 = vld [vmem:[#allocation13_spill] sm:$0xff] }
 0x11a   :  { %v505_v12 = vsel %vm495_vm0, %v7314_v24, %v7318_v32  ;;  %v7339_v39 = vunpack.i.h.bf16 %v14416_v44  ;;  %v7338_v30 = vunpack.i.l.bf16 %v14416_v44  ;;  %v7334_v45 = vunpack.i.h.bf16 %v14417_v43  ;;  %7926 = vrot.lane.b32.xlu1 %v9261_v2, %s8802_s20  ;;  %7921 = vrot.lane.b32.xlu0 %v9265_v7, %s8802_s20 }
 0x11b   :  { %v7333_v59 = vunpack.i.l.bf16 %v14417_v43  ;;  %v10124_v19 = vsel %vm2351_vm1, %v14418_v36, %v498_v11  ;;  %v10128_v32 = vsel %vm2351_vm1, %v14419_v35, %v506_v3  ;;  %v14420_v44 = vunpack.i.h.bf16 %v9331_v9  ;;  %v10141_v41 = vpop.permute.xlu1 %7646  ;;  %v10143_v35 = vpop.permute.xlu0 %7641 }
 0x11c   :  { %v504_v43 = vsel %vm495_vm0, %v7313_v49, %v7314_v24  ;;  %v10136_v2 = vsel %vm2351_vm1, %v14421_v40, %v505_v12  ;;  %v510_v7 = vsel %vm495_vm0, %v7328_v4, %v7329_v23  ;;  %v509_v10 = vsel %vm495_vm0, %v7324_v5, %v7328_v4  ;;  %14422 = vst [vmem:[#allocation71_spill] sm:$0xff] %v10141_v41  ;;  %v14424_v4 = vld [vmem:[#allocation10_spill] sm:$0xff] }
 0x11d   :  { %v503_v18 = vsel %vm495_vm0, %v14420_v44, %v7313_v49  ;;  %v507_v11 = vsel %vm495_vm0, %v7319_v31, %v7323_v51  ;;  %14423 = vst [vmem:[#allocation77_spill] sm:$0xff] %v10143_v35  ;;  %v508_v9 = vsel %vm495_vm0, %v7323_v51, %v7324_v5  ;;  %v514_v3 = vsel %vm495_vm0, %v7338_v30, %v7339_v39  ;;  %v14425_v5 = vld [vmem:[#allocation15_spill] sm:$0xff]  ;;  %v14430_v44 = vld [vmem:[#allocation14_spill] sm:$0xff] }
 0x11e   :  { %v513_v24 = vsel %vm495_vm0, %v7334_v45, %v7338_v30  ;;  %v511_v49 = vsel %vm495_vm0, %v7329_v23, %v7333_v59  ;;  %v512_v40 = vsel %vm495_vm0, %v7333_v59, %v7334_v45  ;;  %7936 = vrot.lane.b32.xlu1 %v8917_v25, %s8803_s21  ;;  %7931 = vrot.lane.b32.xlu0 %v8899_v21, %s8803_s21  ;;  %v14426_v30 = vld [vmem:[#allocation18_spill] sm:$0xff]  ;;  %v14427_v59 = vld [vmem:[#allocation83_spill] sm:$0xff] }
 0x11f   :  { %v10156_v31 = vsel %vm2351_vm1, %v14424_v4, %v503_v18  ;;  %v10160_v51 = vsel %vm2351_vm1, %v14425_v5, %v504_v43  ;;  %v10164_v23 = vsel %vm2351_vm1, %v14426_v30, %v510_v7  ;;  %v14428_v12 = vunpack.i.l.bf16 %v14427_v59  ;;  %v14429_v25 = vld [vmem:[#allocation22_spill] sm:$0xff]  ;;  %v14431_v4 = vld [vmem:[#allocation21_spill] sm:$0xff]  ;;  %v14432_v5 = vld [vmem:[#allocation24_spill] sm:$0xff]  ;;  %v10185_v30 = vpop.permute.xlu1 %7656 }
 0x120   :  { %v10171_v21 = vsel %vm2351_vm1, %v14429_v25, %v509_v10  ;;  %v10175_v18 = vsel %vm2351_vm1, %v14430_v44, %v507_v11  ;;  %v10179_v43 = vsel %vm2351_vm1, %v14431_v4, %v508_v9  ;;  %v10183_v7 = vsel %vm2351_vm1, %v14432_v5, %v514_v3  ;;  %14433 = vst [vmem:[#allocation5_spill] sm:$0xff] %v10185_v30  ;;  %v14435_v59 = vld [vmem:[#allocation28_spill] sm:$0xff]  ;;  %v14439_v25 = vld [vmem:[#allocation27_spill] sm:$0xff]  ;;  %v14441_v44 = vld [vmem:[#allocation25_spill] sm:$0xff] }
 0x121   :  { %v515_v45 = vsel %vm495_vm0, %v7339_v39, %v14428_v12  ;;  %v10187_v39 = vpop.permute.xlu0 %7651  ;;  %v10191_v10 = vsel %vm2351_vm1, %v14435_v59, %v513_v24  ;;  %v14437_v12 = vld [vmem:[#allocation19_spill] sm:$0xff]  ;;  %v10199_v9 = vsel %vm2351_vm1, %v14439_v25, %v512_v40  ;;  %v10211_v24 = vpack.i.bf16 %v14418_v36, %v14415_v63  ;;  %v14444_v25 = vld [vmem:[#allocation20_spill] sm:$0xff] }
 0x122   :  { %14434 = vst [vmem:[#allocation7_spill] sm:$0xff] %v10187_v39  ;;  %14436 = vst [vmem:[#allocation6_spill] sm:$0xff] %v10191_v10  ;;  %v10195_v11 = vsel %vm2351_vm1, %v14437_v12, %v511_v49  ;;  %v10203_v3 = vsel %vm2351_vm1, %v14441_v44, %v515_v45  ;;  %7946 = vrot.lane.b32.xlu1 %v8903_v22, %s8803_s21  ;;  %7941 = vrot.lane.b32.xlu0 %v8895_v20, %s8803_s21  ;;  %v14458_v10 = vld [vmem:[#allocation46_spill] sm:$0xff] }
 0x123   :  { %14438 = vst [vmem:[#allocation78_spill] sm:$0xff] %v10195_v11  ;;  %14440 = vst [vmem:[#allocation9_spill] sm:$0xff] %v10199_v9  ;;  %v7667_v49 = vpop.permute.xlu1 %7666  ;;  %v10217_v40 = vpack.i.bf16 %v14408_v6, %v14402_v14  ;;  %v14460_v11 = vld [vmem:[#allocation29_spill] sm:$0xff] }
 0x124   :  { %14442 = vst [vmem:[#allocation12_spill] sm:$0xff] %v10203_v3  ;;  %v7669_v45 = vunpack.i.h.bf16 %v7667_v49  ;;  %v7668_v5 = vunpack.i.l.bf16 %v7667_v49 }
 0x125   :  { %v10213_v4 = vpop.permute.xlu0 %7661 }
 0x126   :  { %14443 = vst [vmem:[#allocation79_spill] sm:$0xff] %v10213_v4  ;;  %v7664_v59 = vunpack.i.h.bf16 %v10213_v4  ;;  %v14053_v12 = vunpack.i.l.bf16 %v10213_v4  ;;  %7956 = vrot.lane.b32.xlu1 %v14312_v27, %s8803_s21  ;;  %7951 = vrot.lane.b32.xlu0 %v14444_v25, %s8803_s21  ;;  %v1030_v63 = vsel %vm1007_vm4, %v7668_v5, %v7669_v45 }
 0x127   :  { %v7677_v6 = vpop.permute.xlu1 %7676  ;;  %v10232_v49 = vsel %vm2481_vm5, %v9701_v29, %v1030_v63  ;;  %v14450_v29 = vunpack.i.h.bf16 %v14365_v1  ;;  %v14451_v63 = vld [vmem:[#allocation70_spill] sm:$0xff] }
 0x128   :  { %v1029_v36 = vsel %vm1007_vm4, %v7664_v59, %v7668_v5  ;;  %v1028_v14 = vsel %vm1007_vm4, %v14053_v12, %v7664_v59  ;;  %14445 = vst [vmem:[#allocation80_spill] sm:$0xff] %v10232_v49  ;;  %v7679_v35 = vunpack.i.h.bf16 %v7677_v6  ;;  %v7678_v5 = vunpack.i.l.bf16 %v7677_v6  ;;  %v14448_v59 = vld [vmem:[#allocation23_spill] sm:$0xff]  ;;  %v14449_v12 = vld [vmem:[#allocation26_spill] sm:$0xff] }
 0x129   :  { %v7672_v44 = vpop.permute.xlu0 %7671  ;;  %v10236_v39 = vsel %vm2481_vm5, %v9705_v33, %v1028_v14  ;;  %v10240_v30 = vsel %vm2481_vm5, %v9709_v60, %v1029_v36  ;;  %v10250_v33 = vsel %vm2351_vm1, %v14451_v63, %v14450_v29  ;;  %v14452_v14 = vld [vmem:[#allocation90_spill] sm:$0xff] }
 0x12a   :  { %14446 = vst [vmem:[#allocation8_spill] sm:$0xff] %v10236_v39  ;;  %14447 = vst [vmem:[#allocation81_spill] sm:$0xff] %v10240_v30  ;;  %v7674_v41 = vunpack.i.h.bf16 %v7672_v44  ;;  %v7673_v4 = vunpack.i.l.bf16 %v7672_v44  ;;  %7966 = vrot.lane.b32.xlu1 %v14448_v59, %s8803_s21  ;;  %7961 = vrot.lane.b32.xlu0 %v14449_v12, %s8803_s21  ;;  %v7458_v60 = vunpack.i.l.bf16 %v14452_v14  ;;  %v1034_v36 = vsel %vm1007_vm4, %v7678_v5, %v7679_v35  ;;  %v14454_v29 = vld [vmem:[#allocation38_spill] sm:$0xff]  ;;  %v14456_v39 = vld [vmem:[#allocation41_spill] sm:$0xff] }
 0x12b   :  { %v7687_v49 = vpop.permute.xlu1 %7686  ;;  %v10260_v1 = vsel %vm2481_vm5, %v9737_v56, %v1034_v36  ;;  %v14461_v56 = vld [vmem:[#allocation30_spill] sm:$0xff]  ;;  %v14462_v36 = vunpack.i.h.bf16 %v14452_v14 }
 0x12c   :  { %v1033_v6 = vsel %vm1007_vm4, %v7674_v41, %v7678_v5  ;;  %v1031_v44 = vsel %vm1007_vm4, %v7669_v45, %v7673_v4  ;;  %v1032_v30 = vsel %vm1007_vm4, %v7673_v4, %v7674_v41  ;;  %14453 = vst [vmem:[#allocation82_spill] sm:$0xff] %v10260_v1  ;;  %v7689_v45 = vunpack.i.h.bf16 %v7687_v49  ;;  %v14464_v1 = vld [vmem:[#allocation50_spill] sm:$0xff] }
 0x12d   :  { %v7682_v59 = vpop.permute.xlu0 %7681  ;;  %v10264_v63 = vsel %vm2481_vm5, %v14454_v29, %v1031_v44  ;;  %v10268_v3 = vsel %vm2481_vm5, %v14456_v39, %v1032_v30  ;;  %v10272_v5 = vsel %vm2481_vm5, %v14458_v10, %v1033_v6  ;;  %v7688_v41 = vunpack.i.l.bf16 %v7687_v49  ;;  %v14463_v30 = vld [vmem:[#allocation91_spill] sm:$0xff] }
 0x12e   :  { %14455 = vst [vmem:[#allocation11_spill] sm:$0xff] %v10264_v63  ;;  %14457 = vst [vmem:[#allocation13_spill] sm:$0xff] %v10268_v3  ;;  %v7684_v4 = vunpack.i.h.bf16 %v7682_v59  ;;  %v7683_v9 = vunpack.i.l.bf16 %v7682_v59  ;;  %7976 = vrot.lane.b32.xlu1 %v14460_v11, %s8803_s21  ;;  %7971 = vrot.lane.b32.xlu0 %v14461_v56, %s8803_s21  ;;  %v754_v44 = vsel %vm751_vm2, %v7458_v60, %v14462_v36  ;;  %v7454_v39 = vunpack.i.h.bf16 %v14463_v30 }
 0x12f   :  { %14459 = vst [vmem:[#allocation16_spill] sm:$0xff] %v10272_v5  ;;  %v7453_v29 = vunpack.i.l.bf16 %v14463_v30  ;;  %v1038_v10 = vsel %vm1007_vm4, %v7688_v41, %v7689_v45  ;;  %v7697_v5 = vpop.permute.xlu1 %7696 }
 0x130   :  { %v1037_v49 = vsel %vm1007_vm4, %v7684_v4, %v7688_v41  ;;  %v1035_v59 = vsel %vm1007_vm4, %v7679_v35, %v7683_v9  ;;  %v1036_v6 = vsel %vm1007_vm4, %v7683_v9, %v7684_v4  ;;  %v10289_v63 = vsel %vm2481_vm5, %v9765_v37, %v1038_v10  ;;  %v14466_v37 = vld [vmem:[#allocation32_spill] sm:$0xff] }
 0x131   :  { %v7692_v3 = vpop.permute.xlu0 %7691  ;;  %v10293_v36 = vsel %vm2481_vm5, %v9769_v46, %v1035_v59  ;;  %v10297_v30 = vsel %vm2481_vm5, %v9773_v38, %v1036_v6  ;;  %v10301_v41 = vsel %vm2481_vm5, %v14464_v1, %v1037_v49  ;;  %v7699_v35 = vunpack.i.h.bf16 %v7697_v5 }
 0x132   :  { %14465 = vst [vmem:[#allocation10_spill] sm:$0xff] %v10301_v41  ;;  %v7698_v9 = vunpack.i.l.bf16 %v7697_v5  ;;  %v7694_v4 = vunpack.i.h.bf16 %v7692_v3  ;;  %v7693_v11 = vunpack.i.l.bf16 %v7692_v3  ;;  %7986 = vrot.lane.b32.xlu1 %v10211_v24, %s8804_s22  ;;  %7981 = vrot.lane.b32.xlu0 %v14466_v37, %s8803_s21  ;;  %v10309_v46 = vsel %vm2416_vm3, %v10124_v19, %v754_v44 }
 0x133   :  { %v753_v38 = vsel %vm751_vm2, %v7454_v39, %v7458_v60  ;;  %v752_v1 = vsel %vm751_vm2, %v7453_v29, %v7454_v39  ;;  %v7707_v59 = vpop.permute.xlu1 %7706 }
 0x134   :  { %v1042_v10 = vsel %vm1007_vm4, %v7698_v9, %v7699_v35  ;;  %v1041_v5 = vsel %vm1007_vm4, %v7694_v4, %v7698_v9  ;;  %v1039_v3 = vsel %vm1007_vm4, %v7689_v45, %v7693_v11  ;;  %v1040_v49 = vsel %vm1007_vm4, %v7693_v11, %v7694_v4 }
 0x135   :  { %v7702_v6 = vpop.permute.xlu0 %7701  ;;  %v10319_v41 = vsel %vm2481_vm5, %v9797_v53, %v1042_v10  ;;  %v10323_v19 = vsel %vm2481_vm5, %v9801_v57, %v1039_v3  ;;  %v10327_v60 = vsel %vm2481_vm5, %v9805_v34, %v1040_v49  ;;  %v10331_v44 = vsel %vm2481_vm5, %v9809_v55, %v1041_v5  ;;  %v14468_v34 = vld [vmem:[#allocation92_spill] sm:$0xff]  ;;  %v14472_v55 = vld [vmem:[#allocation49_spill] sm:$0xff] }
 0x136   :  { %14467 = vst [vmem:[#allocation15_spill] sm:$0xff] %v10331_v44  ;;  %v7709_v45 = vunpack.i.h.bf16 %v7707_v59  ;;  %v7708_v11 = vunpack.i.l.bf16 %v7707_v59  ;;  %v7704_v39 = vunpack.i.h.bf16 %v7702_v6  ;;  %v7703_v29 = vunpack.i.l.bf16 %v7702_v6  ;;  %7996 = vrot.lane.b32.xlu1 %v10211_v24, %s8805_s23  ;;  %7991 = vrot.lane.b32.xlu0 %v10217_v40, %s8804_s22 }
 0x137   :  { %v10339_v53 = vsel %vm2416_vm3, %v10070_v58, %v752_v1  ;;  %v10343_v57 = vsel %vm2416_vm3, %v10111_v17, %v753_v38  ;;  %v7468_v9 = vunpack.i.l.bf16 %v14468_v34  ;;  %v7717_v49 = vpop.permute.xlu1 %7716  ;;  %v14469_v17 = vld [vmem:[#allocation17_spill] sm:$0xff]  ;;  %v14470_v1 = vld [vmem:[#allocation40_spill] sm:$0xff] }
 0x138   :  { %v1046_v4 = vsel %vm1007_vm4, %v7708_v11, %v7709_v45  ;;  %v1045_v10 = vsel %vm1007_vm4, %v7704_v39, %v7708_v11  ;;  %v1043_v5 = vsel %vm1007_vm4, %v7699_v35, %v7703_v29  ;;  %v1044_v3 = vsel %vm1007_vm4, %v7703_v29, %v7704_v39 }
 0x139   :  { %v7712_v59 = vpop.permute.xlu0 %7711  ;;  %v10353_v58 = vsel %vm2481_vm5, %v9837_v42, %v1046_v4  ;;  %v10357_v38 = vsel %vm2481_vm5, %v14469_v17, %v1043_v5  ;;  %v10361_v6 = vsel %vm2481_vm5, %v14470_v1, %v1044_v3  ;;  %v10365_v11 = vsel %vm2481_vm5, %v14472_v55, %v1045_v10  ;;  %v14474_v42 = vld [vmem:[#allocation93_spill] sm:$0xff] }
 0x13a   :  { %14471 = vst [vmem:[#allocation18_spill] sm:$0xff] %v10361_v6  ;;  %14473 = vst [vmem:[#allocation83_spill] sm:$0xff] %v10365_v11  ;;  %v7719_v35 = vunpack.i.h.bf16 %v7717_v49  ;;  %v7718_v39 = vunpack.i.l.bf16 %v7717_v49  ;;  %v7714_v29 = vunpack.i.h.bf16 %v7712_v59  ;;  %v7713_v44 = vunpack.i.l.bf16 %v7712_v59  ;;  %8006 = vrot.lane.b32.xlu1 %v10211_v24, %s8806_s24  ;;  %8001 = vrot.lane.b32.xlu0 %v10217_v40, %s8805_s23  ;;  %v14477_v11 = vld [vmem:[#allocation52_spill] sm:$0xff] }
 0x13b   :  { %v7464_v4 = vunpack.i.h.bf16 %v14474_v42  ;;  %v7463_v5 = vunpack.i.l.bf16 %v14474_v42  ;;  %v7727_v59 = vpop.permute.xlu1 %7726 }
 0x13c   :  { %v1050_v3 = vsel %vm1007_vm4, %v7718_v39, %v7719_v35  ;;  %v1049_v55 = vsel %vm1007_vm4, %v7714_v29, %v7718_v39  ;;  %v1047_v10 = vsel %vm1007_vm4, %v7709_v45, %v7713_v44  ;;  %v1048_v49 = vsel %vm1007_vm4, %v7713_v44, %v7714_v29 }
 0x13d   :  { %v7722_v17 = vpop.permute.xlu0 %7721  ;;  %v10379_v24 = vsel %vm2481_vm5, %v9865_v0, %v1050_v3  ;;  %v10383_v1 = vsel %vm2481_vm5, %v9869_v47, %v1047_v10  ;;  %v10387_v42 = vsel %vm2481_vm5, %v9873_v26, %v1048_v49  ;;  %v10391_v39 = vsel %vm2481_vm5, %v14477_v11, %v1049_v55 }
 0x13e   :  { %14475 = vst [vmem:[#allocation22_spill] sm:$0xff] %v10383_v1  ;;  %14476 = vst [vmem:[#allocation14_spill] sm:$0xff] %v10387_v42  ;;  %v7729_v45 = vunpack.i.h.bf16 %v7727_v59  ;;  %v7728_v44 = vunpack.i.l.bf16 %v7727_v59  ;;  %v7724_v29 = vunpack.i.h.bf16 %v7722_v17  ;;  %v7723_v6 = vunpack.i.l.bf16 %v7722_v17  ;;  %8016 = vrot.lane.b32.xlu1 %v8895_v20, %s8804_s22  ;;  %8011 = vrot.lane.b32.xlu0 %v10217_v40, %s8806_s24 }
 0x13f   :  { %14478 = vst [vmem:[#allocation21_spill] sm:$0xff] %v10391_v39  ;;  %v14479_v0 = vunpack.i.h.bf16 %v14468_v34  ;;  %v757_v26 = vsel %vm751_vm2, %v7464_v4, %v7468_v9  ;;  %v14480_v3 = vunpack.i.h.bf16 %v14452_v14  ;;  %v7737_v17 = vpop.permute.xlu1 %7736  ;;  %v14054_v39 = vmov 0.0  }
 0x140   :  { %v1054_v55 = vsel %vm1007_vm4, %v7728_v44, %v7729_v45  ;;  %v1053_v10 = vsel %vm1007_vm4, %v7724_v29, %v7728_v44  ;;  %v1051_v49 = vsel %vm1007_vm4, %v7719_v35, %v7723_v6  ;;  %v1052_v59 = vsel %vm1007_vm4, %v7723_v6, %v7724_v29  ;;  %3009 = vmatprep.mubr.f32.mxu0 %v14054_v39  ;;  %v14482_v35 = vld [vmem:[#allocation47_spill] sm:$0xff] }
 0x141   :  { %v758_v47 = vsel %vm751_vm2, %v7468_v9, %v14479_v0  ;;  %v755_v11 = vsel %vm751_vm2, %v14480_v3, %v7463_v5  ;;  %v7732_v40 = vpop.permute.xlu0 %7731  ;;  %v10411_v9 = vsel %vm2481_vm5, %v9897_v28, %v1054_v55  ;;  %v10415_v14 = vsel %vm2481_vm5, %v9901_v13, %v1051_v49  ;;  %v14481_v0 = vld [vmem:[#allocation56_spill] sm:$0xff]  ;;  %3648 = vmatprep.mubr.f32.mxu1 %v14054_v39 }
 0x142   :  { %v10419_v44 = vsel %vm2481_vm5, %v14481_v0, %v1052_v59  ;;  %v10423_v6 = vsel %vm2481_vm5, %v14482_v35, %v1053_v10  ;;  %v7739_v29 = vunpack.i.h.bf16 %v7737_v17  ;;  %v7738_v3 = vunpack.i.l.bf16 %v7737_v17  ;;  %8026 = vrot.lane.b32.xlu1 %v8895_v20, %s8806_s24  ;;  %8021 = vrot.lane.b32.xlu0 %v8895_v20, %s8805_s23  ;;  %v14491_v39 = vld [vmem:[#allocation84_spill] sm:$0xff] }
 0x143   :  { %v7734_v42 = vunpack.i.h.bf16 %v7732_v40  ;;  %v7733_v1 = vunpack.i.l.bf16 %v7732_v40  ;;  %v10432_v28 = vsel %vm2416_vm3, %v10084_v16, %v758_v47  ;;  %v10436_v13 = vsel %vm2416_vm3, %v10074_v52, %v757_v26  ;;  %v7747_v47 = vpop.permute.xlu1 %7746 }
 0x144   :  { %v10439_v55 = vsel %vm751_vm2, %v7463_v5, %v7464_v4  ;;  %v10443_v10 = vsel %vm2416_vm3, %v10092_v50, %v755_v11  ;;  %v1058_v49 = vsel %vm1007_vm4, %v7738_v3, %v7739_v29  ;;  %v14484_v5 = vld [vmem:[#allocation55_spill] sm:$0xff] }
 0x145   :  { %v1057_v59 = vsel %vm1007_vm4, %v7734_v42, %v7738_v3  ;;  %v1055_v20 = vsel %vm1007_vm4, %v7729_v45, %v7733_v1  ;;  %v1056_v16 = vsel %vm1007_vm4, %v7733_v1, %v7734_v42  ;;  %v7742_v17 = vpop.permute.xlu0 %7741  ;;  %v10451_v52 = vsel %vm2481_vm5, %v9929_v62, %v1058_v49  ;;  %v14486_v62 = vld [vmem:[#allocation94_spill] sm:$0xff] }
 0x146   :  { %v10455_v4 = vsel %vm2481_vm5, %v9933_v54, %v1055_v20  ;;  %v10459_v50 = vsel %vm2481_vm5, %v9937_v61, %v1056_v16  ;;  %v10463_v26 = vsel %vm2481_vm5, %v14484_v5, %v1057_v59  ;;  %v7749_v45 = vunpack.i.h.bf16 %v7747_v47  ;;  %8036 = vrot.lane.b32.xlu1 %v8903_v22, %s8805_s23  ;;  %8031 = vrot.lane.b32.xlu0 %v8903_v22, %s8804_s22  ;;  %v14487_v61 = vld [vmem:[#allocation95_spill] sm:$0xff] }
 0x147   :  { %14483 = vst [vmem:[#allocation24_spill] sm:$0xff] %v10459_v50  ;;  %14485 = vst [vmem:[#allocation28_spill] sm:$0xff] %v10463_v26  ;;  %v7748_v1 = vunpack.i.l.bf16 %v7747_v47  ;;  %v7744_v42 = vunpack.i.h.bf16 %v7742_v17  ;;  %v7743_v11 = vunpack.i.l.bf16 %v7742_v17  ;;  %v7478_v40 = vunpack.i.l.bf16 %v14486_v62  ;;  %v7757_v16 = vpop.permute.xlu1 %7756  ;;  %v14500_v26 = vld [vmem:[#allocation61_spill] sm:$0xff] }
 0x148   :  { %v7474_v0 = vunpack.i.h.bf16 %v14487_v61  ;;  %v7473_v35 = vunpack.i.l.bf16 %v14487_v61 }
 0x149   :  { %v1062_v3 = vsel %vm1007_vm4, %v7748_v1, %v7749_v45  ;;  %v1061_v49 = vsel %vm1007_vm4, %v7744_v42, %v7748_v1  ;;  %v1059_v59 = vsel %vm1007_vm4, %v7739_v29, %v7743_v11  ;;  %v1060_v20 = vsel %vm1007_vm4, %v7743_v11, %v7744_v42  ;;  %v7752_v47 = vpop.permute.xlu0 %7751 }
 0x14a   :  { %v10479_v17 = vsel %vm2481_vm5, %v9957_v48, %v1062_v3  ;;  %v10483_v5 = vsel %vm2481_vm5, %v9961_v8, %v1059_v59  ;;  %v10487_v61 = vsel %vm2481_vm5, %v9965_v15, %v1060_v20  ;;  %v10491_v1 = vsel %vm2481_vm5, %v14491_v39, %v1061_v49  ;;  %8046 = vrot.lane.b32.xlu1 %v14444_v25, %s8804_s22  ;;  %v14495_v49 = vld [vmem:[#allocation96_spill] sm:$0xff] }
 0x14b   :  { %14488 = vst [vmem:[#allocation19_spill] sm:$0xff] %v10479_v17  ;;  %14489 = vst [vmem:[#allocation27_spill] sm:$0xff] %v10483_v5  ;;  %v7759_v29 = vunpack.i.h.bf16 %v7757_v16  ;;  %v7758_v42 = vunpack.i.l.bf16 %v7757_v16  ;;  %v7754_v11 = vunpack.i.h.bf16 %v7752_v47  ;;  %v7753_v54 = vunpack.i.l.bf16 %v7752_v47  ;;  %8041 = vrot.lane.b32.xlu0 %v8903_v22, %s8806_s24  ;;  %v14496_v5 = vld [vmem:[#allocation58_spill] sm:$0xff] }
 0x14c   :  { %14490 = vst [vmem:[#allocation25_spill] sm:$0xff] %v10487_v61  ;;  %14492 = vst [vmem:[#allocation20_spill] sm:$0xff] %v10491_v1  ;;  %v14493_v48 = vunpack.i.h.bf16 %v14486_v62  ;;  %v14494_v15 = vunpack.i.h.bf16 %v14468_v34  ;;  %v760_v39 = vsel %vm751_vm2, %v7473_v35, %v7474_v0  ;;  %v7489_v59 = vunpack.i.h.bf16 %v14495_v49  ;;  %v7767_v1 = vpop.permute.xlu1 %7766  ;;  %v14497_v34 = vld [vmem:[#allocation62_spill] sm:$0xff] }
 0x14d   :  { %v1066_v20 = vsel %vm1007_vm4, %v7758_v42, %v7759_v29  ;;  %v1065_v16 = vsel %vm1007_vm4, %v7754_v11, %v7758_v42  ;;  %v1063_v47 = vsel %vm1007_vm4, %v7749_v45, %v7753_v54  ;;  %v1064_v22 = vsel %vm1007_vm4, %v7753_v54, %v7754_v11  ;;  %v7762_v61 = vpop.permute.xlu0 %7761 }
 0x14e   :  { %v762_v8 = vsel %vm751_vm2, %v7478_v40, %v14493_v48  ;;  %v759_v3 = vsel %vm751_vm2, %v14494_v15, %v7473_v35  ;;  %v10511_v48 = vsel %vm2481_vm5, %v14496_v5, %v1066_v20  ;;  %v10515_v15 = vsel %vm2481_vm5, %v14497_v34, %v1063_v47  ;;  %v14498_v35 = vld [vmem:[#allocation53_spill] sm:$0xff]  ;;  %8056 = vrot.lane.b32.xlu1 %v14444_v25, %s8806_s24 }
 0x14f   :  { %v10519_v17 = vsel %vm2481_vm5, %v14498_v35, %v1064_v22  ;;  %v10523_v42 = vsel %vm2481_vm5, %v14500_v26, %v1065_v16  ;;  %v7769_v45 = vunpack.i.h.bf16 %v7767_v1  ;;  %v7768_v54 = vunpack.i.l.bf16 %v7767_v1  ;;  %8051 = vrot.lane.b32.xlu0 %v14444_v25, %s8805_s23  ;;  %v14502_v20 = vld [vmem:[#allocation97_spill] sm:$0xff] }
 0x150   :  { %14499 = vst [vmem:[#allocation26_spill] sm:$0xff] %v10519_v17  ;;  %14501 = vst [vmem:[#allocation70_spill] sm:$0xff] %v10523_v42  ;;  %v7764_v11 = vunpack.i.h.bf16 %v7762_v61  ;;  %v7763_v50 = vunpack.i.l.bf16 %v7762_v61  ;;  %v7488_v5 = vunpack.i.l.bf16 %v14495_v49  ;;  %v7484_v47 = vunpack.i.h.bf16 %v14502_v20  ;;  %v14503_v34 = vld [vmem:[#allocation85_spill] sm:$0xff]  ;;  %v10542_v42 = vpop.permute.xlu1 %7776  ;;  %v14508_v17 = vld [vmem:[#allocation64_spill] sm:$0xff] }
 0x151   :  { %v7483_v22 = vunpack.i.l.bf16 %v14502_v20  ;;  %v14504_v35 = vunpack.i.h.bf16 %v14503_v34  ;;  %v1070_v1 = vsel %vm1007_vm4, %v7768_v54, %v7769_v45  ;;  %14506 = vst [vmem:[#allocation38_spill] sm:$0xff] %v10542_v42  ;;  %v10544_v49 = vpop.permute.xlu0 %7771 }
 0x152   :  { %v1069_v16 = vsel %vm1007_vm4, %v7764_v11, %v7768_v54  ;;  %v1067_v25 = vsel %vm1007_vm4, %v7759_v29, %v7763_v50  ;;  %14507 = vst [vmem:[#allocation41_spill] sm:$0xff] %v10544_v49  ;;  %v10548_v20 = vsel %vm2481_vm5, %v14508_v17, %v1070_v1  ;;  %v1068_v34 = vsel %vm1007_vm4, %v7763_v50, %v7764_v11  ;;  %v14511_v54 = vld [vmem:[#allocation98_spill] sm:$0xff]  ;;  %v14513_v50 = vld [vmem:[#allocation88_spill] sm:$0xff] }
 0x153   :  { %v2480_v26 = vsel %vm2416_vm3, %v10250_v33, %v14504_v35  ;;  %v14509_v33 = vld [vmem:[#allocation68_spill] sm:$0xff]  ;;  %v761_v29 = vsel %vm751_vm2, %v7474_v0, %v7478_v40  ;;  %v7499_v42 = vunpack.i.h.bf16 %v14511_v54  ;;  %v7498_v49 = vunpack.i.l.bf16 %v14511_v54  ;;  %8066 = vrot.lane.b32.xlu1 %v14312_v27, %s8805_s23  ;;  %8061 = vrot.lane.b32.xlu0 %v14312_v27, %s8804_s22  ;;  %v14514_v40 = vld [vmem:[#allocation99_spill] sm:$0xff] }
 0x154   :  { %v10538_v61 = vsel %vm2481_vm5, %v2480_v26, %v7769_v45  ;;  %v10553_v35 = vsel %vm2481_vm5, %v14509_v33, %v1067_v25  ;;  %v14510_v45 = vld [vmem:[#allocation59_spill] sm:$0xff]  ;;  %v10573_v11 = vsel %vm2416_vm3, %v14513_v50, %v10439_v55  ;;  %v7494_v0 = vunpack.i.h.bf16 %v14514_v40  ;;  %v14519_v50 = vld [vmem:[#allocation78_spill] sm:$0xff] }
 0x155   :  { %14505 = vst [vmem:[#allocation90_spill] sm:$0xff] %v10538_v61  ;;  %v10557_v26 = vsel %vm2481_vm5, %v14510_v45, %v1069_v16  ;;  %v14512_v61 = vld [vmem:[#allocation67_spill] sm:$0xff]  ;;  %v7493_v1 = vunpack.i.l.bf16 %v14514_v40  ;;  %v10579_v16 = vsel %vm2416_vm3, %v10128_v32, %v762_v8  ;;  %v10587_v25 = vsel %vm2416_vm3, %v10160_v51, %v760_v39  ;;  %v10591_v55 = vpop.permute.xlu0 %7781  ;;  %v14520_v40 = vld [vmem:[#allocation9_spill] sm:$0xff] }
 0x156   :  { %v10564_v17 = vsel %vm2481_vm5, %v14512_v61, %v1068_v34  ;;  %v10583_v61 = vsel %vm2416_vm3, %v10156_v31, %v759_v3  ;;  %v10589_v34 = vpop.permute.xlu1 %7786  ;;  %v10595_v33 = vsel %vm2416_vm3, %v10136_v2, %v761_v29  ;;  %v766_v45 = vsel %vm751_vm2, %v7488_v5, %v7489_v59 }
 0x157   :  { %v14515_v32 = vunpack.i.h.bf16 %v14486_v62  ;;  %v764_v31 = vsel %vm751_vm2, %v7483_v22, %v7484_v47  ;;  %v765_v3 = vsel %vm751_vm2, %v7484_v47, %v7488_v5  ;;  %v770_v51 = vsel %vm751_vm2, %v7498_v49, %v7499_v42  ;;  %8076 = vrot.lane.b32.xlu1 %v14449_v12, %s8804_s22  ;;  %8071 = vrot.lane.b32.xlu0 %v14312_v27, %s8806_s24 }
 0x158   :  { %v769_v2 = vsel %vm751_vm2, %v7494_v0, %v7498_v49  ;;  %v767_v39 = vsel %vm751_vm2, %v7489_v59, %v7493_v1  ;;  %v768_v62 = vsel %vm751_vm2, %v7493_v1, %v7494_v0  ;;  %v10613_v29 = vsel %vm2416_vm3, %v10164_v23, %v766_v45 }
 0x159   :  { %v763_v8 = vsel %vm751_vm2, %v14515_v32, %v7483_v22  ;;  %v10621_v47 = vsel %vm2416_vm3, %v10179_v43, %v764_v31  ;;  %v14516_v22 = vld [vmem:[#allocation44_spill] sm:$0xff]  ;;  %v10628_v59 = vpop.permute.xlu0 %7791  ;;  %v10632_v23 = vsel %vm2416_vm3, %v10171_v21, %v765_v3  ;;  %v10640_v43 = vsel %vm2416_vm3, %v14519_v50, %v767_v39 }
 0x15a   :  { %v10617_v5 = vsel %vm2416_vm3, %v10175_v18, %v763_v8  ;;  %v14517_v27 = vunpack.i.l.bf16 %v14516_v22  ;;  %v10626_v54 = vpop.permute.xlu1 %7796  ;;  %14518 = vst [vmem:[#allocation46_spill] sm:$0xff] %v10628_v59  ;;  %v10636_v18 = vsel %vm2416_vm3, %v10183_v7, %v770_v51  ;;  %v10644_v0 = vsel %vm2416_vm3, %v14520_v40, %v768_v62  ;;  %v14522_v21 = vld [vmem:[#allocation12_spill] sm:$0xff]  ;;  %v14525_v8 = vld [vmem:[#allocation86_spill] sm:$0xff]  ;;  %v14526_v51 = vld [vmem:[#allocation87_spill] sm:$0xff] }
 0x15b   :  { %8086 = vrot.lane.b32.xlu1 %v14449_v12, %s8806_s24  ;;  %8081 = vrot.lane.b32.xlu0 %v14449_v12, %s8805_s23  ;;  %v7619_v31 = vunpack.i.h.bf16 %v14525_v8  ;;  %v7618_v3 = vunpack.i.l.bf16 %v14525_v8  ;;  %v7613_v39 = vunpack.i.l.bf16 %v14526_v51  ;;  %v14527_v62 = vld [vmem:[#allocation23_spill] sm:$0xff]  ;;  %v14528_v12 = vld [vmem:[#allocation89_spill] sm:$0xff] }
 0x15c   :  { %v771_v49 = vsel %vm751_vm2, %v7499_v42, %v14517_v27  ;;  %v14521_v42 = vld [vmem:[#allocation6_spill] sm:$0xff]  ;;  %v7628_v27 = vunpack.i.l.bf16 %v14528_v12  ;;  %vm11283_vm2 = vmpackc.low %vm2351_vm1, %vm8809_vm15 }
 0x15d   :  { %v10648_v1 = vsel %vm2416_vm3, %v14521_v42, %v769_v2  ;;  %v10656_v7 = vsel %vm2416_vm3, %v14522_v21, %v771_v49  ;;  %v10660_v32 = vpop.permute.xlu0 %7801  ;;  %v7614_v2 = vunpack.i.h.bf16 %v14526_v51  ;;  %v14529_v49 = vld [vmem:[#allocation69_spill] sm:$0xff]  ;;  %v1010_v21 = vsel %vm1007_vm4, %v7618_v3, %v7619_v31 }
 0x15e   :  { %v10658_v45 = vpop.permute.xlu1 %7806  ;;  %14524 = vst [vmem:[#allocation91_spill] sm:$0xff] %v10660_v32  ;;  %v7623_v50 = vunpack.i.l.bf16 %v14529_v49  ;;  %v7624_v8 = vunpack.i.h.bf16 %v14529_v49  ;;  %v10687_v22 = vsel %vm2481_vm5, %v10309_v46, %v1010_v21  ;;  %vm2813_vm3 = vcmask 72704  }
 0x15f   :  { %14523 = vst [vmem:[#allocation30_spill] sm:$0xff] %v10658_v45  ;;  %8096 = vrot.lane.b32.xlu1 %v14527_v62, %s8805_s23  ;;  %8091 = vrot.lane.b32.xlu0 %v14527_v62, %s8804_s22  ;;  %v1009_v51 = vsel %vm1007_vm4, %v7614_v2, %v7618_v3  ;;  %v1008_v32 = vsel %vm1007_vm4, %v7613_v39, %v7614_v2 }
 0x160   :  { %v1011_v49 = vsel %vm1007_vm4, %v7619_v31, %v7623_v50  ;;  %v10697_v2 = vsel %vm2481_vm5, %v10339_v53, %v1008_v32  ;;  %v10701_v39 = vsel %vm2481_vm5, %v10343_v57, %v1009_v51  ;;  %v1012_v46 = vsel %vm1007_vm4, %v7623_v50, %v7624_v8 }
 0x161   :  { %v10675_v42 = vpop.permute.xlu0 %7811  ;;  %14534 = vst [vmem:[#allocation17_spill] sm:$0xff] %v10697_v2  ;;  %14535 = vst [vmem:[#allocation40_spill] sm:$0xff] %v10701_v39  ;;  %v1013_v57 = vsel %vm1007_vm4, %v7624_v8, %v7628_v27  ;;  %v10717_v32 = vsel %vm2481_vm5, %v10443_v10, %v1011_v49  ;;  %v10721_v31 = vsel %vm2481_vm5, %v10573_v11, %v1012_v46  ;;  %v14541_v10 = vld [vmem:[#allocation8_spill] sm:$0xff]  ;;  %v14543_v11 = vld [vmem:[#allocation81_spill] sm:$0xff] }
 0x162   :  { %v10673_v40 = vpop.permute.xlu1 %7816  ;;  %14531 = vst [vmem:[#allocation32_spill] sm:$0xff] %v10675_v42  ;;  %v14532_v42 = vunpack.i.h.bf16 %v14528_v12  ;;  %14537 = vst [vmem:[#allocation93_spill] sm:$0xff] %v10717_v32  ;;  %v14553_v39 = vld [vmem:[#allocation16_spill] sm:$0xff] }
 0x163   :  { %14530 = vst [vmem:[#allocation50_spill] sm:$0xff] %v10673_v40  ;;  %8106 = vrot.lane.b32.xlu1 %v14461_v56, %s8804_s22  ;;  %8101 = vrot.lane.b32.xlu0 %v14527_v62, %s8806_s24  ;;  %14538 = vst [vmem:[#allocation52_spill] sm:$0xff] %v10721_v31 }
 0x164   :  { %v1014_v40 = vsel %vm1007_vm4, %v7628_v27, %v14532_v42 }
 0x165   :  { %v10693_v45 = vpop.permute.xlu0 %7821  ;;  %v10712_v53 = vsel %vm2481_vm5, %v10432_v28, %v1014_v40 }
 0x166   :  { %v7827_v3 = vpop.permute.xlu1 %7826  ;;  %14533 = vst [vmem:[#allocation92_spill] sm:$0xff] %v10693_v45  ;;  %v7824_v59 = vunpack.i.h.bf16 %v10693_v45  ;;  %v14063_v42 = vunpack.i.l.bf16 %v10693_v45  ;;  %14536 = vst [vmem:[#allocation49_spill] sm:$0xff] %v10712_v53  ;;  %v14552_v53 = vld [vmem:[#allocation13_spill] sm:$0xff] }
 0x167   :  { %v7829_v62 = vunpack.i.h.bf16 %v7827_v3  ;;  %v7828_v21 = vunpack.i.l.bf16 %v7827_v3  ;;  %8116 = vrot.lane.b32.xlu1 %v14461_v56, %s8806_s24  ;;  %8111 = vrot.lane.b32.xlu0 %v14461_v56, %s8805_s23  ;;  %v14539_v3 = vld [vmem:[#allocation80_spill] sm:$0xff] }
 0x168   :  { %v1284_v56 = vsel %vm1263_vm6, %v14063_v42, %v7824_v59 }
 0x169   :  { %v1286_v50 = vsel %vm1263_vm6, %v7828_v21, %v7829_v62  ;;  %v1285_v51 = vsel %vm1263_vm6, %v7824_v59, %v7828_v21  ;;  %v7832_v40 = vpop.permute.xlu0 %7831  ;;  %v10734_v8 = vsel %vm2546_vm7, %v14541_v10, %v1284_v56  ;;  %v10742_v21 = vsel %vm2481_vm5, %v10436_v13, %v1013_v57  ;;  %v14547_v56 = vld [vmem:[#allocation74_spill] sm:$0xff] }
 0x16a   :  { %v7837_v28 = vpop.permute.xlu1 %7836  ;;  %v10730_v27 = vsel %vm2546_vm7, %v14539_v3, %v1286_v50  ;;  %14542 = vst [vmem:[#allocation47_spill] sm:$0xff] %v10734_v8  ;;  %v10738_v49 = vsel %vm2546_vm7, %v14543_v11, %v1285_v51  ;;  %14545 = vst [vmem:[#allocation94_spill] sm:$0xff] %v10742_v21  ;;  %v7834_v42 = vunpack.i.h.bf16 %v7832_v40  ;;  %v7833_v45 = vunpack.i.l.bf16 %v7832_v40  ;;  %v14546_v50 = vld [vmem:[#allocation29_spill] sm:$0xff]  ;;  %v14549_v21 = vld [vmem:[#allocation82_spill] sm:$0xff] }
 0x16b   :  { %14540 = vst [vmem:[#allocation56_spill] sm:$0xff] %v10730_v27  ;;  %14544 = vst [vmem:[#allocation55_spill] sm:$0xff] %v10738_v49  ;;  %v7839_v46 = vunpack.i.h.bf16 %v7837_v28  ;;  %v7838_v59 = vunpack.i.l.bf16 %v7837_v28  ;;  %8126 = vrot.lane.b32.xlu1 %v14466_v37, %s8804_s22  ;;  %8121 = vrot.lane.b32.xlu0 %v14546_v50, %s8804_s22  ;;  %v7638_v10 = vunpack.i.l.bf16 %v14547_v56  ;;  %v14548_v51 = vld [vmem:[#allocation65_spill] sm:$0xff]  ;;  %v14551_v3 = vld [vmem:[#allocation11_spill] sm:$0xff] }
 0x16c   :  { %v7634_v11 = vunpack.i.h.bf16 %v14548_v51  ;;  %v7633_v27 = vunpack.i.l.bf16 %v14548_v51  ;;  %v1287_v28 = vsel %vm1263_vm6, %v7829_v62, %v7833_v45  ;;  %v1288_v40 = vsel %vm1263_vm6, %v7833_v45, %v7834_v42 }
 0x16d   :  { %v1290_v13 = vsel %vm1263_vm6, %v7838_v59, %v7839_v46  ;;  %v1289_v57 = vsel %vm1263_vm6, %v7834_v42, %v7838_v59  ;;  %v7842_v8 = vpop.permute.xlu0 %7841  ;;  %v10762_v32 = vsel %vm2546_vm7, %v14551_v3, %v1287_v28  ;;  %v10766_v51 = vsel %vm2546_vm7, %v14552_v53, %v1288_v40 }
 0x16e   :  { %v7847_v49 = vpop.permute.xlu1 %7846  ;;  %v10758_v31 = vsel %vm2546_vm7, %v14549_v21, %v1290_v13  ;;  %v10770_v59 = vsel %vm2546_vm7, %v14553_v39, %v1289_v57  ;;  %v7844_v42 = vunpack.i.h.bf16 %v7842_v8  ;;  %v7843_v2 = vunpack.i.l.bf16 %v7842_v8 }
 0x16f   :  { %14550 = vst [vmem:[#allocation95_spill] sm:$0xff] %v10758_v31  ;;  %14554 = vst [vmem:[#allocation84_spill] sm:$0xff] %v10770_v59  ;;  %v7849_v62 = vunpack.i.h.bf16 %v7847_v49  ;;  %v7848_v45 = vunpack.i.l.bf16 %v7847_v49  ;;  %8136 = vrot.lane.b32.xlu1 %v14466_v37, %s8805_s23  ;;  %8131 = vrot.lane.b32.xlu0 %v14546_v50, %s8805_s23  ;;  %v14555_v21 = vunpack.i.h.bf16 %v14547_v56  ;;  %v14556_v53 = vunpack.i.h.bf16 %v14528_v12 }
 0x170   :  { %v1291_v8 = vsel %vm1263_vm6, %v7839_v46, %v7843_v2  ;;  %v1292_v57 = vsel %vm1263_vm6, %v7843_v2, %v7844_v42 }
 0x171   :  { %v1018_v3 = vsel %vm1007_vm4, %v7638_v10, %v14555_v21  ;;  %v1015_v13 = vsel %vm1007_vm4, %v14556_v53, %v7633_v27  ;;  %v1294_v39 = vsel %vm1263_vm6, %v7848_v45, %v7849_v62  ;;  %v1293_v49 = vsel %vm1263_vm6, %v7844_v42, %v7848_v45  ;;  %v7852_v40 = vpop.permute.xlu0 %7851  ;;  %v14558_v53 = vld [vmem:[#allocation10_spill] sm:$0xff] }
 0x172   :  { %v7857_v28 = vpop.permute.xlu1 %7856  ;;  %v10788_v31 = vsel %vm2546_vm7, %v10289_v63, %v1294_v39  ;;  %v10792_v21 = vsel %vm2546_vm7, %v10293_v36, %v1291_v8  ;;  %v10796_v12 = vsel %vm2546_vm7, %v10297_v30, %v1292_v57  ;;  %v10800_v45 = vsel %vm2546_vm7, %v14558_v53, %v1293_v49  ;;  %v14566_v53 = vld [vmem:[#allocation71_spill] sm:$0xff] }
 0x173   :  { %14557 = vst [vmem:[#allocation96_spill] sm:$0xff] %v10788_v31  ;;  %v7859_v46 = vunpack.i.h.bf16 %v7857_v28  ;;  %v7858_v2 = vunpack.i.l.bf16 %v7857_v28  ;;  %v7854_v42 = vunpack.i.h.bf16 %v7852_v40  ;;  %v7853_v59 = vunpack.i.l.bf16 %v7852_v40  ;;  %8146 = vrot.lane.b32.xlu1 %v14466_v37, %s8806_s24  ;;  %8141 = vrot.lane.b32.xlu0 %v14546_v50, %s8806_s24  ;;  %v14564_v40 = vld [vmem:[#allocation34_spill] sm:$0xff] }
 0x174   :  { %v10808_v63 = vsel %vm2481_vm5, %v10579_v16, %v1018_v3  ;;  %v1017_v36 = vsel %vm1007_vm4, %v7634_v11, %v7638_v10  ;;  %v1016_v30 = vsel %vm1007_vm4, %v7633_v27, %v7634_v11  ;;  %v10814_v39 = vsel %vm2481_vm5, %v10583_v61, %v1015_v13  ;;  %v14562_v10 = vld [vmem:[#allocation15_spill] sm:$0xff] }
 0x175   :  { %v1298_v49 = vsel %vm1263_vm6, %v7858_v2, %v7859_v46  ;;  %v1297_v8 = vsel %vm1263_vm6, %v7854_v42, %v7858_v2  ;;  %v1295_v37 = vsel %vm1263_vm6, %v7849_v62, %v7853_v59  ;;  %v1296_v50 = vsel %vm1263_vm6, %v7853_v59, %v7854_v42  ;;  %v7862_v28 = vpop.permute.xlu0 %7861 }
 0x176   :  { %v7867_v57 = vpop.permute.xlu1 %7866  ;;  %v10822_v16 = vsel %vm2546_vm7, %v10319_v41, %v1298_v49  ;;  %v10826_v27 = vsel %vm2546_vm7, %v10323_v19, %v1295_v37  ;;  %v10830_v61 = vsel %vm2546_vm7, %v10327_v60, %v1296_v50  ;;  %v10834_v11 = vsel %vm2546_vm7, %v14562_v10, %v1297_v8  ;;  %v14565_v41 = vld [vmem:[#allocation31_spill] sm:$0xff] }
 0x177   :  { %14559 = vst [vmem:[#allocation58_spill] sm:$0xff] %v10822_v16  ;;  %14560 = vst [vmem:[#allocation62_spill] sm:$0xff] %v10826_v27  ;;  %v7869_v62 = vunpack.i.h.bf16 %v7867_v57  ;;  %v7868_v59 = vunpack.i.l.bf16 %v7867_v57  ;;  %v7864_v3 = vunpack.i.h.bf16 %v7862_v28  ;;  %v7863_v13 = vunpack.i.l.bf16 %v7862_v28  ;;  %8156 = vrot.lane.b32.xlu1 %v14564_v40, %s8803_s21  ;;  %8151 = vrot.lane.b32.xlu0 %v14565_v41, %s8803_s21  ;;  %v14571_v10 = vld [vmem:[#allocation83_spill] sm:$0xff] }
 0x178   :  { %14561 = vst [vmem:[#allocation53_spill] sm:$0xff] %v10830_v61  ;;  %14563 = vst [vmem:[#allocation61_spill] sm:$0xff] %v10834_v11  ;;  %v10842_v19 = vsel %vm2481_vm5, %v10587_v25, %v1016_v30  ;;  %v10846_v60 = vsel %vm2481_vm5, %v10595_v33, %v1017_v36  ;;  %v7648_v42 = vunpack.i.l.bf16 %v14566_v53  ;;  %v14569_v36 = vld [vmem:[#allocation18_spill] sm:$0xff] }
 0x179   :  { %v1302_v49 = vsel %vm1263_vm6, %v7868_v59, %v7869_v62  ;;  %v1301_v8 = vsel %vm1263_vm6, %v7864_v3, %v7868_v59  ;;  %v1299_v37 = vsel %vm1263_vm6, %v7859_v46, %v7863_v13  ;;  %v1300_v50 = vsel %vm1263_vm6, %v7863_v13, %v7864_v3  ;;  %v7872_v28 = vpop.permute.xlu0 %7871 }
 0x17a   :  { %v7877_v57 = vpop.permute.xlu1 %7876  ;;  %v10856_v25 = vsel %vm2546_vm7, %v10353_v58, %v1302_v49  ;;  %v10860_v33 = vsel %vm2546_vm7, %v10357_v38, %v1299_v37  ;;  %v10864_v30 = vsel %vm2546_vm7, %v14569_v36, %v1300_v50  ;;  %v10868_v59 = vsel %vm2546_vm7, %v14571_v10, %v1301_v8  ;;  %v14573_v58 = vld [vmem:[#allocation77_spill] sm:$0xff] }
 0x17b   :  { %14567 = vst [vmem:[#allocation97_spill] sm:$0xff] %v10856_v25  ;;  %14568 = vst [vmem:[#allocation85_spill] sm:$0xff] %v10860_v33  ;;  %v7879_v46 = vunpack.i.h.bf16 %v7877_v57  ;;  %v7878_v3 = vunpack.i.l.bf16 %v7877_v57  ;;  %v7874_v13 = vunpack.i.h.bf16 %v7872_v28  ;;  %v7873_v2 = vunpack.i.l.bf16 %v7872_v28  ;;  %8166 = vrot.lane.b32.xlu1 %v14564_v40, %s8804_s22  ;;  %8161 = vrot.lane.b32.xlu0 %v14565_v41, %s8804_s22  ;;  %v14575_v25 = vld [vmem:[#allocation22_spill] sm:$0xff]  ;;  %v14579_v33 = vld [vmem:[#allocation21_spill] sm:$0xff] }
 0x17c   :  { %14570 = vst [vmem:[#allocation64_spill] sm:$0xff] %v10864_v30  ;;  %14572 = vst [vmem:[#allocation68_spill] sm:$0xff] %v10868_v59  ;;  %v7644_v38 = vunpack.i.h.bf16 %v14573_v58  ;;  %v7643_v49 = vunpack.i.l.bf16 %v14573_v58  ;;  %v14577_v30 = vld [vmem:[#allocation14_spill] sm:$0xff] }
 0x17d   :  { %v1306_v37 = vsel %vm1263_vm6, %v7878_v3, %v7879_v46  ;;  %v1305_v50 = vsel %vm1263_vm6, %v7874_v13, %v7878_v3  ;;  %v1303_v8 = vsel %vm1263_vm6, %v7869_v62, %v7873_v2  ;;  %v1304_v57 = vsel %vm1263_vm6, %v7873_v2, %v7874_v13  ;;  %v7882_v28 = vpop.permute.xlu0 %7881 }
 0x17e   :  { %v7887_v36 = vpop.permute.xlu1 %7886  ;;  %v10882_v10 = vsel %vm2546_vm7, %v10379_v24, %v1306_v37  ;;  %v10886_v59 = vsel %vm2546_vm7, %v14575_v25, %v1303_v8  ;;  %v10890_v58 = vsel %vm2546_vm7, %v14577_v30, %v1304_v57  ;;  %v10894_v3 = vsel %vm2546_vm7, %v14579_v33, %v1305_v50 }
 0x17f   :  { %14574 = vst [vmem:[#allocation59_spill] sm:$0xff] %v10882_v10  ;;  %14576 = vst [vmem:[#allocation98_spill] sm:$0xff] %v10886_v59  ;;  %v7889_v62 = vunpack.i.h.bf16 %v7887_v36  ;;  %v7888_v2 = vunpack.i.l.bf16 %v7887_v36  ;;  %v7884_v13 = vunpack.i.h.bf16 %v7882_v28  ;;  %v7883_v16 = vunpack.i.l.bf16 %v7882_v28  ;;  %8176 = vrot.lane.b32.xlu1 %v14564_v40, %s8805_s23  ;;  %8171 = vrot.lane.b32.xlu0 %v14565_v41, %s8805_s23 }
 0x180   :  { %14578 = vst [vmem:[#allocation67_spill] sm:$0xff] %v10890_v58  ;;  %14580 = vst [vmem:[#allocation88_spill] sm:$0xff] %v10894_v3  ;;  %v14581_v24 = vunpack.i.h.bf16 %v14566_v53  ;;  %v1021_v30 = vsel %vm1007_vm4, %v7644_v38, %v7648_v42  ;;  %v14582_v37 = vunpack.i.h.bf16 %v14547_v56  ;;  %v1020_v50 = vsel %vm1007_vm4, %v7643_v49, %v7644_v38 }
 0x181   :  { %v1310_v8 = vsel %vm1263_vm6, %v7888_v2, %v7889_v62  ;;  %v1309_v57 = vsel %vm1263_vm6, %v7884_v13, %v7888_v2  ;;  %v1307_v36 = vsel %vm1263_vm6, %v7879_v46, %v7883_v16  ;;  %v1308_v28 = vsel %vm1263_vm6, %v7883_v16, %v7884_v13  ;;  %v7892_v3 = vpop.permute.xlu0 %7891 }
 0x182   :  { %v1022_v25 = vsel %vm1007_vm4, %v7648_v42, %v14581_v24  ;;  %v1019_v33 = vsel %vm1007_vm4, %v14582_v37, %v7643_v49  ;;  %v7897_v10 = vpop.permute.xlu1 %7896  ;;  %v10914_v24 = vsel %vm2546_vm7, %v10411_v9, %v1310_v8  ;;  %v10918_v56 = vsel %vm2546_vm7, %v10415_v14, %v1307_v36 }
 0x183   :  { %14583 = vst [vmem:[#allocation99_spill] sm:$0xff] %v10914_v24  ;;  %14584 = vst [vmem:[#allocation44_spill] sm:$0xff] %v10918_v56  ;;  %v10922_v42 = vsel %vm2546_vm7, %v10419_v44, %v1308_v28  ;;  %v10926_v38 = vsel %vm2546_vm7, %v10423_v6, %v1309_v57  ;;  %v7899_v46 = vunpack.i.h.bf16 %v7897_v10  ;;  %v7898_v16 = vunpack.i.l.bf16 %v7897_v10  ;;  %8186 = vrot.lane.b32.xlu1 %v14564_v40, %s8806_s24  ;;  %v14593_v57 = vld [vmem:[#allocation36_spill] sm:$0xff]  ;;  %v14632_v56 = vld [vmem:[#allocation94_spill] sm:$0xff] }
 0x184   :  { %14585 = vst [vmem:[#allocation78_spill] sm:$0xff] %v10922_v42  ;;  %14586 = vst [vmem:[#allocation9_spill] sm:$0xff] %v10926_v38  ;;  %v7894_v49 = vunpack.i.h.bf16 %v7892_v3  ;;  %v7893_v2 = vunpack.i.l.bf16 %v7892_v3  ;;  %8181 = vrot.lane.b32.xlu0 %v14565_v41, %s8806_s24  ;;  %v10934_v9 = vsel %vm2481_vm5, %v10613_v29, %v1022_v25  ;;  %v10938_v14 = vsel %vm2481_vm5, %v10617_v5, %v1019_v33  ;;  %v14631_v38 = vld [vmem:[#allocation52_spill] sm:$0xff] }
 0x185   :  { %v10942_v44 = vsel %vm2481_vm5, %v10621_v47, %v1020_v50  ;;  %v10946_v6 = vsel %vm2481_vm5, %v10632_v23, %v1021_v30  ;;  %v1314_v40 = vsel %vm1263_vm6, %v7898_v16, %v7899_v46  ;;  %v7902_v13 = vpop.permute.xlu0 %7901  ;;  %v14589_v23 = vld [vmem:[#allocation24_spill] sm:$0xff] }
 0x186   :  { %v1313_v41 = vsel %vm1263_vm6, %v7894_v49, %v7898_v16  ;;  %v1311_v10 = vsel %vm1263_vm6, %v7889_v62, %v7893_v2  ;;  %v1312_v29 = vsel %vm1263_vm6, %v7893_v2, %v7894_v49  ;;  %v7907_v3 = vpop.permute.xlu1 %7906  ;;  %v10954_v5 = vsel %vm2546_vm7, %v10451_v52, %v1314_v40  ;;  %v14591_v30 = vld [vmem:[#allocation28_spill] sm:$0xff]  ;;  %v14594_v52 = vld [vmem:[#allocation33_spill] sm:$0xff]  ;;  %v14596_v16 = vld [vmem:[#allocation7_spill] sm:$0xff] }
 0x187   :  { %14587 = vst [vmem:[#allocation6_spill] sm:$0xff] %v10954_v5  ;;  %v10958_v47 = vsel %vm2546_vm7, %v10455_v4, %v1311_v10  ;;  %v10962_v25 = vsel %vm2546_vm7, %v14589_v23, %v1312_v29  ;;  %v10966_v37 = vsel %vm2546_vm7, %v14591_v30, %v1313_v41  ;;  %v7909_v62 = vunpack.i.h.bf16 %v7907_v3  ;;  %8196 = vrot.lane.b32.xlu1 %v14593_v57, %s8803_s21  ;;  %v14595_v4 = vld [vmem:[#allocation5_spill] sm:$0xff]  ;;  %v14597_v23 = vld [vmem:[#allocation19_spill] sm:$0xff] }
 0x188   :  { %14588 = vst [vmem:[#allocation12_spill] sm:$0xff] %v10958_v47  ;;  %14590 = vst [vmem:[#allocation86_spill] sm:$0xff] %v10962_v25  ;;  %v7908_v33 = vunpack.i.l.bf16 %v7907_v3  ;;  %v7904_v50 = vunpack.i.h.bf16 %v7902_v13  ;;  %v7903_v8 = vunpack.i.l.bf16 %v7902_v13  ;;  %8191 = vrot.lane.b32.xlu0 %v14594_v52, %s8803_s21  ;;  %v7659_v36 = vunpack.i.h.bf16 %v14595_v4  ;;  %v14599_v5 = vld [vmem:[#allocation27_spill] sm:$0xff]  ;;  %v14603_v25 = vld [vmem:[#allocation20_spill] sm:$0xff] }
 0x189   :  { %14592 = vst [vmem:[#allocation87_spill] sm:$0xff] %v10966_v37  ;;  %v7658_v28 = vunpack.i.l.bf16 %v14595_v4  ;;  %v7654_v49 = vunpack.i.h.bf16 %v14596_v16  ;;  %v7653_v2 = vunpack.i.l.bf16 %v14596_v16  ;;  %v7912_v13 = vpop.permute.xlu0 %7911  ;;  %v14601_v37 = vld [vmem:[#allocation25_spill] sm:$0xff] }
 0x18a   :  { %v1318_v40 = vsel %vm1263_vm6, %v7908_v33, %v7909_v62  ;;  %v1317_v41 = vsel %vm1263_vm6, %v7904_v50, %v7908_v33  ;;  %v1315_v10 = vsel %vm1263_vm6, %v7899_v46, %v7903_v8  ;;  %v1316_v29 = vsel %vm1263_vm6, %v7903_v8, %v7904_v50  ;;  %v7917_v3 = vpop.permute.xlu1 %7916 }
 0x18b   :  { %v10982_v30 = vsel %vm2546_vm7, %v14597_v23, %v1318_v40  ;;  %v10986_v4 = vsel %vm2546_vm7, %v14599_v5, %v1315_v10  ;;  %v10990_v16 = vsel %vm2546_vm7, %v14601_v37, %v1316_v29  ;;  %v10994_v33 = vsel %vm2546_vm7, %v14603_v25, %v1317_v41  ;;  %8206 = vrot.lane.b32.xlu1 %v14593_v57, %s8804_s22 }
 0x18c   :  { %14598 = vst [vmem:[#allocation23_spill] sm:$0xff] %v10982_v30  ;;  %14600 = vst [vmem:[#allocation89_spill] sm:$0xff] %v10986_v4  ;;  %v7919_v46 = vunpack.i.h.bf16 %v7917_v3  ;;  %v7918_v50 = vunpack.i.l.bf16 %v7917_v3  ;;  %v7914_v8 = vunpack.i.h.bf16 %v7912_v13  ;;  %v7913_v47 = vunpack.i.l.bf16 %v7912_v13  ;;  %8201 = vrot.lane.b32.xlu0 %v14594_v52, %s8804_s22  ;;  %v14607_v30 = vld [vmem:[#allocation26_spill] sm:$0xff] }
 0x18d   :  { %14602 = vst [vmem:[#allocation69_spill] sm:$0xff] %v10990_v16  ;;  %14604 = vst [vmem:[#allocation80_spill] sm:$0xff] %v10994_v33  ;;  %v1026_v5 = vsel %vm1007_vm4, %v7658_v28, %v7659_v36  ;;  %v1025_v40 = vsel %vm1007_vm4, %v7654_v49, %v7658_v28  ;;  %v7922_v3 = vpop.permute.xlu0 %7921  ;;  %v14609_v33 = vld [vmem:[#allocation70_spill] sm:$0xff] }
 0x18e   :  { %v1322_v37 = vsel %vm1263_vm6, %v7918_v50, %v7919_v46  ;;  %v1321_v10 = vsel %vm1263_vm6, %v7914_v8, %v7918_v50  ;;  %v1319_v25 = vsel %vm1263_vm6, %v7909_v62, %v7913_v47  ;;  %v1320_v41 = vsel %vm1263_vm6, %v7913_v47, %v7914_v8  ;;  %v7927_v29 = vpop.permute.xlu1 %7926 }
 0x18f   :  { %v11008_v13 = vsel %vm2546_vm7, %v10511_v48, %v1322_v37  ;;  %v11012_v23 = vsel %vm2546_vm7, %v10515_v15, %v1319_v25  ;;  %v11016_v28 = vsel %vm2546_vm7, %v14607_v30, %v1320_v41  ;;  %v11020_v50 = vsel %vm2546_vm7, %v14609_v33, %v1321_v10  ;;  %8216 = vrot.lane.b32.xlu1 %v14593_v57, %s8805_s23  ;;  %v14612_v37 = vld [vmem:[#allocation79_spill] sm:$0xff] }
 0x190   :  { %14605 = vst [vmem:[#allocation8_spill] sm:$0xff] %v11008_v13  ;;  %14606 = vst [vmem:[#allocation81_spill] sm:$0xff] %v11012_v23  ;;  %v7929_v62 = vunpack.i.h.bf16 %v7927_v29  ;;  %v7928_v47 = vunpack.i.l.bf16 %v7927_v29  ;;  %v7924_v8 = vunpack.i.h.bf16 %v7922_v3  ;;  %v7923_v16 = vunpack.i.l.bf16 %v7922_v3  ;;  %8211 = vrot.lane.b32.xlu0 %v14594_v52, %s8805_s23  ;;  %v14614_v29 = vld [vmem:[#allocation90_spill] sm:$0xff] }
 0x191   :  { %14608 = vst [vmem:[#allocation29_spill] sm:$0xff] %v11016_v28  ;;  %14610 = vst [vmem:[#allocation74_spill] sm:$0xff] %v11020_v50  ;;  %v11028_v48 = vsel %vm2481_vm5, %v10636_v18, %v1026_v5  ;;  %v14611_v15 = vunpack.i.h.bf16 %v14566_v53  ;;  %v1024_v33 = vsel %vm1007_vm4, %v7653_v2, %v7654_v49  ;;  %v14613_v10 = vunpack.i.l.bf16 %v14612_v37  ;;  %v11046_v53 = vpop.permute.xlu0 %7931 }
 0x192   :  { %v1326_v41 = vsel %vm1263_vm6, %v7928_v47, %v7929_v62  ;;  %v11040_v3 = vsel %vm2546_vm7, %v14614_v29, %v7929_v62  ;;  %v1325_v13 = vsel %vm1263_vm6, %v7924_v8, %v7928_v47  ;;  %v1323_v18 = vsel %vm1263_vm6, %v7919_v46, %v7923_v16  ;;  %v11044_v5 = vpop.permute.xlu1 %7936 }
 0x193   :  { %v1023_v30 = vsel %vm1007_vm4, %v14611_v15, %v7653_v2  ;;  %v1027_v25 = vsel %vm1007_vm4, %v7659_v36, %v14613_v10  ;;  %14615 = vst [vmem:[#allocation65_spill] sm:$0xff] %v11040_v3  ;;  %v11050_v49 = vsel %vm2546_vm7, %v10548_v20, %v1326_v41  ;;  %v1324_v36 = vsel %vm1263_vm6, %v7923_v16, %v7924_v8  ;;  %v14622_v15 = vld [vmem:[#allocation39_spill] sm:$0xff]  ;;  %v14627_v3 = vld [vmem:[#allocation30_spill] sm:$0xff] }
 0x194   :  { %14616 = vst [vmem:[#allocation82_spill] sm:$0xff] %v11050_v49  ;;  %v11055_v2 = vsel %vm2546_vm7, %v10553_v35, %v1323_v18  ;;  %v11059_v62 = vsel %vm2546_vm7, %v10557_v26, %v1325_v13  ;;  %v11063_v46 = vsel %vm2481_vm5, %v10640_v43, %v1023_v30  ;;  %v11067_v47 = vsel %vm2481_vm5, %v10644_v0, %v1024_v33 }
 0x195   :  { %14617 = vst [vmem:[#allocation11_spill] sm:$0xff] %v11055_v2  ;;  %14618 = vst [vmem:[#allocation13_spill] sm:$0xff] %v11059_v62  ;;  %v11071_v20 = vsel %vm2546_vm7, %v10564_v17, %v1324_v36  ;;  %8226 = vrot.lane.b32.xlu1 %v14593_v57, %s8806_s24  ;;  %8221 = vrot.lane.b32.xlu0 %v14594_v52, %s8806_s24  ;;  %v11079_v35 = vsel %vm2481_vm5, %v10648_v1, %v1025_v40  ;;  %v11087_v0 = vpop.permute.xlu0 %7941  ;;  %v14620_v17 = vld [vmem:[#allocation38_spill] sm:$0xff]  ;;  %v14621_v57 = vld [vmem:[#allocation41_spill] sm:$0xff]  ;;  %v7789_v10 = vunpack.i.h.bf16 %v10589_v34  ;;  %v8808_v23 = vmov 0  }
 0x196   :  { %14619 = vst [vmem:[#allocation16_spill] sm:$0xff] %v11071_v20  ;;  %v11083_v26 = vsel %vm2481_vm5, %v10656_v7, %v1027_v25  ;;  %v11085_v43 = vpop.permute.xlu1 %7946  ;;  %v7779_v16 = vunpack.i.h.bf16 %v14620_v17  ;;  %v7778_v13 = vunpack.i.l.bf16 %v14620_v17  ;;  %v7774_v8 = vunpack.i.h.bf16 %v14621_v57  ;;  %v14623_v1 = vld [vmem:[#allocation35_spill] sm:$0xff]  ;;  %v14626_v62 = vld [vmem:[#allocation40_spill] sm:$0xff]  ;;  %8570 = vset.pattern.permute.xlu0 %v8808_v23 }
 0x197   :  { %v7773_v52 = vunpack.i.l.bf16 %v14621_v57  ;;  %v7788_v25 = vunpack.i.l.bf16 %v10589_v34  ;;  %v7784_v41 = vunpack.i.h.bf16 %v10591_v55  ;;  %v7783_v29 = vunpack.i.l.bf16 %v10591_v55  ;;  %v14624_v57 = vld [vmem:[#allocation17_spill] sm:$0xff]  ;;  %v14628_v20 = vld [vmem:[#allocation91_spill] sm:$0xff] }
 0x198   :  { %v1266_v30 = vsel %vm1263_vm6, %v7778_v13, %v7779_v16  ;;  %v1265_v33 = vsel %vm1263_vm6, %v7774_v8, %v7778_v13  ;;  %v7799_v36 = vunpack.i.h.bf16 %v10626_v54  ;;  %v7798_v17 = vunpack.i.l.bf16 %v10626_v54 }
 0x199   :  { %8236 = vrot.lane.b32.xlu1 %v14622_v15, %s8803_s21  ;;  %8231 = vrot.lane.b32.xlu0 %v14623_v1, %s8803_s21  ;;  %v11099_v40 = vpop.permute.xlu0 %7951  ;;  %v1264_v37 = vsel %vm1263_vm6, %v7773_v52, %v7774_v8  ;;  %v11114_v18 = vsel %vm2546_vm7, %v10687_v22, %v1266_v30  ;;  %v14625_v52 = vld [vmem:[#allocation46_spill] sm:$0xff]  ;;  %v11130_v22 = vsel %vm2546_vm7, %v14626_v62, %v1265_v33  ;;  %v7809_v62 = vunpack.i.h.bf16 %v14627_v3 }
 0x19a   :  { %v11097_v7 = vpop.permute.xlu1 %7956  ;;  %v11124_v8 = vsel %vm2546_vm7, %v14624_v57, %v1264_v37  ;;  %v7794_v49 = vunpack.i.h.bf16 %v14625_v52  ;;  %v7793_v55 = vunpack.i.l.bf16 %v14625_v52  ;;  %v1270_v30 = vsel %vm1263_vm6, %v7788_v25, %v7789_v10 }
 0x19b   :  { %v1269_v54 = vsel %vm1263_vm6, %v7784_v41, %v7788_v25  ;;  %v1267_v37 = vsel %vm1263_vm6, %v7779_v16, %v7783_v29  ;;  %v1268_v57 = vsel %vm1263_vm6, %v7783_v29, %v7784_v41  ;;  %v1274_v52 = vsel %vm1263_vm6, %v7798_v17, %v7799_v36  ;;  %v14629_v25 = vld [vmem:[#allocation49_spill] sm:$0xff] }
 0x19c   :  { %v7808_v33 = vunpack.i.l.bf16 %v14627_v3  ;;  %v7803_v2 = vunpack.i.l.bf16 %v14628_v20  ;;  %v11150_v16 = vsel %vm2546_vm7, %v14629_v25, %v1270_v30  ;;  %v1271_v41 = vsel %vm1263_vm6, %v7789_v10, %v7793_v55  ;;  %v14630_v3 = vld [vmem:[#allocation93_spill] sm:$0xff] }
 0x19d   :  { %8246 = vrot.lane.b32.xlu1 %v14622_v15, %s8804_s22  ;;  %8241 = vrot.lane.b32.xlu0 %v14623_v1, %s8804_s22  ;;  %v11120_v34 = vpop.permute.xlu0 %7961  ;;  %v1272_v29 = vsel %vm1263_vm6, %v7793_v55, %v7794_v49  ;;  %v7804_v4 = vunpack.i.h.bf16 %v14628_v20  ;;  %v11157_v24 = vsel %vm2546_vm7, %v14630_v3, %v1267_v37  ;;  %v11161_v42 = vsel %vm2546_vm7, %v14631_v38, %v1268_v57  ;;  %v14636_v25 = vld [vmem:[#allocation37_spill] sm:$0xff] }
 0x19e   :  { %v11118_v13 = vpop.permute.xlu1 %7966  ;;  %v11165_v23 = vsel %vm2546_vm7, %v14632_v56, %v1269_v54  ;;  %v11173_v20 = vsel %vm2546_vm7, %v10808_v63, %v1274_v52  ;;  %v1273_v10 = vsel %vm1263_vm6, %v7794_v49, %v7798_v17  ;;  %v11178_v38 = vsel %vm2546_vm7, %v10814_v39, %v1271_v41  ;;  %v14633_v49 = vld [vmem:[#allocation50_spill] sm:$0xff]  ;;  %v14634_v54 = vld [vmem:[#allocation32_spill] sm:$0xff]  ;;  %v14635_v52 = vld [vmem:[#allocation43_spill] sm:$0xff] }
 0x19f   :  { %v11182_v56 = vsel %vm2546_vm7, %v10842_v19, %v1272_v29  ;;  %v1276_v63 = vsel %vm1263_vm6, %v7803_v2, %v7804_v4  ;;  %v7819_v17 = vunpack.i.h.bf16 %v14633_v49  ;;  %v7818_v39 = vunpack.i.l.bf16 %v14633_v49 }
 0x1a0   :  { %v7813_v37 = vunpack.i.l.bf16 %v14634_v54  ;;  %v11196_v19 = vsel %vm2546_vm7, %v10846_v60, %v1273_v10  ;;  %v7934_v57 = vunpack.i.h.bf16 %v11046_v53  ;;  %v7814_v41 = vunpack.i.h.bf16 %v14634_v54 }
 0x1a1   :  { %8256 = vrot.lane.b32.xlu1 %v14622_v15, %s8805_s23  ;;  %8251 = vrot.lane.b32.xlu0 %v14623_v1, %s8805_s23  ;;  %v11146_v28 = vpop.permute.xlu0 %7971  ;;  %v11218_v49 = vsel %vm2546_vm7, %v10942_v44, %v1276_v63  ;;  %v7933_v44 = vunpack.i.l.bf16 %v11046_v53 }
 0x1a2   :  { %v11144_v50 = vpop.permute.xlu1 %7976  ;;  %v1279_v54 = vsel %vm1263_vm6, %v7809_v62, %v7813_v37  ;;  %v1281_v53 = vsel %vm1263_vm6, %v7814_v41, %v7818_v39 }
 0x1a5   :  { %8266 = vrot.lane.b32.xlu1 %v14622_v15, %s8806_s24  ;;  %8261 = vrot.lane.b32.xlu0 %v14623_v1, %s8806_s24  ;;  %v1278_v15 = vsel %vm1263_vm6, %v7808_v33, %v7809_v62  ;;  %v1275_v1 = vsel %vm1263_vm6, %v7799_v36, %v7803_v2  ;;  %v11188_v30 = vpop.permute.xlu0 %7981  ;;  %v7938_v36 = vunpack.i.l.bf16 %v11044_v5  ;;  %v1277_v2 = vsel %vm1263_vm6, %v7804_v4, %v7808_v33 }
 0x1a6   :  { %v11186_v55 = vpop.permute.xlu1 %7986  ;;  %v11210_v60 = vsel %vm2546_vm7, %v10934_v9, %v1278_v15  ;;  %v11214_v10 = vsel %vm2546_vm7, %v10938_v14, %v1275_v1  ;;  %v1282_v33 = vsel %vm1263_vm6, %v7818_v39, %v7819_v17  ;;  %v11230_v14 = vsel %vm2546_vm7, %v10946_v6, %v1277_v2 }
 0x1a7   :  { %v7988_v3 = vunpack.i.l.bf16 %v11186_v55  ;;  %v1521_v15 = vsel %vm1519_vm8, %v7934_v57, %v7938_v36  ;;  %v1280_v62 = vsel %vm1263_vm6, %v7813_v37, %v7814_v41  ;;  %v14637_v63 = vunpack.i.h.bf16 %v11186_v55 }
 0x1a8   :  { %v11245_v6 = vsel %vm2546_vm7, %v11028_v48, %v1282_v33  ;;  %v11250_v2 = vsel %vm2546_vm7, %v11063_v46, %v1279_v54  ;;  %v2613_v48 = vsel %vm2611_vm10, %v11130_v22, %v1521_v15  ;;  %v11263_v39 = vsel %vm2546_vm7, %v11067_v47, %v1280_v62 }
 0x1a9   :  { %8276 = vrot.lane.b32.xlu1 %v14635_v52, %s8803_s21  ;;  %8271 = vrot.lane.b32.xlu0 %v14636_v25, %s8803_s21  ;;  %v11222_v4 = vpop.permute.xlu0 %7991  ;;  %v1777_v29 = vsel %vm1775_vm9, %v7988_v3, %v14637_v63  ;;  %v7939_v46 = vunpack.i.h.bf16 %v11044_v5  ;;  %v1520_v41 = vsel %vm1519_vm8, %v7933_v44, %v7934_v57  ;;  %v7943_v33 = vunpack.i.l.bf16 %v11087_v0 }
 0x1aa   :  { %v11220_v58 = vpop.permute.xlu1 %7996  ;;  %v7993_v1 = vunpack.i.l.bf16 %v11222_v4  ;;  %v11278_v5 = vsel %vm2546_vm7, %v11079_v35, %v1281_v53  ;;  %v2612_v35 = vsel %vm2611_vm10, %v11124_v8, %v1520_v41 }
 0x1ab   :  { %v7998_v9 = vunpack.i.l.bf16 %v11220_v58  ;;  %v14638_v37 = vunpack.i.h.bf16 %v11220_v58 }
 0x1ac   :  { %v1776_v22 = vsel %vm1775_vm9, %v7993_v1, %v7988_v3  ;;  %v14641_v1 = vld [vmem:[#allocation92_spill] sm:$0xff] }
 0x1ad   :  { %8286 = vrot.lane.b32.xlu1 %v14635_v52, %s8804_s22  ;;  %8281 = vrot.lane.b32.xlu0 %v14636_v25, %s8804_s22  ;;  %v8002_v11 = vpop.permute.xlu0 %8001  ;;  %v2033_v61 = vsel %vm2031_vm11, %v7998_v9, %v14638_v37  ;;  %v14642_v53 = vunpack.i.l.bf16 %v14641_v1  ;;  %v14646_v1 = vunpack.i.h.bf16 %v11220_v58 }
 0x1ae   :  { %v11252_v59 = vpop.permute.xlu1 %8006  ;;  %v8003_v31 = vunpack.i.l.bf16 %v8002_v11 }
 0x1af   :  { %v8009_v27 = vunpack.i.h.bf16 %v11252_v59  ;;  %v8008_v63 = vunpack.i.l.bf16 %v11252_v59  ;;  %v2678_v59 = vsel %vm2676_vm12, %v2613_v48, %v1777_v29  ;;  %v1283_v37 = vsel %vm1263_vm6, %v7819_v17, %v14642_v53 }
 0x1b0   :  { %v2743_v47 = vsel %vm2741_vm14, %v2678_v59, %v2033_v61  ;;  %v2032_v3 = vsel %vm2031_vm11, %v8003_v31, %v7998_v9  ;;  %v1522_v48 = vsel %vm1519_vm8, %v7938_v36, %v7939_v46  ;;  %v7994_v59 = vunpack.i.h.bf16 %v11222_v4 }
 0x1b1   :  { %8296 = vrot.lane.b32.xlu1 %v14635_v52, %s8805_s23  ;;  %8291 = vrot.lane.b32.xlu0 %v14636_v25, %s8805_s23  ;;  %v2289_v54 = vsel %vm2287_vm13, %v8008_v63, %v8009_v27  ;;  %v8012_v15 = vpop.permute.xlu0 %8011  ;;  %v2677_v31 = vsel %vm2676_vm12, %v2612_v35, %v1776_v22  ;;  %v1523_v9 = vsel %vm1519_vm8, %v7939_v46, %v7943_v33  ;;  %v7944_v36 = vunpack.i.h.bf16 %v11087_v0  ;;  %v14645_v35 = vld [vmem:[#allocation42_spill] sm:$0xff] }
 0x1b2   :  { %v11280_v57 = vpop.permute.xlu1 %8016  ;;  %v6836_v44 = vpack.c.bf16 %v2289_v54, %v2743_v47  ;;  %v8013_v61 = vunpack.i.l.bf16 %v8012_v15  ;;  %v8004_v54 = vunpack.i.h.bf16 %v8002_v11  ;;  %v2742_v17 = vsel %vm2741_vm14, %v2677_v31, %v2032_v3 }
 0x1b3   :  { %v8018_v62 = vunpack.i.l.bf16 %v11280_v57  ;;  %v7948_v22 = vunpack.i.l.bf16 %v11085_v43  ;;  %v2615_v0 = vsel %vm2611_vm10, %v11157_v24, %v1523_v9  ;;  %v14643_v3 = vunpack.i.h.bf16 %v11186_v55 }
 0x1b4   :  { %6838 = vmatprep.subr.msk.bf16.mxu0 %vm11283_vm2, %v6836_v44  ;;  %v2288_v8 = vsel %vm2287_vm13, %v8013_v61, %v8008_v63  ;;  %v2614_v44 = vsel %vm2611_vm10, %v11114_v18, %v1522_v48  ;;  %v7949_v63 = vunpack.i.h.bf16 %v11085_v43  ;;  %v14644_v61 = vld [vmem:[#allocation48_spill] sm:$0xff]  ;;  %v2034_v53 = vsel %vm2031_vm11, %v14646_v1, %v8004_v54 }
 0x1b5   :  { %8306 = vrot.lane.b32.xlu1 %v14635_v52, %s8806_s24  ;;  %8301 = vrot.lane.b32.xlu0 %v14636_v25, %s8806_s24  ;;  %v1779_v4 = vsel %vm1775_vm9, %v7994_v59, %v8018_v62  ;;  %v8014_v52 = vunpack.i.h.bf16 %v8012_v15  ;;  %v8022_v25 = vpop.permute.xlu0 %8021  ;;  %v6839_v47 = vpack.c.bf16 %v2288_v8, %v2742_v17  ;;  %v1778_v15 = vsel %vm1775_vm9, %v14643_v3, %v7994_v59  ;;  %v11341_v8 = vld [vmem:[%s13908_s1] sm:$0xff] }
 0x1b6   :  { %v11308_v41 = vpop.permute.xlu1 %8026  ;;  %v8023_v46 = vunpack.i.l.bf16 %v8022_v25  ;;  %v2680_v18 = vsel %vm2676_vm12, %v2615_v0, %v1779_v4  ;;  %v1524_v55 = vsel %vm1519_vm8, %v7943_v33, %v7944_v36  ;;  %v8019_v48 = vunpack.i.h.bf16 %v11280_v57 }
 0x1b7   :  { %v8028_v11 = vunpack.i.l.bf16 %v11308_v41  ;;  %6841 = vmatpush1.bf16.msk.msra.mxu0 %vm11283_vm2, %v6839_v47  ;;  %v2290_v59 = vsel %vm2287_vm13, %v8009_v27, %v8014_v52  ;;  %v2679_v17 = vsel %vm2676_vm12, %v2614_v44, %v1778_v15  ;;  %v8024_v4 = vunpack.i.h.bf16 %v8022_v25 }
 0x1b8   :  { %v2035_v24 = vsel %vm2031_vm11, %v8004_v54, %v8023_v46  ;;  %v1525_v54 = vsel %vm1519_vm8, %v7944_v36, %v7948_v22  ;;  %v2744_v33 = vsel %vm2741_vm14, %v2679_v17, %v2034_v53  ;;  %v1526_v47 = vsel %vm1519_vm8, %v7948_v22, %v7949_v63 }
 0x1b9   :  { %8316 = vrot.lane.b32.xlu1 %v14644_v61, %s8803_s21  ;;  %8311 = vrot.lane.b32.xlu0 %v14645_v35, %s8803_s21  ;;  %v2291_v43 = vsel %vm2287_vm13, %v8014_v52, %v8028_v11  ;;  %v8032_v58 = vpop.permute.xlu0 %8031  ;;  %v2745_v9 = vsel %vm2741_vm14, %v2680_v18, %v2035_v24  ;;  %v2616_v36 = vsel %vm2611_vm10, %v11161_v42, %v1524_v55  ;;  %v7953_v44 = vunpack.i.l.bf16 %v11099_v40 }
 0x1ba   :  { %v11335_v31 = vpop.permute.xlu1 %8036  ;;  %v8033_v27 = vunpack.i.l.bf16 %v8032_v58  ;;  %v6842_v52 = vpack.c.bf16 %v2291_v43, %v2745_v9  ;;  %v6845_v0 = vpack.c.bf16 %v2290_v59, %v2744_v33  ;;  %6732 = vmatmul.mubr.msk.f32.vlgmr.msra.gmra.mrb[0].mxu0 %vm2813_vm3, %v11341_v8  ;;  %v11358_v25 = vsel %vm2546_vm7, %v11083_v26, %v1283_v37 }
 0x1bb   :  { %v8038_v57 = vunpack.i.l.bf16 %v11335_v31  ;;  %v1780_v3 = vsel %vm1775_vm9, %v8018_v62, %v8019_v48  ;;  %v8029_v15 = vunpack.i.h.bf16 %v11308_v41  ;;  %v14647_v53 = vmov 0.0  }
 0x1bc   :  { %v1781_v1 = vsel %vm1775_vm9, %v8019_v48, %v8033_v27  ;;  %6844 = vmatprep.subr.msk.bf16.mxu0 %vm11283_vm2, %v6842_v52  ;;  %3080 = vmatprep.mubr.f32.mxu0 %v14647_v53  ;;  %v2617_v26 = vsel %vm2611_vm10, %v11165_v23, %v1525_v54  ;;  %v7959_v37 = vunpack.i.h.bf16 %v11097_v7  ;;  %v2036_v18 = vsel %vm2031_vm11, %v8023_v46, %v8024_v4 }
 0x1bd   :  { %8326 = vrot.lane.b32.xlu1 %v14644_v61, %s8804_s22  ;;  %8321 = vrot.lane.b32.xlu0 %v14645_v35, %s8804_s22  ;;  %v8042_v22 = vpop.permute.xlu0 %8041  ;;  %v8034_v62 = vunpack.i.h.bf16 %v8032_v58  ;;  %v2037_v41 = vsel %vm2031_vm11, %v8024_v4, %v8038_v57  ;;  %v2682_v43 = vsel %vm2676_vm12, %v2617_v26, %v1781_v1  ;;  %v7958_v23 = vunpack.i.l.bf16 %v11097_v7 }
 0x1be   :  { %v11366_v42 = vpop.permute.xlu1 %8046  ;;  %6847 = vmatpush1.bf16.msk.msra.mxu0 %vm11283_vm2, %v6845_v0  ;;  %v8043_v55 = vunpack.i.l.bf16 %v8042_v22  ;;  %v7954_v46 = vunpack.i.h.bf16 %v11099_v40  ;;  %v2681_v48 = vsel %vm2676_vm12, %v2616_v36, %v1780_v3  ;;  %v8039_v59 = vunpack.i.h.bf16 %v11335_v31 }
 0x1bf   :  { %v8048_v24 = vunpack.i.l.bf16 %v11366_v42  ;;  %v1527_v58 = vsel %vm1519_vm8, %v7949_v63, %v7953_v44  ;;  %v2292_v9 = vsel %vm2287_vm13, %v8028_v11, %v8029_v15  ;;  %v2746_v54 = vsel %vm2741_vm14, %v2681_v48, %v2036_v18  ;;  %v14648_v48 = vld [vmem:[#allocation54_spill] sm:$0xff] }
 0x1c0   :  { %v2293_v17 = vsel %vm2287_vm13, %v8029_v15, %v8043_v55  ;;  %v1782_v40 = vsel %vm1775_vm9, %v8033_v27, %v8034_v62  ;;  %v8044_v52 = vunpack.i.h.bf16 %v8042_v22  ;;  %v2747_v31 = vsel %vm2741_vm14, %v2682_v43, %v2037_v41 }
 0x1c1   :  { %8336 = vrot.lane.b32.xlu1 %v14644_v61, %s8805_s23  ;;  %8331 = vrot.lane.b32.xlu0 %v14645_v35, %s8805_s23  ;;  %v8052_v33 = vpop.permute.xlu0 %8051  ;;  %v2618_v11 = vsel %vm2611_vm10, %v11150_v16, %v1526_v47  ;;  %v1783_v63 = vsel %vm1775_vm9, %v8034_v62, %v8048_v24  ;;  %v6848_v27 = vpack.c.bf16 %v2293_v17, %v2747_v31  ;;  %v8049_v47 = vunpack.i.h.bf16 %v11366_v42 }
 0x1c2   :  { %v11390_v4 = vpop.permute.xlu1 %8056  ;;  %6735 = vmatmul.mubr.msk.f32.vlgmr.msra.gmra.mrb[2].mxu0 %vm2813_vm3, %v11341_v8  ;;  %v8053_v0 = vunpack.i.l.bf16 %v8052_v33  ;;  %v1528_v3 = vsel %vm1519_vm8, %v7953_v44, %v7954_v46  ;;  %v2619_v15 = vsel %vm2611_vm10, %v11178_v38, %v1527_v58  ;;  %v6851_v1 = vpack.c.bf16 %v2292_v9, %v2746_v54 }
 0x1c3   :  { %v8058_v36 = vunpack.i.l.bf16 %v11390_v4  ;;  %3151 = vmatprep.mubr.f32.mxu0 %v14647_v53  ;;  %v2038_v22 = vsel %vm2031_vm11, %v8038_v57, %v8039_v59  ;;  %v2683_v16 = vsel %vm2676_vm12, %v2618_v11, %v1782_v40  ;;  %6850 = vmatprep.subr.msk.bf16.mxu0 %vm11283_vm2, %v6848_v27  ;;  %v1530_v38 = vsel %vm1519_vm8, %v7958_v23, %v7959_v37 }
 0x1c4   :  { %v2684_v57 = vsel %vm2676_vm12, %v2619_v15, %v1783_v63  ;;  %v2294_v18 = vsel %vm2287_vm13, %v8043_v55, %v8044_v52  ;;  %v8054_v62 = vunpack.i.h.bf16 %v8052_v33  ;;  %6853 = vmatpush1.bf16.msk.msra.mxu0 %vm11283_vm2, %v6851_v1  ;;  %v1529_v42 = vsel %vm1519_vm8, %v7954_v46, %v7958_v23 }
 0x1c5   :  { %8346 = vrot.lane.b32.xlu1 %v14644_v61, %s8806_s24  ;;  %8341 = vrot.lane.b32.xlu0 %v14645_v35, %s8806_s24  ;;  %v2295_v26 = vsel %vm2287_vm13, %v8044_v52, %v8058_v36  ;;  %v2039_v61 = vsel %vm2031_vm11, %v8039_v59, %v8053_v0  ;;  %v8062_v44 = vpop.permute.xlu0 %8061  ;;  %v14649_v59 = vld [vmem:[#allocation45_spill] sm:$0xff]  ;;  %v2620_v55 = vsel %vm2611_vm10, %v11182_v56, %v1528_v3  ;;  %v7963_v9 = vunpack.i.l.bf16 %v11120_v34 }
 0x1c6   :  { %v11415_v35 = vpop.permute.xlu1 %8066  ;;  %v8063_v43 = vunpack.i.l.bf16 %v8062_v44  ;;  %v2749_v58 = vsel %vm2741_vm14, %v2684_v57, %v2039_v61  ;;  %v2748_v54 = vsel %vm2741_vm14, %v2683_v16, %v2038_v22  ;;  %v1784_v23 = vsel %vm1775_vm9, %v8048_v24, %v8049_v47 }
 0x1c7   :  { %v8068_v41 = vunpack.i.l.bf16 %v11415_v35  ;;  %v6854_v17 = vpack.c.bf16 %v2295_v26, %v2749_v58  ;;  %v6857_v46 = vpack.c.bf16 %v2294_v18, %v2748_v54  ;;  %v8059_v33 = vunpack.i.h.bf16 %v11390_v4  ;;  %6738 = vmatmul.mubr.msk.f32.vlgmr.msra.gmra.mrb[4].mxu0 %vm2813_vm3, %v11341_v8 }
 0x1c8   :  { %v1785_v40 = vsel %vm1775_vm9, %v8049_v47, %v8063_v43  ;;  %v2621_v56 = vsel %vm2611_vm10, %v11196_v19, %v1529_v42  ;;  %v7969_v11 = vunpack.i.h.bf16 %v11118_v13  ;;  %v2040_v63 = vsel %vm2031_vm11, %v8053_v0, %v8054_v62  ;;  %3222 = vmatprep.mubr.f32.mxu0 %v14647_v53 }
 0x1c9   :  { %8356 = vrot.lane.b32.xlu1 %v14648_v48, %s8803_s21  ;;  %8351 = vrot.lane.b32.xlu0 %v14649_v59, %s8803_s21  ;;  %v8072_v31 = vpop.permute.xlu0 %8071  ;;  %v8064_v27 = vunpack.i.h.bf16 %v8062_v44  ;;  %v2041_v24 = vsel %vm2031_vm11, %v8054_v62, %v8068_v41  ;;  %v2686_v4 = vsel %vm2676_vm12, %v2621_v56, %v1785_v40  ;;  %v7968_v19 = vunpack.i.l.bf16 %v11118_v13 }
 0x1ca   :  { %v11438_v52 = vpop.permute.xlu1 %8076  ;;  %6856 = vmatprep.subr.msk.bf16.mxu0 %vm11283_vm2, %v6854_v17  ;;  %v8073_v15 = vunpack.i.l.bf16 %v8072_v31  ;;  %v7964_v0 = vunpack.i.h.bf16 %v11120_v34  ;;  %v2685_v1 = vsel %vm2676_vm12, %v2620_v55, %v1784_v23  ;;  %v8069_v22 = vunpack.i.h.bf16 %v11415_v35 }
 0x1cb   :  { %v8078_v3 = vunpack.i.l.bf16 %v11438_v52  ;;  %6859 = vmatpush1.bf16.msk.msra.mxu0 %vm11283_vm2, %v6857_v46  ;;  %v1531_v16 = vsel %vm1519_vm8, %v7959_v37, %v7963_v9  ;;  %v2296_v47 = vsel %vm2287_vm13, %v8058_v36, %v8059_v33  ;;  %v2750_v26 = vsel %vm2741_vm14, %v2685_v1, %v2040_v63 }
 0x1cc   :  { %v2297_v61 = vsel %vm2287_vm13, %v8059_v33, %v8073_v15  ;;  %v1786_v57 = vsel %vm1775_vm9, %v8063_v43, %v8064_v27  ;;  %v8074_v18 = vunpack.i.h.bf16 %v8072_v31  ;;  %v2751_v62 = vsel %vm2741_vm14, %v2686_v4, %v2041_v24 }
 0x1cd   :  { %8366 = vrot.lane.b32.xlu1 %v14648_v48, %s8804_s22  ;;  %8361 = vrot.lane.b32.xlu0 %v14649_v59, %s8804_s22  ;;  %v8082_v34 = vpop.permute.xlu0 %8081  ;;  %v2622_v7 = vsel %vm2611_vm10, %v11173_v20, %v1530_v38  ;;  %v1787_v37 = vsel %vm1775_vm9, %v8064_v27, %v8078_v3  ;;  %v6860_v42 = vpack.c.bf16 %v2297_v61, %v2751_v62  ;;  %v8079_v38 = vunpack.i.h.bf16 %v11438_v52 }
 0x1ce   :  { %v11468_v44 = vpop.permute.xlu1 %8086  ;;  %6741 = vmatmul.mubr.msk.f32.vlgmr.msra.gmra.mrb[6].mxu0 %vm2813_vm3, %v11341_v8  ;;  %v8083_v36 = vunpack.i.l.bf16 %v8082_v34  ;;  %v1534_v43 = vsel %vm1519_vm8, %v7968_v19, %v7969_v11  ;;  %v2623_v58 = vsel %vm2611_vm10, %v11214_v10, %v1531_v16  ;;  %v6863_v55 = vpack.c.bf16 %v2296_v47, %v2750_v26 }
 0x1cf   :  { %v8088_v35 = vunpack.i.l.bf16 %v11468_v44  ;;  %3293 = vmatprep.mubr.f32.mxu0 %v14647_v53  ;;  %v2042_v54 = vsel %vm2031_vm11, %v8068_v41, %v8069_v22  ;;  %v2687_v20 = vsel %vm2676_vm12, %v2622_v7, %v1786_v57  ;;  %6862 = vmatprep.subr.msk.bf16.mxu0 %vm11283_vm2, %v6860_v42  ;;  %v1533_v33 = vsel %vm1519_vm8, %v7964_v0, %v7968_v19  ;;  %v14651_v7 = vld [vmem:[#allocation51_spill] sm:$0xff] }
 0x1d0   :  { %v2043_v23 = vsel %vm2031_vm11, %v8069_v22, %v8083_v36  ;;  %v2688_v41 = vsel %vm2676_vm12, %v2623_v58, %v1787_v37  ;;  %v2298_v40 = vsel %vm2287_vm13, %v8073_v15, %v8074_v18  ;;  %v8084_v31 = vunpack.i.h.bf16 %v8082_v34  ;;  %6865 = vmatpush1.bf16.msk.msra.mxu0 %vm11283_vm2, %v6863_v55 }
 0x1d1   :  { %8376 = vrot.lane.b32.xlu1 %v14648_v48, %s8805_s23  ;;  %8371 = vrot.lane.b32.xlu0 %v14649_v59, %s8805_s23  ;;  %v2299_v17 = vsel %vm2287_vm13, %v8074_v18, %v8088_v35  ;;  %v8092_v10 = vpop.permute.xlu0 %8091  ;;  %v1532_v52 = vsel %vm1519_vm8, %v7963_v9, %v7964_v0  ;;  %v2753_v27 = vsel %vm2741_vm14, %v2688_v41, %v2043_v23  ;;  %v7973_v4 = vunpack.i.l.bf16 %v11146_v28 }
 0x1d2   :  { %v11495_v46 = vpop.permute.xlu1 %8096  ;;  %v8093_v63 = vunpack.i.l.bf16 %v8092_v10  ;;  %v2626_v24 = vsel %vm2611_vm10, %v11210_v60, %v1534_v43  ;;  %v2752_v15 = vsel %vm2741_vm14, %v2687_v20, %v2042_v54  ;;  %v6866_v19 = vpack.c.bf16 %v2299_v17, %v2753_v27 }
 0x1d3   :  { %v8098_v56 = vunpack.i.l.bf16 %v11495_v46  ;;  %v1788_v9 = vsel %vm1775_vm9, %v8078_v3, %v8079_v38  ;;  %v6869_v0 = vpack.c.bf16 %v2298_v40, %v2752_v15  ;;  %v8089_v1 = vunpack.i.h.bf16 %v11468_v44  ;;  %6744 = vmatmul.mubr.msk.f32.vlgmr.msra.gmra.mrb[8].mxu0 %vm2813_vm3, %v11341_v8 }
 0x1d4   :  { %v2624_v16 = vsel %vm2611_vm10, %v11218_v49, %v1532_v52  ;;  %v2044_v47 = vsel %vm2031_vm11, %v8083_v36, %v8084_v31  ;;  %v8094_v3 = vunpack.i.h.bf16 %v8092_v10  ;;  %6868 = vmatprep.subr.msk.bf16.mxu0 %vm11283_vm2, %v6866_v19  ;;  %3364 = vmatprep.mubr.f32.mxu0 %v14647_v53  ;;  %v14650_v49 = vld [vmem:[#allocation60_spill] sm:$0xff]  ;;  %v7978_v57 = vunpack.i.l.bf16 %v11144_v50 }
 0x1d5   :  { %8386 = vrot.lane.b32.xlu1 %v14648_v48, %s8806_s24  ;;  %8381 = vrot.lane.b32.xlu0 %v14649_v59, %s8806_s24  ;;  %v1789_v48 = vsel %vm1775_vm9, %v8079_v38, %v8093_v63  ;;  %v8102_v60 = vpop.permute.xlu0 %8101  ;;  %v2625_v59 = vsel %vm2611_vm10, %v11230_v14, %v1533_v33  ;;  %v2045_v26 = vsel %vm2031_vm11, %v8084_v31, %v8098_v56  ;;  %v7979_v14 = vunpack.i.h.bf16 %v11144_v50 }
 0x1d6   :  { %v11518_v22 = vpop.permute.xlu1 %8106  ;;  %v2690_v61 = vsel %vm2676_vm12, %v2625_v59, %v1789_v48  ;;  %v8103_v34 = vunpack.i.l.bf16 %v8102_v60  ;;  %6871 = vmatpush1.bf16.msk.msra.mxu0 %vm11283_vm2, %v6869_v0  ;;  %v2689_v18 = vsel %vm2676_vm12, %v2624_v16, %v1788_v9  ;;  %v8099_v62 = vunpack.i.h.bf16 %v11495_v46 }
 0x1d7   :  { %v8108_v44 = vunpack.i.l.bf16 %v11518_v22  ;;  %v1535_v37 = vsel %vm1519_vm8, %v7969_v11, %v7973_v4  ;;  %v2300_v36 = vsel %vm2287_vm13, %v8088_v35, %v8089_v1  ;;  %v2754_v42 = vsel %vm2741_vm14, %v2689_v18, %v2044_v47 }
 0x1d8   :  { %v2301_v43 = vsel %vm2287_vm13, %v8089_v1, %v8103_v34  ;;  %v1790_v55 = vsel %vm1775_vm9, %v8093_v63, %v8094_v3  ;;  %v8104_v54 = vunpack.i.h.bf16 %v8102_v60  ;;  %v2755_v11 = vsel %vm2741_vm14, %v2690_v61, %v2045_v26 }
 0x1d9   :  { %8396 = vrot.lane.b32.xlu1 %v14650_v49, %s8803_s21  ;;  %8391 = vrot.lane.b32.xlu0 %v14651_v7, %s8803_s21  ;;  %v11551_v58 = vpop.permute.xlu0 %8111  ;;  %v7974_v35 = vunpack.i.h.bf16 %v11146_v28  ;;  %v1791_v20 = vsel %vm1775_vm9, %v8094_v3, %v8108_v44  ;;  %v6872_v17 = vpack.c.bf16 %v2301_v43, %v2755_v11  ;;  %v2627_v23 = vsel %vm2611_vm10, %v11250_v2, %v1535_v37 }
 0x1da   :  { %v11549_v50 = vpop.permute.xlu1 %8116  ;;  %6747 = vmatmul.mubr.msk.f32.vlgmr.msra.gmra.mrb[10].mxu0 %vm2813_vm3, %v11341_v8  ;;  %v8113_v38 = vunpack.i.l.bf16 %v11551_v58  ;;  %v7983_v46 = vunpack.i.l.bf16 %v11188_v30  ;;  %v6875_v10 = vpack.c.bf16 %v2300_v36, %v2754_v42  ;;  %v2046_v33 = vsel %vm2031_vm11, %v8098_v56, %v8099_v62 }
 0x1db   :  { %v8118_v13 = vunpack.i.l.bf16 %v11549_v50  ;;  %3435 = vmatprep.mubr.f32.mxu0 %v14647_v53  ;;  %v2691_v41 = vsel %vm2676_vm12, %v2626_v24, %v1790_v55  ;;  %v8109_v40 = vunpack.i.h.bf16 %v11518_v22  ;;  %6874 = vmatprep.subr.msk.bf16.mxu0 %vm11283_vm2, %v6872_v17  ;;  %v2692_v27 = vsel %vm2676_vm12, %v2627_v23, %v1791_v20  ;;  %v14653_v23 = vld [vmem:[#allocation57_spill] sm:$0xff] }
 0x1dc   :  { %v2047_v52 = vsel %vm2031_vm11, %v8099_v62, %v8113_v38  ;;  %v2302_v56 = vsel %vm2287_vm13, %v8103_v34, %v8104_v54  ;;  %6877 = vmatpush1.bf16.msk.msra.mxu0 %vm11283_vm2, %v6875_v10  ;;  %v1538_v19 = vsel %vm1519_vm8, %v7978_v57, %v7979_v14  ;;  %v1537_v9 = vsel %vm1519_vm8, %v7974_v35, %v7978_v57 }
 0x1dd   :  { %8406 = vrot.lane.b32.xlu1 %v14650_v49, %s8804_s22  ;;  %8401 = vrot.lane.b32.xlu0 %v14651_v7, %s8804_s22  ;;  %v2303_v31 = vsel %vm2287_vm13, %v8104_v54, %v8118_v13  ;;  %v8122_v63 = vpop.permute.xlu0 %8121  ;;  %v1536_v0 = vsel %vm1519_vm8, %v7973_v4, %v7974_v35  ;;  %v2757_v1 = vsel %vm2741_vm14, %v2692_v27, %v2047_v52  ;;  %v8119_v4 = vunpack.i.h.bf16 %v11549_v50  ;;  %v14652_v35 = vld [vmem:[#allocation66_spill] sm:$0xff] }
 0x1de   :  { %v11576_v2 = vpop.permute.xlu1 %8126  ;;  %v8124_v15 = vunpack.i.h.bf16 %v8122_v63  ;;  %v1539_v48 = vsel %vm1519_vm8, %v7979_v14, %v7983_v46  ;;  %v2756_v22 = vsel %vm2741_vm14, %v2691_v41, %v2046_v33  ;;  %v8123_v60 = vunpack.i.l.bf16 %v8122_v63 }
 0x1df   :  { %v8128_v24 = vunpack.i.l.bf16 %v11576_v2  ;;  %v6878_v16 = vpack.c.bf16 %v2303_v31, %v2757_v1  ;;  %v1792_v28 = vsel %vm1775_vm9, %v8108_v44, %v8109_v40  ;;  %v6881_v59 = vpack.c.bf16 %v2302_v56, %v2756_v22  ;;  %6750 = vmatmul.mubr.msk.f32.vlgmr.msra.gmra.mrb[12].mxu0 %vm2813_vm3, %v11341_v8 }
 0x1e0   :  { %v8114_v47 = vunpack.i.h.bf16 %v11551_v58  ;;  %v2628_v61 = vsel %vm2611_vm10, %v11263_v39, %v1536_v0  ;;  %3506 = vmatprep.mubr.f32.mxu0 %v14647_v53  ;;  %v2629_v57 = vsel %vm2611_vm10, %v11278_v5, %v1537_v9  ;;  %v2631_v39 = vsel %vm2611_vm10, %v11358_v25, %v1539_v48 }
 0x1e1   :  { %8416 = vrot.lane.b32.xlu1 %v14650_v49, %s8805_s23  ;;  %8411 = vrot.lane.b32.xlu0 %v14651_v7, %s8805_s23  ;;  %v8132_v26 = vpop.permute.xlu0 %8131  ;;  %v1795_v14 = vsel %vm1775_vm9, %v8124_v15, %v8128_v24  ;;  %v2630_v62 = vsel %vm2611_vm10, %v11245_v6, %v1538_v19  ;;  %v2693_v37 = vsel %vm2676_vm12, %v2628_v61, %v1792_v28  ;;  %v7984_v19 = vunpack.i.h.bf16 %v11188_v30 }
 0x1e2   :  { %v11602_v3 = vpop.permute.xlu1 %8136  ;;  %6880 = vmatprep.subr.msk.bf16.mxu0 %vm11283_vm2, %v6878_v16  ;;  %v8134_v44 = vunpack.i.h.bf16 %v8132_v26  ;;  %v8133_v18 = vunpack.i.l.bf16 %v8132_v26  ;;  %v1793_v36 = vsel %vm1775_vm9, %v8109_v40, %v8123_v60  ;;  %v1794_v42 = vsel %vm1775_vm9, %v8123_v60, %v8124_v15 }
 0x1e3   :  { %v8138_v34 = vunpack.i.l.bf16 %v11602_v3  ;;  %6883 = vmatpush1.bf16.msk.msra.mxu0 %vm11283_vm2, %v6881_v59  ;;  %v2048_v25 = vsel %vm2031_vm11, %v8113_v38, %v8114_v47  ;;  %v2696_v58 = vsel %vm2676_vm12, %v2631_v39, %v1795_v14  ;;  %v2695_v38 = vsel %vm2676_vm12, %v2630_v62, %v1794_v42 }
 0x1e4   :  { %v2049_v43 = vsel %vm2031_vm11, %v8114_v47, %v8133_v18  ;;  %v2050_v11 = vsel %vm2031_vm11, %v8133_v18, %v8134_v44  ;;  %v2758_v40 = vsel %vm2741_vm14, %v2693_v37, %v2048_v25  ;;  %v8129_v28 = vunpack.i.h.bf16 %v11576_v2  ;;  %v14654_v37 = vld [vmem:[#allocation47_spill] sm:$0xff] }
 0x1e5   :  { %8426 = vrot.lane.b32.xlu1 %v14650_v49, %s8806_s24  ;;  %8421 = vrot.lane.b32.xlu0 %v14651_v7, %s8806_s24  ;;  %v2051_v5 = vsel %vm2031_vm11, %v8134_v44, %v8138_v34  ;;  %v2304_v49 = vsel %vm2287_vm13, %v8118_v13, %v8119_v4  ;;  %v8142_v50 = vpop.permute.xlu0 %8141  ;;  %v2694_v13 = vsel %vm2676_vm12, %v2629_v57, %v1793_v36  ;;  %v8139_v26 = vunpack.i.h.bf16 %v11602_v3  ;;  %v14658_v3 = vld [vmem:[#allocation63_spill] sm:$0xff] }
 0x1e6   :  { %v11634_v6 = vpop.permute.xlu1 %8146  ;;  %6753 = vmatmul.mubr.msk.f32.vlgmr.msra.gmra.mrb[14].mxu0 %vm2813_vm3, %v11341_v8  ;;  %v8144_v55 = vunpack.i.h.bf16 %v8142_v50  ;;  %v8143_v54 = vunpack.i.l.bf16 %v8142_v50  ;;  %v2761_v20 = vsel %vm2741_vm14, %v2696_v58, %v2051_v5  ;;  %v2759_v10 = vsel %vm2741_vm14, %v2694_v13, %v2049_v43 }
 0x1e7   :  { %v8148_v7 = vunpack.i.l.bf16 %v11634_v6  ;;  %3577 = vmatprep.mubr.f32.mxu0 %v14647_v53  ;;  %v2760_v56 = vsel %vm2741_vm14, %v2695_v38, %v2050_v11  ;;  %v6887_v9 = vpack.c.bf16 %v2304_v49, %v2758_v40  ;;  %v1540_v59 = vsel %vm1519_vm8, %v7983_v46, %v7984_v19  ;;  %v14655_v49 = vld [vmem:[#allocation55_spill] sm:$0xff] }
 0x1e8   :  { %v2305_v17 = vsel %vm2287_vm13, %v8119_v4, %v8143_v54  ;;  %v2306_v41 = vsel %vm2287_vm13, %v8143_v54, %v8144_v55  ;;  %v2632_v36 = vsel %vm2611_vm10, %v14654_v37, %v1540_v59  ;;  %v1796_v42 = vsel %vm1775_vm9, %v8128_v24, %v8129_v28  ;;  %v14656_v24 = vld [vmem:[#allocation56_spill] sm:$0xff] }
 0x1e9   :  { %8436 = vrot.lane.b32.xlu1 %v14652_v35, %s8803_s21  ;;  %8431 = vrot.lane.b32.xlu0 %v14653_v23, %s8803_s21  ;;  %v2307_v33 = vsel %vm2287_vm13, %v8144_v55, %v8148_v7  ;;  %v8152_v52 = vpop.permute.xlu0 %8151  ;;  %v6884_v63 = vpack.c.bf16 %v2305_v17, %v2759_v10  ;;  %v6893_v15 = vpack.c.bf16 %v2306_v41, %v2760_v56  ;;  %v8149_v5 = vunpack.i.h.bf16 %v11634_v6  ;;  %v14657_v41 = vld [vmem:[#allocation73_spill] sm:$0xff] }
 0x1ea   :  { %v11656_v31 = vpop.permute.xlu1 %8156  ;;  %v6890_v27 = vpack.c.bf16 %v2307_v33, %v2761_v20  ;;  %v8154_v1 = vunpack.i.h.bf16 %v8152_v52  ;;  %v8153_v48 = vunpack.i.l.bf16 %v8152_v52  ;;  %v2052_v10 = vsel %vm2031_vm11, %v8138_v34, %v8139_v26 }
 0x1eb   :  { %6886 = vmatprep.subr.msk.bf16.mxu0 %vm11283_vm2, %v6884_v63  ;;  %v8158_v0 = vunpack.i.l.bf16 %v11656_v31  ;;  %v2308_v56 = vsel %vm2287_vm13, %v8148_v7, %v8149_v5  ;;  %v8159_v7 = vunpack.i.h.bf16 %v11656_v31 }
 0x1ec   :  { %6892 = vmatprep.subr.msk.bf16.mxu1 %vm11283_vm2, %v6890_v27  ;;  %6889 = vmatpush1.bf16.msk.msra.mxu0 %vm11283_vm2, %v6887_v9  ;;  %v1541_v44 = vsel %vm1519_vm8, %v7984_v19, %v8153_v48  ;;  %v1542_v14 = vsel %vm1519_vm8, %v8153_v48, %v8154_v1 }
 0x1ed   :  { %8446 = vrot.lane.b32.xlu1 %v14652_v35, %s8804_s22  ;;  %8441 = vrot.lane.b32.xlu0 %v14653_v23, %s8804_s22  ;;  %v8162_v60 = vpop.permute.xlu0 %8161  ;;  %v1543_v61 = vsel %vm1519_vm8, %v8154_v1, %v8158_v0  ;;  %v2633_v25 = vsel %vm2611_vm10, %v14655_v49, %v1541_v44  ;;  %v2634_v58 = vsel %vm2611_vm10, %v14656_v24, %v1542_v14 }
 0x1ee   :  { %v11669_v22 = vpop.permute.xlu1 %8166  ;;  %6895 = vmatpush1.bf16.msk.msra.mxu1 %vm11283_vm2, %v6893_v15  ;;  %v8163_v16 = vunpack.i.l.bf16 %v8162_v60  ;;  %v8164_v47 = vunpack.i.h.bf16 %v8162_v60  ;;  %v2635_v55 = vsel %vm2611_vm10, %v10762_v32, %v1543_v61  ;;  %v2697_v60 = vsel %vm2676_vm12, %v2632_v36, %v1796_v42 }
 0x1ef   :  { %v8168_v4 = vunpack.i.l.bf16 %v11669_v22  ;;  %6756 = vmatmul.mubr.msk.f32.vlgmr.msra.gmra.mrb[16].mxu0 %vm2813_vm3, %v11341_v8 }
 0x1f0   :  { %v1797_v57 = vsel %vm1775_vm9, %v8129_v28, %v8163_v16  ;;  %3719 = vmatprep.mubr.f32.mxu0 %v14647_v53  ;;  %v1798_v50 = vsel %vm1775_vm9, %v8163_v16, %v8164_v47  ;;  %v2762_v28 = vsel %vm2741_vm14, %v2697_v60, %v2052_v10 }
 0x1f1   :  { %8456 = vrot.lane.b32.xlu1 %v14652_v35, %s8805_s23  ;;  %8451 = vrot.lane.b32.xlu0 %v14653_v23, %s8805_s23  ;;  %v8172_v46 = vpop.permute.xlu0 %8171  ;;  %v1799_v43 = vsel %vm1775_vm9, %v8164_v47, %v8168_v4  ;;  %v2698_v54 = vsel %vm2676_vm12, %v2633_v25, %v1797_v57  ;;  %v2699_v32 = vsel %vm2676_vm12, %v2634_v58, %v1798_v50 }
 0x1f2   :  { %v11692_v30 = vpop.permute.xlu1 %8176  ;;  %6759 = vmatmul.mubr.msk.f32.vlgmr.msra.gmra.mrb[0].mxu1 %vm2813_vm3, %v11341_v8  ;;  %v8174_v39 = vunpack.i.h.bf16 %v8172_v46  ;;  %v8173_v62 = vunpack.i.l.bf16 %v8172_v46  ;;  %v2700_v33 = vsel %vm2676_vm12, %v2635_v55, %v1799_v43  ;;  %v6899_v6 = vpack.c.bf16 %v2308_v56, %v2762_v28  ;;  %v14659_v55 = vld [vmem:[#allocation84_spill] sm:$0xff] }
 0x1f3   :  { %v8178_v18 = vunpack.i.l.bf16 %v11692_v30  ;;  %3790 = vmatprep.mubr.f32.mxu1 %v14647_v53  ;;  %v8169_v46 = vunpack.i.h.bf16 %v11669_v22  ;;  %v1544_v57 = vsel %vm1519_vm8, %v8158_v0, %v8159_v7  ;;  %v8179_v37 = vunpack.i.h.bf16 %v11692_v30  ;;  %v14662_v30 = vld [vmem:[#allocation72_spill] sm:$0xff] }
 0x1f4   :  { %v2053_v2 = vsel %vm2031_vm11, %v8139_v26, %v8173_v62  ;;  %v2054_v20 = vsel %vm2031_vm11, %v8173_v62, %v8174_v39 }
 0x1f5   :  { %8466 = vrot.lane.b32.xlu1 %v14652_v35, %s8806_s24  ;;  %8461 = vrot.lane.b32.xlu0 %v14653_v23, %s8806_s24  ;;  %v2055_v11 = vsel %vm2031_vm11, %v8174_v39, %v8178_v18  ;;  %v2763_v40 = vsel %vm2741_vm14, %v2698_v54, %v2053_v2  ;;  %v2764_v15 = vsel %vm2741_vm14, %v2699_v32, %v2054_v20 }
 0x1f6   :  { %v11725_v13 = vpop.permute.xlu1 %8186  ;;  %v8182_v35 = vpop.permute.xlu0 %8181  ;;  %v2765_v34 = vsel %vm2741_vm14, %v2700_v33, %v2055_v11  ;;  %v2636_v2 = vsel %vm2611_vm10, %v10766_v51, %v1544_v57  ;;  %v1800_v24 = vsel %vm1775_vm9, %v8168_v4, %v8169_v46  ;;  %v14660_v4 = vld [vmem:[#allocation95_spill] sm:$0xff] }
 0x1f7   :  { %v8188_v38 = vunpack.i.l.bf16 %v11725_v13  ;;  %v8184_v17 = vunpack.i.h.bf16 %v8182_v35  ;;  %v8183_v23 = vunpack.i.l.bf16 %v8182_v35  ;;  %v8189_v58 = vunpack.i.h.bf16 %v11725_v13 }
 0x1f9   :  { %8476 = vrot.lane.b32.xlu1 %v14657_v41, %s8803_s21  ;;  %v2311_v52 = vsel %vm2287_vm13, %v8184_v17, %v8188_v38  ;;  %v2309_v63 = vsel %vm2287_vm13, %v8149_v5, %v8183_v23  ;;  %v2310_v27 = vsel %vm2287_vm13, %v8183_v23, %v8184_v17  ;;  %8471 = vrot.lane.b32.xlu0 %v14658_v3, %s8803_s21 }
 0x1fa   :  { %v11749_v19 = vpop.permute.xlu1 %8196  ;;  %v8192_v9 = vpop.permute.xlu0 %8191  ;;  %v6896_v1 = vpack.c.bf16 %v2309_v63, %v2763_v40  ;;  %v6902_v48 = vpack.c.bf16 %v2311_v52, %v2765_v34  ;;  %v6905_v16 = vpack.c.bf16 %v2310_v27, %v2764_v15  ;;  %v2056_v63 = vsel %vm2031_vm11, %v8178_v18, %v8179_v37 }
 0x1fb   :  { %v8198_v59 = vunpack.i.l.bf16 %v11749_v19  ;;  %v8194_v47 = vunpack.i.h.bf16 %v8192_v9  ;;  %v8193_v26 = vunpack.i.l.bf16 %v8192_v9 }
 0x1fc   :  { %6898 = vmatprep.subr.msk.bf16.mxu0 %vm11283_vm2, %v6896_v1  ;;  %6904 = vmatprep.subr.msk.bf16.mxu1 %vm11283_vm2, %v6902_v48  ;;  %v2312_v1 = vsel %vm2287_vm13, %v8188_v38, %v8189_v58  ;;  %v8199_v38 = vunpack.i.h.bf16 %v11749_v19 }
 0x1fd   :  { %8486 = vrot.lane.b32.xlu1 %v14657_v41, %s8804_s22  ;;  %8481 = vrot.lane.b32.xlu0 %v14658_v3, %s8804_s22  ;;  %v1547_v36 = vsel %vm1519_vm8, %v8194_v47, %v8198_v59  ;;  %v1545_v42 = vsel %vm1519_vm8, %v8159_v7, %v8193_v26  ;;  %v1546_v5 = vsel %vm1519_vm8, %v8193_v26, %v8194_v47 }
 0x1fe   :  { %v11763_v61 = vpop.permute.xlu1 %8206  ;;  %v8202_v44 = vpop.permute.xlu0 %8201  ;;  %6901 = vmatpush1.bf16.msk.msra.mxu0 %vm11283_vm2, %v6899_v6  ;;  %6907 = vmatpush1.bf16.msk.msra.mxu1 %vm11283_vm2, %v6905_v16  ;;  %v2637_v54 = vsel %vm2611_vm10, %v14659_v55, %v1545_v42  ;;  %v2638_v35 = vsel %vm2611_vm10, %v14660_v4, %v1546_v5  ;;  %v2639_v20 = vsel %vm2611_vm10, %v10792_v21, %v1547_v36 }
 0x1ff   :  { %v8203_v14 = vunpack.i.l.bf16 %v8202_v44  ;;  %v8208_v39 = vunpack.i.l.bf16 %v11763_v61  ;;  %v8204_v62 = vunpack.i.h.bf16 %v8202_v44  ;;  %v2701_v7 = vsel %vm2676_vm12, %v2636_v2, %v1800_v24 }
 0x200   :  { %v2766_v26 = vsel %vm2741_vm14, %v2701_v7, %v2056_v63  ;;  %v8209_v36 = vunpack.i.h.bf16 %v11763_v61  ;;  %v1548_v42 = vsel %vm1519_vm8, %v8198_v59, %v8199_v38 }
 0x201   :  { %8496 = vrot.lane.b32.xlu1 %v14657_v41, %s8805_s23  ;;  %8491 = vrot.lane.b32.xlu0 %v14658_v3, %s8805_s23  ;;  %v1801_v49 = vsel %vm1775_vm9, %v8169_v46, %v8203_v14  ;;  %v1803_v11 = vsel %vm1775_vm9, %v8204_v62, %v8208_v39  ;;  %v1802_v51 = vsel %vm1775_vm9, %v8203_v14, %v8204_v62 }
 0x202   :  { %6762 = vmatmul.mubr.msk.f32.vlgmr.msra.gmra.mrb[18].mxu0 %vm2813_vm3, %v11341_v8  ;;  %v11786_v31 = vpop.permute.xlu1 %8216  ;;  %v8212_v0 = vpop.permute.xlu0 %8211  ;;  %6765 = vmatmul.mubr.msk.f32.vlgmr.msra.gmra.mrb[2].mxu1 %vm2813_vm3, %v11341_v8  ;;  %v2702_v17 = vsel %vm2676_vm12, %v2637_v54, %v1801_v49  ;;  %v2703_v21 = vsel %vm2676_vm12, %v2638_v35, %v1802_v51  ;;  %v2704_v27 = vsel %vm2676_vm12, %v2639_v20, %v1803_v11  ;;  %v14664_v20 = vld [vmem:[#allocation62_spill] sm:$0xff] }
 0x203   :  { %v8218_v25 = vunpack.i.l.bf16 %v11786_v31  ;;  %v8214_v43 = vunpack.i.h.bf16 %v8212_v0  ;;  %v8213_v50 = vunpack.i.l.bf16 %v8212_v0  ;;  %3861 = vmatprep.mubr.f32.mxu0 %v14647_v53  ;;  %3932 = vmatprep.mubr.f32.mxu1 %v14647_v53  ;;  %v6911_v13 = vpack.c.bf16 %v2312_v1, %v2766_v26 }
 0x204   :  { %v8219_v49 = vunpack.i.h.bf16 %v11786_v31  ;;  %v2640_v11 = vsel %vm2611_vm10, %v10796_v12, %v1548_v42  ;;  %v1804_v51 = vsel %vm1775_vm9, %v8208_v39, %v8209_v36  ;;  %v14663_v39 = vld [vmem:[#allocation96_spill] sm:$0xff] }
 0x205   :  { %8506 = vrot.lane.b32.xlu1 %v14657_v41, %s8806_s24  ;;  %v2057_v22 = vsel %vm2031_vm11, %v8179_v37, %v8213_v50  ;;  %8501 = vrot.lane.b32.xlu0 %v14658_v3, %s8806_s24  ;;  %v2059_v23 = vsel %vm2031_vm11, %v8214_v43, %v8218_v25  ;;  %v2058_v33 = vsel %vm2031_vm11, %v8213_v50, %v8214_v43  ;;  %v14661_v3 = vld [vmem:[#allocation76_spill] sm:$0xff] }
 0x206   :  { %v2767_v34 = vsel %vm2741_vm14, %v2702_v17, %v2057_v22  ;;  %v2769_v18 = vsel %vm2741_vm14, %v2704_v27, %v2059_v23  ;;  %v2768_v48 = vsel %vm2741_vm14, %v2703_v21, %v2058_v33  ;;  %v2060_v27 = vsel %vm2031_vm11, %v8218_v25, %v8219_v49 }
 0x207   :  { %v11819_v10 = vpop.permute.xlu1 %8226  ;;  %v8222_v32 = vpop.permute.xlu0 %8221  ;;  %v2705_v7 = vsel %vm2676_vm12, %v2640_v11, %v1804_v51 }
 0x208   :  { %v8228_v41 = vunpack.i.l.bf16 %v11819_v10  ;;  %v8224_v40 = vunpack.i.h.bf16 %v8222_v32  ;;  %v8223_v52 = vunpack.i.l.bf16 %v8222_v32  ;;  %v8229_v22 = vunpack.i.h.bf16 %v11819_v10 }
 0x209   :  { %8516 = vrot.lane.b32.xlu1 %v14661_v3, %s8803_s21  ;;  %8511 = vrot.lane.b32.xlu0 %v14662_v30, %s8803_s21 }
 0x20a   :  { %v2315_v56 = vsel %vm2287_vm13, %v8224_v40, %v8228_v41  ;;  %v2313_v15 = vsel %vm2287_vm13, %v8189_v58, %v8223_v52  ;;  %v2314_v9 = vsel %vm2287_vm13, %v8223_v52, %v8224_v40  ;;  %v2316_v25 = vsel %vm2287_vm13, %v8228_v41, %v8229_v22 }
 0x20b   :  { %v11843_v60 = vpop.permute.xlu1 %8236  ;;  %v8232_v16 = vpop.permute.xlu0 %8231  ;;  %v6908_v28 = vpack.c.bf16 %v2313_v15, %v2767_v34  ;;  %v6914_v6 = vpack.c.bf16 %v2315_v56, %v2769_v18  ;;  %v6917_v47 = vpack.c.bf16 %v2314_v9, %v2768_v48  ;;  %v14665_v56 = vld [vmem:[#allocation75_spill] sm:$0xff] }
 0x20c   :  { %v8238_v44 = vunpack.i.l.bf16 %v11843_v60  ;;  %v8234_v14 = vunpack.i.h.bf16 %v8232_v16  ;;  %v8233_v46 = vunpack.i.l.bf16 %v8232_v16 }
 0x20d   :  { %8526 = vrot.lane.b32.xlu1 %v14661_v3, %s8804_s22  ;;  %6910 = vmatprep.subr.msk.bf16.mxu0 %vm11283_vm2, %v6908_v28 }
 0x20e   :  { %8521 = vrot.lane.b32.xlu0 %v14662_v30, %s8804_s22  ;;  %6916 = vmatprep.subr.msk.bf16.mxu1 %vm11283_vm2, %v6914_v6  ;;  %v1551_v43 = vsel %vm1519_vm8, %v8234_v14, %v8238_v44  ;;  %v1549_v50 = vsel %vm1519_vm8, %v8199_v38, %v8233_v46  ;;  %v1550_v2 = vsel %vm1519_vm8, %v8233_v46, %v8234_v14 }
 0x20f   :  { %v11857_v57 = vpop.permute.xlu1 %8246  ;;  %v8242_v62 = vpop.permute.xlu0 %8241  ;;  %6913 = vmatpush1.bf16.msk.msra.mxu0 %vm11283_vm2, %v6911_v13  ;;  %6919 = vmatpush1.bf16.msk.msra.mxu1 %vm11283_vm2, %v6917_v47  ;;  %v2642_v35 = vsel %vm2611_vm10, %v14663_v39, %v1550_v2  ;;  %v2643_v17 = vsel %vm2611_vm10, %v14664_v20, %v1551_v43  ;;  %v8239_v47 = vunpack.i.h.bf16 %v11843_v60  ;;  %v2770_v13 = vsel %vm2741_vm14, %v2705_v7, %v2060_v27  ;;  %v14666_v60 = vld [vmem:[#allocation53_spill] sm:$0xff] }
 0x210   :  { %v8243_v37 = vunpack.i.l.bf16 %v8242_v62  ;;  %v8248_v5 = vunpack.i.l.bf16 %v11857_v57  ;;  %v8244_v0 = vunpack.i.h.bf16 %v8242_v62  ;;  %v6923_v10 = vpack.c.bf16 %v2316_v25, %v2770_v13 }
 0x211   :  { %8536 = vrot.lane.b32.xlu1 %v14661_v3, %s8805_s23  ;;  %v8249_v41 = vunpack.i.h.bf16 %v11857_v57  ;;  %v1552_v42 = vsel %vm1519_vm8, %v8238_v44, %v8239_v47  ;;  %v11979_v57 = vld [vmem:[%s13908_s1] sm:$0xff] }
 0x212   :  { %8531 = vrot.lane.b32.xlu0 %v14662_v30, %s8805_s23  ;;  %6768 = vmatmul.mubr.msk.f32.vlgmr.msra.gmra.mrb[20].mxu0 %vm2813_vm3, %v11341_v8  ;;  %v1805_v24 = vsel %vm1775_vm9, %v8209_v36, %v8243_v37  ;;  %v1807_v4 = vsel %vm1775_vm9, %v8244_v0, %v8248_v5  ;;  %v1806_v12 = vsel %vm1775_vm9, %v8243_v37, %v8244_v0  ;;  %v2807_v36 = vld [vmem:[%s13909_s2] sm:$0xff] }
 0x213   :  { %v11880_v19 = vpop.permute.xlu1 %8256  ;;  %v8252_v59 = vpop.permute.xlu0 %8251  ;;  %6771 = vmatmul.mubr.msk.f32.vlgmr.msra.gmra.mrb[4].mxu1 %vm2813_vm3, %v11341_v8  ;;  %4003 = vmatprep.mubr.f32.mxu0 %v14647_v53  ;;  %v2641_v8 = vsel %vm2611_vm10, %v10800_v45, %v1549_v50  ;;  %v2708_v34 = vsel %vm2676_vm12, %v2643_v17, %v1807_v4  ;;  %v1808_v50 = vsel %vm1775_vm9, %v8248_v5, %v8249_v41 }
 0x214   :  { %v8258_v58 = vunpack.i.l.bf16 %v11880_v19  ;;  %v8254_v55 = vunpack.i.h.bf16 %v8252_v59  ;;  %v8253_v54 = vunpack.i.l.bf16 %v8252_v59  ;;  %4074 = vmatprep.mubr.f32.mxu1 %v14647_v53  ;;  %v2706_v23 = vsel %vm2676_vm12, %v2641_v8, %v1805_v24 }
 0x215   :  { %8546 = vrot.lane.b32.xlu1 %v14661_v3, %s8806_s24  ;;  %v2707_v3 = vsel %vm2676_vm12, %v2642_v35, %v1806_v12  ;;  %v2644_v44 = vsel %vm2611_vm10, %v14666_v60, %v1552_v42  ;;  %v14667_v35 = vld [vmem:[#allocation61_spill] sm:$0xff] }
 0x216   :  { %v2061_v61 = vsel %vm2031_vm11, %v8219_v49, %v8253_v54  ;;  %8541 = vrot.lane.b32.xlu0 %v14662_v30, %s8806_s24  ;;  %v2063_v45 = vsel %vm2031_vm11, %v8254_v55, %v8258_v58  ;;  %v2062_v40 = vsel %vm2031_vm11, %v8253_v54, %v8254_v55  ;;  %v8259_v49 = vunpack.i.h.bf16 %v11880_v19  ;;  %v14668_v19 = vld [vmem:[#allocation58_spill] sm:$0xff] }
 0x217   :  { %v11913_v32 = vpop.permute.xlu1 %8266  ;;  %v8262_v33 = vpop.permute.xlu0 %8261  ;;  %v2771_v15 = vsel %vm2741_vm14, %v2706_v23, %v2061_v61  ;;  %v2773_v31 = vsel %vm2741_vm14, %v2708_v34, %v2063_v45  ;;  %v2772_v1 = vsel %vm2741_vm14, %v2707_v3, %v2062_v40  ;;  %v2709_v4 = vsel %vm2676_vm12, %v2644_v44, %v1808_v50 }
 0x218   :  { %v8268_v52 = vunpack.i.l.bf16 %v11913_v32  ;;  %v8264_v63 = vunpack.i.h.bf16 %v8262_v33  ;;  %v8263_v21 = vunpack.i.l.bf16 %v8262_v33  ;;  %v2064_v12 = vsel %vm2031_vm11, %v8258_v58, %v8259_v49  ;;  %v14669_v33 = vld [vmem:[#allocation85_spill] sm:$0xff] }
 0x219   :  { %8556 = vrot.lane.b32.xlu1 %v14665_v56, %s8804_s22  ;;  %v8269_v61 = vunpack.i.h.bf16 %v11913_v32  ;;  %v2774_v32 = vsel %vm2741_vm14, %v2709_v4, %v2064_v12 }
 0x21a   :  { %v2319_v9 = vsel %vm2287_vm13, %v8264_v63, %v8268_v52  ;;  %v2317_v30 = vsel %vm2287_vm13, %v8229_v22, %v8263_v21  ;;  %v2318_v18 = vsel %vm2287_vm13, %v8263_v21, %v8264_v63  ;;  %8551 = vrot.lane.b32.xlu0 %v14665_v56, %s8803_s21 }
 0x21b   :  { %v11937_v48 = vpop.permute.xlu1 %8276  ;;  %v8272_v16 = vpop.permute.xlu0 %8271  ;;  %v6920_v28 = vpack.c.bf16 %v2317_v30, %v2771_v15  ;;  %v6926_v6 = vpack.c.bf16 %v2319_v9, %v2773_v31  ;;  %v6929_v26 = vpack.c.bf16 %v2318_v18, %v2772_v1  ;;  %v2320_v30 = vsel %vm2287_vm13, %v8268_v52, %v8269_v61 }
 0x21c   :  { %v8278_v38 = vunpack.i.l.bf16 %v11937_v48  ;;  %v8274_v14 = vunpack.i.h.bf16 %v8272_v16  ;;  %v8273_v46 = vunpack.i.l.bf16 %v8272_v16 }
 0x21d   :  { %8566 = vrot.lane.b32.xlu1 %v14665_v56, %s8806_s24  ;;  %6922 = vmatprep.subr.msk.bf16.mxu0 %vm11283_vm2, %v6920_v28 }
 0x21e   :  { %8561 = vrot.lane.b32.xlu0 %v14665_v56, %s8805_s23  ;;  %6928 = vmatprep.subr.msk.bf16.mxu1 %vm11283_vm2, %v6926_v6  ;;  %v1555_v59 = vsel %vm1519_vm8, %v8274_v14, %v8278_v38  ;;  %v1553_v24 = vsel %vm1519_vm8, %v8239_v47, %v8273_v46  ;;  %v1554_v55 = vsel %vm1519_vm8, %v8273_v46, %v8274_v14 }
 0x21f   :  { %v11952_v62 = vpop.permute.xlu1 %8286  ;;  %v8282_v37 = vpop.permute.xlu0 %8281  ;;  %6925 = vmatpush1.bf16.msk.msra.mxu0 %vm11283_vm2, %v6923_v10  ;;  %6931 = vmatpush1.bf16.msk.msra.mxu1 %vm11283_vm2, %v6929_v26  ;;  %v2645_v20 = vsel %vm2611_vm10, %v14667_v35, %v1553_v24  ;;  %v2646_v58 = vsel %vm2611_vm10, %v14668_v19, %v1554_v55  ;;  %v2647_v40 = vsel %vm2611_vm10, %v14669_v33, %v1555_v59  ;;  %v14670_v24 = vld [vmem:[#allocation64_spill] sm:$0xff]  ;;  %v14673_v33 = vld [vmem:[#allocation98_spill] sm:$0xff] }
 0x220   :  { %v8283_v0 = vunpack.i.l.bf16 %v8282_v37  ;;  %v8284_v43 = vunpack.i.h.bf16 %v8282_v37  ;;  %v8288_v2 = vunpack.i.l.bf16 %v11952_v62  ;;  %v6935_v10 = vpack.c.bf16 %v2320_v30, %v2774_v32 }
 0x221   :  { %v8289_v14 = vunpack.i.h.bf16 %v11952_v62 }
 0x222   :  { %2810 = vperm.xlu0 %8570, %v2807_v36   ;;  %6774 = vmatmul.mubr.msk.f32.vlgmr.msra.gmra.mrb[22].mxu0 %vm2813_vm3, %v11979_v57  ;;  %v1809_v11 = vsel %vm1775_vm9, %v8249_v41, %v8283_v0  ;;  %v1810_v39 = vsel %vm1775_vm9, %v8283_v0, %v8284_v43  ;;  %v1811_v17 = vsel %vm1775_vm9, %v8284_v43, %v8288_v2  ;;  %v8279_v41 = vunpack.i.h.bf16 %v11937_v48 }
 0x223   :  { %v11983_v5 = vpop.permute.xlu1 %8296  ;;  %v8292_v54 = vpop.permute.xlu0 %8291  ;;  %6777 = vmatmul.mubr.msk.f32.vlgmr.msra.gmra.mrb[6].mxu1 %vm2813_vm3, %v11979_v57  ;;  %4145 = vmatprep.mubr.f32.mxu0 %v14647_v53  ;;  %v2710_v63 = vsel %vm2676_vm12, %v2645_v20, %v1809_v11  ;;  %v2711_v34 = vsel %vm2676_vm12, %v2646_v58, %v1810_v39  ;;  %v2712_v18 = vsel %vm2676_vm12, %v2647_v40, %v1811_v17  ;;  %v14671_v20 = vld [vmem:[#allocation68_spill] sm:$0xff]  ;;  %v14672_v58 = vld [vmem:[#allocation97_spill] sm:$0xff] }
 0x224   :  { %v8298_v51 = vunpack.i.l.bf16 %v11983_v5  ;;  %v8294_v22 = vunpack.i.h.bf16 %v8292_v54  ;;  %v8293_v8 = vunpack.i.l.bf16 %v8292_v54  ;;  %4216 = vmatprep.mubr.f32.mxu1 %v14647_v53  ;;  %v8299_v50 = vunpack.i.h.bf16 %v11983_v5 }
 0x225   :  { %v1812_v44 = vsel %vm1775_vm9, %v8288_v2, %v8289_v14 }
 0x226   :  { %v2065_v23 = vsel %vm2031_vm11, %v8259_v49, %v8293_v8  ;;  %v2066_v45 = vsel %vm2031_vm11, %v8293_v8, %v8294_v22  ;;  %v2067_v21 = vsel %vm2031_vm11, %v8294_v22, %v8298_v51  ;;  %v1556_v49 = vsel %vm1519_vm8, %v8278_v38, %v8279_v41 }
 0x227   :  { %v12012_v27 = vpop.permute.xlu1 %8306  ;;  %v8302_v3 = vpop.permute.xlu0 %8301  ;;  %v2776_v31 = vsel %vm2741_vm14, %v2711_v34, %v2066_v45  ;;  %v2775_v25 = vsel %vm2741_vm14, %v2710_v63, %v2065_v23  ;;  %v2777_v6 = vsel %vm2741_vm14, %v2712_v18, %v2067_v21  ;;  %v2648_v48 = vsel %vm2611_vm10, %v14670_v24, %v1556_v49 }
 0x228   :  { %v8308_v56 = vunpack.i.l.bf16 %v12012_v27  ;;  %v8304_v15 = vunpack.i.h.bf16 %v8302_v3  ;;  %v8303_v9 = vunpack.i.l.bf16 %v8302_v3  ;;  %v2713_v12 = vsel %vm2676_vm12, %v2648_v48, %v1812_v44 }
 0x229   :  { %v8309_v39 = vunpack.i.h.bf16 %v12012_v27 }
 0x22a   :  { %v2323_v1 = vsel %vm2287_vm13, %v8304_v15, %v8308_v56  ;;  %v2321_v16 = vsel %vm2287_vm13, %v8269_v61, %v8303_v9  ;;  %v2322_v28 = vsel %vm2287_vm13, %v8303_v9, %v8304_v15  ;;  %v2068_v61 = vsel %vm2031_vm11, %v8298_v51, %v8299_v50 }
 0x22b   :  { %v6941_v7 = vpack.c.bf16 %v2322_v28, %v2776_v31  ;;  %v12029_v52 = vpop.permute.xlu1 %8316  ;;  %v8312_v47 = vpop.permute.xlu0 %8311  ;;  %v6932_v26 = vpack.c.bf16 %v2321_v16, %v2775_v25  ;;  %v6938_v13 = vpack.c.bf16 %v2323_v1, %v2777_v6  ;;  %v2324_v18 = vsel %vm2287_vm13, %v8308_v56, %v8309_v39 }
 0x22c   :  { %v8318_v46 = vunpack.i.l.bf16 %v12029_v52  ;;  %v8314_v37 = vunpack.i.h.bf16 %v8312_v47  ;;  %v8313_v36 = vunpack.i.l.bf16 %v8312_v47  ;;  %v2778_v27 = vsel %vm2741_vm14, %v2713_v12, %v2068_v61 }
 0x22d   :  { %6934 = vmatprep.subr.msk.bf16.mxu0 %vm11283_vm2, %v6932_v26  ;;  %6940 = vmatprep.subr.msk.bf16.mxu1 %vm11283_vm2, %v6938_v13 }
 0x22e   :  { %6937 = vmatpush1.bf16.msk.msra.mxu0 %vm11283_vm2, %v6935_v10  ;;  %6943 = vmatpush1.bf16.msk.msra.mxu1 %vm11283_vm2, %v6941_v7  ;;  %v1559_v38 = vsel %vm1519_vm8, %v8314_v37, %v8318_v46  ;;  %v1557_v55 = vsel %vm1519_vm8, %v8279_v41, %v8313_v36  ;;  %v1558_v54 = vsel %vm1519_vm8, %v8313_v36, %v8314_v37  ;;  %v8319_v41 = vunpack.i.h.bf16 %v12029_v52  ;;  %v14674_v52 = vld [vmem:[#allocation67_spill] sm:$0xff] }
 0x22f   :  { %v12042_v42 = vpop.permute.xlu1 %8326  ;;  %v8322_v0 = vpop.permute.xlu0 %8321  ;;  %v2649_v17 = vsel %vm2611_vm10, %v14671_v20, %v1557_v55  ;;  %v2650_v5 = vsel %vm2611_vm10, %v14672_v58, %v1558_v54  ;;  %v2651_v51 = vsel %vm2611_vm10, %v14673_v33, %v1559_v38  ;;  %v6947_v10 = vpack.c.bf16 %v2324_v18, %v2778_v27  ;;  %v14677_v58 = vld [vmem:[#allocation44_spill] sm:$0xff] }
 0x230   :  { %v8323_v43 = vunpack.i.l.bf16 %v8322_v0  ;;  %v8324_v60 = vunpack.i.h.bf16 %v8322_v0  ;;  %v8328_v59 = vunpack.i.l.bf16 %v12042_v42 }
 0x231   :  { %6780 = vmatmul.mubr.msk.f32.vlgmr.msra.gmra.mrb[24].mxu0 %vm2813_vm3, %v11979_v57  ;;  %6783 = vmatmul.mubr.msk.f32.vlgmr.msra.gmra.mrb[8].mxu1 %vm2813_vm3, %v11979_v57 }
 0x232   :  { %4287 = vmatprep.mubr.f32.mxu0 %v14647_v53  ;;  %v1813_v2 = vsel %vm1775_vm9, %v8289_v14, %v8323_v43  ;;  %4358 = vmatprep.mubr.f32.mxu1 %v14647_v53  ;;  %v1814_v35 = vsel %vm1775_vm9, %v8323_v43, %v8324_v60  ;;  %v1815_v23 = vsel %vm1775_vm9, %v8324_v60, %v8328_v59 }
 0x233   :  { %v12063_v11 = vpop.permute.xlu1 %8336  ;;  %v8332_v62 = vpop.permute.xlu0 %8331  ;;  %v2714_v40 = vsel %vm2676_vm12, %v2649_v17, %v1813_v2  ;;  %v2715_v34 = vsel %vm2676_vm12, %v2650_v5, %v1814_v35  ;;  %v2716_v31 = vsel %vm2676_vm12, %v2651_v51, %v1815_v23  ;;  %v1560_v43 = vsel %vm1519_vm8, %v8318_v46, %v8319_v41  ;;  %v14675_v17 = vld [vmem:[#allocation88_spill] sm:$0xff] }
 0x234   :  { %v8338_v22 = vunpack.i.l.bf16 %v12063_v11  ;;  %v8334_v8 = vunpack.i.h.bf16 %v8332_v62  ;;  %v8333_v4 = vunpack.i.l.bf16 %v8332_v62  ;;  %v8339_v60 = vunpack.i.h.bf16 %v12063_v11  ;;  %v14676_v11 = vld [vmem:[#allocation59_spill] sm:$0xff] }
 0x235   :  { %v2652_v46 = vsel %vm2611_vm10, %v14674_v52, %v1560_v43 }
 0x236   :  { %v2069_v45 = vsel %vm2031_vm11, %v8299_v50, %v8333_v4  ;;  %v2070_v19 = vsel %vm2031_vm11, %v8333_v4, %v8334_v8  ;;  %v2071_v63 = vsel %vm2031_vm11, %v8334_v8, %v8338_v22  ;;  %v8329_v50 = vunpack.i.h.bf16 %v12042_v42 }
 0x237   :  { %v12090_v21 = vpop.permute.xlu1 %8346  ;;  %v8342_v3 = vpop.permute.xlu0 %8341  ;;  %v2780_v25 = vsel %vm2741_vm14, %v2715_v34, %v2070_v19  ;;  %v2779_v1 = vsel %vm2741_vm14, %v2714_v40, %v2069_v45  ;;  %v2781_v32 = vsel %vm2741_vm14, %v2716_v31, %v2071_v63 }
 0x238   :  { %v8348_v15 = vunpack.i.l.bf16 %v12090_v21  ;;  %v8344_v9 = vunpack.i.h.bf16 %v8342_v3  ;;  %v8343_v30 = vunpack.i.l.bf16 %v8342_v3  ;;  %v1816_v61 = vsel %vm1775_vm9, %v8328_v59, %v8329_v50 }
 0x239   :  { %v8349_v35 = vunpack.i.h.bf16 %v12090_v21 }
 0x23a   :  { %v2327_v16 = vsel %vm2287_vm13, %v8344_v9, %v8348_v15  ;;  %v2325_v28 = vsel %vm2287_vm13, %v8309_v39, %v8343_v30  ;;  %v2326_v6 = vsel %vm2287_vm13, %v8343_v30, %v8344_v9  ;;  %v2072_v39 = vsel %vm2031_vm11, %v8338_v22, %v8339_v60 }
 0x23b   :  { %v6953_v7 = vpack.c.bf16 %v2326_v6, %v2780_v25  ;;  %v12107_v56 = vpop.permute.xlu1 %8356  ;;  %v8352_v47 = vpop.permute.xlu0 %8351  ;;  %v6944_v26 = vpack.c.bf16 %v2325_v28, %v2779_v1  ;;  %v6950_v13 = vpack.c.bf16 %v2327_v16, %v2781_v32  ;;  %v2328_v30 = vsel %vm2287_vm13, %v8348_v15, %v8349_v35 }
 0x23c   :  { %v8358_v37 = vunpack.i.l.bf16 %v12107_v56  ;;  %v8354_v36 = vunpack.i.h.bf16 %v8352_v47  ;;  %v8353_v0 = vunpack.i.l.bf16 %v8352_v47  ;;  %v2717_v15 = vsel %vm2676_vm12, %v2652_v46, %v1816_v61 }
 0x23d   :  { %6946 = vmatprep.subr.msk.bf16.mxu0 %vm11283_vm2, %v6944_v26  ;;  %6952 = vmatprep.subr.msk.bf16.mxu1 %vm11283_vm2, %v6950_v13  ;;  %v2782_v26 = vsel %vm2741_vm14, %v2717_v15, %v2072_v39  ;;  %v8359_v13 = vunpack.i.h.bf16 %v12107_v56 }
 0x23e   :  { %6949 = vmatpush1.bf16.msk.msra.mxu0 %vm11283_vm2, %v6947_v10  ;;  %6955 = vmatpush1.bf16.msk.msra.mxu1 %vm11283_vm2, %v6953_v7  ;;  %v1563_v55 = vsel %vm1519_vm8, %v8354_v36, %v8358_v37  ;;  %v1561_v54 = vsel %vm1519_vm8, %v8319_v41, %v8353_v0  ;;  %v1562_v2 = vsel %vm1519_vm8, %v8353_v0, %v8354_v36 }
 0x23f   :  { %v12118_v14 = vpop.permute.xlu1 %8366  ;;  %v8362_v49 = vpop.permute.xlu0 %8361  ;;  %v2653_v23 = vsel %vm2611_vm10, %v14675_v17, %v1561_v54  ;;  %v2654_v22 = vsel %vm2611_vm10, %v14676_v11, %v1562_v2  ;;  %v2655_v5 = vsel %vm2611_vm10, %v14677_v58, %v1563_v55  ;;  %v6959_v41 = vpack.c.bf16 %v2328_v30, %v2782_v26  ;;  %v14681_v58 = vld [vmem:[#allocation12_spill] sm:$0xff] }
 0x240   :  { %v8364_v44 = vunpack.i.h.bf16 %v8362_v49  ;;  %v8363_v24 = vunpack.i.l.bf16 %v8362_v49  ;;  %v8368_v48 = vunpack.i.l.bf16 %v12118_v14 }
 0x241   :  { %6786 = vmatmul.mubr.msk.f32.vlgmr.msra.gmra.mrb[26].mxu0 %vm2813_vm3, %v11979_v57  ;;  %6789 = vmatmul.mubr.msk.f32.vlgmr.msra.gmra.mrb[10].mxu1 %vm2813_vm3, %v11979_v57 }
 0x242   :  { %4429 = vmatprep.mubr.f32.mxu0 %v14647_v53  ;;  %4500 = vmatprep.mubr.f32.mxu1 %v14647_v53  ;;  %v1818_v20 = vsel %vm1775_vm9, %v8363_v24, %v8364_v44  ;;  %v1819_v45 = vsel %vm1775_vm9, %v8364_v44, %v8368_v48  ;;  %v1817_v19 = vsel %vm1775_vm9, %v8329_v50, %v8363_v24  ;;  %v8369_v44 = vunpack.i.h.bf16 %v12118_v14 }
 0x243   :  { %v12132_v38 = vpop.permute.xlu1 %8376  ;;  %v8372_v62 = vpop.permute.xlu0 %8371  ;;  %v2719_v63 = vsel %vm2676_vm12, %v2654_v22, %v1818_v20  ;;  %v2718_v18 = vsel %vm2676_vm12, %v2653_v23, %v1817_v19  ;;  %v2720_v31 = vsel %vm2676_vm12, %v2655_v5, %v1819_v45  ;;  %v14679_v19 = vld [vmem:[#allocation9_spill] sm:$0xff] }
 0x244   :  { %v8378_v8 = vunpack.i.l.bf16 %v12132_v38  ;;  %v8374_v4 = vunpack.i.h.bf16 %v8372_v62  ;;  %v8373_v12 = vunpack.i.l.bf16 %v8372_v62  ;;  %v8379_v24 = vunpack.i.h.bf16 %v12132_v38  ;;  %v14678_v62 = vld [vmem:[#allocation78_spill] sm:$0xff]  ;;  %v14680_v38 = vld [vmem:[#allocation99_spill] sm:$0xff] }
 0x245   :  { %v1820_v20 = vsel %vm1775_vm9, %v8368_v48, %v8369_v44 }
 0x246   :  { %v2074_v42 = vsel %vm2031_vm11, %v8373_v12, %v8374_v4  ;;  %v2073_v33 = vsel %vm2031_vm11, %v8339_v60, %v8373_v12  ;;  %v2075_v3 = vsel %vm2031_vm11, %v8374_v4, %v8378_v8  ;;  %v1564_v60 = vsel %vm1519_vm8, %v8358_v37, %v8359_v13 }
 0x247   :  { %v12158_v59 = vpop.permute.xlu1 %8386  ;;  %v8382_v40 = vpop.permute.xlu0 %8381  ;;  %v2784_v25 = vsel %vm2741_vm14, %v2719_v63, %v2074_v42  ;;  %v2783_v21 = vsel %vm2741_vm14, %v2718_v18, %v2073_v33  ;;  %v2785_v47 = vsel %vm2741_vm14, %v2720_v31, %v2075_v3  ;;  %v2656_v2 = vsel %vm2611_vm10, %v14678_v62, %v1564_v60 }
 0x248   :  { %v8388_v51 = vunpack.i.l.bf16 %v12158_v59  ;;  %v8384_v34 = vunpack.i.h.bf16 %v8382_v40  ;;  %v8383_v9 = vunpack.i.l.bf16 %v8382_v40  ;;  %v2076_v17 = vsel %vm2031_vm11, %v8378_v8, %v8379_v24 }
 0x249   :  { %v8389_v23 = vunpack.i.h.bf16 %v12158_v59 }
 0x24a   :  { %v2331_v1 = vsel %vm2287_vm13, %v8384_v34, %v8388_v51  ;;  %v2329_v16 = vsel %vm2287_vm13, %v8349_v35, %v8383_v9  ;;  %v2330_v28 = vsel %vm2287_vm13, %v8383_v9, %v8384_v34 }
 0x24b   :  { %v12181_v6 = vpop.permute.xlu1 %8396  ;;  %v6965_v32 = vpack.c.bf16 %v2330_v28, %v2784_v25  ;;  %v8392_v27 = vpop.permute.xlu0 %8391  ;;  %v6956_v7 = vpack.c.bf16 %v2329_v16, %v2783_v21  ;;  %v6962_v10 = vpack.c.bf16 %v2331_v1, %v2785_v47  ;;  %v2332_v18 = vsel %vm2287_vm13, %v8388_v51, %v8389_v23 }
 0x24c   :  { %v8398_v0 = vunpack.i.l.bf16 %v12181_v6  ;;  %v8394_v49 = vunpack.i.h.bf16 %v8392_v27  ;;  %v8393_v43 = vunpack.i.l.bf16 %v8392_v27  ;;  %v2721_v51 = vsel %vm2676_vm12, %v2656_v2, %v1820_v20 }
 0x24d   :  { %6958 = vmatprep.subr.msk.bf16.mxu0 %vm11283_vm2, %v6956_v7  ;;  %6964 = vmatprep.subr.msk.bf16.mxu1 %vm11283_vm2, %v6962_v10  ;;  %v2786_v26 = vsel %vm2741_vm14, %v2721_v51, %v2076_v17 }
 0x24e   :  { %6961 = vmatpush1.bf16.msk.msra.mxu0 %vm11283_vm2, %v6959_v41  ;;  %6967 = vmatpush1.bf16.msk.msra.mxu1 %vm11283_vm2, %v6965_v32  ;;  %v1567_v56 = vsel %vm1519_vm8, %v8394_v49, %v8398_v0  ;;  %v1565_v37 = vsel %vm1519_vm8, %v8359_v13, %v8393_v43  ;;  %v1566_v12 = vsel %vm1519_vm8, %v8393_v43, %v8394_v49  ;;  %v8399_v13 = vunpack.i.h.bf16 %v12181_v6 }
 0x24f   :  { %v12192_v36 = vpop.permute.xlu1 %8406  ;;  %v8402_v50 = vpop.permute.xlu0 %8401  ;;  %v2657_v42 = vsel %vm2611_vm10, %v14679_v19, %v1565_v37  ;;  %v2658_v8 = vsel %vm2611_vm10, %v14680_v38, %v1566_v12  ;;  %v2659_v5 = vsel %vm2611_vm10, %v14681_v58, %v1567_v56  ;;  %v6971_v41 = vpack.c.bf16 %v2332_v18, %v2786_v26  ;;  %v14682_v12 = vld [vmem:[#allocation86_spill] sm:$0xff] }
 0x250   :  { %v8404_v52 = vunpack.i.h.bf16 %v8402_v50  ;;  %v8403_v46 = vunpack.i.l.bf16 %v8402_v50  ;;  %v8408_v55 = vunpack.i.l.bf16 %v12192_v36  ;;  %v8409_v49 = vunpack.i.h.bf16 %v12192_v36 }
 0x251   :  { %6792 = vmatmul.mubr.msk.f32.vlgmr.msra.gmra.mrb[28].mxu0 %vm2813_vm3, %v11979_v57  ;;  %6795 = vmatmul.mubr.msk.f32.vlgmr.msra.gmra.mrb[12].mxu1 %vm2813_vm3, %v11979_v57 }
 0x252   :  { %4571 = vmatprep.mubr.f32.mxu0 %v14647_v53  ;;  %4642 = vmatprep.mubr.f32.mxu1 %v14647_v53  ;;  %v1822_v45 = vsel %vm1775_vm9, %v8403_v46, %v8404_v52  ;;  %v1823_v11 = vsel %vm1775_vm9, %v8404_v52, %v8408_v55  ;;  %v1821_v22 = vsel %vm1775_vm9, %v8369_v44, %v8403_v46 }
 0x253   :  { %v12207_v54 = vpop.permute.xlu1 %8416  ;;  %v8412_v4 = vpop.permute.xlu0 %8411  ;;  %v2723_v3 = vsel %vm2676_vm12, %v2658_v8, %v1822_v45  ;;  %v2722_v31 = vsel %vm2676_vm12, %v2657_v42, %v1821_v22  ;;  %v2724_v25 = vsel %vm2676_vm12, %v2659_v5, %v1823_v11  ;;  %v1568_v52 = vsel %vm1519_vm8, %v8398_v0, %v8399_v13  ;;  %v14683_v11 = vld [vmem:[#allocation87_spill] sm:$0xff]  ;;  %v14684_v5 = vld [vmem:[#allocation6_spill] sm:$0xff] }
 0x254   :  { %v8418_v61 = vunpack.i.l.bf16 %v12207_v54  ;;  %v8414_v39 = vunpack.i.h.bf16 %v8412_v4  ;;  %v8413_v35 = vunpack.i.l.bf16 %v8412_v4  ;;  %v8419_v46 = vunpack.i.h.bf16 %v12207_v54 }
 0x255   :  { %v1824_v56 = vsel %vm1775_vm9, %v8408_v55, %v8409_v49  ;;  %v2660_v6 = vsel %vm2611_vm10, %v14682_v12, %v1568_v52 }
 0x256   :  { %v2078_v14 = vsel %vm2031_vm11, %v8413_v35, %v8414_v39  ;;  %v2077_v33 = vsel %vm2031_vm11, %v8379_v24, %v8413_v35  ;;  %v2079_v34 = vsel %vm2031_vm11, %v8414_v39, %v8418_v61  ;;  %v2080_v45 = vsel %vm2031_vm11, %v8418_v61, %v8419_v46 }
 0x257   :  { %v12236_v48 = vpop.permute.xlu1 %8426  ;;  %v8422_v63 = vpop.permute.xlu0 %8421  ;;  %v2788_v1 = vsel %vm2741_vm14, %v2723_v3, %v2078_v14  ;;  %v2787_v59 = vsel %vm2741_vm14, %v2722_v31, %v2077_v33  ;;  %v2789_v47 = vsel %vm2741_vm14, %v2724_v25, %v2079_v34  ;;  %v14685_v33 = vld [vmem:[#allocation89_spill] sm:$0xff] }
 0x258   :  { %v8428_v40 = vunpack.i.l.bf16 %v12236_v48  ;;  %v8424_v9 = vunpack.i.h.bf16 %v8422_v63  ;;  %v8423_v30 = vunpack.i.l.bf16 %v8422_v63  ;;  %v8429_v19 = vunpack.i.h.bf16 %v12236_v48 }
 0x25a   :  { %v2335_v16 = vsel %vm2287_vm13, %v8424_v9, %v8428_v40  ;;  %v2333_v28 = vsel %vm2287_vm13, %v8389_v23, %v8423_v30  ;;  %v2334_v21 = vsel %vm2287_vm13, %v8423_v30, %v8424_v9  ;;  %v2725_v23 = vsel %vm2676_vm12, %v2660_v6, %v1824_v56 }
 0x25b   :  { %v12259_v15 = vpop.permute.xlu1 %8436  ;;  %v6977_v32 = vpack.c.bf16 %v2334_v21, %v2788_v1  ;;  %v8432_v27 = vpop.permute.xlu0 %8431  ;;  %v6968_v7 = vpack.c.bf16 %v2333_v28, %v2787_v59  ;;  %v6974_v10 = vpack.c.bf16 %v2335_v16, %v2789_v47  ;;  %v2336_v25 = vsel %vm2287_vm13, %v8428_v40, %v8429_v19 }
 0x25c   :  { %v8438_v50 = vunpack.i.l.bf16 %v12259_v15  ;;  %v8434_v60 = vunpack.i.h.bf16 %v8432_v27  ;;  %v8433_v44 = vunpack.i.l.bf16 %v8432_v27  ;;  %v8439_v48 = vunpack.i.h.bf16 %v12259_v15 }
 0x25d   :  { %6970 = vmatprep.subr.msk.bf16.mxu0 %vm11283_vm2, %v6968_v7  ;;  %6976 = vmatprep.subr.msk.bf16.mxu1 %vm11283_vm2, %v6974_v10 }
 0x25e   :  { %6973 = vmatpush1.bf16.msk.msra.mxu0 %vm11283_vm2, %v6971_v41  ;;  %6979 = vmatpush1.bf16.msk.msra.mxu1 %vm11283_vm2, %v6977_v32  ;;  %v1571_v0 = vsel %vm1519_vm8, %v8434_v60, %v8438_v50  ;;  %v1569_v39 = vsel %vm1519_vm8, %v8399_v13, %v8433_v44  ;;  %v1570_v55 = vsel %vm1519_vm8, %v8433_v44, %v8434_v60 }
 0x25f   :  { %v12271_v43 = vpop.permute.xlu1 %8446  ;;  %v8442_v24 = vpop.permute.xlu0 %8441  ;;  %v2661_v22 = vsel %vm2611_vm10, %v14683_v11, %v1569_v39  ;;  %v2662_v54 = vsel %vm2611_vm10, %v14684_v5, %v1570_v55  ;;  %v2663_v61 = vsel %vm2611_vm10, %v14685_v33, %v1571_v0  ;;  %v2790_v13 = vsel %vm2741_vm14, %v2725_v23, %v2080_v45 }
 0x260   :  { %v8444_v62 = vunpack.i.h.bf16 %v8442_v24  ;;  %v8443_v2 = vunpack.i.l.bf16 %v8442_v24  ;;  %v8448_v37 = vunpack.i.l.bf16 %v12271_v43  ;;  %v8449_v10 = vunpack.i.h.bf16 %v12271_v43 }
 0x261   :  { %6798 = vmatmul.mubr.msk.f32.vlgmr.msra.gmra.mrb[30].mxu0 %vm2813_vm3, %v11979_v57  ;;  %6801 = vmatmul.mubr.msk.f32.vlgmr.msra.gmra.mrb[14].mxu1 %vm2813_vm3, %v11979_v57  ;;  %v1572_v44 = vsel %vm1519_vm8, %v8438_v50, %v8439_v48  ;;  %v14686_v50 = vld [vmem:[#allocation69_spill] sm:$0xff] }
 0x262   :  { %4713 = vmatprep.mubr.f32.mxu0 %v14647_v53  ;;  %4784 = vmatprep.mubr.f32.mxu1 %v14647_v53  ;;  %v1826_v42 = vsel %vm1775_vm9, %v8443_v2, %v8444_v62  ;;  %v1827_v14 = vsel %vm1775_vm9, %v8444_v62, %v8448_v37  ;;  %v1825_v38 = vsel %vm1775_vm9, %v8409_v49, %v8443_v2 }
 0x263   :  { %v12288_v4 = vpop.permute.xlu1 %8456  ;;  %v8452_v36 = vpop.permute.xlu0 %8451  ;;  %v2727_v9 = vsel %vm2676_vm12, %v2662_v54, %v1826_v42  ;;  %v2726_v1 = vsel %vm2676_vm12, %v2661_v22, %v1825_v38  ;;  %v2728_v16 = vsel %vm2676_vm12, %v2663_v61, %v1827_v14  ;;  %v6983_v49 = vpack.c.bf16 %v2336_v25, %v2790_v13  ;;  %v14687_v38 = vld [vmem:[#allocation80_spill] sm:$0xff]  ;;  %v14689_v61 = vld [vmem:[#allocation81_spill] sm:$0xff] }
 0x264   :  { %v8458_v35 = vunpack.i.l.bf16 %v12288_v4  ;;  %v8454_v20 = vunpack.i.h.bf16 %v8452_v36  ;;  %v8453_v17 = vunpack.i.l.bf16 %v8452_v36  ;;  %v1828_v62 = vsel %vm1775_vm9, %v8448_v37, %v8449_v10 }
 0x265   :  { %v8459_v2 = vunpack.i.h.bf16 %v12288_v4  ;;  %v2664_v6 = vsel %vm2611_vm10, %v14686_v50, %v1572_v44  ;;  %v14688_v4 = vld [vmem:[#allocation23_spill] sm:$0xff] }
 0x266   :  { %v2082_v8 = vsel %vm2031_vm11, %v8453_v17, %v8454_v20  ;;  %v2081_v63 = vsel %vm2031_vm11, %v8419_v46, %v8453_v17  ;;  %v2083_v30 = vsel %vm2031_vm11, %v8454_v20, %v8458_v35  ;;  %v2729_v36 = vsel %vm2676_vm12, %v2664_v6, %v1828_v62 }
 0x267   :  { %v12313_v58 = vpop.permute.xlu1 %8466  ;;  %v8462_v34 = vpop.permute.xlu0 %8461  ;;  %v2792_v28 = vsel %vm2741_vm14, %v2727_v9, %v2082_v8  ;;  %v2791_v27 = vsel %vm2741_vm14, %v2726_v1, %v2081_v63  ;;  %v2793_v26 = vsel %vm2741_vm14, %v2728_v16, %v2083_v30  ;;  %v2084_v42 = vsel %vm2031_vm11, %v8458_v35, %v8459_v2 }
 0x268   :  { %v8468_v3 = vunpack.i.l.bf16 %v12313_v58  ;;  %v8464_v18 = vunpack.i.h.bf16 %v8462_v34  ;;  %v8463_v31 = vunpack.i.l.bf16 %v8462_v34  ;;  %v8469_v56 = vunpack.i.h.bf16 %v12313_v58 }
 0x26a   :  { %v2339_v21 = vsel %vm2287_vm13, %v8464_v18, %v8468_v3  ;;  %v2337_v59 = vsel %vm2287_vm13, %v8429_v19, %v8463_v31  ;;  %v2338_v51 = vsel %vm2287_vm13, %v8463_v31, %v8464_v18  ;;  %v2340_v11 = vsel %vm2287_vm13, %v8468_v3, %v8469_v56 }
 0x26b   :  { %v12334_v32 = vpop.permute.xlu1 %8476  ;;  %v6989_v7 = vpack.c.bf16 %v2338_v51, %v2792_v28  ;;  %v8472_v40 = vpop.permute.xlu0 %8471  ;;  %v6980_v47 = vpack.c.bf16 %v2337_v59, %v2791_v27  ;;  %v6986_v41 = vpack.c.bf16 %v2339_v21, %v2793_v26 }
 0x26c   :  { %v8478_v24 = vunpack.i.l.bf16 %v12334_v32  ;;  %v8474_v52 = vunpack.i.h.bf16 %v8472_v40  ;;  %v8473_v46 = vunpack.i.l.bf16 %v8472_v40  ;;  %v8479_v22 = vunpack.i.h.bf16 %v12334_v32 }
 0x26d   :  { %6982 = vmatprep.subr.msk.bf16.mxu0 %vm11283_vm2, %v6980_v47  ;;  %6988 = vmatprep.subr.msk.bf16.mxu1 %vm11283_vm2, %v6986_v41  ;;  %v2794_v41 = vsel %vm2741_vm14, %v2729_v36, %v2084_v42 }
 0x26e   :  { %6985 = vmatpush1.bf16.msk.msra.mxu0 %vm11283_vm2, %v6983_v49  ;;  %6991 = vmatpush1.bf16.msk.msra.mxu1 %vm11283_vm2, %v6989_v7  ;;  %v1575_v37 = vsel %vm1519_vm8, %v8474_v52, %v8478_v24  ;;  %v1573_v55 = vsel %vm1519_vm8, %v8439_v48, %v8473_v46  ;;  %v1574_v17 = vsel %vm1519_vm8, %v8473_v46, %v8474_v52 }
 0x26f   :  { %v12345_v60 = vpop.permute.xlu1 %8486  ;;  %v8482_v43 = vpop.permute.xlu0 %8481  ;;  %v2665_v8 = vsel %vm2611_vm10, %v14687_v38, %v1573_v55  ;;  %v2666_v35 = vsel %vm2611_vm10, %v14688_v4, %v1574_v17  ;;  %v2667_v63 = vsel %vm2611_vm10, %v14689_v61, %v1575_v37  ;;  %v6995_v44 = vpack.c.bf16 %v2340_v11, %v2794_v41  ;;  %v14692_v4 = vld [vmem:[#allocation8_spill] sm:$0xff]  ;;  %v14693_v61 = vld [vmem:[#allocation11_spill] sm:$0xff] }
 0x270   :  { %v8484_v15 = vunpack.i.h.bf16 %v8482_v43  ;;  %v8483_v12 = vunpack.i.l.bf16 %v8482_v43  ;;  %v8488_v0 = vunpack.i.l.bf16 %v12345_v60  ;;  %v8489_v1 = vunpack.i.h.bf16 %v12345_v60 }
 0x271   :  { %6804 = vmatmul.mubr.msk.f32.vlgmr.msra.gmra.mrb[32].mxu0 %vm2813_vm3, %v11979_v57  ;;  %6807 = vmatmul.mubr.msk.f32.vlgmr.msra.gmra.mrb[16].mxu1 %vm2813_vm3, %v11979_v57  ;;  %v1576_v52 = vsel %vm1519_vm8, %v8478_v24, %v8479_v22  ;;  %v14690_v24 = vld [vmem:[#allocation29_spill] sm:$0xff] }
 0x272   :  { %4855 = vmatprep.mubr.f32.mxu0 %v14647_v53  ;;  %4926 = vmatprep.mubr.f32.mxu1 %v14647_v53  ;;  %v1830_v14 = vsel %vm1775_vm9, %v8483_v12, %v8484_v15  ;;  %v1831_v58 = vsel %vm1775_vm9, %v8484_v15, %v8488_v0  ;;  %v1829_v5 = vsel %vm1775_vm9, %v8449_v10, %v8483_v12 }
 0x273   :  { %v12363_v39 = vpop.permute.xlu1 %8496  ;;  %v8492_v20 = vpop.permute.xlu0 %8491  ;;  %v2731_v30 = vsel %vm2676_vm12, %v2666_v35, %v1830_v14  ;;  %v2730_v16 = vsel %vm2676_vm12, %v2665_v8, %v1829_v5  ;;  %v2732_v28 = vsel %vm2676_vm12, %v2667_v63, %v1831_v58  ;;  %v1832_v46 = vsel %vm1775_vm9, %v8488_v0, %v8489_v1  ;;  %v14691_v58 = vld [vmem:[#allocation74_spill] sm:$0xff] }
 0x274   :  { %v8498_v23 = vunpack.i.l.bf16 %v12363_v39  ;;  %v8494_v45 = vunpack.i.h.bf16 %v8492_v20  ;;  %v8493_v19 = vunpack.i.l.bf16 %v8492_v20  ;;  %v8499_v40 = vunpack.i.h.bf16 %v12363_v39 }
 0x275   :  { %v2668_v12 = vsel %vm2611_vm10, %v14690_v24, %v1576_v52 }
 0x276   :  { %v2086_v54 = vsel %vm2031_vm11, %v8493_v19, %v8494_v45  ;;  %v2085_v3 = vsel %vm2031_vm11, %v8459_v2, %v8493_v19  ;;  %v2087_v18 = vsel %vm2031_vm11, %v8494_v45, %v8498_v23  ;;  %v2088_v2 = vsel %vm2031_vm11, %v8498_v23, %v8499_v40 }
 0x277   :  { %v12387_v33 = vpop.permute.xlu1 %8506  ;;  %v8502_v9 = vpop.permute.xlu0 %8501  ;;  %v2796_v21 = vsel %vm2741_vm14, %v2731_v30, %v2086_v54  ;;  %v2795_v7 = vsel %vm2741_vm14, %v2730_v16, %v2085_v3  ;;  %v2797_v10 = vsel %vm2741_vm14, %v2732_v28, %v2087_v18  ;;  %v2733_v0 = vsel %vm2676_vm12, %v2668_v12, %v1832_v46 }
 0x278   :  { %v8508_v34 = vunpack.i.l.bf16 %v12387_v33  ;;  %v8504_v31 = vunpack.i.h.bf16 %v8502_v9  ;;  %v8503_v25 = vunpack.i.l.bf16 %v8502_v9  ;;  %v8509_v49 = vunpack.i.h.bf16 %v12387_v33 }
 0x279   :  { %v2798_v55 = vsel %vm2741_vm14, %v2733_v0, %v2088_v2  ;;  %v14695_v0 = vld [vmem:[#allocation65_spill] sm:$0xff] }
 0x27a   :  { %v2343_v59 = vsel %vm2287_vm13, %v8504_v31, %v8508_v34  ;;  %v2341_v51 = vsel %vm2287_vm13, %v8469_v56, %v8503_v25  ;;  %v2342_v27 = vsel %vm2287_vm13, %v8503_v25, %v8504_v31  ;;  %v12430_v50 = vsel %vm2287_vm13, %v8508_v34, %v8509_v49 }
 0x27b   :  { %v12404_v48 = vpop.permute.xlu1 %8516  ;;  %v7001_v47 = vpack.c.bf16 %v2342_v27, %v2796_v21  ;;  %v8512_v26 = vpop.permute.xlu0 %8511  ;;  %v6992_v13 = vpack.c.bf16 %v2341_v51, %v2795_v7  ;;  %v6998_v60 = vpack.c.bf16 %v2343_v59, %v2797_v10  ;;  %v7007_v23 = vpack.c.bf16 %v12430_v50, %v2798_v55 }
 0x27c   :  { %v8513_v43 = vunpack.i.l.bf16 %v8512_v26  ;;  %v8518_v56 = vunpack.i.l.bf16 %v12404_v48  ;;  %v8514_v15 = vunpack.i.h.bf16 %v8512_v26  ;;  %v8519_v39 = vunpack.i.h.bf16 %v12404_v48 }
 0x27d   :  { %6994 = vmatprep.subr.msk.bf16.mxu0 %vm11283_vm2, %v6992_v13  ;;  %7000 = vmatprep.subr.msk.bf16.mxu1 %vm11283_vm2, %v6998_v60 }
 0x27e   :  { %6997 = vmatpush1.bf16.msk.msra.mxu0 %vm11283_vm2, %v6995_v44  ;;  %7003 = vmatpush1.bf16.msk.msra.mxu1 %vm11283_vm2, %v7001_v47  ;;  %v1577_v20 = vsel %vm1519_vm8, %v8479_v22, %v8513_v43  ;;  %v1579_v45 = vsel %vm1519_vm8, %v8514_v15, %v8518_v56  ;;  %v1578_v19 = vsel %vm1519_vm8, %v8513_v43, %v8514_v15 }
 0x27f   :  { %v12419_v62 = vpop.permute.xlu1 %8526  ;;  %v1580_v8 = vsel %vm1519_vm8, %v8518_v56, %v8519_v39  ;;  %v2669_v5 = vsel %vm2611_vm10, %v14691_v58, %v1577_v20  ;;  %v2670_v35 = vsel %vm2611_vm10, %v14692_v4, %v1578_v19  ;;  %v2671_v63 = vsel %vm2611_vm10, %v14693_v61, %v1579_v45 }
 0x280   :  { %v8522_v32 = vpop.permute.xlu0 %8521  ;;  %v8528_v36 = vunpack.i.l.bf16 %v12419_v62  ;;  %v8529_v30 = vunpack.i.h.bf16 %v12419_v62  ;;  %v14694_v62 = vld [vmem:[#allocation16_spill] sm:$0xff] }
 0x281   :  { %v8523_v6 = vunpack.i.l.bf16 %v8522_v32  ;;  %v8524_v37 = vunpack.i.h.bf16 %v8522_v32  ;;  %6810 = vmatmul.mubr.msk.f32.vlgmr.msra.gmra.mrb[34].mxu0 %vm2813_vm3, %v11979_v57  ;;  %6813 = vmatmul.mubr.msk.f32.vlgmr.msra.gmra.mrb[18].mxu1 %vm2813_vm3, %v11979_v57  ;;  %v2672_v2 = vsel %vm2611_vm10, %v14694_v62, %v1580_v8 }
 0x282   :  { %4997 = vmatprep.mubr.f32.mxu0 %v14647_v53  ;;  %5068 = vmatprep.mubr.f32.mxu1 %v14647_v53  ;;  %v1836_v24 = vsel %vm1775_vm9, %v8528_v36, %v8529_v30 }
 0x283   :  { %v12439_v17 = vpop.permute.xlu1 %8536  ;;  %v1833_v11 = vsel %vm1775_vm9, %v8489_v1, %v8523_v6  ;;  %v1835_v54 = vsel %vm1775_vm9, %v8524_v37, %v8528_v36  ;;  %v1834_v33 = vsel %vm1775_vm9, %v8523_v6, %v8524_v37 }
 0x284   :  { %v8532_v42 = vpop.permute.xlu0 %8531  ;;  %v8538_v14 = vunpack.i.l.bf16 %v12439_v17  ;;  %v2734_v18 = vsel %vm2676_vm12, %v2669_v5, %v1833_v11  ;;  %v2735_v16 = vsel %vm2676_vm12, %v2670_v35, %v1834_v33  ;;  %v2736_v28 = vsel %vm2676_vm12, %v2671_v63, %v1835_v54 }
 0x285   :  { %v8534_v22 = vunpack.i.h.bf16 %v8532_v42  ;;  %v8533_v38 = vunpack.i.l.bf16 %v8532_v42  ;;  %v8539_v51 = vunpack.i.h.bf16 %v12439_v17  ;;  %v14696_v17 = vld [vmem:[#allocation13_spill] sm:$0xff]  ;;  %v2737_v63 = vsel %vm2676_vm12, %v2672_v2, %v1836_v24 }
 0x287   :  { %v2089_v3 = vsel %vm2031_vm11, %v8499_v40, %v8533_v38  ;;  %v2090_v34 = vsel %vm2031_vm11, %v8533_v38, %v8534_v22  ;;  %v8547_v9 = vpop.permute.xlu1 %8546  ;;  %v2091_v31 = vsel %vm2031_vm11, %v8534_v22, %v8538_v14 }
 0x288   :  { %v8548_v25 = vunpack.i.l.bf16 %v8547_v9  ;;  %v8542_v1 = vpop.permute.xlu0 %8541  ;;  %v8549_v27 = vunpack.i.h.bf16 %v8547_v9  ;;  %v2799_v7 = vsel %vm2741_vm14, %v2734_v18, %v2089_v3  ;;  %v2800_v40 = vsel %vm2741_vm14, %v2735_v16, %v2090_v34 }
 0x289   :  { %v8544_v21 = vunpack.i.h.bf16 %v8542_v1  ;;  %v8543_v59 = vunpack.i.l.bf16 %v8542_v1  ;;  %v2801_v10 = vsel %vm2741_vm14, %v2736_v28, %v2091_v31 }
 0x28a   :  { %v2348_v12 = vsel %vm2287_vm13, %v8548_v25, %v8549_v27 }
 0x28b   :  { %v2347_v47 = vsel %vm2287_vm13, %v8544_v21, %v8548_v25  ;;  %v2345_v26 = vsel %vm2287_vm13, %v8509_v49, %v8543_v59  ;;  %v2346_v13 = vsel %vm2287_vm13, %v8543_v59, %v8544_v21  ;;  %v8557_v41 = vpop.permute.xlu1 %8556  ;;  %v2092_v49 = vsel %vm2031_vm11, %v8538_v14, %v8539_v51  ;;  %v14697_v14 = vld [vmem:[#allocation82_spill] sm:$0xff] }
 0x28c   :  { %v7004_v60 = vpack.c.bf16 %v2345_v26, %v2799_v7  ;;  %v7010_v44 = vpack.c.bf16 %v2347_v47, %v2801_v10  ;;  %v7013_v52 = vpack.c.bf16 %v2346_v13, %v2800_v40  ;;  %v8559_v46 = vunpack.i.h.bf16 %v8557_v41  ;;  %v8552_v43 = vpop.permute.xlu0 %8551 }
 0x28d   :  { %v8558_v56 = vunpack.i.l.bf16 %v8557_v41  ;;  %v8554_v15 = vunpack.i.h.bf16 %v8552_v43  ;;  %v8553_v32 = vunpack.i.l.bf16 %v8552_v43 }
 0x28e   :  { %7006 = vmatprep.subr.msk.bf16.mxu0 %vm11283_vm2, %v7004_v60  ;;  %7012 = vmatprep.subr.msk.bf16.mxu1 %vm11283_vm2, %v7010_v44 }
 0x28f   :  { %v1837_v50 = vsel %vm1775_vm9, %v8529_v30, %v8558_v56  ;;  %v1838_v6 = vsel %vm1775_vm9, %v8558_v56, %v8559_v46  ;;  %v2675_v37 = vsel %vm2611_vm10, %v14695_v0, %v8554_v15  ;;  %v1581_v36 = vsel %vm1519_vm8, %v8519_v39, %v8553_v32  ;;  %7009 = vmatpush1.bf16.msk.msra.mxu0 %vm11283_vm2, %v7007_v23  ;;  %v8567_v55 = vpop.permute.xlu1 %8566  ;;  %v3011_v23 = vpop.f32.mrb[0].mxu0 }
 0x290   :  { %v1582_v20 = vsel %vm1519_vm8, %v8553_v32, %v8554_v15  ;;  %v2673_v45 = vsel %vm2611_vm10, %v14696_v17, %v1581_v36  ;;  %7015 = vmatpush1.bf16.msk.msra.mxu1 %vm11283_vm2, %v7013_v52  ;;  %v8569_v19 = vunpack.i.h.bf16 %v8567_v55  ;;  %v8568_v42 = vunpack.i.l.bf16 %v8567_v55  ;;  %v8562_v11 = vpop.permute.xlu0 %8561  ;;  %v3013_v33 = vpop.f32.mrb[1].mxu0 }
 0x291   :  { %v2674_v48 = vsel %vm2611_vm10, %v14697_v14, %v1582_v20  ;;  %v8564_v22 = vunpack.i.h.bf16 %v8562_v11  ;;  %v8563_v39 = vunpack.i.l.bf16 %v8562_v11  ;;  %v2740_v38 = vsel %vm2676_vm12, %v2675_v37, %v8559_v46 }
 0x292   :  { %v2349_v8 = vsel %vm2287_vm13, %v8549_v27, %v8568_v42  ;;  %v2350_v58 = vsel %vm2287_vm13, %v8568_v42, %v8569_v19  ;;  %v2739_v5 = vsel %vm2676_vm12, %v2674_v48, %v1838_v6  ;;  %6816 = vmatmul.mubr.msk.f32.vlgmr.msra.gmra.mrb[36].mxu0 %vm2813_vm3, %v11979_v57  ;;  %v2738_v54 = vsel %vm2676_vm12, %v2673_v45, %v1837_v50 }
 0x293   :  { %v2093_v4 = vsel %vm2031_vm11, %v8539_v51, %v8563_v39  ;;  %v2094_v35 = vsel %vm2031_vm11, %v8563_v39, %v8564_v22  ;;  %v2805_v61 = vsel %vm2741_vm14, %v2740_v38, %v8564_v22  ;;  %6819 = vmatmul.mubr.msk.f32.vlgmr.msra.gmra.mrb[20].mxu1 %vm2813_vm3, %v11979_v57  ;;  %5139 = vmatprep.mubr.f32.mxu0 %v14647_v53 }
 0x294   :  { %v2804_v3 = vsel %vm2741_vm14, %v2739_v5, %v2094_v35  ;;  %v7022_v34 = vpack.c.bf16 %v8569_v19, %v2805_v61  ;;  %v2803_v9 = vsel %vm2741_vm14, %v2738_v54, %v2093_v4  ;;  %5210 = vmatprep.mubr.f32.mxu1 %v14647_v53  ;;  %v2802_v30 = vsel %vm2741_vm14, %v2737_v63, %v2092_v49  ;;  %v6027_v53 = vld [vmem:[#allocation2 + $0x18] sm:$0xff] }
 0x295   :  { %v7025_v18 = vpack.c.bf16 %v2350_v58, %v2804_v3  ;;  %v7016_v31 = vpack.c.bf16 %v2349_v8, %v2803_v9  ;;  %v7019_v25 = vpack.c.bf16 %v2348_v12, %v2802_v30  ;;  %v3082_v1 = vpop.f32.mrb[2].mxu0 }
 0x296   :  { %7024 = vmatprep.subr.msk.bf16.mxu1 %vm11283_vm2, %v7022_v34  ;;  %v3084_v16 = vpop.f32.mrb[3].mxu0 }
 0x297   :  { %7018 = vmatprep.subr.msk.bf16.mxu0 %vm11283_vm2, %v7016_v31  ;;  %7027 = vmatpush1.bf16.msk.msra.mxu1 %vm11283_vm2, %v7025_v18 }
 0x298   :  { %7021 = vmatpush1.bf16.msk.msra.mxu0 %vm11283_vm2, %v7019_v25 }
 0x29a   :  { %6825 = vmatmul.mubr.msk.f32.vlgmr.msra.gmra.mrb[22].mxu1 %vm2813_vm3, %v11979_v57  ;;  %v3153_v28 = vpop.f32.mrb[4].mxu0 }
 0x29b   :  { %6822 = vmatmul.mubr.msk.f32.vlgmr.msra.gmra.mrb[38].mxu0 %vm2813_vm3, %v11979_v57  ;;  %v3155_v21 = vpop.f32.mrb[5].mxu0 }
 0x2a1   :  { %v12530_v59 = vpop.permute.xlu0 %2810  ;;  %v3224_v47 = vpop.f32.mrb[6].mxu0 }
 0x2a2   :  { %v12533_v51 = vadd.f32 %v3013_v33, %v12530_v59  ;;  %v12536_v27 = vadd.f32 %v3082_v1, %v12530_v59  ;;  %v12539_v7 = vadd.f32 %v3011_v23, %v12530_v59  ;;  %v12542_v29 = vadd.f32 %v3084_v16, %v12530_v59  ;;  %v3226_v60 = vpop.f32.mrb[7].mxu0 }
 0x2a3   :  { %v12545_v40 = vadd.f32 %v3153_v28, %v12530_v59  ;;  %v12548_v57 = vadd.f32 %v3155_v21, %v12530_v59  ;;  %v12557_v46 = vadd.f32 %v3226_v60, %v12530_v59  ;;  %v12573_v56 = vadd.f32 %v3224_v47, %v12530_v59 }
 0x2a4   :  { %14698 = vst [vmem:[#allocation10_spill] sm:$0xff] %v12542_v29  ;;  %v14104_v26 = vmax.f32 %v12533_v51, 0.0  ;;  %v14107_v13 = vmax.f32 %v12536_v27, 0.0  ;;  %v14102_v10 = vmax.f32 %v12539_v7, 0.0  ;;  %v14071_v41 = vmax.f32 %v12542_v29, 0.0  ;;  %v6155_v29 = vld [vmem:[#allocation2 + $0x418] sm:$0xff] }
 0x2a5   :  { %v14095_v44 = vmax.f32 %v12545_v40, 0.0  ;;  %v14103_v52 = vmax.f32 %v12548_v57, 0.0  ;;  %14699 = vst [vmem:[#allocation15_spill] sm:$0xff] %v12557_v46  ;;  %v14068_v15 = vmax.f32 %v12557_v46, 0.0  ;;  %v14101_v49 = vmax.f32 %v12573_v56, 0.0 }
 0x2a6   :  { %v8571_v43 = vpack.i.bf16 %v14107_v13, %v14104_v26  ;;  %v8576_v2 = vpack.i.bf16 %v14102_v10, %v14071_v41  ;;  %v3295_v32 = vpop.f32.mrb[8].mxu0 }
 0x2a7   :  { %v8581_v62 = vpack.i.bf16 %v14095_v44, %v14103_v52  ;;  %v3297_v24 = vpop.f32.mrb[9].mxu0  ;;  %v12607_v48 = vadd.f32 %v3295_v32, %v12530_v59 }
 0x2a8   :  { %8572 = vrot.lane.b32.xlu1 %v8571_v43, %s8799_s6  ;;  %v12580_v12 = vadd.f32 %v3297_v24, %v12530_v59 }
 0x2a9   :  { %8582 = vrot.lane.b32.xlu0 %v8581_v62, %s8799_s6  ;;  %v14092_v5 = vmax.f32 %v12607_v48, 0.0 }
 0x2aa   :  { %v14097_v6 = vmax.f32 %v12580_v12, 0.0 }
 0x2ac   :  { %8577 = vrot.lane.b32.xlu1 %v8576_v2, %s8799_s6 }
 0x2ad   :  { %5359 = vrot.lane.b32.xlu0 %v14068_v15, %s8799_s6  ;;  %v3366_v50 = vpop.f32.mrb[10].mxu0 }
 0x2ae   :  { %v12587_v0 = vadd.f32 %v3366_v50, %v12530_v59  ;;  %v3368_v37 = vpop.f32.mrb[11].mxu0 }
 0x2af   :  { %v12598_v20 = vadd.f32 %v3368_v37, %v12530_v59 }
 0x2b0   :  { %5357 = vrot.lane.b32.xlu1 %v14101_v49, %s8799_s6  ;;  %v14100_v36 = vmax.f32 %v12587_v0, 0.0 }
 0x2b1   :  { %14700 = vst [vmem:[#allocation34_spill] sm:$0xff] %v12598_v20  ;;  %v14070_v19 = vmax.f32 %v12598_v20, 0.0  ;;  %v6153_v20 = vld [vmem:[#allocation2 + $0x408] sm:$0xff] }
 0x2b2   :  { %v8586_v55 = vpack.i.bf16 %v14100_v36, %v14097_v6  ;;  %v3437_v17 = vpop.f32.mrb[12].mxu0 }
 0x2b3   :  { %v3439_v45 = vpop.f32.mrb[13].mxu0  ;;  %v12630_v54 = vadd.f32 %v3437_v17, %v12530_v59 }
 0x2b4   :  { %8587 = vrot.lane.b32.xlu1 %v8586_v55, %s8799_s6  ;;  %v12603_v42 = vadd.f32 %v3439_v45, %v12530_v59 }
 0x2b5   :  { %v14094_v61 = vmax.f32 %v12630_v54, 0.0 }
 0x2b6   :  { %v14099_v11 = vmax.f32 %v12603_v42, 0.0 }
 0x2b8   :  { %v8591_v22 = vpack.i.bf16 %v14099_v11, %v14070_v19 }
 0x2b9   :  { %v3508_v14 = vpop.f32.mrb[14].mxu0 }
 0x2ba   :  { %v12614_v39 = vadd.f32 %v3508_v14, %v12530_v59  ;;  %v3510_v38 = vpop.f32.mrb[15].mxu0  ;;  %8592 = vrot.lane.b32.xlu0 %v8591_v22, %s8799_s6 }
 0x2bb   :  { %v12617_v23 = vadd.f32 %v3510_v38, %v12530_v59 }
 0x2bc   :  { %v14086_v8 = vmax.f32 %v12614_v39, 0.0 }
 0x2bd   :  { %14701 = vst [vmem:[#allocation31_spill] sm:$0xff] %v12617_v23  ;;  %v14066_v58 = vmax.f32 %v12617_v23, 0.0  ;;  %v6029_v23 = vld [vmem:[#allocation2 + $0x28] sm:$0xff] }
 0x2be   :  { %5373 = vrot.lane.b32.xlu1 %v14086_v8, %s8799_s6 }
 0x2bf   :  { %5375 = vrot.lane.b32.xlu0 %v14066_v58, %s8799_s6 }
 0x2c2   :  { %5361 = vrot.lane.b32.xlu1 %v14092_v5, %s8799_s6  ;;  %v3579_v33 = vpop.f32.mrb[16].mxu0 }
 0x2c3   :  { %v3581_v35 = vpop.f32.mrb[17].mxu0  ;;  %v12662_v60 = vadd.f32 %v3579_v33, %v12530_v59 }
 0x2c4   :  { %v12640_v3 = vadd.f32 %v3581_v35, %v12530_v59 }
 0x2c5   :  { %v3650_v4 = vpop.f32.mrb[0].mxu1  ;;  %v14087_v55 = vmax.f32 %v12662_v60, 0.0 }
 0x2c6   :  { %v12637_v63 = vadd.f32 %v3650_v4, %v12530_v59  ;;  %v3652_v34 = vpop.f32.mrb[1].mxu1  ;;  %v14085_v18 = vmax.f32 %v12640_v3, 0.0 }
 0x2c7   :  { %v12643_v9 = vadd.f32 %v3652_v34, %v12530_v59 }
 0x2c8   :  { %v14080_v30 = vmax.f32 %v12637_v63, 0.0  ;;  %v8596_v25 = vpack.i.bf16 %v14085_v18, %v14094_v61 }
 0x2c9   :  { %14702 = vst [vmem:[#allocation71_spill] sm:$0xff] %v12643_v9  ;;  %v14067_v31 = vmax.f32 %v12643_v9, 0.0  ;;  %v6031_v9 = vld [vmem:[#allocation2 + $0x38] sm:$0xff] }
 0x2ca   :  { %8597 = vrot.lane.b32.xlu0 %v8596_v25, %s8799_s6 }
 0x2cb   :  { %v8601_v1 = vpack.i.bf16 %v14067_v31, %v14080_v30 }
 0x2cd   :  { %8602 = vrot.lane.b32.xlu1 %v8601_v1, %s8799_s6 }
 0x2d5   :  { %v3721_v16 = vpop.f32.mrb[18].mxu0  ;;  %v3792_v21 = vpop.f32.mrb[2].mxu1 }
 0x2d6   :  { %v12659_v28 = vadd.f32 %v3721_v16, %v12530_v59  ;;  %v3723_v47 = vpop.f32.mrb[19].mxu0  ;;  %v12665_v43 = vadd.f32 %v3792_v21, %v12530_v59  ;;  %v3794_v2 = vpop.f32.mrb[3].mxu1 }
 0x2d7   :  { %v12668_v62 = vadd.f32 %v3723_v47, %v12530_v59  ;;  %v12674_v37 = vadd.f32 %v3794_v2, %v12530_v59 }
 0x2d8   :  { %v14078_v32 = vmax.f32 %v12659_v28, 0.0  ;;  %v14077_v24 = vmax.f32 %v12665_v43, 0.0 }
 0x2d9   :  { %v14091_v50 = vmax.f32 %v12668_v62, 0.0  ;;  %14703 = vst [vmem:[#allocation18_spill] sm:$0xff] %v12674_v37  ;;  %v14065_v45 = vmax.f32 %v12674_v37, 0.0 }
 0x2da   :  { %5389 = vrot.lane.b32.xlu1 %v14077_v24, %s8799_s6 }
 0x2db   :  { %v8606_v17 = vpack.i.bf16 %v14078_v32, %v14091_v50 }
 0x2dd   :  { %8607 = vrot.lane.b32.xlu0 %v8606_v17, %s8799_s6 }
 0x2de   :  { %5377 = vrot.lane.b32.xlu1 %v14087_v55, %s8799_s6 }
 0x2e1   :  { %5391 = vrot.lane.b32.xlu0 %v14065_v45, %s8799_s6 }
 0x2e5   :  { %v3863_v14 = vpop.f32.mrb[20].mxu0 }
 0x2e6   :  { %v3865_v22 = vpop.f32.mrb[21].mxu0  ;;  %v3934_v38 = vpop.f32.mrb[4].mxu1  ;;  %v12709_v17 = vadd.f32 %v3863_v14, %v12530_v59 }
 0x2e7   :  { %v12693_v33 = vadd.f32 %v3865_v22, %v12530_v59  ;;  %v12696_v4 = vadd.f32 %v3934_v38, %v12530_v59  ;;  %v3936_v35 = vpop.f32.mrb[5].mxu1 }
 0x2e8   :  { %v12706_v16 = vadd.f32 %v3936_v35, %v12530_v59  ;;  %14706 = vst [vmem:[#allocation22_spill] sm:$0xff] %v12709_v17  ;;  %v14074_v15 = vmax.f32 %v12709_v17, 0.0 }
 0x2e9   :  { %14704 = vst [vmem:[#allocation83_spill] sm:$0xff] %v12696_v4  ;;  %v14079_v34 = vmax.f32 %v12693_v33, 0.0  ;;  %v14073_v25 = vmax.f32 %v12696_v4, 0.0 }
 0x2ea   :  { %14705 = vst [vmem:[#allocation77_spill] sm:$0xff] %v12706_v16  ;;  %v14069_v22 = vmax.f32 %v12706_v16, 0.0  ;;  %v6026_v16 = vld [vmem:[#allocation2 + $0x10] sm:$0xff] }
 0x2eb   :  { %v8611_v1 = vpack.i.bf16 %v14073_v25, %v14079_v34 }
 0x2ed   :  { %8612 = vrot.lane.b32.xlu0 %v8611_v1, %s8799_s6 }
 0x2f5   :  { %v4005_v21 = vpop.f32.mrb[22].mxu0 }
 0x2f6   :  { %v4076_v47 = vpop.f32.mrb[6].mxu1  ;;  %v4007_v2 = vpop.f32.mrb[23].mxu0 }
 0x2f7   :  { %v12713_v38 = vadd.f32 %v4076_v47, %v12530_v59  ;;  %v12716_v45 = vadd.f32 %v4007_v2, %v12530_v59  ;;  %v4078_v58 = vpop.f32.mrb[7].mxu1 }
 0x2f8   :  { %v12721_v31 = vadd.f32 %v4078_v58, %v12530_v59  ;;  %v12737_v58 = vadd.f32 %v4005_v21, %v12530_v59 }
 0x2f9   :  { %14707 = vst [vmem:[#allocation14_spill] sm:$0xff] %v12713_v38  ;;  %14708 = vst [vmem:[#allocation21_spill] sm:$0xff] %v12716_v45  ;;  %v14072_v1 = vmax.f32 %v12713_v38, 0.0  ;;  %v14075_v35 = vmax.f32 %v12716_v45, 0.0  ;;  %v6063_v38 = vld [vmem:[#allocation2 + $0x138] sm:$0xff] }
 0x2fa   :  { %14709 = vst [vmem:[#allocation24_spill] sm:$0xff] %v12721_v31  ;;  %v14076_v47 = vmax.f32 %v12721_v31, 0.0  ;;  %14710 = vst [vmem:[#allocation28_spill] sm:$0xff] %v12737_v58  ;;  %v14081_v41 = vmax.f32 %v12737_v58, 0.0  ;;  %v6178_v58 = vld [vmem:[#allocation2 + $0x4d0] sm:$0xff] }
 0x2fb   :  { %v8616_v14 = vpack.i.bf16 %v14075_v35, %v14069_v22  ;;  %5405 = vrot.lane.b32.xlu0 %v14072_v1, %s8799_s6 }
 0x2fd   :  { %8617 = vrot.lane.b32.xlu1 %v8616_v14, %s8799_s6 }
 0x2ff   :  { %5393 = vrot.lane.b32.xlu0 %v14074_v15, %s8799_s6 }
 0x301   :  { %5407 = vrot.lane.b32.xlu1 %v14076_v47, %s8799_s6 }
 0x304   :  { %v4147_v2 = vpop.f32.mrb[24].mxu0  ;;  %v4218_v22 = vpop.f32.mrb[8].mxu1 }
 0x305   :  { %v4149_v19 = vpop.f32.mrb[25].mxu0  ;;  %v12744_v1 = vadd.f32 %v4218_v22, %v12530_v59  ;;  %v4220_v25 = vpop.f32.mrb[9].mxu1  ;;  %v12769_v30 = vadd.f32 %v4147_v2, %v12530_v59 }
 0x306   :  { %v12747_v14 = vadd.f32 %v4149_v19, %v12530_v59  ;;  %v12750_v15 = vadd.f32 %v4220_v25, %v12530_v59 }
 0x307   :  { %14711 = vst [vmem:[#allocation36_spill] sm:$0xff] %v12744_v1  ;;  %v14084_v21 = vmax.f32 %v12744_v1, 0.0  ;;  %14715 = vst [vmem:[#allocation19_spill] sm:$0xff] %v12769_v30  ;;  %v14093_v18 = vmax.f32 %v12769_v30, 0.0  ;;  %v6061_v1 = vld [vmem:[#allocation2 + $0x128] sm:$0xff] }
 0x308   :  { %14712 = vst [vmem:[#allocation33_spill] sm:$0xff] %v12747_v14  ;;  %14713 = vst [vmem:[#allocation5_spill] sm:$0xff] %v12750_v15  ;;  %v14082_v35 = vmax.f32 %v12747_v14, 0.0  ;;  %v14083_v47 = vmax.f32 %v12750_v15, 0.0  ;;  %v6152_v15 = vld [vmem:[#allocation2 + $0x400] sm:$0xff]  ;;  %v6057_v14 = vld [vmem:[#allocation2 + $0x108] sm:$0xff] }
 0x30a   :  { %v8621_v24 = vpack.i.bf16 %v14082_v35, %v14081_v41  ;;  %v8626_v19 = vpack.i.bf16 %v14083_v47, %v14084_v21 }
 0x30c   :  { %8622 = vrot.lane.b32.xlu1 %v8621_v24, %s8799_s6  ;;  %8627 = vrot.lane.b32.xlu0 %v8626_v19, %s8799_s6 }
 0x314   :  { %v4289_v25 = vpop.f32.mrb[26].mxu0  ;;  %v4360_v32 = vpop.f32.mrb[10].mxu1 }
 0x315   :  { %v12766_v22 = vadd.f32 %v4289_v25, %v12530_v59  ;;  %v4291_v34 = vpop.f32.mrb[27].mxu0  ;;  %v12772_v41 = vadd.f32 %v4360_v32, %v12530_v59  ;;  %v4362_v47 = vpop.f32.mrb[11].mxu1 }
 0x316   :  { %v12775_v35 = vadd.f32 %v4291_v34, %v12530_v59  ;;  %v12781_v25 = vadd.f32 %v4362_v47, %v12530_v59 }
 0x317   :  { %14714 = vst [vmem:[#allocation7_spill] sm:$0xff] %v12766_v22  ;;  %14716 = vst [vmem:[#allocation27_spill] sm:$0xff] %v12772_v41  ;;  %v14088_v24 = vmax.f32 %v12766_v22, 0.0  ;;  %v14089_v19 = vmax.f32 %v12772_v41, 0.0 }
 0x318   :  { %14717 = vst [vmem:[#allocation25_spill] sm:$0xff] %v12775_v35  ;;  %v14090_v21 = vmax.f32 %v12775_v35, 0.0  ;;  %14718 = vst [vmem:[#allocation20_spill] sm:$0xff] %v12781_v25  ;;  %v14096_v8 = vmax.f32 %v12781_v25, 0.0  ;;  %v6024_v25 = vld [vmem:[#allocation2] sm:$0xff] }
 0x319   :  { %5421 = vrot.lane.b32.xlu0 %v14089_v19, %s8799_s6 }
 0x31a   :  { %v8631_v32 = vpack.i.bf16 %v14088_v24, %v14090_v21  ;;  %v12791_v34 = vpop.permute.xlu1 %8572 }
 0x31b   :  { %v12793_v2 = vpop.permute.xlu0 %8582  ;;  %v14748_v4 = vunpack.i.l.bf16 %v12791_v34 }
 0x31c   :  { %8632 = vrot.lane.b32.xlu1 %v8631_v32, %s8799_s6  ;;  %v14098_v47 = vunpack.i.h.bf16 %v12793_v2 }
 0x31d   :  { %5409 = vrot.lane.b32.xlu0 %v14093_v18, %s8799_s6 }
 0x31e   :  { %v12801_v55 = vpop.permute.xlu1 %8577 }
 0x31f   :  { %v14108_v24 = vunpack.i.l.bf16 %v12801_v55  ;;  %v12831_v36 = vpop.permute.xlu0 %5359 }
 0x320   :  { %5423 = vrot.lane.b32.xlu1 %v14096_v8, %s8799_s6 }
 0x321   :  { %v12812_v32 = vsel %vm495_vm0, %v14108_v24, %v14098_v47  ;;  %v6025_v24 = vld [vmem:[#allocation2 + $0x8] sm:$0xff] }
 0x322   :  { %14719 = vst [vmem:[#allocation26_spill] sm:$0xff] %v12812_v32  ;;  %v12814_v5 = vpop.permute.xlu1 %5357  ;;  %v7028_v37 = vpack.c.bf16 %v6027_v53, %v6025_v24  ;;  %v6028_v32 = vld [vmem:[#allocation2 + $0x20] sm:$0xff]  ;;  %v6154_v53 = vld [vmem:[#allocation2 + $0x410] sm:$0xff] }
 0x324   :  { %v4431_v19 = vpop.f32.mrb[28].mxu0  ;;  %v4502_v21 = vpop.f32.mrb[12].mxu1  ;;  %7029 = vmatprep.subr.bf16.mxu1 %v7028_v37 }
 0x325   :  { %v4433_v50 = vpop.f32.mrb[29].mxu0  ;;  %v12817_v18 = vadd.f32 %v4502_v21, %v12530_v59  ;;  %v4504_v44 = vpop.f32.mrb[13].mxu1  ;;  %v12854_v31 = vadd.f32 %v4431_v19, %v12530_v59  ;;  %v7156_v19 = vpack.c.bf16 %v6155_v29, %v6153_v20 }
 0x326   :  { %v12820_v61 = vadd.f32 %v4433_v50, %v12530_v59  ;;  %v12828_v11 = vpop.permute.xlu1 %8587  ;;  %v12836_v50 = vadd.f32 %v4504_v44, %v12530_v59 }
 0x327   :  { %14720 = vst [vmem:[#allocation70_spill] sm:$0xff] %v12817_v18  ;;  %v14105_v8 = vmax.f32 %v12817_v18, 0.0  ;;  %14726 = vst [vmem:[#allocation35_spill] sm:$0xff] %v12854_v31  ;;  %7157 = vmatprep.subr.bf16.mxu0 %v7156_v19  ;;  %v14124_v29 = vmax.f32 %v12854_v31, 0.0 }
 0x328   :  { %14721 = vst [vmem:[#allocation79_spill] sm:$0xff] %v12820_v61  ;;  %v14106_v6 = vmax.f32 %v12820_v61, 0.0  ;;  %14722 = vst [vmem:[#allocation90_spill] sm:$0xff] %v12836_v50  ;;  %v6030_v61 = vld [vmem:[#allocation2 + $0x30] sm:$0xff]  ;;  %v14728_v22 = vmax.f32 %v12836_v50, 0.0  ;;  %v6163_v50 = vld [vmem:[#allocation2 + $0x458] sm:$0xff] }
 0x32a   :  { %v8636_v47 = vpack.i.bf16 %v14105_v8, %v14106_v6 }
 0x32c   :  { %8637 = vrot.lane.b32.xlu1 %v8636_v47, %s8799_s6  ;;  %v12838_v49 = vpop.permute.xlu0 %8592 }
 0x330   :  { %v12833_v21 = vpop.permute.xlu1 %5373 }
 0x331   :  { %v12862_v24 = vpop.permute.xlu0 %5375 }
 0x334   :  { %v4573_v10 = vpop.f32.mrb[30].mxu0  ;;  %v12840_v52 = vpop.permute.xlu1 %5361 }
 0x335   :  { %v4644_v26 = vpop.f32.mrb[14].mxu1  ;;  %v12845_v8 = vsel %vm495_vm0, %v12831_v36, %v12840_v52  ;;  %v4575_v6 = vpop.f32.mrb[31].mxu0 }
 0x336   :  { %14723 = vst [vmem:[#allocation38_spill] sm:$0xff] %v12845_v8  ;;  %v12848_v47 = vadd.f32 %v4644_v26, %v12530_v59  ;;  %v12851_v13 = vadd.f32 %v4575_v6, %v12530_v59  ;;  %v4646_v44 = vpop.f32.mrb[15].mxu1  ;;  %v7030_v8 = vpack.c.bf16 %v6026_v16, %v6024_v25  ;;  %v7032_v6 = vpack.c.bf16 %v6031_v9, %v6029_v23  ;;  %v6157_v25 = vld [vmem:[#allocation2 + $0x428] sm:$0xff] }
 0x337   :  { %v12860_v18 = vadd.f32 %v4646_v44, %v12530_v59  ;;  %v7034_v9 = vpack.c.bf16 %v6030_v61, %v6028_v32  ;;  %v7158_v16 = vpack.c.bf16 %v6154_v53, %v6152_v15  ;;  %v6033_v61 = vld [vmem:[#allocation2 + $0x48] sm:$0xff]  ;;  %v6159_v32 = vld [vmem:[#allocation2 + $0x438] sm:$0xff]  ;;  %v6032_v44 = vld [vmem:[#allocation2 + $0x40] sm:$0xff] }
 0x338   :  { %14724 = vst [vmem:[#allocation41_spill] sm:$0xff] %v12848_v47  ;;  %14725 = vst [vmem:[#allocation39_spill] sm:$0xff] %v12851_v13  ;;  %v14125_v26 = vmax.f32 %v12851_v13, 0.0  ;;  %v14729_v23 = vmax.f32 %v12848_v47, 0.0  ;;  %7031 = vmatpush1.bf16.msra.mxu1 %v7030_v8  ;;  %v14128_v8 = vunpack.i.l.bf16 %v12838_v49  ;;  %v7160_v53 = vpack.c.bf16 %v6159_v32, %v6157_v25  ;;  %v6160_v25 = vld [vmem:[#allocation2 + $0x440] sm:$0xff] }
 0x339   :  { %14727 = vst [vmem:[#allocation17_spill] sm:$0xff] %v12860_v18  ;;  %7033 = vmatprep.subr.bf16.mxu1 %v7032_v6  ;;  %7159 = vmatpush1.bf16.msra.mxu0 %v7158_v16  ;;  %v14123_v20 = vmax.f32 %v12860_v18, 0.0  ;;  %v6034_v6 = vld [vmem:[#allocation2 + $0x50] sm:$0xff]  ;;  %v6037_v16 = vld [vmem:[#allocation2 + $0x68] sm:$0xff] }
 0x33a   :  { %v8641_v46 = vpack.i.bf16 %v14125_v26, %v14728_v22  ;;  %5437 = vrot.lane.b32.xlu1 %v14729_v23, %s8799_s6  ;;  %v6035_v22 = vld [vmem:[#allocation2 + $0x58] sm:$0xff]  ;;  %v6156_v23 = vld [vmem:[#allocation2 + $0x420] sm:$0xff]  ;;  %v7038_v26 = vpack.c.bf16 %v6034_v6, %v6032_v44  ;;  %7161 = vmatprep.subr.bf16.mxu0 %v7160_v53  ;;  %v6162_v6 = vld [vmem:[#allocation2 + $0x450] sm:$0xff] }
 0x33b   :  { %v7036_v19 = vpack.c.bf16 %v6035_v22, %v6033_v61  ;;  %v6036_v61 = vld [vmem:[#allocation2 + $0x60] sm:$0xff]  ;;  %v6038_v22 = vld [vmem:[#allocation2 + $0x70] sm:$0xff]  ;;  %v6041_v53 = vld [vmem:[#allocation2 + $0x88] sm:$0xff] }
 0x33c   :  { %8642 = vrot.lane.b32.xlu0 %v8641_v46, %s8799_s6  ;;  %v12877_v37 = vpop.permute.xlu0 %8597  ;;  %7035 = vmatpush1.bf16.msra.mxu1 %v7034_v9  ;;  %v6158_v9 = vld [vmem:[#allocation2 + $0x430] sm:$0xff] }
 0x33d   :  { %v14127_v15 = vunpack.i.l.bf16 %v12877_v37  ;;  %v7162_v18 = vpack.c.bf16 %v6158_v9, %v6156_v23  ;;  %7037 = vmatprep.subr.bf16.mxu1 %v7036_v19  ;;  %v7042_v19 = vpack.c.bf16 %v6038_v22, %v6036_v61  ;;  %v6043_v9 = vld [vmem:[#allocation2 + $0x98] sm:$0xff]  ;;  %v6164_v22 = vld [vmem:[#allocation2 + $0x460] sm:$0xff] }
 0x33e   :  { %5425 = vrot.lane.b32.xlu1 %v14124_v29, %s8799_s6 }
 0x33f   :  { %v12889_v46 = vsel %vm495_vm0, %v14128_v8, %v14127_v15  ;;  %v6039_v15 = vld [vmem:[#allocation2 + $0x78] sm:$0xff]  ;;  %v6161_v8 = vld [vmem:[#allocation2 + $0x448] sm:$0xff]  ;;  %7163 = vmatpush1.bf16.msra.mxu0 %v7162_v18  ;;  %v12906_v41 = vpop.permute.xlu1 %8602  ;;  %v7044_v18 = vpack.c.bf16 %v6043_v9, %v6041_v53 }
 0x340   :  { %5439 = vrot.lane.b32.xlu0 %v14123_v20, %s8799_s6  ;;  %14730 = vst [vmem:[#allocation46_spill] sm:$0xff] %v12889_v46  ;;  %v12892_v20 = vadd.f32 %v4573_v10, %v12530_v59  ;;  %v7040_v47 = vpack.c.bf16 %v6039_v15, %v6037_v16  ;;  %7039 = vmatpush1.bf16.msra.mxu1 %v7038_v26  ;;  %v6165_v16 = vld [vmem:[#allocation2 + $0x468] sm:$0xff] }
 0x341   :  { %v7164_v44 = vpack.c.bf16 %v6163_v50, %v6161_v8  ;;  %v7166_v15 = vpack.c.bf16 %v6162_v6, %v6160_v25  ;;  %v6167_v50 = vld [vmem:[#allocation2 + $0x478] sm:$0xff]  ;;  %v6040_v8 = vld [vmem:[#allocation2 + $0x80] sm:$0xff]  ;;  %v6166_v25 = vld [vmem:[#allocation2 + $0x470] sm:$0xff] }
 0x342   :  { %14731 = vst [vmem:[#allocation40_spill] sm:$0xff] %v12892_v20  ;;  %7041 = vmatprep.subr.bf16.mxu1 %v7040_v47  ;;  %v7168_v61 = vpack.c.bf16 %v6167_v50, %v6165_v16  ;;  %v7170_v35 = vpack.c.bf16 %v6166_v25, %v6164_v22  ;;  %v6045_v16 = vld [vmem:[#allocation2 + $0xa8] sm:$0xff]  ;;  %v6047_v50 = vld [vmem:[#allocation2 + $0xb8] sm:$0xff] }
 0x343   :  { %7165 = vmatprep.subr.bf16.mxu0 %v7164_v44 }
 0x344   :  { %v12894_v29 = vpop.f32.mrb[32].mxu0  ;;  %v4786_v46 = vpop.f32.mrb[16].mxu1  ;;  %7043 = vmatpush1.bf16.msra.mxu1 %v7042_v19  ;;  %7167 = vmatpush1.bf16.msra.mxu0 %v7166_v15  ;;  %v7048_v19 = vpack.c.bf16 %v6047_v50, %v6045_v16  ;;  %v6171_v15 = vld [vmem:[#allocation2 + $0x498] sm:$0xff]  ;;  %v6048_v50 = vld [vmem:[#allocation2 + $0xc0] sm:$0xff] }
 0x345   :  { %v4717_v31 = vpop.f32.mrb[33].mxu0  ;;  %v12897_v32 = vadd.f32 %v4786_v46, %v12530_v59  ;;  %v4788_v13 = vpop.f32.mrb[17].mxu1  ;;  %v14138_v46 = vmax.f32 %v12892_v20, 0.0  ;;  %7045 = vmatprep.subr.bf16.mxu1 %v7044_v18  ;;  %7169 = vmatprep.subr.bf16.mxu0 %v7168_v61  ;;  %v6169_v20 = vld [vmem:[#allocation2 + $0x488] sm:$0xff]  ;;  %v6168_v61 = vld [vmem:[#allocation2 + $0x480] sm:$0xff]  ;;  %v6175_v16 = vld [vmem:[#allocation2 + $0x4b8] sm:$0xff] }
 0x346   :  { %v12900_v10 = vadd.f32 %v4717_v31, %v12530_v59  ;;  %v12903_v23 = vadd.f32 %v4788_v13, %v12530_v59  ;;  %v6042_v13 = vld [vmem:[#allocation2 + $0x90] sm:$0xff]  ;;  %v7172_v25 = vpack.c.bf16 %v6171_v15, %v6169_v20  ;;  %v6051_v20 = vld [vmem:[#allocation2 + $0xd8] sm:$0xff] }
 0x347   :  { %14732 = vst [vmem:[#allocation30_spill] sm:$0xff] %v12897_v32  ;;  %v7046_v31 = vpack.c.bf16 %v6042_v13, %v6040_v8  ;;  %v14735_v44 = vmax.f32 %v12897_v32, 0.0  ;;  %v6044_v8 = vld [vmem:[#allocation2 + $0xa0] sm:$0xff]  ;;  %v6046_v13 = vld [vmem:[#allocation2 + $0xb0] sm:$0xff] }
 0x348   :  { %14733 = vst [vmem:[#allocation91_spill] sm:$0xff] %v12900_v10  ;;  %14734 = vst [vmem:[#allocation49_spill] sm:$0xff] %v12903_v23  ;;  %v14137_v26 = vmax.f32 %v12900_v10, 0.0  ;;  %v14136_v47 = vmax.f32 %v12903_v23, 0.0  ;;  %7171 = vmatpush1.bf16.msra.mxu0 %v7170_v35  ;;  %v7050_v18 = vpack.c.bf16 %v6046_v13, %v6044_v8  ;;  %v6049_v35 = vld [vmem:[#allocation2 + $0xc8] sm:$0xff]  ;;  %v6050_v15 = vld [vmem:[#allocation2 + $0xd0] sm:$0xff] }
 0x349   :  { %7047 = vmatpush1.bf16.msra.mxu1 %v7046_v31  ;;  %7173 = vmatprep.subr.bf16.mxu0 %v7172_v25  ;;  %v7052_v8 = vpack.c.bf16 %v6051_v20, %v6049_v35  ;;  %v6172_v25 = vld [vmem:[#allocation2 + $0x4a0] sm:$0xff]  ;;  %v6055_v23 = vld [vmem:[#allocation2 + $0xf8] sm:$0xff]  ;;  %v6054_v35 = vld [vmem:[#allocation2 + $0xf0] sm:$0xff] }
 0x34a   :  { %v8646_v6 = vpack.i.bf16 %v14137_v26, %v14138_v46  ;;  %v8651_v53 = vpack.i.bf16 %v14136_v47, %v14735_v44  ;;  %v6170_v44 = vld [vmem:[#allocation2 + $0x490] sm:$0xff]  ;;  %v14140_v47 = vunpack.i.h.bf16 %v12906_v41  ;;  %7049 = vmatprep.subr.bf16.mxu1 %v7048_v19 }
 0x34b   :  { %v7174_v26 = vpack.c.bf16 %v6170_v44, %v6168_v61  ;;  %v6174_v61 = vld [vmem:[#allocation2 + $0x4b0] sm:$0xff] }
 0x34c   :  { %v12919_v9 = vpop.permute.xlu1 %5389  ;;  %8647 = vrot.lane.b32.xlu0 %v8646_v6, %s8799_s6  ;;  %8652 = vrot.lane.b32.xlu1 %v8651_v53, %s8799_s6  ;;  %v6173_v53 = vld [vmem:[#allocation2 + $0x4a8] sm:$0xff]  ;;  %v7178_v30 = vpack.c.bf16 %v6174_v61, %v6172_v25  ;;  %v6056_v61 = vld [vmem:[#allocation2 + $0x100] sm:$0xff] }
 0x34d   :  { %7051 = vmatpush1.bf16.msra.mxu1 %v7050_v18  ;;  %7175 = vmatpush1.bf16.msra.mxu0 %v7174_v26  ;;  %v7176_v13 = vpack.c.bf16 %v6175_v16, %v6173_v53  ;;  %v6052_v26 = vld [vmem:[#allocation2 + $0xe0] sm:$0xff] }
 0x34e   :  { %7053 = vmatprep.subr.bf16.mxu1 %v7052_v8  ;;  %v12952_v8 = vadd.f32 %v12894_v29, %v12530_v59  ;;  %v6182_v29 = vld [vmem:[#allocation2 + $0x4f0] sm:$0xff] }
 0x34f   :  { %v12923_v22 = vpop.permute.xlu0 %8607  ;;  %7177 = vmatprep.subr.bf16.mxu0 %v7176_v13  ;;  %v6181_v13 = vld [vmem:[#allocation2 + $0x4e8] sm:$0xff] }
 0x350   :  { %v14139_v6 = vunpack.i.h.bf16 %v12923_v22  ;;  %v12927_v46 = vpop.permute.xlu1 %5377  ;;  %14741 = vst [vmem:[#allocation43_spill] sm:$0xff] %v12952_v8 }
 0x351   :  { %v12939_v19 = vsel %vm495_vm0, %v12862_v24, %v12927_v46  ;;  %7179 = vmatpush1.bf16.msra.mxu0 %v7178_v30 }
 0x352   :  { %v12934_v31 = vsel %vm495_vm0, %v14140_v47, %v14139_v6  ;;  %14737 = vst [vmem:[#allocation52_spill] sm:$0xff] %v12939_v19  ;;  %v7054_v6 = vpack.c.bf16 %v6050_v15, %v6048_v50  ;;  %v6053_v47 = vld [vmem:[#allocation2 + $0xe8] sm:$0xff]  ;;  %v6179_v19 = vld [vmem:[#allocation2 + $0x4d8] sm:$0xff]  ;;  %v7058_v15 = vpack.c.bf16 %v6054_v35, %v6052_v26  ;;  %v6058_v26 = vld [vmem:[#allocation2 + $0x110] sm:$0xff] }
 0x353   :  { %14736 = vst [vmem:[#allocation93_spill] sm:$0xff] %v12934_v31  ;;  %v6177_v31 = vld [vmem:[#allocation2 + $0x4c8] sm:$0xff]  ;;  %v7056_v17 = vpack.c.bf16 %v6055_v23, %v6053_v47  ;;  %v6059_v47 = vld [vmem:[#allocation2 + $0x118] sm:$0xff]  ;;  %v6180_v35 = vld [vmem:[#allocation2 + $0x4e0] sm:$0xff] }
 0x354   :  { %v4857_v44 = vpop.f32.mrb[34].mxu0  ;;  %v4928_v32 = vpop.f32.mrb[18].mxu1  ;;  %7055 = vmatpush1.bf16.msra.mxu1 %v7054_v6  ;;  %v7180_v50 = vpack.c.bf16 %v6179_v19, %v6177_v31  ;;  %v7060_v31 = vpack.c.bf16 %v6059_v47, %v6057_v14  ;;  %v6185_v14 = vld [vmem:[#allocation2 + $0x508] sm:$0xff]  ;;  %v7064_v47 = vpack.c.bf16 %v6063_v38, %v6061_v1 }
 0x355   :  { %v12942_v18 = vadd.f32 %v4857_v44, %v12530_v59  ;;  %v4859_v10 = vpop.f32.mrb[35].mxu0  ;;  %v12945_v20 = vadd.f32 %v4928_v32, %v12530_v59  ;;  %v4930_v16 = vpop.f32.mrb[19].mxu1  ;;  %v6176_v44 = vld [vmem:[#allocation2 + $0x4c0] sm:$0xff]  ;;  %7057 = vmatprep.subr.bf16.mxu1 %v7056_v17  ;;  %v6065_v1 = vld [vmem:[#allocation2 + $0x148] sm:$0xff] }
 0x356   :  { %v12948_v53 = vadd.f32 %v4859_v10, %v12530_v59  ;;  %v7182_v32 = vpack.c.bf16 %v6178_v58, %v6176_v44  ;;  %v6183_v10 = vld [vmem:[#allocation2 + $0x4f8] sm:$0xff]  ;;  %7181 = vmatprep.subr.bf16.mxu0 %v7180_v50  ;;  %v12962_v17 = vadd.f32 %v4930_v16, %v12530_v59  ;;  %v7062_v58 = vpack.c.bf16 %v6058_v26, %v6056_v61  ;;  %v6064_v26 = vld [vmem:[#allocation2 + $0x140] sm:$0xff] }
 0x357   :  { %14738 = vst [vmem:[#allocation94_spill] sm:$0xff] %v12942_v18  ;;  %14739 = vst [vmem:[#allocation50_spill] sm:$0xff] %v12945_v20  ;;  %v14151_v23 = vmax.f32 %v12942_v18, 0.0  ;;  %v14153_v25 = vmax.f32 %v12945_v20, 0.0  ;;  %v7184_v19 = vpack.c.bf16 %v6183_v10, %v6181_v13  ;;  %v6187_v50 = vld [vmem:[#allocation2 + $0x518] sm:$0xff]  ;;  %v7186_v44 = vpack.c.bf16 %v6182_v29, %v6180_v35  ;;  %v6060_v13 = vld [vmem:[#allocation2 + $0x120] sm:$0xff]  ;;  %v12976_v29 = vpop.permute.xlu0 %5391 }
 0x358   :  { %14740 = vst [vmem:[#allocation32_spill] sm:$0xff] %v12948_v53  ;;  %v14152_v6 = vmax.f32 %v12948_v53, 0.0  ;;  %14742 = vst [vmem:[#allocation37_spill] sm:$0xff] %v12962_v17  ;;  %7059 = vmatpush1.bf16.msra.mxu1 %v7058_v15  ;;  %7183 = vmatpush1.bf16.msra.mxu0 %v7182_v32  ;;  %v6062_v10 = vld [vmem:[#allocation2 + $0x130] sm:$0xff]  ;;  %v14155_v18 = vmax.f32 %v12952_v8, 0.0  ;;  %v7188_v16 = vpack.c.bf16 %v6187_v50, %v6185_v14  ;;  %v6067_v32 = vld [vmem:[#allocation2 + $0x158] sm:$0xff] }
 0x359   :  { %5453 = vrot.lane.b32.xlu1 %v14153_v25, %s8799_s6  ;;  %7061 = vmatprep.subr.bf16.mxu1 %v7060_v31  ;;  %v14154_v25 = vmax.f32 %v12962_v17, 0.0  ;;  %v7066_v15 = vpack.c.bf16 %v6062_v10, %v6060_v13  ;;  %v6189_v31 = vld [vmem:[#allocation2 + $0x528] sm:$0xff]  ;;  %v6191_v61 = vld [vmem:[#allocation2 + $0x538] sm:$0xff]  ;;  %v6066_v35 = vld [vmem:[#allocation2 + $0x150] sm:$0xff] }
 0x35a   :  { %v8656_v30 = vpack.i.bf16 %v14151_v23, %v14152_v6  ;;  %7185 = vmatprep.subr.bf16.mxu0 %v7184_v19  ;;  %v6184_v23 = vld [vmem:[#allocation2 + $0x500] sm:$0xff]  ;;  %v6186_v6 = vld [vmem:[#allocation2 + $0x510] sm:$0xff]  ;;  %v7068_v19 = vpack.c.bf16 %v6067_v32, %v6065_v1  ;;  %v6069_v50 = vld [vmem:[#allocation2 + $0x168] sm:$0xff] }
 0x35b   :  { %v7190_v38 = vpack.c.bf16 %v6186_v6, %v6184_v23  ;;  %v7070_v23 = vpack.c.bf16 %v6066_v35, %v6064_v26  ;;  %v6188_v6 = vld [vmem:[#allocation2 + $0x520] sm:$0xff]  ;;  %v6190_v14 = vld [vmem:[#allocation2 + $0x530] sm:$0xff]  ;;  %v6071_v10 = vld [vmem:[#allocation2 + $0x178] sm:$0xff] }
 0x35c   :  { %8657 = vrot.lane.b32.xlu0 %v8656_v30, %s8799_s6  ;;  %7063 = vmatpush1.bf16.msra.mxu1 %v7062_v58  ;;  %v7192_v58 = vpack.c.bf16 %v6191_v61, %v6189_v31  ;;  %v7194_v13 = vpack.c.bf16 %v6190_v14, %v6188_v6  ;;  %v6068_v61 = vld [vmem:[#allocation2 + $0x160] sm:$0xff]  ;;  %v6070_v26 = vld [vmem:[#allocation2 + $0x170] sm:$0xff] }
 0x35d   :  { %5441 = vrot.lane.b32.xlu1 %v14155_v18, %s8799_s6  ;;  %7187 = vmatpush1.bf16.msra.mxu0 %v7186_v44  ;;  %v6192_v35 = vld [vmem:[#allocation2 + $0x540] sm:$0xff]  ;;  %v7074_v18 = vpack.c.bf16 %v6070_v26, %v6068_v61  ;;  %v6074_v61 = vld [vmem:[#allocation2 + $0x190] sm:$0xff] }
 0x35e   :  { %7065 = vmatprep.subr.bf16.mxu1 %v7064_v47  ;;  %7189 = vmatprep.subr.bf16.mxu0 %v7188_v16  ;;  %v6193_v16 = vld [vmem:[#allocation2 + $0x548] sm:$0xff]  ;;  %v6076_v20 = vld [vmem:[#allocation2 + $0x1a0] sm:$0xff]  ;;  %v6078_v8 = vld [vmem:[#allocation2 + $0x1b0] sm:$0xff] }
 0x35f   :  { %v12988_v17 = vpop.permute.xlu0 %8612  ;;  %v6200_v53 = vld [vmem:[#allocation2 + $0x580] sm:$0xff] }
 0x360   :  { %5455 = vrot.lane.b32.xlu0 %v14154_v25, %s8799_s6  ;;  %7067 = vmatpush1.bf16.msra.mxu1 %v7066_v15  ;;  %v6195_v15 = vld [vmem:[#allocation2 + $0x558] sm:$0xff] }
 0x361   :  { %7191 = vmatpush1.bf16.msra.mxu0 %v7190_v38  ;;  %7069 = vmatprep.subr.bf16.mxu1 %v7068_v19  ;;  %v7072_v38 = vpack.c.bf16 %v6071_v10, %v6069_v50  ;;  %v7196_v31 = vpack.c.bf16 %v6195_v15, %v6193_v16  ;;  %v6194_v19 = vld [vmem:[#allocation2 + $0x550] sm:$0xff]  ;;  %v6073_v50 = vld [vmem:[#allocation2 + $0x188] sm:$0xff]  ;;  %v6199_v16 = vld [vmem:[#allocation2 + $0x578] sm:$0xff] }
 0x362   :  { %7193 = vmatprep.subr.bf16.mxu0 %v7192_v58  ;;  %v6072_v15 = vld [vmem:[#allocation2 + $0x180] sm:$0xff] }
 0x364   :  { %7071 = vmatpush1.bf16.msra.mxu1 %v7070_v23  ;;  %v6197_v23 = vld [vmem:[#allocation2 + $0x568] sm:$0xff] }
 0x365   :  { %v12978_v30 = vpop.f32.mrb[36].mxu0  ;;  %7195 = vmatpush1.bf16.msra.mxu0 %v7194_v13  ;;  %7073 = vmatprep.subr.bf16.mxu1 %v7072_v38  ;;  %v8575_v13 = vunpack.i.h.bf16 %v12791_v34 }
 0x366   :  { %v5070_v44 = vpop.f32.mrb[20].mxu1  ;;  %v5001_v47 = vpop.f32.mrb[37].mxu0  ;;  %7197 = vmatprep.subr.bf16.mxu0 %v7196_v31  ;;  %v7200_v31 = vpack.c.bf16 %v6199_v16, %v6197_v23 }
 0x367   :  { %v12981_v1 = vadd.f32 %v5070_v44, %v12530_v59  ;;  %v12984_v32 = vadd.f32 %v5001_v47, %v12530_v59  ;;  %v5072_v25 = vpop.f32.mrb[21].mxu1  ;;  %v7198_v44 = vpack.c.bf16 %v6194_v19, %v6192_v35  ;;  %v6075_v47 = vld [vmem:[#allocation2 + $0x198] sm:$0xff]  ;;  %v7078_v35 = vpack.c.bf16 %v6074_v61, %v6072_v15  ;;  %v6196_v19 = vld [vmem:[#allocation2 + $0x560] sm:$0xff] }
 0x368   :  { %7075 = vmatpush1.bf16.msra.mxu1 %v7074_v18  ;;  %v7076_v10 = vpack.c.bf16 %v6075_v47, %v6073_v50  ;;  %v6203_v61 = vld [vmem:[#allocation2 + $0x598] sm:$0xff] }
 0x369   :  { %14743 = vst [vmem:[#allocation92_spill] sm:$0xff] %v12981_v1  ;;  %14744 = vst [vmem:[#allocation48_spill] sm:$0xff] %v12984_v32  ;;  %v14157_v6 = vmax.f32 %v12981_v1, 0.0  ;;  %v14158_v14 = vmax.f32 %v12984_v32, 0.0  ;;  %7199 = vmatpush1.bf16.msra.mxu0 %v7198_v44  ;;  %v6077_v1 = vld [vmem:[#allocation2 + $0x1a8] sm:$0xff]  ;;  %v6079_v32 = vld [vmem:[#allocation2 + $0x1b8] sm:$0xff]  ;;  %v14747_v44 = vunpack.i.l.bf16 %v12801_v55 }
 0x36a   :  { %7077 = vmatprep.subr.bf16.mxu1 %v7076_v10  ;;  %7201 = vmatprep.subr.bf16.mxu0 %v7200_v31  ;;  %v8580_v31 = vunpack.i.h.bf16 %v12801_v55 }
 0x36b   :  { %v8661_v58 = vpack.i.bf16 %v14157_v6, %v14158_v14  ;;  %v6198_v6 = vld [vmem:[#allocation2 + $0x570] sm:$0xff]  ;;  %v12998_v14 = vadd.f32 %v5072_v25, %v12530_v59  ;;  %v5475_v23 = vsel %vm495_vm0, %v8575_v13, %v14747_v44  ;;  %v7080_v25 = vpack.c.bf16 %v6079_v32, %v6077_v1 }
 0x36c   :  { %v7202_v38 = vpack.c.bf16 %v6198_v6, %v6196_v19  ;;  %7079 = vmatpush1.bf16.msra.mxu1 %v7078_v35  ;;  %v6202_v44 = vld [vmem:[#allocation2 + $0x590] sm:$0xff]  ;;  %v5474_v1 = vsel %vm495_vm0, %v14748_v4, %v8575_v13  ;;  %v7082_v32 = vpack.c.bf16 %v6078_v8, %v6076_v20  ;;  %v6081_v20 = vld [vmem:[#allocation2 + $0x1c8] sm:$0xff]  ;;  %v6083_v8 = vld [vmem:[#allocation2 + $0x1d8] sm:$0xff] }
 0x36d   :  { %v5212_v26 = vpop.f32.mrb[22].mxu1  ;;  %8662 = vrot.lane.b32.xlu0 %v8661_v58, %s8799_s6  ;;  %14745 = vst [vmem:[#allocation42_spill] sm:$0xff] %v12998_v14  ;;  %v13000_v18 = vpop.permute.xlu0 %5405  ;;  %v6201_v58 = vld [vmem:[#allocation2 + $0x588] sm:$0xff]  ;;  %7081 = vmatprep.subr.bf16.mxu1 %v7080_v25 }
 0x36e   :  { %v13003_v50 = vadd.f32 %v5212_v26, %v12530_v59  ;;  %v13005_v47 = vpop.f32.mrb[38].mxu0  ;;  %v5214_v16 = vpop.f32.mrb[23].mxu1  ;;  %v13012_v26 = vadd.f32 %v12978_v30, %v12530_v59  ;;  %v7204_v19 = vpack.c.bf16 %v6203_v61, %v6201_v58  ;;  %7203 = vmatpush1.bf16.msra.mxu0 %v7202_v38  ;;  %v14168_v30 = vmax.f32 %v12998_v14, 0.0  ;;  %v6205_v13 = vld [vmem:[#allocation2 + $0x5a8] sm:$0xff]  ;;  %v6080_v61 = vld [vmem:[#allocation2 + $0x1c0] sm:$0xff]  ;;  %v6206_v14 = vld [vmem:[#allocation2 + $0x5b0] sm:$0xff] }
 0x36f   :  { %v5143_v15 = vpop.f32.mrb[39].mxu0  ;;  %v7206_v58 = vpack.c.bf16 %v6202_v44, %v6200_v53  ;;  %v13040_v25 = vadd.f32 %v5214_v16, %v12530_v59  ;;  %v13046_v53 = vpop.permute.xlu1 %8617  ;;  %v14753_v44 = vmax.f32 %v12533_v51, 0.0  ;;  %v7084_v16 = vpack.c.bf16 %v6083_v8, %v6081_v20  ;;  %v6085_v20 = vld [vmem:[#allocation2 + $0x1e8] sm:$0xff] }
 0x370   :  { %14746 = vst [vmem:[#allocation54_spill] sm:$0xff] %v13003_v50  ;;  %v13016_v10 = vadd.f32 %v5143_v15, %v12530_v59  ;;  %v14749_v35 = vmax.f32 %v13003_v50, 0.0  ;;  %7205 = vmatprep.subr.bf16.mxu0 %v7204_v19  ;;  %v14750_v15 = vmax.f32 %v12536_v27, 0.0  ;;  %7083 = vmatpush1.bf16.msra.mxu1 %v7082_v32  ;;  %v6082_v19 = vld [vmem:[#allocation2 + $0x1d0] sm:$0xff]  ;;  %v14754_v50 = vunpack.i.l.bf16 %v12791_v34 }
 0x371   :  { %v13024_v45 = vpop.permute.xlu0 %5393  ;;  %v8595_v32 = vunpack.i.h.bf16 %v12838_v49  ;;  %v7086_v51 = vpack.c.bf16 %v6082_v19, %v6080_v61  ;;  %7085 = vmatprep.subr.bf16.mxu1 %v7084_v16  ;;  %v8590_v8 = vunpack.i.h.bf16 %v12828_v11  ;;  %v6084_v61 = vld [vmem:[#allocation2 + $0x1e0] sm:$0xff]  ;;  %v6086_v19 = vld [vmem:[#allocation2 + $0x1f0] sm:$0xff] }
 0x372   :  { %v14169_v6 = vmax.f32 %v13016_v10, 0.0  ;;  %5469 = vrot.lane.b32.xlu0 %v14749_v35, %s8799_s6  ;;  %v13031_v4 = vmax.f32 %v14750_v15, %v5475_v23  ;;  %v13036_v55 = vsel %vm495_vm0, %v12976_v29, %v13024_v45  ;;  %v6207_v23 = vld [vmem:[#allocation2 + $0x5b8] sm:$0xff]  ;;  %v13050_v35 = vmax.f32 %v14753_v44, %v5474_v1  ;;  %7207 = vmatpush1.bf16.msra.mxu0 %v7206_v58  ;;  %v6208_v16 = vld [vmem:[#allocation2 + $0x5c0] sm:$0xff] }
 0x373   :  { %14752 = vst [vmem:[#allocation60_spill] sm:$0xff] %v13036_v55  ;;  %v8584_v15 = vunpack.i.l.bf16 %v12793_v2  ;;  %v7208_v38 = vpack.c.bf16 %v6207_v23, %v6205_v13  ;;  %v6204_v55 = vld [vmem:[#allocation2 + $0x5a0] sm:$0xff]  ;;  %v14171_v13 = vmax.f32 %v13040_v25, 0.0  ;;  %v6211_v23 = vld [vmem:[#allocation2 + $0x5d8] sm:$0xff]  ;;  %v7090_v44 = vpack.c.bf16 %v6086_v19, %v6084_v61 }
 0x374   :  { %14751 = vst [vmem:[#allocation45_spill] sm:$0xff] %v13031_v4  ;;  %v8666_v27 = vpack.i.bf16 %v14169_v6, %v14168_v30  ;;  %v5473_v30 = vsel %vm495_vm0, %v8580_v31, %v14754_v50  ;;  %v14755_v6 = vmax.f32 %v13012_v26, 0.0  ;;  %v8671_v58 = vpack.i.bf16 %v13031_v4, %v13050_v35  ;;  %v6087_v50 = vld [vmem:[#allocation2 + $0x1f8] sm:$0xff]  ;;  %v6209_v31 = vld [vmem:[#allocation2 + $0x5c8] sm:$0xff]  ;;  %7087 = vmatpush1.bf16.msra.mxu1 %v7086_v51  ;;  %v6210_v4 = vld [vmem:[#allocation2 + $0x5d0] sm:$0xff] }
 0x375   :  { %v5478_v1 = vsel %vm495_vm0, %v8584_v15, %v12814_v5  ;;  %7209 = vmatprep.subr.bf16.mxu0 %v7208_v38  ;;  %v7210_v34 = vpack.c.bf16 %v6206_v14, %v6204_v55  ;;  %v5479_v14 = vsel %vm495_vm0, %v12814_v5, %v12831_v36  ;;  %v8589_v55 = vunpack.i.l.bf16 %v12828_v11 }
 0x376   :  { %5457 = vrot.lane.b32.xlu0 %v14755_v6, %s8799_s6  ;;  %8667 = vrot.lane.b32.xlu1 %v8666_v27, %s8799_s6  ;;  %v13068_v6 = vadd.f32 %v13005_v47, %v12530_v59  ;;  %v7088_v27 = vpack.c.bf16 %v6087_v50, %v6085_v20  ;;  %v7212_v38 = vpack.c.bf16 %v6211_v23, %v6209_v31  ;;  %v14756_v59 = vunpack.i.l.bf16 %v12838_v49  ;;  %v13080_v20 = vpop.permute.xlu1 %5407  ;;  %v6213_v49 = vld [vmem:[#allocation2 + $0x5e8] sm:$0xff] }
 0x377   :  { %7211 = vmatpush1.bf16.msra.mxu0 %v7210_v34  ;;  %v5485_v51 = vsel %vm495_vm0, %v8595_v32, %v12833_v21  ;;  %v7214_v36 = vpack.c.bf16 %v6210_v4, %v6208_v16  ;;  %v14757_v11 = vmax.f32 %v12548_v57, 0.0  ;;  %v6215_v34 = vld [vmem:[#allocation2 + $0x5f8] sm:$0xff]  ;;  %v14758_v50 = vmax.f32 %v12539_v7, 0.0  ;;  %v6214_v57 = vld [vmem:[#allocation2 + $0x5f0] sm:$0xff] }
 0x378   :  { %v5482_v47 = vsel %vm495_vm0, %v8590_v8, %v14756_v59  ;;  %7089 = vmatprep.subr.bf16.mxu1 %v7088_v27  ;;  %7213 = vmatprep.subr.bf16.mxu0 %v7212_v38  ;;  %v14759_v23 = vmax.f32 %v12573_v56, 0.0  ;;  %v14173_v19 = vmax.f32 %v13068_v6, 0.0  ;;  %v7216_v4 = vpack.c.bf16 %v6215_v34, %v6213_v49 }
 0x379   :  { %v13088_v5 = vmax.f32 %v14757_v11, %v5478_v1  ;;  %v13092_v31 = vmax.f32 %v14758_v50, %v5473_v30  ;;  %7091 = vmatpush1.bf16.msra.mxu1 %v7090_v44  ;;  %v5481_v1 = vsel %vm495_vm0, %v8589_v55, %v8590_v8  ;;  %v14761_v27 = vmax.f32 %v12587_v0, 0.0 }
 0x37a   :  { %5471 = vrot.lane.b32.xlu1 %v14171_v13, %s8799_s6  ;;  %8672 = vrot.lane.b32.xlu0 %v8671_v58, %s8801_s19  ;;  %v13096_v61 = vmax.f32 %v14759_v23, %v5479_v14  ;;  %v6212_v58 = vld [vmem:[#allocation2 + $0x5e0] sm:$0xff]  ;;  %v14763_v7 = vmax.f32 %v12603_v42, 0.0  ;;  %v14764_v14 = vunpack.i.h.bf16 %v12793_v2  ;;  %v14765_v44 = vunpack.i.l.bf16 %v12877_v37  ;;  %v14826_v13 = vld [vmem:[#allocation30_spill] sm:$0xff] }
 0x37b   :  { %v13102_v38 = vmax.f32 %v14761_v27, %v5482_v47  ;;  %7215 = vmatpush1.bf16.msra.mxu0 %v7214_v36  ;;  %v7218_v56 = vpack.c.bf16 %v6214_v57, %v6212_v58  ;;  %v8609_v8 = vunpack.i.l.bf16 %v12923_v22  ;;  %v8676_v42 = vpack.i.bf16 %v13088_v5, %v13092_v31 }
 0x37c   :  { %14760 = vst [vmem:[#allocation51_spill] sm:$0xff] %v13096_v61  ;;  %v13106_v30 = vmax.f32 %v14763_v7, %v5485_v51  ;;  %v5477_v16 = vsel %vm495_vm0, %v14764_v14, %v8584_v15  ;;  %v5484_v59 = vsel %vm495_vm0, %v14765_v44, %v8595_v32  ;;  %v8619_v2 = vunpack.i.l.bf16 %v13046_v53  ;;  %7217 = vmatprep.subr.bf16.mxu0 %v7216_v4 }
 0x37d   :  { %14762 = vst [vmem:[#allocation66_spill] sm:$0xff] %v13102_v38  ;;  %v14766_v32 = vmax.f32 %v12580_v12, 0.0  ;;  %v5480_v51 = vsel %vm495_vm0, %v12840_v52, %v8589_v55  ;;  %v8600_v36 = vunpack.i.h.bf16 %v12877_v37  ;;  %v8604_v11 = vunpack.i.l.bf16 %v12906_v41 }
 0x37e   :  { %5465 = vrot.lane.b32.xlu1 %v14173_v19, %s8799_s6  ;;  %5740 = vrot.lane.b32.xlu0 %v13096_v61, %s8801_s19  ;;  %v13120_v0 = vpop.permute.xlu1 %8622  ;;  %v14767_v49 = vmax.f32 %v12545_v40, 0.0  ;;  %v8686_v50 = vpack.i.bf16 %v13106_v30, %v13102_v38  ;;  %v14768_v23 = vmax.f32 %v12630_v54, 0.0  ;;  %v5492_v52 = vsel %vm495_vm0, %v8609_v8, %v12919_v9 }
 0x37f   :  { %v8624_v15 = vunpack.i.l.bf16 %v13120_v0  ;;  %v13128_v47 = vmax.f32 %v14766_v32, %v5481_v1  ;;  %7219 = vmatpush1.bf16.msra.mxu0 %v7218_v56  ;;  %v5487_v37 = vsel %vm495_vm0, %v12927_v46, %v8600_v36  ;;  %v8615_v40 = vunpack.i.h.bf16 %v12988_v17 }
 0x380   :  { %v13136_v34 = vmax.f32 %v14767_v49, %v5477_v16  ;;  %v13142_v4 = vmax.f32 %v14768_v23, %v5484_v59  ;;  %v8614_v55 = vunpack.i.l.bf16 %v12988_v17  ;;  %v14769_v54 = vmax.f32 %v12607_v48, 0.0  ;;  %v8628_v16 = vpop.permute.xlu0 %8627 }
 0x381   :  { %v13145_v12 = vsel %vm495_vm0, %v8619_v2, %v8624_v15  ;;  %v5486_v57 = vsel %vm495_vm0, %v12833_v21, %v12862_v24  ;;  %v5488_v1 = vsel %vm495_vm0, %v8600_v36, %v8604_v11  ;;  %v14770_v27 = vunpack.i.h.bf16 %v12906_v41 }
 0x382   :  { %8677 = vrot.lane.b32.xlu1 %v8676_v42, %s8801_s19  ;;  %v13156_v58 = vmax.f32 %v14769_v54, %v5480_v51  ;;  %8687 = vrot.lane.b32.xlu0 %v8686_v50, %s8801_s19  ;;  %v8681_v46 = vpack.i.bf16 %v13128_v47, %v13136_v34  ;;  %v14771_v7 = vmax.f32 %v12668_v62, 0.0  ;;  %v14772_v56 = vmax.f32 %v12662_v60, 0.0 }
 0x383   :  { %v5489_v17 = vsel %vm495_vm0, %v8604_v11, %v14770_v27  ;;  %v5495_v24 = vsel %vm495_vm0, %v8614_v55, %v8615_v40  ;;  %v14773_v41 = vmax.f32 %v12614_v39, 0.0  ;;  %v14775_v62 = vmax.f32 %v12640_v3, 0.0  ;;  %v14785_v27 = vld [vmem:[#allocation83_spill] sm:$0xff] }
 0x384   :  { %v13170_v48 = vmax.f32 %v14771_v7, %v5492_v52  ;;  %v13174_v14 = vmax.f32 %v14772_v56, %v5487_v37  ;;  %v8691_v21 = vpack.i.bf16 %v13142_v4, %v13156_v58  ;;  %v14776_v60 = vmax.f32 %v12637_v63, 0.0  ;;  %v14788_v56 = vld [vmem:[#allocation14_spill] sm:$0xff] }
 0x385   :  { %v13183_v44 = vmax.f32 %v14773_v41, %v5486_v57  ;;  %v13187_v59 = vmax.f32 %v14775_v62, %v5488_v1  ;;  %v14778_v32 = vunpack.i.h.bf16 %v12923_v22  ;;  %v14779_v11 = vmax.f32 %v12693_v33, 0.0  ;;  %v14791_v41 = vld [vmem:[#allocation36_spill] sm:$0xff] }
 0x386   :  { %8682 = vrot.lane.b32.xlu1 %v8681_v46, %s8801_s19  ;;  %8692 = vrot.lane.b32.xlu0 %v8691_v21, %s8801_s19  ;;  %v13191_v42 = vmax.f32 %v14776_v60, %v5489_v17  ;;  %v8701_v36 = vpack.i.bf16 %v13174_v14, %v13170_v48  ;;  %v8620_v49 = vunpack.i.h.bf16 %v13046_v53  ;;  %v8630_v3 = vunpack.i.h.bf16 %v8628_v16 }
 0x387   :  { %14774 = vst [vmem:[#allocation57_spill] sm:$0xff] %v13183_v44  ;;  %v5491_v51 = vsel %vm495_vm0, %v14778_v32, %v8609_v8  ;;  %v13200_v39 = vmax.f32 %v14779_v11, %v5495_v24  ;;  %v8629_v50 = vunpack.i.l.bf16 %v8628_v16  ;;  %v8625_v23 = vunpack.i.h.bf16 %v13120_v0  ;;  %v14794_v32 = vld [vmem:[#allocation33_spill] sm:$0xff] }
 0x388   :  { %14777 = vst [vmem:[#allocation47_spill] sm:$0xff] %v13191_v42  ;;  %v14780_v63 = vmax.f32 %v12659_v28, 0.0  ;;  %v5493_v33 = vsel %vm495_vm0, %v12919_v9, %v12976_v29  ;;  %v8696_v53 = vpack.i.bf16 %v13191_v42, %v13187_v59  ;;  %v5499_v0 = vsel %vm495_vm0, %v8620_v49, %v13000_v18 }
 0x389   :  { %v5496_v52 = vsel %vm495_vm0, %v8615_v40, %v8619_v2  ;;  %v5500_v28 = vsel %vm495_vm0, %v13000_v18, %v13080_v20  ;;  %v5503_v54 = vsel %vm495_vm0, %v8629_v50, %v8630_v3  ;;  %v5502_v9 = vsel %vm495_vm0, %v8625_v23, %v8629_v50  ;;  %v14783_v40 = vld [vmem:[#allocation21_spill] sm:$0xff] }
 0x38a   :  { %5756 = vrot.lane.b32.xlu1 %v13183_v44, %s8801_s19  ;;  %v13208_v22 = vmax.f32 %v14780_v63, %v5491_v51  ;;  %8702 = vrot.lane.b32.xlu0 %v8701_v36, %s8801_s19  ;;  %v14781_v57 = vmax.f32 %v12665_v43, 0.0  ;;  %v14784_v46 = vmax.f32 %v14783_v40, 0.0  ;;  %v14786_v17 = vmax.f32 %v14785_v27, 0.0  ;;  %v14802_v40 = vld [vmem:[#allocation25_spill] sm:$0xff] }
 0x38b   :  { %v5422_v8 = vpop.permute.xlu0 %5421  ;;  %v14789_v21 = vmax.f32 %v14788_v56, 0.0  ;;  %v5498_v16 = vsel %vm495_vm0, %v8624_v15, %v8620_v49  ;;  %v14792_v62 = vmax.f32 %v14791_v41, 0.0  ;;  %v14795_v51 = vmax.f32 %v14794_v32, 0.0 }
 0x38c   :  { %v8706_v37 = vpack.i.bf16 %v13200_v39, %v13208_v22  ;;  %v13229_v1 = vmax.f32 %v14781_v57, %v5493_v33  ;;  %v13234_v18 = vmax.f32 %v14784_v46, %v5499_v0  ;;  %v13238_v7 = vmax.f32 %v14786_v17, %v5496_v52  ;;  %v14796_v33 = vld [vmem:[#allocation28_spill] sm:$0xff]  ;;  %v14804_v17 = vld [vmem:[#allocation27_spill] sm:$0xff] }
 0x38d   :  { %v13242_v24 = vmax.f32 %v14789_v21, %v5500_v28  ;;  %v13247_v60 = vmax.f32 %v14792_v62, %v5503_v54  ;;  %v13251_v36 = vmax.f32 %v14795_v51, %v5502_v9  ;;  %v5494_v63 = vsel %vm495_vm0, %v13024_v45, %v8614_v55  ;;  %v14800_v9 = vld [vmem:[#allocation19_spill] sm:$0xff] }
 0x38e   :  { %8697 = vrot.lane.b32.xlu1 %v8696_v53, %s8801_s19  ;;  %v8633_v29 = vpop.permute.xlu1 %8632  ;;  %14782 = vst [vmem:[#allocation55_spill] sm:$0xff] %v13229_v1  ;;  %8707 = vrot.lane.b32.xlu0 %v8706_v37, %s8801_s19  ;;  %14787 = vst [vmem:[#allocation56_spill] sm:$0xff] %v13238_v7  ;;  %v14797_v53 = vmax.f32 %v14796_v33, 0.0  ;;  %v14803_v46 = vmax.f32 %v14802_v40, 0.0  ;;  %v14805_v56 = vmax.f32 %v14804_v17, 0.0  ;;  %v14807_v51 = vld [vmem:[#allocation7_spill] sm:$0xff] }
 0x38f   :  { %v8635_v2 = vunpack.i.h.bf16 %v8633_v29  ;;  %14790 = vst [vmem:[#allocation73_spill] sm:$0xff] %v13242_v24  ;;  %v5410_v43 = vpop.permute.xlu0 %5409  ;;  %14793 = vst [vmem:[#allocation63_spill] sm:$0xff] %v13247_v60  ;;  %v8634_v50 = vunpack.i.l.bf16 %v8633_v29  ;;  %v8721_v45 = vpack.i.bf16 %v13247_v60, %v13251_v36  ;;  %v14801_v29 = vmax.f32 %v14800_v9, 0.0  ;;  %v14811_v17 = vld [vmem:[#allocation70_spill] sm:$0xff] }
 0x390   :  { %v13262_v15 = vsel %vm495_vm0, %v13080_v20, %v5410_v43  ;;  %v13268_v0 = vmax.f32 %v14797_v53, %v5498_v16  ;;  %v5501_v28 = vsel %vm495_vm0, %v5410_v43, %v8625_v23  ;;  %v14798_v20 = vld [vmem:[#allocation22_spill] sm:$0xff]  ;;  %v14809_v53 = vld [vmem:[#allocation79_spill] sm:$0xff] }
 0x391   :  { %v13254_v11 = vsel %vm495_vm0, %v8630_v3, %v8635_v2  ;;  %v8711_v3 = vpack.i.bf16 %v13234_v18, %v13238_v7  ;;  %v5506_v52 = vsel %vm495_vm0, %v8634_v50, %v5422_v8  ;;  %v14799_v55 = vmax.f32 %v14798_v20, 0.0 }
 0x392   :  { %5772 = vrot.lane.b32.xlu1 %v13229_v1, %s8801_s19  ;;  %5788 = vrot.lane.b32.xlu0 %v13242_v24, %s8801_s19  ;;  %v5424_v49 = vpop.permute.xlu1 %5423  ;;  %v13285_v57 = vmax.f32 %v14801_v29, %v5501_v28  ;;  %v13289_v23 = vmax.f32 %v14803_v46, %v5506_v52  ;;  %v5505_v43 = vsel %vm495_vm0, %v8635_v2, %v8634_v50  ;;  %v6089_v2 = vld [vmem:[#allocation2 + $0x208] sm:$0xff]  ;;  %v6091_v50 = vld [vmem:[#allocation2 + $0x218] sm:$0xff] }
 0x393   :  { %v13278_v37 = vmax.f32 %v14799_v55, %v5494_v63  ;;  %v5507_v54 = vsel %vm495_vm0, %v5422_v8, %v5424_v49  ;;  %v14808_v63 = vmax.f32 %v14807_v51, 0.0  ;;  %v7092_v9 = vpack.c.bf16 %v6091_v50, %v6089_v2 }
 0x394   :  { %v13295_v21 = vmax.f32 %v14805_v56, %v5507_v54  ;;  %v8726_v8 = vpack.i.bf16 %v13285_v57, %v13289_v23  ;;  %v14812_v56 = vmax.f32 %v14811_v17, 0.0 }
 0x395   :  { %v8716_v27 = vpack.i.bf16 %v13268_v0, %v13278_v37  ;;  %v13307_v33 = vmax.f32 %v14808_v63, %v5505_v43  ;;  %7093 = vmatprep.subr.bf16.mxu1 %v7092_v9 }
 0x396   :  { %8712 = vrot.lane.b32.xlu1 %v8711_v3, %s8801_s19  ;;  %8722 = vrot.lane.b32.xlu0 %v8721_v45, %s8801_s19  ;;  %14806 = vst [vmem:[#allocation84_spill] sm:$0xff] %v13295_v21  ;;  %v14810_v3 = vmax.f32 %v14809_v53, 0.0 }
 0x39a   :  { %8717 = vrot.lane.b32.xlu1 %v8716_v27, %s8801_s19  ;;  %5804 = vrot.lane.b32.xlu0 %v13295_v21, %s8801_s19 }
 0x39e   :  { %8727 = vrot.lane.b32.xlu1 %v8726_v8, %s8801_s19  ;;  %v8638_v16 = vpop.permute.xlu1 %8637 }
 0x39f   :  { %v8640_v41 = vunpack.i.h.bf16 %v8638_v16  ;;  %v8639_v62 = vunpack.i.l.bf16 %v8638_v16  ;;  %v14814_v16 = vld [vmem:[#allocation39_spill] sm:$0xff] }
 0x3a0   :  { %v14815_v43 = vmax.f32 %v14814_v16, 0.0 }
 0x3a1   :  { %v5509_v32 = vsel %vm495_vm0, %v8639_v62, %v8640_v41 }
 0x3a2   :  { %v13311_v52 = vmax.f32 %v14810_v3, %v5509_v32 }
 0x3a4   :  { %v8731_v28 = vpack.i.bf16 %v13311_v52, %v13307_v33 }
 0x3a6   :  { %8732 = vrot.lane.b32.xlu1 %v8731_v28, %s8801_s19 }
 0x3ac   :  { %v5438_v45 = vpop.permute.xlu1 %5437 }
 0x3ae   :  { %v8643_v20 = vpop.permute.xlu0 %8642 }
 0x3af   :  { %v8645_v55 = vunpack.i.h.bf16 %v8643_v20  ;;  %v8644_v54 = vunpack.i.l.bf16 %v8643_v20 }
 0x3b0   :  { %v5426_v29 = vpop.permute.xlu1 %5425 }
 0x3b1   :  { %v5510_v40 = vsel %vm495_vm0, %v8640_v41, %v8644_v54  ;;  %v5513_v46 = vsel %vm495_vm0, %v8645_v55, %v5438_v45  ;;  %v13319_v27 = vsel %vm495_vm0, %v5424_v49, %v5426_v29  ;;  %v14816_v41 = vld [vmem:[#allocation41_spill] sm:$0xff]  ;;  %v5508_v20 = vsel %vm495_vm0, %v5426_v29, %v8639_v62 }
 0x3b2   :  { %v13323_v8 = vmax.f32 %v14812_v56, %v5510_v40  ;;  %v13327_v32 = vmax.f32 %v14815_v43, %v5513_v46  ;;  %v13329_v51 = vpop.permute.xlu0 %5439  ;;  %v14817_v53 = vmax.f32 %v14816_v41, 0.0  ;;  %v14819_v56 = vld [vmem:[#allocation35_spill] sm:$0xff] }
 0x3b3   :  { %v5514_v63 = vsel %vm495_vm0, %v5438_v45, %v13329_v51  ;;  %v14820_v16 = vmax.f32 %v14819_v56, 0.0 }
 0x3b4   :  { %14813 = vst [vmem:[#allocation95_spill] sm:$0xff] %v13323_v8  ;;  %v13335_v3 = vmax.f32 %v14817_v53, %v5514_v63  ;;  %v8736_v49 = vpack.i.bf16 %v13327_v32, %v13323_v8  ;;  %v14821_v63 = vld [vmem:[#allocation40_spill] sm:$0xff] }
 0x3b5   :  { %v13353_v43 = vmax.f32 %v14820_v16, %v5508_v20  ;;  %v14822_v41 = vmax.f32 %v14821_v63, 0.0  ;;  %v6217_v63 = vld [vmem:[#allocation2 + $0x608] sm:$0xff] }
 0x3b6   :  { %14818 = vst [vmem:[#allocation76_spill] sm:$0xff] %v13335_v3  ;;  %5820 = vrot.lane.b32.xlu1 %v13335_v3, %s8801_s19  ;;  %8737 = vrot.lane.b32.xlu0 %v8736_v49, %s8801_s19  ;;  %v14823_v49 = vld [vmem:[#allocation91_spill] sm:$0xff] }
 0x3be   :  { %v8648_v28 = vpop.permute.xlu0 %8647  ;;  %v13343_v9 = vpop.permute.xlu1 %8652 }
 0x3bf   :  { %v8650_v2 = vunpack.i.h.bf16 %v8648_v28  ;;  %v8649_v50 = vunpack.i.l.bf16 %v8648_v28  ;;  %v14172_v45 = vunpack.i.h.bf16 %v13343_v9  ;;  %v8654_v40 = vunpack.i.l.bf16 %v13343_v9 }
 0x3c0   :  { %v14824_v28 = vmax.f32 %v14823_v49, 0.0 }
 0x3c1   :  { %v13348_v46 = vsel %vm495_vm0, %v8644_v54, %v8649_v50  ;;  %v5512_v17 = vsel %vm495_vm0, %v8649_v50, %v8645_v55  ;;  %v5516_v29 = vsel %vm495_vm0, %v8650_v2, %v8654_v40  ;;  %v5517_v53 = vsel %vm495_vm0, %v8654_v40, %v14172_v45 }
 0x3c2   :  { %v13357_v62 = vmax.f32 %v14822_v41, %v5512_v17  ;;  %v13365_v54 = vmax.f32 %v14824_v28, %v5516_v29  ;;  %v14827_v55 = vmax.f32 %v14826_v13, 0.0  ;;  %v6219_v41 = vld [vmem:[#allocation2 + $0x618] sm:$0xff]  ;;  %v14829_v28 = vld [vmem:[#allocation32_spill] sm:$0xff] }
 0x3c3   :  { %v7220_v29 = vpack.c.bf16 %v6219_v41, %v6217_v63  ;;  %v14835_v41 = vld [vmem:[#allocation50_spill] sm:$0xff] }
 0x3c4   :  { %14825 = vst [vmem:[#allocation72_spill] sm:$0xff] %v13365_v54  ;;  %v13369_v50 = vmax.f32 %v14827_v55, %v5517_v53  ;;  %v8741_v20 = vpack.i.bf16 %v13357_v62, %v13353_v43  ;;  %v14830_v55 = vmax.f32 %v14829_v28, 0.0  ;;  %v14836_v8 = vmax.f32 %v14835_v41, 0.0 }
 0x3c5   :  { %7221 = vmatprep.subr.bf16.mxu0 %v7220_v29 }
 0x3c6   :  { %14828 = vst [vmem:[#allocation96_spill] sm:$0xff] %v13369_v50  ;;  %v8746_v17 = vpack.i.bf16 %v13369_v50, %v13365_v54  ;;  %8742 = vrot.lane.b32.xlu0 %v8741_v20, %s8801_s19 }
 0x3c8   :  { %8747 = vrot.lane.b32.xlu1 %v8746_v17, %s8801_s19  ;;  %v14832_v17 = vld [vmem:[#allocation43_spill] sm:$0xff] }
 0x3c9   :  { %v14833_v45 = vmax.f32 %v14832_v17, 0.0 }
 0x3cb   :  { %v5454_v56 = vpop.permute.xlu1 %5453 }
 0x3ce   :  { %v13377_v40 = vpop.permute.xlu0 %8657 }
 0x3cf   :  { %v8659_v16 = vunpack.i.l.bf16 %v13377_v40  ;;  %v13380_v13 = vpop.permute.xlu1 %5441 }
 0x3d0   :  { %v5515_v49 = vsel %vm495_vm0, %v13380_v13, %v8650_v2 }
 0x3d1   :  { %v5520_v53 = vsel %vm495_vm0, %v8659_v16, %v5454_v56  ;;  %v13391_v19 = vmax.f32 %v14833_v45, %v5515_v49  ;;  %v14180_v45 = vunpack.i.h.bf16 %v13377_v40 }
 0x3d2   :  { %v13387_v20 = vmax.f32 %v14830_v55, %v5520_v53  ;;  %v13393_v50 = vpop.permute.xlu0 %5455  ;;  %v14838_v55 = vld [vmem:[#allocation94_spill] sm:$0xff] }
 0x3d3   :  { %14834 = vst [vmem:[#allocation75_spill] sm:$0xff] %v13391_v19  ;;  %v5521_v3 = vsel %vm495_vm0, %v5454_v56, %v13393_v50  ;;  %v5519_v29 = vsel %vm495_vm0, %v14180_v45, %v8659_v16  ;;  %v14839_v17 = vmax.f32 %v14838_v55, 0.0 }
 0x3d4   :  { %14831 = vst [vmem:[#allocation62_spill] sm:$0xff] %v13387_v20  ;;  %v8751_v63 = vpack.i.bf16 %v13391_v19, %v13387_v20  ;;  %v13401_v2 = vmax.f32 %v14836_v8, %v5521_v3  ;;  %v14841_v3 = vld [vmem:[#allocation48_spill] sm:$0xff]  ;;  %v14880_v20 = vld [vmem:[#allocation77_spill] sm:$0xff] }
 0x3d5   :  { %v13413_v8 = vmax.f32 %v14839_v17, %v5519_v29  ;;  %v14842_v41 = vmax.f32 %v14841_v3, 0.0  ;;  %v14844_v17 = vmax.f32 %v13016_v10, 0.0  ;;  %v14881_v19 = vmax.f32 %v14880_v20, 0.0 }
 0x3d6   :  { %14837 = vst [vmem:[#allocation53_spill] sm:$0xff] %v13401_v2  ;;  %5836 = vrot.lane.b32.xlu1 %v13401_v2, %s8801_s19  ;;  %8752 = vrot.lane.b32.xlu0 %v8751_v63, %s8801_s19 }
 0x3d7   :  { %14840 = vst [vmem:[#allocation61_spill] sm:$0xff] %v13413_v8  ;;  %v13532_v54 = vmax.f32 %v14881_v19, %v13145_v12  ;;  %v6098_v12 = vld [vmem:[#allocation2 + $0x250] sm:$0xff] }
 0x3df   :  { %v8663_v53 = vpop.permute.xlu0 %8662 }
 0x3e0   :  { %v8665_v56 = vunpack.i.h.bf16 %v8663_v53  ;;  %v8664_v49 = vunpack.i.l.bf16 %v8663_v53 }
 0x3e2   :  { %v5523_v28 = vsel %vm495_vm0, %v8664_v49, %v8665_v56 }
 0x3e3   :  { %v13417_v2 = vmax.f32 %v14842_v41, %v5523_v28  ;;  %v14846_v41 = vld [vmem:[#allocation92_spill] sm:$0xff] }
 0x3e4   :  { %v5470_v63 = vpop.permute.xlu0 %5469 }
 0x3e5   :  { %14843 = vst [vmem:[#allocation58_spill] sm:$0xff] %v13417_v2  ;;  %v8756_v21 = vpack.i.bf16 %v13417_v2, %v13413_v8 }
 0x3e7   :  { %8757 = vrot.lane.b32.xlu0 %v8756_v21, %s8801_s19  ;;  %v14847_v21 = vmax.f32 %v14846_v41, 0.0 }
 0x3e8   :  { %v13422_v60 = vpop.permute.xlu0 %5457  ;;  %v13424_v16 = vpop.permute.xlu1 %8667 }
 0x3e9   :  { %v8670_v53 = vunpack.i.h.bf16 %v13424_v16  ;;  %v14186_v55 = vunpack.i.l.bf16 %v13424_v16 }
 0x3eb   :  { %v5527_v29 = vsel %vm495_vm0, %v8670_v53, %v5470_v63  ;;  %v5524_v28 = vsel %vm495_vm0, %v8665_v56, %v14186_v55  ;;  %v14850_v56 = vld [vmem:[#allocation54_spill] sm:$0xff] }
 0x3ec   :  { %v13434_v3 = vmax.f32 %v14844_v17, %v5527_v29  ;;  %v13438_v45 = vmax.f32 %v14847_v21, %v5524_v28  ;;  %v13440_v24 = vpop.permute.xlu1 %5471  ;;  %v13442_v7 = vpop.permute.xlu0 %8672  ;;  %v14851_v55 = vmax.f32 %v14850_v56, 0.0  ;;  %v5522_v28 = vsel %vm495_vm0, %v13422_v60, %v8664_v49  ;;  %v14854_v21 = vld [vmem:[#allocation26_spill] sm:$0xff] }
 0x3ed   :  { %14849 = vst [vmem:[#allocation68_spill] sm:$0xff] %v13442_v7  ;;  %v5528_v1 = vsel %vm495_vm0, %v5470_v63, %v13440_v24  ;;  %v14188_v42 = vunpack.i.h.bf16 %v13442_v7  ;;  %v8674_v44 = vunpack.i.l.bf16 %v13442_v7  ;;  %v14855_v49 = vld [vmem:[#allocation10_spill] sm:$0xff] }
 0x3ee   :  { %14845 = vst [vmem:[#allocation85_spill] sm:$0xff] %v13434_v3  ;;  %14848 = vst [vmem:[#allocation64_spill] sm:$0xff] %v13438_v45  ;;  %v13450_v10 = vmax.f32 %v14851_v55, %v5528_v1  ;;  %v8761_v29 = vpack.i.bf16 %v13434_v3, %v13438_v45  ;;  %v14856_v56 = vmax.f32 %v14855_v49, 0.0  ;;  %v6090_v49 = vld [vmem:[#allocation2 + $0x210] sm:$0xff] }
 0x3ef   :  { %v5857_v17 = vsel %vm1007_vm4, %v8674_v44, %v14188_v42  ;;  %v14858_v42 = vmax.f32 %v13012_v26, 0.0  ;;  %v14863_v26 = vld [vmem:[#allocation46_spill] sm:$0xff] }
 0x3f0   :  { %14852 = vst [vmem:[#allocation97_spill] sm:$0xff] %v13450_v10  ;;  %v13459_v41 = vpop.permute.xlu1 %5465  ;;  %8762 = vrot.lane.b32.xlu1 %v8761_v29, %s8801_s19  ;;  %5852 = vrot.lane.b32.xlu0 %v13450_v10, %s8801_s19  ;;  %v13464_v63 = vpop.permute.xlu0 %5740  ;;  %v5969_v1 = vmax.f32 %v13050_v35, %v5857_v17  ;;  %v13472_v45 = vmax.f32 %v14856_v56, %v14854_v21  ;;  %v14860_v29 = vmax.f32 %v13068_v6, 0.0 }
 0x3f1   :  { %14853 = vst [vmem:[#allocation98_spill] sm:$0xff] %v13464_v63  ;;  %v5526_v55 = vsel %vm495_vm0, %v13459_v41, %v8670_v53  ;;  %v13476_v38 = vmax.f32 %v14858_v42, %v5522_v28  ;;  %v6088_v53 = vld [vmem:[#allocation2 + $0x200] sm:$0xff]  ;;  %v14864_v42 = vld [vmem:[#allocation34_spill] sm:$0xff] }
 0x3f2   :  { %14857 = vst [vmem:[#allocation67_spill] sm:$0xff] %v13472_v45  ;;  %v13480_v61 = vmax.f32 %v14860_v29, %v5526_v55  ;;  %6321 = vmatprep.mubr.f32.mxu1 %v5969_v1  ;;  %v14865_v28 = vmax.f32 %v14864_v42, 0.0  ;;  %v6093_v1 = vld [vmem:[#allocation2 + $0x228] sm:$0xff]  ;;  %v6095_v55 = vld [vmem:[#allocation2 + $0x238] sm:$0xff]  ;;  %v7094_v7 = vpack.c.bf16 %v6090_v49, %v6088_v53  ;;  %v14872_v42 = vld [vmem:[#allocation71_spill] sm:$0xff] }
 0x3f3   :  { %14859 = vst [vmem:[#allocation88_spill] sm:$0xff] %v13476_v38  ;;  %v7096_v49 = vpack.c.bf16 %v6095_v55, %v6093_v1 }
 0x3f4   :  { %14861 = vst [vmem:[#allocation59_spill] sm:$0xff] %v13480_v61  ;;  %v8766_v35 = vpack.i.bf16 %v13480_v61, %v13476_v38  ;;  %v8678_v17 = vpop.permute.xlu1 %8677  ;;  %5734 = vrot.lane.b32.xlu0 %v13472_v45, %s8801_s19  ;;  %v13486_v10 = vpop.permute.xlu0 %8687  ;;  %v13491_v6 = vmax.f32 %v14865_v28, %v14863_v26  ;;  %v14867_v61 = vld [vmem:[#allocation38_spill] sm:$0xff]  ;;  %v14868_v38 = vld [vmem:[#allocation15_spill] sm:$0xff]  ;;  %v6218_v26 = vld [vmem:[#allocation2 + $0x610] sm:$0xff] }
 0x3f5   :  { %v8680_v21 = vunpack.i.h.bf16 %v8678_v17  ;;  %v8679_v56 = vunpack.i.l.bf16 %v8678_v17  ;;  %14862 = vst [vmem:[#allocation44_spill] sm:$0xff] %v13486_v10  ;;  %v14869_v17 = vmax.f32 %v14868_v38, 0.0  ;;  %v6092_v38 = vld [vmem:[#allocation2 + $0x220] sm:$0xff]  ;;  %v8690_v55 = vunpack.i.h.bf16 %v13486_v10 }
 0x3f6   :  { %14866 = vst [vmem:[#allocation78_spill] sm:$0xff] %v13491_v6  ;;  %8767 = vrot.lane.b32.xlu1 %v8766_v35, %s8801_s19 }
 0x3f7   :  { %v5856_v29 = vsel %vm1007_vm4, %v8679_v56, %v8674_v44  ;;  %v5861_v45 = vsel %vm1007_vm4, %v8680_v21, %v13464_v63  ;;  %v5656_v2 = vmax.f32 %v14869_v17, %v14867_v61  ;;  %v14871_v61 = vld [vmem:[#allocation93_spill] sm:$0xff]  ;;  %v14875_v56 = vld [vmem:[#allocation52_spill] sm:$0xff] }
 0x3f8   :  { %v5968_v3 = vmax.f32 %v13092_v31, %v5856_v29  ;;  %v13501_v8 = vpop.permute.xlu1 %8682  ;;  %5750 = vrot.lane.b32.xlu0 %v13491_v6, %s8801_s19  ;;  %v5973_v35 = vmax.f32 %v13088_v5, %v5861_v45  ;;  %v13509_v53 = vpop.permute.xlu0 %8692  ;;  %v14873_v31 = vmax.f32 %v14872_v42, 0.0  ;;  %v6094_v5 = vld [vmem:[#allocation2 + $0x230] sm:$0xff]  ;;  %v6216_v45 = vld [vmem:[#allocation2 + $0x600] sm:$0xff] }
 0x3f9   :  { %14870 = vst [vmem:[#allocation9_spill] sm:$0xff] %v13501_v8  ;;  %v8685_v44 = vunpack.i.h.bf16 %v13501_v8  ;;  %v8694_v17 = vunpack.i.l.bf16 %v13509_v53  ;;  %v14876_v6 = vld [vmem:[#allocation31_spill] sm:$0xff]  ;;  %v14878_v42 = vunpack.i.l.bf16 %v13501_v8  ;;  %v6222_v8 = vld [vmem:[#allocation2 + $0x630] sm:$0xff] }
 0x3fa   :  { %v13514_v28 = vmax.f32 %v14873_v31, %v14871_v61  ;;  %5742 = vrot.lane.b32.xlu1 %v5656_v2, %s8801_s19  ;;  %6322 = vmatmul.mubr.f32.vlgmr.msra.gmra.mrb[24].mxu1 %v5968_v3  ;;  %v14877_v63 = vmax.f32 %v14876_v6, 0.0  ;;  %v14879_v31 = vunpack.i.l.bf16 %v13486_v10  ;;  %v6097_v2 = vld [vmem:[#allocation2 + $0x248] sm:$0xff]  ;;  %v6099_v3 = vld [vmem:[#allocation2 + $0x258] sm:$0xff]  ;;  %v6220_v10 = vld [vmem:[#allocation2 + $0x620] sm:$0xff] }
 0x3fb   :  { %v5860_v61 = vsel %vm1007_vm4, %v14878_v42, %v8680_v21  ;;  %6547 = vmatprep.mubr.f32.mxu0 %v5973_v35  ;;  %7095 = vmatpush1.bf16.msra.mxu1 %v7094_v7  ;;  %v5863_v35 = vsel %vm1007_vm4, %v8694_v17, %v8685_v44  ;;  %v6221_v7 = vld [vmem:[#allocation2 + $0x628] sm:$0xff]  ;;  %v6223_v42 = vld [vmem:[#allocation2 + $0x638] sm:$0xff] }
 0x3fc   :  { %14874 = vst [vmem:[#allocation99_spill] sm:$0xff] %v13514_v28  ;;  %v5657_v1 = vmax.f32 %v14877_v63, %v14875_v56  ;;  %v5864_v29 = vsel %vm1007_vm4, %v8685_v44, %v14879_v31  ;;  %v5972_v63 = vmax.f32 %v13136_v34, %v5860_v61  ;;  %v13535_v6 = vpop.permute.xlu1 %5756  ;;  %5766 = vrot.lane.b32.xlu0 %v13514_v28, %s8801_s19  ;;  %v6096_v56 = vld [vmem:[#allocation2 + $0x240] sm:$0xff]  ;;  %v8703_v20 = vpop.permute.xlu0 %8702 }
 0x3fd   :  { %v5976_v21 = vmax.f32 %v13128_v47, %v5864_v29  ;;  %v5868_v31 = vsel %vm1007_vm4, %v8690_v55, %v13535_v6  ;;  %v5975_v19 = vmax.f32 %v13156_v58, %v5863_v35  ;;  %7097 = vmatprep.subr.bf16.mxu1 %v7096_v49  ;;  %v7098_v34 = vpack.c.bf16 %v6094_v5, %v6092_v38  ;;  %v14883_v58 = vld [vmem:[#allocation60_spill] sm:$0xff]  ;;  %v14884_v49 = vld [vmem:[#allocation18_spill] sm:$0xff] }
 0x3fe   :  { %v7222_v61 = vpack.c.bf16 %v6218_v26, %v6216_v45  ;;  %v5980_v28 = vmax.f32 %v13106_v30, %v5868_v31  ;;  %5758 = vrot.lane.b32.xlu1 %v5657_v1, %s8801_s19  ;;  %v14882_v47 = vunpack.i.h.bf16 %v13509_v53  ;;  %v7100_v29 = vpack.c.bf16 %v6099_v3, %v6097_v2  ;;  %6548 = vmatmul.mubr.f32.vlgmr.msra.gmra.mrb[40].mxu0 %v5972_v63  ;;  %v6101_v45 = vld [vmem:[#allocation2 + $0x268] sm:$0xff]  ;;  %v6103_v1 = vld [vmem:[#allocation2 + $0x278] sm:$0xff] }
 0x3ff   :  { %6327 = vmatprep.mubr.f32.mxu1 %v5976_v21  ;;  %v7224_v17 = vpack.c.bf16 %v6223_v42, %v6221_v7  ;;  %v14885_v38 = vmax.f32 %v14884_v49, 0.0  ;;  %v7102_v30 = vpack.c.bf16 %v6098_v12, %v6096_v56  ;;  %v7226_v21 = vpack.c.bf16 %v6222_v8, %v6220_v10  ;;  %7099 = vmatpush1.bf16.msra.mxu1 %v7098_v34  ;;  %v14886_v7 = vld [vmem:[#allocation5_spill] sm:$0xff]  ;;  %v6100_v8 = vld [vmem:[#allocation2 + $0x260] sm:$0xff]  ;;  %v6105_v12 = vld [vmem:[#allocation2 + $0x288] sm:$0xff] }
 0x400   :  { %v5867_v44 = vsel %vm1007_vm4, %v14882_v47, %v8690_v55  ;;  %6328 = vmatmul.mubr.f32.gmra.mrb[26].mxu1 %v5975_v19  ;;  %v13552_v26 = vpop.permute.xlu1 %8697  ;;  %5782 = vrot.lane.b32.xlu0 %v13532_v54, %s8801_s19  ;;  %v8705_v35 = vunpack.i.h.bf16 %v8703_v20  ;;  %v13558_v3 = vpop.permute.xlu0 %8707  ;;  %v14887_v42 = vmax.f32 %v14886_v7, 0.0  ;;  %v6102_v10 = vld [vmem:[#allocation2 + $0x270] sm:$0xff]  ;;  %v7104_v34 = vpack.c.bf16 %v6103_v1, %v6101_v45  ;;  %v14890_v1 = vld [vmem:[#allocation90_spill] sm:$0xff] }
 0x401   :  { %v5658_v5 = vmax.f32 %v14885_v38, %v14883_v58  ;;  %6553 = vmatprep.mubr.f32.mxu0 %v5980_v28  ;;  %v8700_v55 = vunpack.i.h.bf16 %v13552_v26  ;;  %v8699_v2 = vunpack.i.l.bf16 %v13552_v26  ;;  %v5979_v63 = vmax.f32 %v13142_v4, %v5867_v44  ;;  %7223 = vmatpush1.bf16.msra.mxu0 %v7222_v61  ;;  %v6107_v61 = vld [vmem:[#allocation2 + $0x298] sm:$0xff]  ;;  %v6106_v45 = vld [vmem:[#allocation2 + $0x290] sm:$0xff] }
 0x402   :  { %v13564_v31 = vmax.f32 %v14887_v42, %v13254_v11  ;;  %v8704_v28 = vunpack.i.l.bf16 %v8703_v20  ;;  %v8709_v56 = vunpack.i.l.bf16 %v13558_v3  ;;  %7101 = vmatprep.subr.bf16.mxu1 %v7100_v29  ;;  %7225 = vmatprep.subr.bf16.mxu0 %v7224_v17  ;;  %v14888_v11 = vld [vmem:[#allocation24_spill] sm:$0xff]  ;;  %v14893_v7 = vunpack.i.h.bf16 %v13343_v9 }
 0x403   :  { %5774 = vrot.lane.b32.xlu1 %v5658_v5, %s8801_s19  ;;  %6554 = vmatmul.mubr.f32.gmra.mrb[42].mxu0 %v5979_v63  ;;  %v5871_v4 = vsel %vm1007_vm4, %v8699_v2, %v8700_v55  ;;  %v5870_v19 = vsel %vm1007_vm4, %v8705_v35, %v8699_v2  ;;  %v14889_v20 = vmax.f32 %v14888_v11, 0.0  ;;  %v6104_v5 = vld [vmem:[#allocation2 + $0x280] sm:$0xff]  ;;  %v14891_v35 = vmax.f32 %v14890_v1, 0.0  ;;  %v14894_v42 = vld [vmem:[#allocation20_spill] sm:$0xff] }
 0x404   :  { %v13575_v44 = vpop.permute.xlu1 %5772  ;;  %5798 = vrot.lane.b32.xlu0 %v13564_v31, %s8801_s19  ;;  %v5983_v29 = vmax.f32 %v13187_v59, %v5871_v4  ;;  %v5982_v58 = vmax.f32 %v13174_v14, %v5870_v19  ;;  %v5874_v49 = vsel %vm1007_vm4, %v8709_v56, %v8704_v28  ;;  %v13586_v38 = vpop.permute.xlu0 %5788  ;;  %7103 = vmatpush1.bf16.msra.mxu1 %v7102_v30  ;;  %v14892_v63 = vunpack.i.h.bf16 %v13377_v40  ;;  %v6109_v40 = vld [vmem:[#allocation2 + $0x2a8] sm:$0xff] }
 0x405   :  { %v5659_v47 = vmax.f32 %v14889_v20, %v13262_v15  ;;  %v5875_v17 = vsel %vm1007_vm4, %v8704_v28, %v13575_v44  ;;  %v7106_v15 = vpack.c.bf16 %v6102_v10, %v6100_v8  ;;  %7227 = vmatpush1.bf16.msra.mxu0 %v7226_v21  ;;  %v13591_v59 = vmax.f32 %v14891_v35, %v13348_v46  ;;  %v6111_v10 = vld [vmem:[#allocation2 + $0x2b8] sm:$0xff]  ;;  %v6225_v9 = vld [vmem:[#allocation2 + $0x648] sm:$0x7f] }
 0x406   :  { %v5987_v14 = vmax.f32 %v13170_v48, %v5875_v17  ;;  %6333 = vmatprep.mubr.f32.mxu1 %v5983_v29  ;;  %v7108_v2 = vpack.c.bf16 %v6107_v61, %v6105_v12  ;;  %v5518_v30 = vsel %vm495_vm0, %v14893_v7, %v14892_v63  ;;  %v5986_v21 = vmax.f32 %v13208_v22, %v5874_v49  ;;  %v6224_v12 = vld [vmem:[#allocation2 + $0x640] sm:$0x7f]  ;;  %v14896_v61 = vld [vmem:[#allocation49_spill] sm:$0xff] }
 0x407   :  { %5790 = vrot.lane.b32.xlu1 %v5659_v47, %s8801_s19  ;;  %6334 = vmatmul.mubr.f32.gmra.mrb[28].mxu1 %v5982_v58  ;;  %v14895_v46 = vmax.f32 %v14894_v42, 0.0  ;;  %v7110_v48 = vpack.c.bf16 %v6106_v45, %v6104_v5  ;;  %v5646_v4 = vsel %vm495_vm0, %v13329_v51, %v13380_v13  ;;  %v8710_v22 = vunpack.i.h.bf16 %v13558_v3  ;;  %v6108_v51 = vld [vmem:[#allocation2 + $0x2a0] sm:$0xff]  ;;  %v6110_v13 = vld [vmem:[#allocation2 + $0x2b0] sm:$0xff]  ;;  %v6115_v42 = vld [vmem:[#allocation2 + $0x2d8] sm:$0xff] }
 0x408   :  { %7105 = vmatprep.subr.bf16.mxu1 %v7104_v34  ;;  %v13604_v8 = vpop.permute.xlu1 %8712  ;;  %5814 = vrot.lane.b32.xlu0 %v13591_v59, %s8801_s19  ;;  %v13614_v34 = vpop.permute.xlu0 %8722  ;;  %v14897_v11 = vmax.f32 %v14896_v61, 0.0  ;;  %v14898_v58 = vunpack.i.l.bf16 %v13424_v16  ;;  %v7112_v5 = vpack.c.bf16 %v6111_v10, %v6109_v40  ;;  %v14899_v45 = vld [vmem:[#allocation17_spill] sm:$0xff] }
 0x409   :  { %v5660_v28 = vmax.f32 %v14895_v46, %v13319_v27  ;;  %6559 = vmatprep.mubr.f32.mxu0 %v5987_v14  ;;  %v8715_v19 = vunpack.i.h.bf16 %v13604_v8  ;;  %v8714_v27 = vunpack.i.l.bf16 %v13604_v8  ;;  %7107 = vmatpush1.bf16.msra.mxu1 %v7106_v15  ;;  %v8725_v47 = vunpack.i.h.bf16 %v13614_v34  ;;  %v14901_v46 = vld [vmem:[#allocation42_spill] sm:$0xff]  ;;  %v14903_v10 = vld [vmem:[#allocation37_spill] sm:$0xff] }
 0x40a   :  { %6560 = vmatmul.mubr.f32.gmra.mrb[44].mxu0 %v5986_v21  ;;  %v13618_v20 = vmax.f32 %v14897_v11, %v5518_v30  ;;  %v8724_v29 = vunpack.i.l.bf16 %v13614_v34  ;;  %7109 = vmatprep.subr.bf16.mxu1 %v7108_v2  ;;  %v5525_v49 = vsel %vm495_vm0, %v14898_v58, %v13459_v41  ;;  %v14900_v1 = vmax.f32 %v14899_v45, 0.0  ;;  %v6113_v21 = vld [vmem:[#allocation2 + $0x2c8] sm:$0xff]  ;;  %v6119_v58 = vld [vmem:[#allocation2 + $0x2f8] sm:$0xff]  ;;  %v6118_v45 = vld [vmem:[#allocation2 + $0x2f0] sm:$0xff] }
 0x40b   :  { %5806 = vrot.lane.b32.xlu1 %v5660_v28, %s8801_s19  ;;  %v5878_v17 = vsel %vm1007_vm4, %v8710_v22, %v8714_v27  ;;  %v5882_v15 = vsel %vm1007_vm4, %v8715_v19, %v13586_v38  ;;  %6826 = vmatprep.subr.msk.mxu0 %vm2741_vm14, %v6225_v9  ;;  %v5647_v2 = vsel %vm495_vm0, %v13393_v50, %v13422_v60  ;;  %v14902_v28 = vmax.f32 %v14901_v46, 0.0  ;;  %v6114_v60 = vld [vmem:[#allocation2 + $0x2d0] sm:$0xff]  ;;  %v6125_v46 = vld [vmem:[#allocation2 + $0x328] sm:$0xff] }
 0x40c   :  { %v5661_v35 = vmax.f32 %v14900_v1, %v5646_v4  ;;  %v13635_v14 = vpop.permute.xlu1 %8717  ;;  %5830 = vrot.lane.b32.xlu0 %v13618_v20, %s8801_s19  ;;  %v5990_v16 = vmax.f32 %v13200_v39, %v5878_v17  ;;  %v5994_v41 = vmax.f32 %v13234_v18, %v5882_v15  ;;  %6827 = vmatpush1.msk.msra.mxu0 %vm2741_vm14, %v6224_v12  ;;  %v6112_v18 = vld [vmem:[#allocation2 + $0x2c0] sm:$0xff]  ;;  %v14904_v9 = vmax.f32 %v14903_v10, 0.0  ;;  %v13666_v15 = vpop.permute.xlu0 %5804 }
 0x40d   :  { %v8720_v63 = vunpack.i.h.bf16 %v13635_v14  ;;  %v8719_v7 = vunpack.i.l.bf16 %v13635_v14  ;;  %7111 = vmatpush1.bf16.msra.mxu1 %v7110_v48  ;;  %v7114_v30 = vpack.c.bf16 %v6110_v13, %v6108_v51  ;;  %v13649_v40 = vmax.f32 %v14902_v28, %v5525_v49  ;;  %v6117_v13 = vld [vmem:[#allocation2 + $0x2e8] sm:$0xff]  ;;  %v6127_v28 = vld [vmem:[#allocation2 + $0x338] sm:$0xff] }
 0x40e   :  { %6339 = vmatprep.mubr.f32.mxu1 %v5990_v16  ;;  %v5885_v39 = vsel %vm1007_vm4, %v8724_v29, %v8725_v47  ;;  %6565 = vmatprep.mubr.f32.mxu0 %v5994_v41  ;;  %v5662_v4 = vmax.f32 %v14904_v9, %v5647_v2  ;;  %v7116_v51 = vpack.c.bf16 %v6115_v42, %v6113_v21  ;;  %v6123_v16 = vld [vmem:[#allocation2 + $0x318] sm:$0xff]  ;;  %v6120_v21 = vld [vmem:[#allocation2 + $0x300] sm:$0xff]  ;;  %v6122_v42 = vld [vmem:[#allocation2 + $0x310] sm:$0xff]  ;;  %vm6226_vm0 = vcmask 318464  }
 0x40f   :  { %5822 = vrot.lane.b32.xlu1 %v5661_v35, %s8801_s19  ;;  %v5877_v50 = vsel %vm1007_vm4, %v8719_v7, %v8710_v22  ;;  %v5881_v48 = vsel %vm1007_vm4, %v8720_v63, %v8715_v19  ;;  %7113 = vmatprep.subr.bf16.mxu1 %v7112_v5  ;;  %v5997_v17 = vmax.f32 %v13251_v36, %v5885_v39  ;;  %v6116_v5 = vld [vmem:[#allocation2 + $0x2e0] sm:$0xff]  ;;  %v6121_v35 = vld [vmem:[#allocation2 + $0x308] sm:$0xff]  ;;  %v14905_v36 = vmax.f32 %v13040_v25, 0.0  ;;  %v6126_v39 = vld [vmem:[#allocation2 + $0x330] sm:$0xff] }
 0x410   :  { %v8728_v12 = vpop.permute.xlu1 %8727  ;;  %5846 = vrot.lane.b32.xlu0 %v13649_v40, %s8801_s19  ;;  %v5989_v61 = vmax.f32 %v13278_v37, %v5877_v50  ;;  %v5993_v11 = vmax.f32 %v13268_v0, %v5881_v48  ;;  %v7118_v19 = vpack.c.bf16 %v6114_v60, %v6112_v18  ;;  %v7120_v1 = vpack.c.bf16 %v6119_v58, %v6117_v13  ;;  %v6129_v60 = vld [vmem:[#allocation2 + $0x348] sm:$0xff]  ;;  %v6131_v50 = vld [vmem:[#allocation2 + $0x358] sm:$0xff] }
 0x411   :  { %v8730_v22 = vunpack.i.h.bf16 %v8728_v12  ;;  %v8729_v49 = vunpack.i.l.bf16 %v8728_v12  ;;  %7115 = vmatpush1.bf16.msra.mxu1 %v7114_v30  ;;  %v5663_v41 = vmax.f32 %v14905_v36, %v13440_v24  ;;  %v7122_v30 = vpack.c.bf16 %v6118_v45, %v6116_v5  ;;  %v6128_v12 = vld [vmem:[#allocation2 + $0x340] sm:$0xff]  ;;  %v6139_v5 = vld [vmem:[#allocation2 + $0x398] sm:$0xff] }
 0x412   :  { %6340 = vmatmul.mubr.f32.gmra.mrb[30].mxu1 %v5989_v61  ;;  %6566 = vmatmul.mubr.f32.gmra.mrb[46].mxu0 %v5993_v11  ;;  %v7126_v25 = vpack.c.bf16 %v6122_v42, %v6120_v21  ;;  %v6130_v61 = vld [vmem:[#allocation2 + $0x350] sm:$0xff]  ;;  %v6133_v11 = vld [vmem:[#allocation2 + $0x368] sm:$0xff]  ;;  %v6147_v42 = vld [vmem:[#allocation2 + $0x3d8] sm:$0xff] }
 0x413   :  { %5838 = vrot.lane.b32.xlu1 %v5662_v4, %s8801_s19  ;;  %6345 = vmatprep.mubr.f32.mxu1 %v5997_v17  ;;  %v5884_v0 = vsel %vm1007_vm4, %v8730_v22, %v8724_v29  ;;  %v5889_v37 = vsel %vm1007_vm4, %v8729_v49, %v13666_v15  ;;  %v7124_v29 = vpack.c.bf16 %v6123_v16, %v6121_v35  ;;  %v6132_v22 = vld [vmem:[#allocation2 + $0x360] sm:$0xff]  ;;  %v6134_v17 = vld [vmem:[#allocation2 + $0x370] sm:$0xff]  ;;  %v6145_v21 = vld [vmem:[#allocation2 + $0x3c8] sm:$0xff] }
 0x414   :  { %v5996_v2 = vmax.f32 %v13285_v57, %v5884_v0  ;;  %v6001_v7 = vmax.f32 %v13289_v23, %v5889_v37  ;;  %7117 = vmatprep.subr.bf16.mxu1 %v7116_v51  ;;  %v7128_v57 = vpack.c.bf16 %v6127_v28, %v6125_v46  ;;  %v6124_v23 = vld [vmem:[#allocation2 + $0x320] sm:$0xff]  ;;  %v7132_v4 = vpack.c.bf16 %v6131_v50, %v6129_v60  ;;  %v6135_v51 = vld [vmem:[#allocation2 + $0x378] sm:$0xff]  ;;  %v6138_v0 = vld [vmem:[#allocation2 + $0x390] sm:$0xff] }
 0x415   :  { %7119 = vmatpush1.bf16.msra.mxu1 %v7118_v19  ;;  %v7130_v10 = vpack.c.bf16 %v6126_v39, %v6124_v23  ;;  %v7134_v13 = vpack.c.bf16 %v6130_v61, %v6128_v12  ;;  %v7136_v58 = vpack.c.bf16 %v6135_v51, %v6133_v11  ;;  %v6137_v19 = vld [vmem:[#allocation2 + $0x388] sm:$0xff]  ;;  %v7148_v60 = vpack.c.bf16 %v6147_v42, %v6145_v21  ;;  %v6144_v50 = vld [vmem:[#allocation2 + $0x3c0] sm:$0xff]  ;;  %v6150_v11 = vld [vmem:[#allocation2 + $0x3f0] sm:$0xff] }
 0x416   :  { %6346 = vmatmul.mubr.f32.gmra.mrb[32].mxu1 %v5996_v2  ;;  %6571 = vmatprep.mubr.f32.mxu0 %v6001_v7  ;;  %v7140_v45 = vpack.c.bf16 %v6139_v5, %v6137_v19  ;;  %v6141_v37 = vld [vmem:[#allocation2 + $0x3a8] sm:$0xff]  ;;  %v6142_v2 = vld [vmem:[#allocation2 + $0x3b0] sm:$0xff]  ;;  %v6148_v61 = vld [vmem:[#allocation2 + $0x3e0] sm:$0xff] }
 0x417   :  { %5854 = vrot.lane.b32.xlu1 %v5663_v41, %s8801_s19  ;;  %7121 = vmatprep.subr.bf16.mxu1 %v7120_v1  ;;  %v6143_v1 = vld [vmem:[#allocation2 + $0x3b8] sm:$0xff]  ;;  %v6140_v41 = vld [vmem:[#allocation2 + $0x3a0] sm:$0xff]  ;;  %v7154_v51 = vpack.c.bf16 %v6150_v11, %v6148_v61 }
 0x418   :  { %v13678_v24 = vpop.permute.xlu1 %8732  ;;  %v7144_v36 = vpack.c.bf16 %v6143_v1, %v6141_v37 }
 0x419   :  { %7123 = vmatpush1.bf16.msra.mxu1 %v7122_v30  ;;  %v8734_v18 = vunpack.i.l.bf16 %v13678_v24  ;;  %v8735_v7 = vunpack.i.h.bf16 %v13678_v24 }
 0x41a   :  { %7125 = vmatprep.subr.bf16.mxu1 %v7124_v29 }
 0x41b   :  { %v5888_v48 = vsel %vm1007_vm4, %v8734_v18, %v8729_v49  ;;  %v7138_v49 = vpack.c.bf16 %v6134_v17, %v6132_v22 }
 0x41c   :  { %v6000_v9 = vmax.f32 %v13307_v33, %v5888_v48  ;;  %v6136_v33 = vld [vmem:[#allocation2 + $0x380] sm:$0xff]  ;;  %v6146_v48 = vld [vmem:[#allocation2 + $0x3d0] sm:$0xff] }
 0x41d   :  { %7127 = vmatpush1.bf16.msra.mxu1 %v7126_v25  ;;  %v7142_v35 = vpack.c.bf16 %v6138_v0, %v6136_v33  ;;  %v14906_v0 = vld [vmem:[#allocation72_spill] sm:$0xff] }
 0x41e   :  { %7129 = vmatprep.subr.bf16.mxu1 %v7128_v57  ;;  %6572 = vmatmul.mubr.f32.gmra.mrb[48].mxu0 %v6000_v9  ;;  %v7146_v57 = vpack.c.bf16 %v6142_v2, %v6140_v41  ;;  %v6151_v9 = vld [vmem:[#allocation2 + $0x3f8] sm:$0xff] }
 0x421   :  { %7131 = vmatpush1.bf16.msra.mxu1 %v7130_v10  ;;  %v6149_v10 = vld [vmem:[#allocation2 + $0x3e8] sm:$0xff] }
 0x422   :  { %7133 = vmatprep.subr.bf16.mxu1 %v7132_v4  ;;  %v7150_v4 = vpack.c.bf16 %v6146_v48, %v6144_v50  ;;  %v7152_v12 = vpack.c.bf16 %v6151_v9, %v6149_v10 }
 0x425   :  { %7135 = vmatpush1.bf16.msra.mxu1 %v7134_v13 }
 0x426   :  { %7137 = vmatprep.subr.bf16.mxu1 %v7136_v58 }
 0x428   :  { %v13685_v16 = vpop.permute.xlu0 %8737  ;;  %v13690_v46 = vpop.permute.xlu1 %5820 }
 0x429   :  { %7139 = vmatpush1.bf16.msra.mxu1 %v7138_v49  ;;  %v8740_v30 = vunpack.i.h.bf16 %v13685_v16  ;;  %v8739_v29 = vunpack.i.l.bf16 %v13685_v16 }
 0x42a   :  { %7141 = vmatprep.subr.bf16.mxu1 %v7140_v45 }
 0x42b   :  { %v5892_v28 = vsel %vm1007_vm4, %v8735_v7, %v8739_v29  ;;  %v5896_v25 = vsel %vm1007_vm4, %v8740_v30, %v13690_v46 }
 0x42c   :  { %v6004_v23 = vmax.f32 %v13311_v52, %v5892_v28  ;;  %v6008_v39 = vmax.f32 %v13327_v32, %v5896_v25 }
 0x42d   :  { %7143 = vmatpush1.bf16.msra.mxu1 %v7142_v35 }
 0x42e   :  { %7145 = vmatprep.subr.bf16.mxu1 %v7144_v36  ;;  %6351 = vmatprep.mubr.f32.mxu1 %v6004_v23 }
 0x42f   :  { %6577 = vmatprep.mubr.f32.mxu0 %v6008_v39 }
 0x431   :  { %7147 = vmatpush1.bf16.msra.mxu1 %v7146_v57  ;;  %v14909_v57 = vld [vmem:[#allocation61_spill] sm:$0xff] }
 0x432   :  { %7149 = vmatprep.subr.bf16.mxu1 %v7148_v60 }
 0x435   :  { %7151 = vmatpush1.bf16.msra.mxu1 %v7150_v4 }
 0x436   :  { %7153 = vmatprep.subr.bf16.mxu1 %v7152_v12  ;;  %v14910_v12 = vld [vmem:[#allocation85_spill] sm:$0xff] }
 0x438   :  { %v13699_v52 = vpop.permute.xlu0 %8742 }
 0x439   :  { %7155 = vmatpush1.bf16.msra.mxu1 %v7154_v51  ;;  %v8745_v13 = vunpack.i.h.bf16 %v13699_v52  ;;  %v8744_v58 = vunpack.i.l.bf16 %v13699_v52  ;;  %v14911_v51 = vld [vmem:[#allocation58_spill] sm:$0xff] }
 0x43a   :  { %v13701_v32 = vpop.permute.xlu1 %8747 }
 0x43b   :  { %v8750_v22 = vunpack.i.h.bf16 %v13701_v32  ;;  %v8749_v17 = vunpack.i.l.bf16 %v13701_v32  ;;  %v5891_v19 = vsel %vm1007_vm4, %v8744_v58, %v8735_v7  ;;  %v5895_v5 = vsel %vm1007_vm4, %v8745_v13, %v8740_v30  ;;  %v14908_v30 = vld [vmem:[#allocation62_spill] sm:$0xff]  ;;  %v14939_v32 = vld [vmem:[#allocation53_spill] sm:$0xff] }
 0x43c   :  { %v6003_v49 = vmax.f32 %v13353_v43, %v5891_v19  ;;  %v6007_v45 = vmax.f32 %v13357_v62, %v5895_v5  ;;  %v14907_v62 = vld [vmem:[#allocation75_spill] sm:$0xff] }
 0x43d   :  { %v5899_v33 = vsel %vm1007_vm4, %v8749_v17, %v8750_v22 }
 0x43e   :  { %v6011_v37 = vmax.f32 %v14906_v0, %v5899_v33  ;;  %6352 = vmatmul.mubr.f32.gmra.mrb[34].mxu1 %v6003_v49  ;;  %6578 = vmatmul.mubr.f32.gmra.mrb[50].mxu0 %v6007_v45  ;;  %v14912_v49 = vld [vmem:[#allocation9_spill] sm:$0xff] }
 0x43f   :  { %v14913_v45 = vunpack.i.l.bf16 %v14912_v49  ;;  %v14924_v49 = vld [vmem:[#allocation44_spill] sm:$0xff] }
 0x440   :  { %6357 = vmatprep.mubr.f32.mxu1 %v6011_v37 }
 0x448   :  { %v8753_v1 = vpop.permute.xlu0 %8752  ;;  %v13717_v41 = vpop.permute.xlu1 %5836 }
 0x449   :  { %v8755_v35 = vunpack.i.h.bf16 %v8753_v1  ;;  %v8754_v36 = vunpack.i.l.bf16 %v8753_v1 }
 0x44b   :  { %v5898_v2 = vsel %vm1007_vm4, %v8755_v35, %v8749_v17  ;;  %v5903_v43 = vsel %vm1007_vm4, %v8754_v36, %v13717_v41 }
 0x44c   :  { %v6010_v7 = vmax.f32 %v14907_v62, %v5898_v2  ;;  %v6015_v21 = vmax.f32 %v14908_v30, %v5903_v43  ;;  %v14915_v43 = vld [vmem:[#allocation59_spill] sm:$0xff] }
 0x44e   :  { %6358 = vmatmul.mubr.f32.gmra.mrb[36].mxu1 %v6010_v7  ;;  %6583 = vmatprep.mubr.f32.mxu0 %v6015_v21  ;;  %v14916_v7 = vld [vmem:[#allocation68_spill] sm:$0xff] }
 0x44f   :  { %v14917_v30 = vunpack.i.h.bf16 %v14916_v7 }
 0x459   :  { %v13724_v42 = vpop.permute.xlu0 %8757 }
 0x45a   :  { %v8759_v28 = vunpack.i.l.bf16 %v13724_v42  ;;  %v8760_v50 = vunpack.i.h.bf16 %v13724_v42 }
 0x45c   :  { %v5902_v25 = vsel %vm1007_vm4, %v8759_v28, %v8754_v36  ;;  %v14914_v36 = vld [vmem:[#allocation88_spill] sm:$0xff] }
 0x45d   :  { %v6014_v23 = vmax.f32 %v14909_v57, %v5902_v25  ;;  %v14918_v25 = vld [vmem:[#allocation67_spill] sm:$0xff] }
 0x45f   :  { %6584 = vmatmul.mubr.f32.gmra.mrb[52].mxu0 %v6014_v23  ;;  %v14919_v23 = vld [vmem:[#allocation98_spill] sm:$0xff] }
 0x462   :  { %v13731_v39 = vpop.permute.xlu1 %8762  ;;  %v13733_v60 = vpop.permute.xlu0 %5852 }
 0x463   :  { %v8765_v48 = vunpack.i.h.bf16 %v13731_v39  ;;  %v8764_v10 = vunpack.i.l.bf16 %v13731_v39 }
 0x465   :  { %v5910_v9 = vsel %vm1007_vm4, %v8765_v48, %v13733_v60  ;;  %v5906_v4 = vsel %vm1007_vm4, %v8760_v50, %v8764_v10 }
 0x466   :  { %v6022_v61 = vmax.f32 %v14910_v12, %v5910_v9  ;;  %v5735_v11 = vpop.permute.xlu0 %5734  ;;  %v6018_v58 = vmax.f32 %v14911_v51, %v5906_v4 }
 0x467   :  { %v5859_v33 = vsel %vm1007_vm4, %v5735_v11, %v14913_v45  ;;  %v5858_v21 = vsel %vm1007_vm4, %v14917_v30, %v5735_v11  ;;  %v14925_v45 = vunpack.i.l.bf16 %v14924_v49  ;;  %v14929_v30 = vld [vmem:[#allocation99_spill] sm:$0xff] }
 0x468   :  { %v13745_v17 = vpop.permute.xlu1 %8767  ;;  %6363 = vmatprep.mubr.f32.mxu1 %v6018_v58  ;;  %6589 = vmatprep.mubr.f32.mxu0 %v6022_v61  ;;  %v5971_v57 = vmax.f32 %v14918_v25, %v5859_v33  ;;  %v14922_v61 = vld [vmem:[#allocation45_spill] sm:$0xff]  ;;  %v14923_v58 = vld [vmem:[#allocation51_spill] sm:$0xff] }
 0x469   :  { %v8770_v19 = vunpack.i.h.bf16 %v13745_v17  ;;  %v8769_v5 = vunpack.i.l.bf16 %v13745_v17  ;;  %v5970_v51 = vmax.f32 %v14922_v61, %v5858_v21  ;;  %v14933_v61 = vld [vmem:[#allocation73_spill] sm:$0xff] }
 0x46a   :  { %v5751_v0 = vpop.permute.xlu0 %5750 }
 0x46b   :  { %v5905_v37 = vsel %vm1007_vm4, %v8769_v5, %v8760_v50  ;;  %v5909_v1 = vsel %vm1007_vm4, %v8770_v19, %v8765_v48  ;;  %v14920_v50 = vunpack.i.h.bf16 %v13509_v53  ;;  %v14921_v48 = vmov 0.0  }
 0x46c   :  { %v5743_v35 = vpop.permute.xlu1 %5742  ;;  %v6017_v2 = vmax.f32 %v14914_v36, %v5905_v37  ;;  %v6021_v62 = vmax.f32 %v14915_v43, %v5909_v1  ;;  %v5865_v33 = vsel %vm1007_vm4, %v14925_v45, %v5751_v0  ;;  %v14926_v37 = vld [vmem:[#allocation78_spill] sm:$0xff] }
 0x46d   :  { %v5862_v9 = vsel %vm1007_vm4, %v14919_v23, %v5743_v35  ;;  %v5866_v4 = vsel %vm1007_vm4, %v5751_v0, %v14920_v50  ;;  %v14931_v23 = vld [vmem:[#allocation55_spill] sm:$0xff] }
 0x46e   :  { %v5767_v12 = vpop.permute.xlu0 %5766  ;;  %6364 = vmatmul.mubr.f32.gmra.mrb[38].mxu1 %v6017_v2  ;;  %6590 = vmatmul.mubr.f32.gmra.mrb[54].mxu0 %v6021_v62  ;;  %v5974_v11 = vmax.f32 %v14923_v58, %v5862_v9  ;;  %v5978_v53 = vmax.f32 %v14926_v37, %v5866_v4  ;;  %v14927_v2 = vld [vmem:[#allocation66_spill] sm:$0xff]  ;;  %v14928_v62 = vld [vmem:[#allocation57_spill] sm:$0xff]  ;;  %v14937_v37 = vld [vmem:[#allocation76_spill] sm:$0xff] }
 0x46f   :  { %6434 = vmatprep.mubr.f32.mxu1 %v5971_v57  ;;  %6660 = vmatprep.mubr.f32.mxu0 %v14921_v48  ;;  %v5873_v35 = vsel %vm1007_vm4, %v5767_v12, %v8709_v56  ;;  %v5977_v43 = vmax.f32 %v14927_v2, %v5865_v33  ;;  %v14930_v57 = vld [vmem:[#allocation47_spill] sm:$0xff] }
 0x470   :  { %v5759_v5 = vpop.permute.xlu1 %5758  ;;  %v5985_v3 = vmax.f32 %v14929_v30, %v5873_v35  ;;  %v14936_v33 = vld [vmem:[#allocation95_spill] sm:$0xff] }
 0x471   :  { %v5869_v1 = vsel %vm1007_vm4, %v13535_v6, %v5759_v5  ;;  %v5872_v6 = vsel %vm1007_vm4, %v8700_v55, %v5767_v12  ;;  %v14932_v12 = vld [vmem:[#allocation56_spill] sm:$0xff] }
 0x472   :  { %v5783_v36 = vpop.permute.xlu0 %5782  ;;  %6435 = vmatmul.mubr.f32.vlgmr.msra.gmra.mrb[24].mxu1 %v5970_v51  ;;  %6828 = vmatmul.mubr.msk.f32.vlgmr.msra.gmra.mrb[40].mxu0 %vm6226_vm0, %v5974_v11  ;;  %v5981_v0 = vmax.f32 %v14928_v62, %v5869_v1  ;;  %v5984_v26 = vmax.f32 %v14930_v57, %v5872_v6  ;;  %v14934_v11 = vld [vmem:[#allocation63_spill] sm:$0xff]  ;;  %v14935_v5 = vld [vmem:[#allocation84_spill] sm:$0xff] }
 0x473   :  { %6440 = vmatprep.mubr.f32.mxu1 %v5978_v53  ;;  %6666 = vmatprep.mubr.f32.mxu0 %v14921_v48  ;;  %v5880_v21 = vsel %vm1007_vm4, %v5783_v36, %v8720_v63  ;;  %v14938_v1 = vld [vmem:[#allocation96_spill] sm:$0xff] }
 0x474   :  { %v5992_v14 = vmax.f32 %v13532_v54, %v5880_v21 }
 0x475   :  { %v5775_v7 = vpop.permute.xlu1 %5774 }
 0x476   :  { %v5876_v56 = vsel %vm1007_vm4, %v13575_v44, %v5775_v7  ;;  %v5799_v25 = vpop.permute.xlu0 %5798  ;;  %6441 = vmatmul.mubr.f32.gmra.mrb[26].mxu1 %v5977_v43  ;;  %6829 = vmatmul.mubr.msk.f32.gmra.mrb[42].mxu0 %vm6226_vm0, %v5981_v0  ;;  %v5879_v44 = vsel %vm1007_vm4, %v8714_v27, %v5783_v36  ;;  %v14941_v43 = vld [vmem:[#allocation97_spill] sm:$0xff] }
 0x477   :  { %6446 = vmatprep.mubr.f32.mxu1 %v5985_v3  ;;  %6672 = vmatprep.mubr.f32.mxu0 %v14921_v48  ;;  %v5988_v55 = vmax.f32 %v14931_v23, %v5876_v56  ;;  %v5887_v50 = vsel %vm1007_vm4, %v5799_v25, %v8734_v18  ;;  %v5991_v8 = vmax.f32 %v14932_v12, %v5879_v44 }
 0x478   :  { %v5886_v54 = vsel %vm1007_vm4, %v8725_v47, %v5799_v25 }
 0x479   :  { %v5791_v9 = vpop.permute.xlu1 %5790  ;;  %v5998_v34 = vmax.f32 %v14934_v11, %v5886_v54 }
 0x47a   :  { %v5883_v63 = vsel %vm1007_vm4, %v13586_v38, %v5791_v9  ;;  %v5815_v4 = vpop.permute.xlu0 %5814  ;;  %6447 = vmatmul.mubr.f32.gmra.mrb[28].mxu1 %v5984_v26  ;;  %6830 = vmatmul.mubr.msk.f32.gmra.mrb[44].mxu0 %vm6226_vm0, %v5988_v55  ;;  %v5999_v38 = vmax.f32 %v13564_v31, %v5887_v50 }
 0x47b   :  { %6452 = vmatprep.mubr.f32.mxu1 %v5992_v14  ;;  %6678 = vmatprep.mubr.f32.mxu0 %v14921_v48  ;;  %v5995_v27 = vmax.f32 %v14933_v61, %v5883_v63  ;;  %v5894_v18 = vsel %vm1007_vm4, %v5815_v4, %v8745_v13  ;;  %v5893_v31 = vsel %vm1007_vm4, %v8739_v29, %v5815_v4 }
 0x47c   :  { %v6005_v16 = vmax.f32 %v14936_v33, %v5893_v31 }
 0x47d   :  { %v5807_v51 = vpop.permute.xlu1 %5806 }
 0x47e   :  { %v5890_v24 = vsel %vm1007_vm4, %v13666_v15, %v5807_v51  ;;  %v5831_v58 = vpop.permute.xlu0 %5830  ;;  %6453 = vmatmul.mubr.f32.gmra.mrb[30].mxu1 %v5991_v8  ;;  %6831 = vmatmul.mubr.msk.f32.gmra.mrb[46].mxu0 %vm6226_vm0, %v5995_v27  ;;  %v6006_v15 = vmax.f32 %v13591_v59, %v5894_v18 }
 0x47f   :  { %6458 = vmatprep.mubr.f32.mxu1 %v5999_v38  ;;  %6684 = vmatprep.mubr.f32.mxu0 %v14921_v48  ;;  %v6002_v47 = vmax.f32 %v14935_v5, %v5890_v24  ;;  %v5901_v13 = vsel %vm1007_vm4, %v5831_v58, %v8759_v28  ;;  %v5900_v59 = vsel %vm1007_vm4, %v8750_v22, %v5831_v58 }
 0x480   :  { %v6012_v35 = vmax.f32 %v14938_v1, %v5900_v59 }
 0x481   :  { %v5823_v49 = vpop.permute.xlu1 %5822 }
 0x482   :  { %v5897_v52 = vsel %vm1007_vm4, %v13690_v46, %v5823_v49  ;;  %6459 = vmatmul.mubr.f32.gmra.mrb[32].mxu1 %v5998_v34  ;;  %6832 = vmatmul.mubr.msk.f32.gmra.mrb[48].mxu0 %vm6226_vm0, %v6002_v47  ;;  %v5847_v45 = vpop.permute.xlu0 %5846  ;;  %v6013_v46 = vmax.f32 %v13618_v20, %v5901_v13 }
 0x483   :  { %6464 = vmatprep.mubr.f32.mxu1 %v6006_v15  ;;  %6690 = vmatprep.mubr.f32.mxu0 %v14921_v48  ;;  %v6009_v29 = vmax.f32 %v14937_v37, %v5897_v52  ;;  %v5908_v28 = vsel %vm1007_vm4, %v5847_v45, %v8770_v19  ;;  %v5907_v20 = vsel %vm1007_vm4, %v8764_v10, %v5847_v45  ;;  %v14940_v19 = vld [vmem:[#allocation64_spill] sm:$0xff] }
 0x484   :  { %v6019_v2 = vmax.f32 %v14940_v19, %v5907_v20 }
 0x485   :  { %v5839_v53 = vpop.permute.xlu1 %5838 }
 0x486   :  { %v5904_v42 = vsel %vm1007_vm4, %v13717_v41, %v5839_v53  ;;  %6465 = vmatmul.mubr.f32.gmra.mrb[34].mxu1 %v6005_v16  ;;  %6833 = vmatmul.mubr.msk.f32.gmra.mrb[50].mxu0 %vm6226_vm0, %v6009_v29  ;;  %v6020_v41 = vmax.f32 %v13649_v40, %v5908_v28 }
 0x487   :  { %6470 = vmatprep.mubr.f32.mxu1 %v6013_v46  ;;  %6696 = vmatprep.mubr.f32.mxu0 %v14921_v48  ;;  %v6016_v36 = vmax.f32 %v14939_v32, %v5904_v42 }
 0x489   :  { %v5855_v22 = vpop.permute.xlu1 %5854 }
 0x48a   :  { %v5911_v17 = vsel %vm1007_vm4, %v13733_v60, %v5855_v22  ;;  %6471 = vmatmul.mubr.f32.gmra.mrb[36].mxu1 %v6012_v35  ;;  %6834 = vmatmul.mubr.msk.f32.gmra.mrb[52].mxu0 %vm6226_vm0, %v6016_v36 }
 0x48b   :  { %6476 = vmatprep.mubr.f32.mxu1 %v6020_v41  ;;  %6702 = vmatprep.mubr.f32.mxu0 %v14921_v48  ;;  %v6023_v62 = vmax.f32 %v14941_v43, %v5911_v17 }
 0x48e   :  { %6477 = vmatmul.mubr.f32.gmra.mrb[38].mxu1 %v6019_v2  ;;  %6835 = vmatmul.mubr.msk.f32.gmra.mrb[54].mxu0 %vm6226_vm0, %v6023_v62 }
 0x545   :  { %v6436_v39 = vpop.f32.mrb[24].mxu1  ;;  %v6662_v10 = vpop.f32.mrb[40].mxu0 }
 0x546   :  { %v7228_v0 = vadd.f32 %v6662_v10, %v6436_v39  ;;  %v6438_v40 = vpop.f32.mrb[25].mxu1  ;;  %v6664_v7 = vpop.f32.mrb[41].mxu0 }
 0x547   :  { %v7229_v6 = vadd.f32 %v6664_v7, %v6438_v40 }
 0x548   :  { %6709 = vst [vmem:[%s13911_s4] sm:$0xff] %v7228_v0 }
 0x549   :  { %6710 = vst [vmem:[%s13911_s4 + $0x8] sm:$0xff] %v7229_v6  ;;  %v6442_v60 = vpop.f32.mrb[26].mxu1  ;;  %v6668_v48 = vpop.f32.mrb[42].mxu0 }
 0x54a   :  { %v7230_v30 = vadd.f32 %v6668_v48, %v6442_v60  ;;  %v6444_v3 = vpop.f32.mrb[27].mxu1  ;;  %v6670_v56 = vpop.f32.mrb[43].mxu0 }
 0x54b   :  { %v7231_v21 = vadd.f32 %v6670_v56, %v6444_v3 }
 0x54c   :  { %6711 = vst [vmem:[%s13911_s4 + $0x10] sm:$0xff] %v7230_v30 }
 0x54d   :  { %6712 = vst [vmem:[%s13911_s4 + $0x18] sm:$0xff] %v7231_v21  ;;  %v6448_v25 = vpop.f32.mrb[28].mxu1  ;;  %v6674_v57 = vpop.f32.mrb[44].mxu0 }
 0x54e   :  { %v7232_v26 = vadd.f32 %v6674_v57, %v6448_v25  ;;  %v6450_v23 = vpop.f32.mrb[29].mxu1  ;;  %v6676_v55 = vpop.f32.mrb[45].mxu0 }
 0x54f   :  { %v7233_v9 = vadd.f32 %v6676_v55, %v6450_v23 }
 0x550   :  { %6713 = vst [vmem:[%s13911_s4 + $0x20] sm:$0xff] %v7232_v26 }
 0x551   :  { %6714 = vst [vmem:[%s13911_s4 + $0x28] sm:$0xff] %v7233_v9  ;;  %v6454_v44 = vpop.f32.mrb[30].mxu1  ;;  %v6680_v14 = vpop.f32.mrb[46].mxu0 }
 0x552   :  { %v7234_v63 = vadd.f32 %v6680_v14, %v6454_v44  ;;  %v6456_v50 = vpop.f32.mrb[31].mxu1  ;;  %v6682_v4 = vpop.f32.mrb[47].mxu0 }
 0x553   :  { %v7235_v12 = vadd.f32 %v6682_v4, %v6456_v50 }
 0x554   :  { %6715 = vst [vmem:[%s13911_s4 + $0x30] sm:$0xff] %v7234_v63 }
 0x555   :  { %6716 = vst [vmem:[%s13911_s4 + $0x38] sm:$0xff] %v7235_v12  ;;  %v6460_v8 = vpop.f32.mrb[32].mxu1  ;;  %v6686_v61 = vpop.f32.mrb[48].mxu0 }
 0x556   :  { %v7236_v27 = vadd.f32 %v6686_v61, %v6460_v8  ;;  %v6462_v51 = vpop.f32.mrb[33].mxu1  ;;  %v6688_v54 = vpop.f32.mrb[49].mxu0 }
 0x557   :  { %v7237_v38 = vadd.f32 %v6688_v54, %v6462_v51 }
 0x558   :  { %6717 = vst [vmem:[%s13911_s4 + $0x40] sm:$0xff] %v7236_v27 }
 0x559   :  { %6718 = vst [vmem:[%s13911_s4 + $0x48] sm:$0xff] %v7237_v38  ;;  %v6466_v24 = vpop.f32.mrb[34].mxu1  ;;  %v6692_v18 = vpop.f32.mrb[50].mxu0 }
 0x55a   :  { %v7238_v58 = vadd.f32 %v6692_v18, %v6466_v24  ;;  %v6468_v11 = vpop.f32.mrb[35].mxu1  ;;  %v6694_v34 = vpop.f32.mrb[51].mxu0 }
 0x55b   :  { %v7239_v5 = vadd.f32 %v6694_v34, %v6468_v11 }
 0x55c   :  { %6719 = vst [vmem:[%s13911_s4 + $0x50] sm:$0xff] %v7238_v58 }
 0x55d   :  { %6720 = vst [vmem:[%s13911_s4 + $0x58] sm:$0xff] %v7239_v5  ;;  %v6472_v47 = vpop.f32.mrb[36].mxu1  ;;  %v6698_v49 = vpop.f32.mrb[52].mxu0 }
 0x55e   :  { %v7240_v31 = vadd.f32 %v6698_v49, %v6472_v47  ;;  %v6474_v15 = vpop.f32.mrb[37].mxu1  ;;  %v6700_v52 = vpop.f32.mrb[53].mxu0 }
 0x55f   :  { %v7241_v13 = vadd.f32 %v6700_v52, %v6474_v15 }
 0x560   :  { %6721 = vst [vmem:[%s13911_s4 + $0x60] sm:$0xff] %v7240_v31 }
 0x561   :  { %6722 = vst [vmem:[%s13911_s4 + $0x68] sm:$0xff] %v7241_v13  ;;  %v6478_v45 = vpop.f32.mrb[38].mxu1  ;;  %v6704_v33 = vpop.f32.mrb[54].mxu0 }
 0x562   :  { %v7242_v16 = vadd.f32 %v6704_v33, %v6478_v45  ;;  %v6480_v37 = vpop.f32.mrb[39].mxu1  ;;  %v6706_v29 = vpop.f32.mrb[55].mxu0 }
 0x563   :  { %v7243_v53 = vadd.f32 %v6706_v29, %v6480_v37 }
 0x564   :  { %6723 = vst [vmem:[%s13911_s4 + $0x70] sm:$0xff] %v7242_v16 }
 0x565   :  { %6724 = vst [vmem:[%s13911_s4 + $0x78] sm:$0xff] %v7243_v53 }
 0x566   :  { %6729 = vsyncpa [#allocation3], 1 }

</bundles_post_ra>
